<compile_context>
chip_gen: v5e
topology: v5e:2x2
jax: 0.10.0
libtpu: 0.0.40
codegen_flags: <defaults>
</compile_context>

<pallas_src>
import numpy as np

import jax
import jax.numpy as jnp
from jax.experimental import pallas as pl
from jax.experimental.pallas import tpu as pltpu


# ----------------------------------------------------------------------------
# Static layer geometry (shared by the init-time packer and the kernel).
# ----------------------------------------------------------------------------
# (name, is_up, Cin, spatial_in, Cout); all feature maps are square.
_CONV_DEFS = (
    ("cd1", False, 1, 32, 5),
    ("cd2", False, 5, 16, 10),
    ("cd3", False, 10, 8, 20),
    ("cu1", True, 20, 4, 10),
    ("cu2", True, 10, 8, 5),
    ("cu3", True, 5, 16, 1),
)


def _rup(n, m):
    return ((n + m - 1) // m) * m


def _build_specs():
    specs = []
    cw_off = mt_off = cw_cols = mt_rows = 0
    for name, up, cin, s_in, cout in _CONV_DEFS:
        taps = 2 if up else 3                      # 2x2 convT / 3x3 conv taps
        s_out = s_in * 2 if up else s_in // 2
        r_in, r_out = cin * s_in, cout * s_out
        specs.append(dict(name=name, up=up, taps=taps, s_in=s_in, s_out=s_out,
                          r_in=r_in, r_out=r_out, cw_off=cw_off, mt_off=mt_off))
        cw_cols = max(cw_cols, taps * s_out)
        mt_rows = max(mt_rows, r_out)
        cw_off += _rup(s_in, 8)                    # sublane-aligned row blocks
        mt_off += _rup(taps * r_in, 128)           # lane-aligned column blocks
    return specs, cw_off, cw_cols, mt_off, mt_rows


_SPECS, _CW_ROWS, _CW_COLS, _MT_COLS, _MT_ROWS = _build_specs()


# ----------------------------------------------------------------------------
# Fused kernel: whole forward pass, everything VMEM resident, one invocation.
# ----------------------------------------------------------------------------
def _ae_kernel(x_ref, cw_ref, mt_ref, w1_ref, w2_ref, bcol_ref, bden_ref, o_ref):
    """Per-sample activation layout is 2D (Cin*H, W): rows = (channel, image
    row), columns = image column.  Every stage is small 2D matmuls + slices +
    concats + elementwise max -- no reshape/transpose/gather in the kernel."""
    s0 = _SPECS[0]["s_in"]                      # 32
    nb = x_ref.shape[0] // s0                   # batch size (static)

    def conv_stage(h, spec, idx):
        taps, w_in, w_out = spec["taps"], spec["s_in"], spec["s_out"]
        r_in, r_out = spec["r_in"], spec["r_out"]
        cw0, mt0 = spec["cw_off"], spec["mt_off"]
        # (a) column sampling: (Cin*H_in, W_in) @ (W_in, taps*W_out)
        a = jnp.dot(h, cw_ref[cw0:cw0 + w_in, 0:taps * w_out],
                    preferred_element_type=jnp.float32)
        # regroup taps into rows -> (taps*Cin*H_in, W_out)
        a = jnp.concatenate(
            [a[:, t * w_out:(t + 1) * w_out] for t in range(taps)], axis=0)
        # (b) row sampling + channel mix (carries the real conv weights)
        y = jnp.dot(mt_ref[0:r_out, mt0:mt0 + taps * r_in], a,
                    preferred_element_type=jnp.float32)
        y = y + bcol_ref[0:r_out, idx:idx + 1]
        if spec["up"]:
            return jnp.maximum(y, 0.01 * y)      # LeakyReLU, torch default slope
        return jnp.maximum(y, 0.0)               # ReLU

    for b in range(nb):
        h = x_ref[b * s0:(b + 1) * s0, 0:s0]                    # (32, 32)

        for idx in range(3):                                    # encoder convs
            h = conv_stage(h, _SPECS[idx], idx)                 # -> (80, 4)

        # Bottleneck.  Flatten order (w, c, h); the permutation to/from
        # PyTorch's (c, h, w) flatten is folded into w1/w2/bden at init.
        v = jnp.concatenate([h[:, c:c + 1] for c in range(4)], axis=0)   # (320,1)
        v = jnp.dot(w1_ref[...], v, preferred_element_type=jnp.float32)
        v = jnp.maximum(v + bden_ref[0:400, 0:1], 0.0)                   # (400,1)
        z = jnp.dot(w2_ref[...], v, preferred_element_type=jnp.float32)
        z = z + bden_ref[0:320, 1:2]                                     # (320,1)
        h = jnp.concatenate([z[c * 80:(c + 1) * 80, :] for c in range(4)],
                            axis=1)                                      # (80, 4)

        for idx in range(3, 6):                                 # decoder convT
            h = conv_stage(h, _SPECS[idx], idx)                 # -> (32, 32)

        o_ref[b * s0:(b + 1) * s0, 0:s0] = h


def _forward(packed, x):
    bsz = x.shape[0]
    x2d = x.reshape(bsz * 32, 32).astype(jnp.float32)
    out = pl.pallas_call(
        _ae_kernel,
        out_shape=jax.ShapeDtypeStruct((bsz * 32, 32), jnp.float32),
        in_specs=[pl.BlockSpec(memory_space=pltpu.MemorySpace.VMEM)]
                 * (1 + len(packed)),
        out_specs=pl.BlockSpec(memory_space=pltpu.MemorySpace.VMEM),
    )(x2d, *packed)
    return out.reshape(bsz, 1, 32, 32)


autoencoder_forward = jax.jit(_forward)


# ----------------------------------------------------------------------------
# Init-time (one-off) packing: separable conv factors + permuted dense weights.
# ----------------------------------------------------------------------------
def _enc_factors(w, s_in):
    """Conv2d(k=3, stride=2, pad=1) -> (CW, MT)."""
    cout, cin = w.shape[0], w.shape[1]
    s_out = s_in // 2
    cw = np.zeros((s_in, 3 * s_out), np.float32)
    for kw in range(3):
        for ow in range(s_out):
            src = 2 * ow + kw - 1
            if 0 <= src < s_in:
                cw[src, kw * s_out + ow] = 1.0
    mt = np.zeros((cout * s_out, 3 * cin * s_in), np.float32)
    for co in range(cout):
        for oh in range(s_out):
            for kh in range(3):
                src = 2 * oh + kh - 1
                if not 0 <= src < s_in:
                    continue
                for kw in range(3):
                    for ci in range(cin):
                        mt[co * s_out + oh, (kw * cin + ci) * s_in + src] = \
                            w[co, ci, kh, kw]
    return cw, mt


def _dec_factors(w, s_in):
    """ConvTranspose2d(k=2, stride=2) -> (CW, MT). w is (Cin, Cout, 2, 2)."""
    cin, cout = w.shape[0], w.shape[1]
    s_out = 2 * s_in
    cw = np.zeros((s_in, 2 * s_out), np.float32)
    for pw in range(2):
        for j in range(s_in):
            cw[j, pw * s_out + 2 * j + pw] = 1.0
    mt = np.zeros((cout * s_out, 2 * cin * s_in), np.float32)
    for co in range(cout):
        for i in range(s_in):
            for ph in range(2):
                oh = 2 * i + ph
                for pw in range(2):
                    for ci in range(cin):
                        mt[co * s_out + oh, (pw * cin + ci) * s_in + i] = \
                            w[ci, co, ph, pw]
    return cw, mt


def pack_params(p):
    """PyTorch-layout params -> 6 dense, aligned arrays consumed by the kernel."""
    f32 = lambda a: np.asarray(a, np.float32)

    cw_all = np.zeros((_CW_ROWS, _CW_COLS), np.float32)
    mt_all = np.zeros((_MT_ROWS, _MT_COLS), np.float32)
    bcol = np.zeros((_MT_ROWS, 8), np.float32)

    for idx, spec in enumerate(_SPECS):
        w = f32(p[spec["name"] + "_w"])
        b = f32(p[spec["name"] + "_b"])
        cw, mt = (_dec_factors if spec["up"] else _enc_factors)(w, spec["s_in"])
        cw_all[spec["cw_off"]:spec["cw_off"] + cw.shape[0], 0:cw.shape[1]] = cw
        mt_all[0:mt.shape[0], spec["mt_off"]:spec["mt_off"] + mt.shape[1]] = mt
        bcol[0:spec["r_out"], idx] = np.repeat(b, spec["s_out"])

    # Kernel flatten order is (w, c, h); PyTorch's view(-1) flatten is (c, h, w).
    perm = np.empty((320,), np.int64)
    for w_ in range(4):
        for ci in range(20):
            for hh in range(4):
                perm[w_ * 80 + ci * 4 + hh] = ci * 16 + hh * 4 + w_

    w1 = f32(p["dd1_w"])[:, perm]            # (400, 320): y = w1 @ v
    w2 = f32(p["du1_w"])[perm, :]            # (320, 400): z = w2 @ y
    bden = np.zeros((400, 2), np.float32)
    bden[:, 0] = f32(p["dd1_b"])
    bden[0:320, 1] = f32(p["du1_b"])[perm]

    packed = (cw_all, mt_all, w1, w2, bcol, bden)
    return tuple(jnp.asarray(a) for a in packed)


# ----------------------------------------------------------------------------
# Deterministic synthetic params (PyTorch shapes) + pure-JAX reference.
# ----------------------------------------------------------------------------
def init_params(key):
    ks = jax.random.split(key, 16)

    def w(k, shape, fan_in):
        return jax.random.normal(k, shape, dtype=jnp.float32) / np.sqrt(fan_in)

    def b(k, shape):
        return 0.1 * jax.random.normal(k, shape, dtype=jnp.float32)

    return {
        "cd1_w": w(ks[0], (5, 1, 3, 3), 9.0),     "cd1_b": b(ks[1], (5,)),
        "cd2_w": w(ks[2], (10, 5, 3, 3), 45.0),   "cd2_b": b(ks[3], (10,)),
        "cd3_w": w(ks[4], (20, 10, 3, 3), 90.0),  "cd3_b": b(ks[5], (20,)),
        "dd1_w": w(ks[6], (400, 320), 320.0),     "dd1_b": b(ks[7], (400,)),
        "du1_w": w(ks[8], (320, 400), 400.0),     "du1_b": b(ks[9], (320,)),
        "cu1_w": w(ks[10], (20, 10, 2, 2), 80.0), "cu1_b": b(ks[11], (10,)),
        "cu2_w": w(ks[12], (10, 5, 2, 2), 40.0),  "cu2_b": b(ks[13], (5,)),
        "cu3_w": w(ks[14], (5, 1, 2, 2), 20.0),   "cu3_b": b(ks[15], (1,)),
    }


def reference_forward(p, x):
    """Pure-JAX (XLA) reference with PyTorch semantics, for validation."""
    def conv_down(h, w, b):
        y = jax.lax.conv_general_dilated(
            h, w, window_strides=(2, 2), padding=((1, 1), (1, 1)),
            dimension_numbers=("NCHW", "OIHW", "NCHW"))
        return y + b.reshape(1, -1, 1, 1)

    def conv_up(h, w, b):
        wt = jnp.flip(w, (2, 3)).transpose(1, 0, 2, 3)
        y = jax.lax.conv_general_dilated(
            h, wt, window_strides=(1, 1), padding=((1, 1), (1, 1)),
            lhs_dilation=(2, 2), dimension_numbers=("NCHW", "OIHW", "NCHW"))
        return y + b.reshape(1, -1, 1, 1)

    h = jax.nn.relu(conv_down(x, p["cd1_w"], p["cd1_b"]))
    h = jax.nn.relu(conv_down(h, p["cd2_w"], p["cd2_b"]))
    h = jax.nn.relu(conv_down(h, p["cd3_w"], p["cd3_b"]))
    v = h.reshape(h.shape[0], -1)
    v = jax.nn.relu(v @ p["dd1_w"].T + p["dd1_b"])
    z = v @ p["du1_w"].T + p["du1_b"]
    z = z.reshape(-1, 20, 4, 4)
    z = jax.nn.leaky_relu(conv_up(z, p["cu1_w"], p["cu1_b"]), 0.01)
    z = jax.nn.leaky_relu(conv_up(z, p["cu2_w"], p["cu2_b"]), 0.01)
    z = jax.nn.leaky_relu(conv_up(z, p["cu3_w"], p["cu3_b"]), 0.01)
    return z


if __name__ == "__main__":
    key = jax.random.PRNGKey(0)
    kp, kx = jax.random.split(key)
    params = init_params(kp)
    packed = pack_params(params)          # one-off init-time packing

    # dense_down1 expects 20*4*4 features => 1-channel 32x32 input.
    x = jax.random.normal(kx, (2, 1, 32, 32), dtype=jnp.float32)

    out = jax.block_until_ready(autoencoder_forward(packed, x))

    assert out.shape == (2, 1, 32, 32), out.shape
    assert out.dtype == jnp.float32
    assert bool(jnp.all(jnp.isfinite(out)))

    ref = reference_forward(params, x)
    rel = float(jnp.linalg.norm(out - ref) / (jnp.linalg.norm(ref) + 1e-12))
    assert rel < 5e-2, f"relative error vs XLA reference too large: {rel}"

    print("KERNEL_OK")
</pallas_src>

<mosaic_0001>
module attributes {stable_mosaic.version = 11 : i64} {
  func.func @_ae_kernel(%arg0: memref<64x32xf32, #tpu.memory_space<vmem>>, %arg1: memref<88x64xf32, #tpu.memory_space<vmem>>, %arg2: memref<80x1408xf32, #tpu.memory_space<vmem>>, %arg3: memref<400x320xf32, #tpu.memory_space<vmem>>, %arg4: memref<320x400xf32, #tpu.memory_space<vmem>>, %arg5: memref<80x8xf32, #tpu.memory_space<vmem>>, %arg6: memref<400x2xf32, #tpu.memory_space<vmem>>, %arg7: memref<64x32xf32, #tpu.memory_space<vmem>>) attributes {dimension_semantics = [], scalar_prefetch = 0 : i64, scratch_operands = 0 : i64, tpu.core_type = #tpu.core_type<tc>} {
    %c0 = arith.constant 0 : index
    %c0_0 = arith.constant 0 : index
    %0 = vector.load %arg0[%c0, %c0_0] : memref<64x32xf32, #tpu.memory_space<vmem>>, vector<32x32xf32>
    %c0_1 = arith.constant 0 : index
    %c0_2 = arith.constant 0 : index
    %1 = vector.load %arg1[%c0_1, %c0_2] : memref<88x64xf32, #tpu.memory_space<vmem>>, vector<32x48xf32>
    %cst = arith.constant dense<0.000000e+00> : vector<32x48xf32>
    %2 = tpu.matmul %0, %1, %cst {dimension_numbers = #tpu.dot_dimension_numbers<[1], [0], [0], [1], [0, 0, 1, 1], [], []>} : vector<32x32xf32>, vector<32x48xf32>, vector<32x48xf32> -> vector<32x48xf32>
    %3 = vector.extract_strided_slice %2 {offsets = [0, 0], sizes = [32, 16], strides = [1, 1]} : vector<32x48xf32> to vector<32x16xf32>
    %4 = vector.extract_strided_slice %2 {offsets = [0, 16], sizes = [32, 16], strides = [1, 1]} : vector<32x48xf32> to vector<32x16xf32>
    %5 = vector.extract_strided_slice %2 {offsets = [0, 32], sizes = [32, 16], strides = [1, 1]} : vector<32x48xf32> to vector<32x16xf32>
    %6 = tpu.concatenate %3, %4, %5 in 0 : vector<32x16xf32>, vector<32x16xf32>, vector<32x16xf32> -> vector<96x16xf32>
    %c0_3 = arith.constant 0 : index
    %c0_4 = arith.constant 0 : index
    %7 = vector.load %arg2[%c0_3, %c0_4] : memref<80x1408xf32, #tpu.memory_space<vmem>>, vector<80x96xf32>
    %cst_5 = arith.constant dense<0.000000e+00> : vector<80x16xf32>
    %8 = tpu.matmul %7, %6, %cst_5 {dimension_numbers = #tpu.dot_dimension_numbers<[1], [0], [0], [1], [0, 0, 1, 1], [], []>} : vector<80x96xf32>, vector<96x16xf32>, vector<80x16xf32> -> vector<80x16xf32>
    %c0_6 = arith.constant 0 : index
    %c0_7 = arith.constant 0 : index
    %9 = vector.load %arg5[%c0_6, %c0_7] : memref<80x8xf32, #tpu.memory_space<vmem>>, vector<80x1xf32>
    %10 = vector.broadcast %9 : vector<80x1xf32> to vector<80x16xf32>
    %11 = arith.addf %8, %10 : vector<80x16xf32>
    %cst_8 = arith.constant 0.000000e+00 : f32
    %12 = vector.broadcast %cst_8 : f32 to vector<80x16xf32>
    %13 = arith.maximumf %11, %12 : vector<80x16xf32>
    %c32 = arith.constant 32 : index
    %c0_9 = arith.constant 0 : index
    %14 = vector.load %arg1[%c32, %c0_9] : memref<88x64xf32, #tpu.memory_space<vmem>>, vector<16x24xf32>
    %cst_10 = arith.constant dense<0.000000e+00> : vector<80x24xf32>
    %15 = tpu.matmul %13, %14, %cst_10 {dimension_numbers = #tpu.dot_dimension_numbers<[1], [0], [0], [1], [0, 0, 1, 1], [], []>} : vector<80x16xf32>, vector<16x24xf32>, vector<80x24xf32> -> vector<80x24xf32>
    %16 = vector.extract_strided_slice %15 {offsets = [0, 0], sizes = [80, 8], strides = [1, 1]} : vector<80x24xf32> to vector<80x8xf32>
    %17 = vector.extract_strided_slice %15 {offsets = [0, 8], sizes = [80, 8], strides = [1, 1]} : vector<80x24xf32> to vector<80x8xf32>
    %18 = vector.extract_strided_slice %15 {offsets = [0, 16], sizes = [80, 8], strides = [1, 1]} : vector<80x24xf32> to vector<80x8xf32>
    %19 = tpu.concatenate %16, %17, %18 in 0 : vector<80x8xf32>, vector<80x8xf32>, vector<80x8xf32> -> vector<240x8xf32>
    %c0_11 = arith.constant 0 : index
    %c128 = arith.constant 128 : index
    %20 = vector.load %arg2[%c0_11, %c128] : memref<80x1408xf32, #tpu.memory_space<vmem>>, vector<80x240xf32>
    %cst_12 = arith.constant dense<0.000000e+00> : vector<80x8xf32>
    %21 = tpu.matmul %20, %19, %cst_12 {dimension_numbers = #tpu.dot_dimension_numbers<[1], [0], [0], [1], [0, 0, 1, 1], [], []>} : vector<80x240xf32>, vector<240x8xf32>, vector<80x8xf32> -> vector<80x8xf32>
    %c0_13 = arith.constant 0 : index
    %c1 = arith.constant 1 : index
    %22 = vector.load %arg5[%c0_13, %c1] : memref<80x8xf32, #tpu.memory_space<vmem>>, vector<80x1xf32>
    %23 = vector.broadcast %22 : vector<80x1xf32> to vector<80x8xf32>
    %24 = arith.addf %21, %23 : vector<80x8xf32>
    %cst_14 = arith.constant 0.000000e+00 : f32
    %25 = vector.broadcast %cst_14 : f32 to vector<80x8xf32>
    %26 = arith.maximumf %24, %25 : vector<80x8xf32>
    %c48 = arith.constant 48 : index
    %c0_15 = arith.constant 0 : index
    %27 = vector.load %arg1[%c48, %c0_15] : memref<88x64xf32, #tpu.memory_space<vmem>>, vector<8x12xf32>
    %cst_16 = arith.constant dense<0.000000e+00> : vector<80x12xf32>
    %28 = tpu.matmul %26, %27, %cst_16 {dimension_numbers = #tpu.dot_dimension_numbers<[1], [0], [0], [1], [0, 0, 1, 1], [], []>} : vector<80x8xf32>, vector<8x12xf32>, vector<80x12xf32> -> vector<80x12xf32>
    %29 = vector.extract_strided_slice %28 {offsets = [0, 0], sizes = [80, 4], strides = [1, 1]} : vector<80x12xf32> to vector<80x4xf32>
    %30 = vector.extract_strided_slice %28 {offsets = [0, 4], sizes = [80, 4], strides = [1, 1]} : vector<80x12xf32> to vector<80x4xf32>
    %31 = vector.extract_strided_slice %28 {offsets = [0, 8], sizes = [80, 4], strides = [1, 1]} : vector<80x12xf32> to vector<80x4xf32>
    %32 = tpu.concatenate %29, %30, %31 in 0 : vector<80x4xf32>, vector<80x4xf32>, vector<80x4xf32> -> vector<240x4xf32>
    %c0_17 = arith.constant 0 : index
    %c384 = arith.constant 384 : index
    %33 = vector.load %arg2[%c0_17, %c384] : memref<80x1408xf32, #tpu.memory_space<vmem>>, vector<80x240xf32>
    %cst_18 = arith.constant dense<0.000000e+00> : vector<80x4xf32>
    %34 = tpu.matmul %33, %32, %cst_18 {dimension_numbers = #tpu.dot_dimension_numbers<[1], [0], [0], [1], [0, 0, 1, 1], [], []>} : vector<80x240xf32>, vector<240x4xf32>, vector<80x4xf32> -> vector<80x4xf32>
    %c0_19 = arith.constant 0 : index
    %c2 = arith.constant 2 : index
    %35 = vector.load %arg5[%c0_19, %c2] : memref<80x8xf32, #tpu.memory_space<vmem>>, vector<80x1xf32>
    %36 = vector.broadcast %35 : vector<80x1xf32> to vector<80x4xf32>
    %37 = arith.addf %34, %36 : vector<80x4xf32>
    %cst_20 = arith.constant 0.000000e+00 : f32
    %38 = vector.broadcast %cst_20 : f32 to vector<80x4xf32>
    %39 = arith.maximumf %37, %38 : vector<80x4xf32>
    %40 = vector.extract_strided_slice %39 {offsets = [0, 0], sizes = [80, 1], strides = [1, 1]} : vector<80x4xf32> to vector<80x1xf32>
    %41 = vector.extract_strided_slice %39 {offsets = [0, 1], sizes = [80, 1], strides = [1, 1]} : vector<80x4xf32> to vector<80x1xf32>
    %42 = vector.extract_strided_slice %39 {offsets = [0, 2], sizes = [80, 1], strides = [1, 1]} : vector<80x4xf32> to vector<80x1xf32>
    %43 = vector.extract_strided_slice %39 {offsets = [0, 3], sizes = [80, 1], strides = [1, 1]} : vector<80x4xf32> to vector<80x1xf32>
    %44 = tpu.concatenate %40, %41, %42, %43 in 0 : vector<80x1xf32>, vector<80x1xf32>, vector<80x1xf32>, vector<80x1xf32> -> vector<320x1xf32>
    %c0_21 = arith.constant 0 : index
    %c0_22 = arith.constant 0 : index
    %45 = vector.load %arg3[%c0_21, %c0_22] : memref<400x320xf32, #tpu.memory_space<vmem>>, vector<400x320xf32>
    %cst_23 = arith.constant dense<0.000000e+00> : vector<400x1xf32>
    %46 = tpu.matmul %45, %44, %cst_23 {dimension_numbers = #tpu.dot_dimension_numbers<[1], [0], [0], [1], [0, 0, 1, 1], [], []>} : vector<400x320xf32>, vector<320x1xf32>, vector<400x1xf32> -> vector<400x1xf32>
    %c0_24 = arith.constant 0 : index
    %c0_25 = arith.constant 0 : index
    %47 = vector.load %arg6[%c0_24, %c0_25] : memref<400x2xf32, #tpu.memory_space<vmem>>, vector<400x1xf32>
    %48 = arith.addf %46, %47 : vector<400x1xf32>
    %cst_26 = arith.constant 0.000000e+00 : f32
    %49 = vector.broadcast %cst_26 : f32 to vector<400x1xf32>
    %50 = arith.maximumf %48, %49 : vector<400x1xf32>
    %c0_27 = arith.constant 0 : index
    %c0_28 = arith.constant 0 : index
    %51 = vector.load %arg4[%c0_27, %c0_28] : memref<320x400xf32, #tpu.memory_space<vmem>>, vector<320x400xf32>
    %cst_29 = arith.constant dense<0.000000e+00> : vector<320x1xf32>
    %52 = tpu.matmul %51, %50, %cst_29 {dimension_numbers = #tpu.dot_dimension_numbers<[1], [0], [0], [1], [0, 0, 1, 1], [], []>} : vector<320x400xf32>, vector<400x1xf32>, vector<320x1xf32> -> vector<320x1xf32>
    %c0_30 = arith.constant 0 : index
    %c1_31 = arith.constant 1 : index
    %53 = vector.load %arg6[%c0_30, %c1_31] : memref<400x2xf32, #tpu.memory_space<vmem>>, vector<320x1xf32>
    %54 = arith.addf %52, %53 : vector<320x1xf32>
    %55 = vector.extract_strided_slice %54 {offsets = [0, 0], sizes = [80, 1], strides = [1, 1]} : vector<320x1xf32> to vector<80x1xf32>
    %56 = vector.extract_strided_slice %54 {offsets = [80, 0], sizes = [80, 1], strides = [1, 1]} : vector<320x1xf32> to vector<80x1xf32>
    %57 = vector.extract_strided_slice %54 {offsets = [160, 0], sizes = [80, 1], strides = [1, 1]} : vector<320x1xf32> to vector<80x1xf32>
    %58 = vector.extract_strided_slice %54 {offsets = [240, 0], sizes = [80, 1], strides = [1, 1]} : vector<320x1xf32> to vector<80x1xf32>
    %59 = tpu.concatenate %55, %56, %57, %58 in 1 : vector<80x1xf32>, vector<80x1xf32>, vector<80x1xf32>, vector<80x1xf32> -> vector<80x4xf32>
    %c56 = arith.constant 56 : index
    %c0_32 = arith.constant 0 : index
    %60 = vector.load %arg1[%c56, %c0_32] : memref<88x64xf32, #tpu.memory_space<vmem>>, vector<4x16xf32>
    %cst_33 = arith.constant dense<0.000000e+00> : vector<80x16xf32>
    %61 = tpu.matmul %59, %60, %cst_33 {dimension_numbers = #tpu.dot_dimension_numbers<[1], [0], [0], [1], [0, 0, 1, 1], [], []>} : vector<80x4xf32>, vector<4x16xf32>, vector<80x16xf32> -> vector<80x16xf32>
    %62 = vector.extract_strided_slice %61 {offsets = [0, 0], sizes = [80, 8], strides = [1, 1]} : vector<80x16xf32> to vector<80x8xf32>
    %63 = vector.extract_strided_slice %61 {offsets = [0, 8], sizes = [80, 8], strides = [1, 1]} : vector<80x16xf32> to vector<80x8xf32>
    %64 = tpu.concatenate %62, %63 in 0 : vector<80x8xf32>, vector<80x8xf32> -> vector<160x8xf32>
    %c0_34 = arith.constant 0 : index
    %c640 = arith.constant 640 : index
    %65 = vector.load %arg2[%c0_34, %c640] : memref<80x1408xf32, #tpu.memory_space<vmem>>, vector<80x160xf32>
    %cst_35 = arith.constant dense<0.000000e+00> : vector<80x8xf32>
    %66 = tpu.matmul %65, %64, %cst_35 {dimension_numbers = #tpu.dot_dimension_numbers<[1], [0], [0], [1], [0, 0, 1, 1], [], []>} : vector<80x160xf32>, vector<160x8xf32>, vector<80x8xf32> -> vector<80x8xf32>
    %c0_36 = arith.constant 0 : index
    %c3 = arith.constant 3 : index
    %67 = vector.load %arg5[%c0_36, %c3] : memref<80x8xf32, #tpu.memory_space<vmem>>, vector<80x1xf32>
    %68 = vector.broadcast %67 : vector<80x1xf32> to vector<80x8xf32>
    %69 = arith.addf %66, %68 : vector<80x8xf32>
    %cst_37 = arith.constant 0.00999999977 : f32
    %70 = vector.broadcast %cst_37 : f32 to vector<80x8xf32>
    %71 = arith.mulf %70, %69 : vector<80x8xf32>
    %72 = arith.maximumf %69, %71 : vector<80x8xf32>
    %c64 = arith.constant 64 : index
    %c0_38 = arith.constant 0 : index
    %73 = vector.load %arg1[%c64, %c0_38] : memref<88x64xf32, #tpu.memory_space<vmem>>, vector<8x32xf32>
    %cst_39 = arith.constant dense<0.000000e+00> : vector<80x32xf32>
    %74 = tpu.matmul %72, %73, %cst_39 {dimension_numbers = #tpu.dot_dimension_numbers<[1], [0], [0], [1], [0, 0, 1, 1], [], []>} : vector<80x8xf32>, vector<8x32xf32>, vector<80x32xf32> -> vector<80x32xf32>
    %75 = vector.extract_strided_slice %74 {offsets = [0, 0], sizes = [80, 16], strides = [1, 1]} : vector<80x32xf32> to vector<80x16xf32>
    %76 = vector.extract_strided_slice %74 {offsets = [0, 16], sizes = [80, 16], strides = [1, 1]} : vector<80x32xf32> to vector<80x16xf32>
    %77 = tpu.concatenate %75, %76 in 0 : vector<80x16xf32>, vector<80x16xf32> -> vector<160x16xf32>
    %c0_40 = arith.constant 0 : index
    %c896 = arith.constant 896 : index
    %78 = vector.load %arg2[%c0_40, %c896] : memref<80x1408xf32, #tpu.memory_space<vmem>>, vector<80x160xf32>
    %cst_41 = arith.constant dense<0.000000e+00> : vector<80x16xf32>
    %79 = tpu.matmul %78, %77, %cst_41 {dimension_numbers = #tpu.dot_dimension_numbers<[1], [0], [0], [1], [0, 0, 1, 1], [], []>} : vector<80x160xf32>, vector<160x16xf32>, vector<80x16xf32> -> vector<80x16xf32>
    %c0_42 = arith.constant 0 : index
    %c4 = arith.constant 4 : index
    %80 = vector.load %arg5[%c0_42, %c4] : memref<80x8xf32, #tpu.memory_space<vmem>>, vector<80x1xf32>
    %81 = vector.broadcast %80 : vector<80x1xf32> to vector<80x16xf32>
    %82 = arith.addf %79, %81 : vector<80x16xf32>
    %cst_43 = arith.constant 0.00999999977 : f32
    %83 = vector.broadcast %cst_43 : f32 to vector<80x16xf32>
    %84 = arith.mulf %83, %82 : vector<80x16xf32>
    %85 = arith.maximumf %82, %84 : vector<80x16xf32>
    %c72 = arith.constant 72 : index
    %c0_44 = arith.constant 0 : index
    %86 = vector.load %arg1[%c72, %c0_44] : memref<88x64xf32, #tpu.memory_space<vmem>>, vector<16x64xf32>
    %cst_45 = arith.constant dense<0.000000e+00> : vector<80x64xf32>
    %87 = tpu.matmul %85, %86, %cst_45 {dimension_numbers = #tpu.dot_dimension_numbers<[1], [0], [0], [1], [0, 0, 1, 1], [], []>} : vector<80x16xf32>, vector<16x64xf32>, vector<80x64xf32> -> vector<80x64xf32>
    %88 = vector.extract_strided_slice %87 {offsets = [0, 0], sizes = [80, 32], strides = [1, 1]} : vector<80x64xf32> to vector<80x32xf32>
    %89 = vector.extract_strided_slice %87 {offsets = [0, 32], sizes = [80, 32], strides = [1, 1]} : vector<80x64xf32> to vector<80x32xf32>
    %90 = tpu.concatenate %88, %89 in 0 : vector<80x32xf32>, vector<80x32xf32> -> vector<160x32xf32>
    %c0_46 = arith.constant 0 : index
    %c1152 = arith.constant 1152 : index
    %91 = vector.load %arg2[%c0_46, %c1152] : memref<80x1408xf32, #tpu.memory_space<vmem>>, vector<32x160xf32>
    %cst_47 = arith.constant dense<0.000000e+00> : vector<32x32xf32>
    %92 = tpu.matmul %91, %90, %cst_47 {dimension_numbers = #tpu.dot_dimension_numbers<[1], [0], [0], [1], [0, 0, 1, 1], [], []>} : vector<32x160xf32>, vector<160x32xf32>, vector<32x32xf32> -> vector<32x32xf32>
    %c0_48 = arith.constant 0 : index
    %c5 = arith.constant 5 : index
    %93 = vector.load %arg5[%c0_48, %c5] : memref<80x8xf32, #tpu.memory_space<vmem>>, vector<32x1xf32>
    %94 = vector.broadcast %93 : vector<32x1xf32> to vector<32x32xf32>
    %95 = arith.addf %92, %94 : vector<32x32xf32>
    %cst_49 = arith.constant 0.00999999977 : f32
    %96 = vector.broadcast %cst_49 : f32 to vector<32x32xf32>
    %97 = arith.mulf %96, %95 : vector<32x32xf32>
    %98 = arith.maximumf %95, %97 : vector<32x32xf32>
    %c0_50 = arith.constant 0 : index
    %c0_51 = arith.constant 0 : index
    %99 = vector.load %arg7[%c0_50, %c0_51] : memref<64x32xf32, #tpu.memory_space<vmem>>, vector<32x32xf32>
    tpu.vector_store %arg7[%c0_50, %c0_51], %98 {strides = array<i32>} : memref<64x32xf32, #tpu.memory_space<vmem>>, vector<32x32xf32>,
    %c32_52 = arith.constant 32 : index
    %c0_53 = arith.constant 0 : index
    %100 = vector.load %arg0[%c32_52, %c0_53] : memref<64x32xf32, #tpu.memory_space<vmem>>, vector<32x32xf32>
    %c0_54 = arith.constant 0 : index
    %c0_55 = arith.constant 0 : index
    %101 = vector.load %arg1[%c0_54, %c0_55] : memref<88x64xf32, #tpu.memory_space<vmem>>, vector<32x48xf32>
    %cst_56 = arith.constant dense<0.000000e+00> : vector<32x48xf32>
    %102 = tpu.matmul %100, %101, %cst_56 {dimension_numbers = #tpu.dot_dimension_numbers<[1], [0], [0], [1], [0, 0, 1, 1], [], []>} : vector<32x32xf32>, vector<32x48xf32>, vector<32x48xf32> -> vector<32x48xf32>
    %103 = vector.extract_strided_slice %102 {offsets = [0, 0], sizes = [32, 16], strides = [1, 1]} : vector<32x48xf32> to vector<32x16xf32>
    %104 = vector.extract_strided_slice %102 {offsets = [0, 16], sizes = [32, 16], strides = [1, 1]} : vector<32x48xf32> to vector<32x16xf32>
    %105 = vector.extract_strided_slice %102 {offsets = [0, 32], sizes = [32, 16], strides = [1, 1]} : vector<32x48xf32> to vector<32x16xf32>
    %106 = tpu.concatenate %103, %104, %105 in 0 : vector<32x16xf32>, vector<32x16xf32>, vector<32x16xf32> -> vector<96x16xf32>
    %c0_57 = arith.constant 0 : index
    %c0_58 = arith.constant 0 : index
    %107 = vector.load %arg2[%c0_57, %c0_58] : memref<80x1408xf32, #tpu.memory_space<vmem>>, vector<80x96xf32>
    %cst_59 = arith.constant dense<0.000000e+00> : vector<80x16xf32>
    %108 = tpu.matmul %107, %106, %cst_59 {dimension_numbers = #tpu.dot_dimension_numbers<[1], [0], [0], [1], [0, 0, 1, 1], [], []>} : vector<80x96xf32>, vector<96x16xf32>, vector<80x16xf32> -> vector<80x16xf32>
    %c0_60 = arith.constant 0 : index
    %c0_61 = arith.constant 0 : index
    %109 = vector.load %arg5[%c0_60, %c0_61] : memref<80x8xf32, #tpu.memory_space<vmem>>, vector<80x1xf32>
    %110 = vector.broadcast %109 : vector<80x1xf32> to vector<80x16xf32>
    %111 = arith.addf %108, %110 : vector<80x16xf32>
    %cst_62 = arith.constant 0.000000e+00 : f32
    %112 = vector.broadcast %cst_62 : f32 to vector<80x16xf32>
    %113 = arith.maximumf %111, %112 : vector<80x16xf32>
    %c32_63 = arith.constant 32 : index
    %c0_64 = arith.constant 0 : index
    %114 = vector.load %arg1[%c32_63, %c0_64] : memref<88x64xf32, #tpu.memory_space<vmem>>, vector<16x24xf32>
    %cst_65 = arith.constant dense<0.000000e+00> : vector<80x24xf32>
    %115 = tpu.matmul %113, %114, %cst_65 {dimension_numbers = #tpu.dot_dimension_numbers<[1], [0], [0], [1], [0, 0, 1, 1], [], []>} : vector<80x16xf32>, vector<16x24xf32>, vector<80x24xf32> -> vector<80x24xf32>
    %116 = vector.extract_strided_slice %115 {offsets = [0, 0], sizes = [80, 8], strides = [1, 1]} : vector<80x24xf32> to vector<80x8xf32>
    %117 = vector.extract_strided_slice %115 {offsets = [0, 8], sizes = [80, 8], strides = [1, 1]} : vector<80x24xf32> to vector<80x8xf32>
    %118 = vector.extract_strided_slice %115 {offsets = [0, 16], sizes = [80, 8], strides = [1, 1]} : vector<80x24xf32> to vector<80x8xf32>
    %119 = tpu.concatenate %116, %117, %118 in 0 : vector<80x8xf32>, vector<80x8xf32>, vector<80x8xf32> -> vector<240x8xf32>
    %c0_66 = arith.constant 0 : index
    %c128_67 = arith.constant 128 : index
    %120 = vector.load %arg2[%c0_66, %c128_67] : memref<80x1408xf32, #tpu.memory_space<vmem>>, vector<80x240xf32>
    %cst_68 = arith.constant dense<0.000000e+00> : vector<80x8xf32>
    %121 = tpu.matmul %120, %119, %cst_68 {dimension_numbers = #tpu.dot_dimension_numbers<[1], [0], [0], [1], [0, 0, 1, 1], [], []>} : vector<80x240xf32>, vector<240x8xf32>, vector<80x8xf32> -> vector<80x8xf32>
    %c0_69 = arith.constant 0 : index
    %c1_70 = arith.constant 1 : index
    %122 = vector.load %arg5[%c0_69, %c1_70] : memref<80x8xf32, #tpu.memory_space<vmem>>, vector<80x1xf32>
    %123 = vector.broadcast %122 : vector<80x1xf32> to vector<80x8xf32>
    %124 = arith.addf %121, %123 : vector<80x8xf32>
    %cst_71 = arith.constant 0.000000e+00 : f32
    %125 = vector.broadcast %cst_71 : f32 to vector<80x8xf32>
    %126 = arith.maximumf %124, %125 : vector<80x8xf32>
    %c48_72 = arith.constant 48 : index
    %c0_73 = arith.constant 0 : index
    %127 = vector.load %arg1[%c48_72, %c0_73] : memref<88x64xf32, #tpu.memory_space<vmem>>, vector<8x12xf32>
    %cst_74 = arith.constant dense<0.000000e+00> : vector<80x12xf32>
    %128 = tpu.matmul %126, %127, %cst_74 {dimension_numbers = #tpu.dot_dimension_numbers<[1], [0], [0], [1], [0, 0, 1, 1], [], []>} : vector<80x8xf32>, vector<8x12xf32>, vector<80x12xf32> -> vector<80x12xf32>
    %129 = vector.extract_strided_slice %128 {offsets = [0, 0], sizes = [80, 4], strides = [1, 1]} : vector<80x12xf32> to vector<80x4xf32>
    %130 = vector.extract_strided_slice %128 {offsets = [0, 4], sizes = [80, 4], strides = [1, 1]} : vector<80x12xf32> to vector<80x4xf32>
    %131 = vector.extract_strided_slice %128 {offsets = [0, 8], sizes = [80, 4], strides = [1, 1]} : vector<80x12xf32> to vector<80x4xf32>
    %132 = tpu.concatenate %129, %130, %131 in 0 : vector<80x4xf32>, vector<80x4xf32>, vector<80x4xf32> -> vector<240x4xf32>
    %c0_75 = arith.constant 0 : index
    %c384_76 = arith.constant 384 : index
    %133 = vector.load %arg2[%c0_75, %c384_76] : memref<80x1408xf32, #tpu.memory_space<vmem>>, vector<80x240xf32>
    %cst_77 = arith.constant dense<0.000000e+00> : vector<80x4xf32>
    %134 = tpu.matmul %133, %132, %cst_77 {dimension_numbers = #tpu.dot_dimension_numbers<[1], [0], [0], [1], [0, 0, 1, 1], [], []>} : vector<80x240xf32>, vector<240x4xf32>, vector<80x4xf32> -> vector<80x4xf32>
    %c0_78 = arith.constant 0 : index
    %c2_79 = arith.constant 2 : index
    %135 = vector.load %arg5[%c0_78, %c2_79] : memref<80x8xf32, #tpu.memory_space<vmem>>, vector<80x1xf32>
    %136 = vector.broadcast %135 : vector<80x1xf32> to vector<80x4xf32>
    %137 = arith.addf %134, %136 : vector<80x4xf32>
    %cst_80 = arith.constant 0.000000e+00 : f32
    %138 = vector.broadcast %cst_80 : f32 to vector<80x4xf32>
    %139 = arith.maximumf %137, %138 : vector<80x4xf32>
    %140 = vector.extract_strided_slice %139 {offsets = [0, 0], sizes = [80, 1], strides = [1, 1]} : vector<80x4xf32> to vector<80x1xf32>
    %141 = vector.extract_strided_slice %139 {offsets = [0, 1], sizes = [80, 1], strides = [1, 1]} : vector<80x4xf32> to vector<80x1xf32>
    %142 = vector.extract_strided_slice %139 {offsets = [0, 2], sizes = [80, 1], strides = [1, 1]} : vector<80x4xf32> to vector<80x1xf32>
    %143 = vector.extract_strided_slice %139 {offsets = [0, 3], sizes = [80, 1], strides = [1, 1]} : vector<80x4xf32> to vector<80x1xf32>
    %144 = tpu.concatenate %140, %141, %142, %143 in 0 : vector<80x1xf32>, vector<80x1xf32>, vector<80x1xf32>, vector<80x1xf32> -> vector<320x1xf32>
    %c0_81 = arith.constant 0 : index
    %c0_82 = arith.constant 0 : index
    %145 = vector.load %arg3[%c0_81, %c0_82] : memref<400x320xf32, #tpu.memory_space<vmem>>, vector<400x320xf32>
    %cst_83 = arith.constant dense<0.000000e+00> : vector<400x1xf32>
    %146 = tpu.matmul %145, %144, %cst_83 {dimension_numbers = #tpu.dot_dimension_numbers<[1], [0], [0], [1], [0, 0, 1, 1], [], []>} : vector<400x320xf32>, vector<320x1xf32>, vector<400x1xf32> -> vector<400x1xf32>
    %c0_84 = arith.constant 0 : index
    %c0_85 = arith.constant 0 : index
    %147 = vector.load %arg6[%c0_84, %c0_85] : memref<400x2xf32, #tpu.memory_space<vmem>>, vector<400x1xf32>
    %148 = arith.addf %146, %147 : vector<400x1xf32>
    %cst_86 = arith.constant 0.000000e+00 : f32
    %149 = vector.broadcast %cst_86 : f32 to vector<400x1xf32>
    %150 = arith.maximumf %148, %149 : vector<400x1xf32>
    %c0_87 = arith.constant 0 : index
    %c0_88 = arith.constant 0 : index
    %151 = vector.load %arg4[%c0_87, %c0_88] : memref<320x400xf32, #tpu.memory_space<vmem>>, vector<320x400xf32>
    %cst_89 = arith.constant dense<0.000000e+00> : vector<320x1xf32>
    %152 = tpu.matmul %151, %150, %cst_89 {dimension_numbers = #tpu.dot_dimension_numbers<[1], [0], [0], [1], [0, 0, 1, 1], [], []>} : vector<320x400xf32>, vector<400x1xf32>, vector<320x1xf32> -> vector<320x1xf32>
    %c0_90 = arith.constant 0 : index
    %c1_91 = arith.constant 1 : index
    %153 = vector.load %arg6[%c0_90, %c1_91] : memref<400x2xf32, #tpu.memory_space<vmem>>, vector<320x1xf32>
    %154 = arith.addf %152, %153 : vector<320x1xf32>
    %155 = vector.extract_strided_slice %154 {offsets = [0, 0], sizes = [80, 1], strides = [1, 1]} : vector<320x1xf32> to vector<80x1xf32>
    %156 = vector.extract_strided_slice %154 {offsets = [80, 0], sizes = [80, 1], strides = [1, 1]} : vector<320x1xf32> to vector<80x1xf32>
    %157 = vector.extract_strided_slice %154 {offsets = [160, 0], sizes = [80, 1], strides = [1, 1]} : vector<320x1xf32> to vector<80x1xf32>
    %158 = vector.extract_strided_slice %154 {offsets = [240, 0], sizes = [80, 1], strides = [1, 1]} : vector<320x1xf32> to vector<80x1xf32>
    %159 = tpu.concatenate %155, %156, %157, %158 in 1 : vector<80x1xf32>, vector<80x1xf32>, vector<80x1xf32>, vector<80x1xf32> -> vector<80x4xf32>
    %c56_92 = arith.constant 56 : index
    %c0_93 = arith.constant 0 : index
    %160 = vector.load %arg1[%c56_92, %c0_93] : memref<88x64xf32, #tpu.memory_space<vmem>>, vector<4x16xf32>
    %cst_94 = arith.constant dense<0.000000e+00> : vector<80x16xf32>
    %161 = tpu.matmul %159, %160, %cst_94 {dimension_numbers = #tpu.dot_dimension_numbers<[1], [0], [0], [1], [0, 0, 1, 1], [], []>} : vector<80x4xf32>, vector<4x16xf32>, vector<80x16xf32> -> vector<80x16xf32>
    %162 = vector.extract_strided_slice %161 {offsets = [0, 0], sizes = [80, 8], strides = [1, 1]} : vector<80x16xf32> to vector<80x8xf32>
    %163 = vector.extract_strided_slice %161 {offsets = [0, 8], sizes = [80, 8], strides = [1, 1]} : vector<80x16xf32> to vector<80x8xf32>
    %164 = tpu.concatenate %162, %163 in 0 : vector<80x8xf32>, vector<80x8xf32> -> vector<160x8xf32>
    %c0_95 = arith.constant 0 : index
    %c640_96 = arith.constant 640 : index
    %165 = vector.load %arg2[%c0_95, %c640_96] : memref<80x1408xf32, #tpu.memory_space<vmem>>, vector<80x160xf32>
    %cst_97 = arith.constant dense<0.000000e+00> : vector<80x8xf32>
    %166 = tpu.matmul %165, %164, %cst_97 {dimension_numbers = #tpu.dot_dimension_numbers<[1], [0], [0], [1], [0, 0, 1, 1], [], []>} : vector<80x160xf32>, vector<160x8xf32>, vector<80x8xf32> -> vector<80x8xf32>
    %c0_98 = arith.constant 0 : index
    %c3_99 = arith.constant 3 : index
    %167 = vector.load %arg5[%c0_98, %c3_99] : memref<80x8xf32, #tpu.memory_space<vmem>>, vector<80x1xf32>
    %168 = vector.broadcast %167 : vector<80x1xf32> to vector<80x8xf32>
    %169 = arith.addf %166, %168 : vector<80x8xf32>
    %cst_100 = arith.constant 0.00999999977 : f32
    %170 = vector.broadcast %cst_100 : f32 to vector<80x8xf32>
    %171 = arith.mulf %170, %169 : vector<80x8xf32>
    %172 = arith.maximumf %169, %171 : vector<80x8xf32>
    %c64_101 = arith.constant 64 : index
    %c0_102 = arith.constant 0 : index
    %173 = vector.load %arg1[%c64_101, %c0_102] : memref<88x64xf32, #tpu.memory_space<vmem>>, vector<8x32xf32>
    %cst_103 = arith.constant dense<0.000000e+00> : vector<80x32xf32>
    %174 = tpu.matmul %172, %173, %cst_103 {dimension_numbers = #tpu.dot_dimension_numbers<[1], [0], [0], [1], [0, 0, 1, 1], [], []>} : vector<80x8xf32>, vector<8x32xf32>, vector<80x32xf32> -> vector<80x32xf32>
    %175 = vector.extract_strided_slice %174 {offsets = [0, 0], sizes = [80, 16], strides = [1, 1]} : vector<80x32xf32> to vector<80x16xf32>
    %176 = vector.extract_strided_slice %174 {offsets = [0, 16], sizes = [80, 16], strides = [1, 1]} : vector<80x32xf32> to vector<80x16xf32>
    %177 = tpu.concatenate %175, %176 in 0 : vector<80x16xf32>, vector<80x16xf32> -> vector<160x16xf32>
    %c0_104 = arith.constant 0 : index
    %c896_105 = arith.constant 896 : index
    %178 = vector.load %arg2[%c0_104, %c896_105] : memref<80x1408xf32, #tpu.memory_space<vmem>>, vector<80x160xf32>
    %cst_106 = arith.constant dense<0.000000e+00> : vector<80x16xf32>
    %179 = tpu.matmul %178, %177, %cst_106 {dimension_numbers = #tpu.dot_dimension_numbers<[1], [0], [0], [1], [0, 0, 1, 1], [], []>} : vector<80x160xf32>, vector<160x16xf32>, vector<80x16xf32> -> vector<80x16xf32>
    %c0_107 = arith.constant 0 : index
    %c4_108 = arith.constant 4 : index
    %180 = vector.load %arg5[%c0_107, %c4_108] : memref<80x8xf32, #tpu.memory_space<vmem>>, vector<80x1xf32>
    %181 = vector.broadcast %180 : vector<80x1xf32> to vector<80x16xf32>
    %182 = arith.addf %179, %181 : vector<80x16xf32>
    %cst_109 = arith.constant 0.00999999977 : f32
    %183 = vector.broadcast %cst_109 : f32 to vector<80x16xf32>
    %184 = arith.mulf %183, %182 : vector<80x16xf32>
    %185 = arith.maximumf %182, %184 : vector<80x16xf32>
    %c72_110 = arith.constant 72 : index
    %c0_111 = arith.constant 0 : index
    %186 = vector.load %arg1[%c72_110, %c0_111] : memref<88x64xf32, #tpu.memory_space<vmem>>, vector<16x64xf32>
    %cst_112 = arith.constant dense<0.000000e+00> : vector<80x64xf32>
    %187 = tpu.matmul %185, %186, %cst_112 {dimension_numbers = #tpu.dot_dimension_numbers<[1], [0], [0], [1], [0, 0, 1, 1], [], []>} : vector<80x16xf32>, vector<16x64xf32>, vector<80x64xf32> -> vector<80x64xf32>
    %188 = vector.extract_strided_slice %187 {offsets = [0, 0], sizes = [80, 32], strides = [1, 1]} : vector<80x64xf32> to vector<80x32xf32>
    %189 = vector.extract_strided_slice %187 {offsets = [0, 32], sizes = [80, 32], strides = [1, 1]} : vector<80x64xf32> to vector<80x32xf32>
    %190 = tpu.concatenate %188, %189 in 0 : vector<80x32xf32>, vector<80x32xf32> -> vector<160x32xf32>
    %c0_113 = arith.constant 0 : index
    %c1152_114 = arith.constant 1152 : index
    %191 = vector.load %arg2[%c0_113, %c1152_114] : memref<80x1408xf32, #tpu.memory_space<vmem>>, vector<32x160xf32>
    %cst_115 = arith.constant dense<0.000000e+00> : vector<32x32xf32>
    %192 = tpu.matmul %191, %190, %cst_115 {dimension_numbers = #tpu.dot_dimension_numbers<[1], [0], [0], [1], [0, 0, 1, 1], [], []>} : vector<32x160xf32>, vector<160x32xf32>, vector<32x32xf32> -> vector<32x32xf32>
    %c0_116 = arith.constant 0 : index
    %c5_117 = arith.constant 5 : index
    %193 = vector.load %arg5[%c0_116, %c5_117] : memref<80x8xf32, #tpu.memory_space<vmem>>, vector<32x1xf32>
    %194 = vector.broadcast %193 : vector<32x1xf32> to vector<32x32xf32>
    %195 = arith.addf %192, %194 : vector<32x32xf32>
    %cst_118 = arith.constant 0.00999999977 : f32
    %196 = vector.broadcast %cst_118 : f32 to vector<32x32xf32>
    %197 = arith.mulf %196, %195 : vector<32x32xf32>
    %198 = arith.maximumf %195, %197 : vector<32x32xf32>
    %c32_119 = arith.constant 32 : index
    %c0_120 = arith.constant 0 : index
    %199 = vector.load %arg7[%c32_119, %c0_120] : memref<64x32xf32, #tpu.memory_space<vmem>>, vector<32x32xf32>
    tpu.vector_store %arg7[%c32_119, %c0_120], %198 {strides = array<i32>} : memref<64x32xf32, #tpu.memory_space<vmem>>, vector<32x32xf32>,
    return
  }
}

</mosaic_0001>

<bundles_post_ra>
// kernel: _forward.1
= control target key start
LH: loop header
LB: loop body
LE: loop exit
PB: predicated region body
PF: predicated region fallthrough
CT: control target
= control target key end

     0   :  { %s14787_s0 = inlined_call_operand.vmem [shape: f32[64,32], index: 0, kind: input, shape index: {}]   ;;  %s14788_s1 = inlined_call_operand.vmem [shape: f32[88,64], index: 1, kind: input, shape index: {}]   ;;  %s14789_s2 = inlined_call_operand.vmem [shape: f32[80,1408], index: 2, kind: input, shape index: {}]   ;;  %s14790_s3 = inlined_call_operand.vmem [shape: f32[400,320], index: 3, kind: input, shape index: {}]   ;;  %s14791_s4 = inlined_call_operand.vmem [shape: f32[320,400], index: 4, kind: input, shape index: {}]   ;;  %s14792_s5 = inlined_call_operand.vmem [shape: f32[80,8], index: 5, kind: input, shape index: {}]   ;;  %s14793_s6 = inlined_call_operand.vmem [shape: f32[400,2], index: 6, kind: input, shape index: {}]   ;;  %s14794_s7 = inlined_call_operand.hbm [shape: f32[64,32], index: 7, kind: output, shape index: {}]  }
   0x1   :  { %v34_v0 = vld [vmem:[%s14788_s1 + $0x18] sm:$0xff]  ;;  %v33_v1 = vld [vmem:[%s14788_s1 + $0x10] sm:$0xff]  ;;  %v32_v2 = vld [vmem:[%s14788_s1 + $0x8] sm:$0xff] }
   0x2   :  { %60 = vmatpush.msra.mxu0 %v34_v0 }
   0x3   :  { %12 = vsyncpa [#allocation3], 0  ;;  %v31_v3 = vld [vmem:[%s14788_s1] sm:$0xff]  ;;  %vm35_vm0 = vcmask 261120   ;;  %v28_v5 = vld [vmem:[%s14787_s0 + $0x8] sm:$0xff]  ;;  %s9072_s17 = smov 112  }
   0x4   :  { %61 = vmatpush.msra.mxu0 %v33_v1  ;;  %v27_v4 = vld [vmem:[%s14787_s0] sm:$0xff]  ;;  %v29_v6 = vld [vmem:[%s14787_s0 + $0x10] sm:$0xff]  ;;  %v30_v7 = vld [vmem:[%s14787_s0 + $0x18] sm:$0xff]  ;;  %s9073_s18 = smov 96   ;;  %v14799_v15 = vmov 0   ;;  %vm175_vm1 = vcmask 785408  }
   0x5   :  { %v9166_v14 = vld [vmem:[%s14792_s5] sm:$0xff]  ;;  %8473 = vset.pattern.permute.xlu2 %v14799_v15  ;;  %8475 = vset.pattern.permute.xlu1 %v14799_v15  ;;  %v9175_v20 = vld [vmem:[%s14792_s5 + $0x8] sm:$0xff]  ;;  %v9186_v27 = vld [vmem:[%s14792_s5 + $0x18] sm:$0xff]  ;;  %vm265_vm2 = vcmask 130048   ;;  %s9075_s21 = smov 120   ;;  %vm473_vm3 = vcmask 916480  }
   0x6   :  { %62 = vmatpush.msra.mxu0 %v32_v2  ;;  %127 = vperm.xlu2 %8473, %v9166_v14   ;;  %v9181_v26 = vld [vmem:[%s14792_s5 + $0x20] sm:$0xff]  ;;  %v9191_v28 = vld [vmem:[%s14792_s5 + $0x10] sm:$0xff]  ;;  %v9204_v33 = vld [vmem:[%s14792_s5 + $0x28] sm:$0xff]  ;;  %vm609_vm4 = vcmask 64512   ;;  %s9077_s24 = smov 124   ;;  %s9079_s27 = smov 125  }
   0x7   :  { %8474 = vset.pattern.permute.xlu0 %v14799_v15  ;;  %v9199_v32 = vld [vmem:[%s14792_s5 + $0x30] sm:$0xff]  ;;  %v9209_v34 = vld [vmem:[%s14792_s5 + $0x38] sm:$0xff]  ;;  %v105_v35 = vld [vmem:[%s14789_s2] sm:$0xff]  ;;  %s9080_s28 = smov 127   ;;  %s9081_s29 = smov 126   ;;  %vm1251_vm5 = vcmask 523264  }
   0x8   :  { %63 = vmatpush.msra.mxu0 %v31_v3  ;;  %v9221_v36 = vld [vmem:[%s14792_s5 + $0x48] sm:$0xff]  ;;  %v9226_v37 = vld [vmem:[%s14792_s5 + $0x40] sm:$0xff]  ;;  %v106_v38 = vld [vmem:[%s14789_s2 + $0x58] sm:$0xff]  ;;  %s9082_s11 = smov 1   ;;  %s9083_s8 = smov 2   ;;  %vm3166_vm6 = vcmask 1043456  }
   0x9   :  { %8012 = vmatmul.msk.f32.vlgmr.msra.gmra.mxu0 %vm35_vm0, %v27_v4  ;;  %v107_v39 = vld [vmem:[%s14789_s2 + $0xb0] sm:$0xff]  ;;  %v108_v40 = vld [vmem:[%s14789_s2 + $0x108] sm:$0xff]  ;;  %v109_v41 = vld [vmem:[%s14789_s2 + $0x160] sm:$0xff]  ;;  %s9084_s14 = smov 3   ;;  %vm3101_vm7 = vcmask 7168   ;;  %vm3112_vm8 = vcmask 15360  }
   0xa   :  { %v110_v42 = vld [vmem:[%s14789_s2 + $0x1b8] sm:$0xff]  ;;  %v111_v43 = vld [vmem:[%s14789_s2 + $0x210] sm:$0xff]  ;;  %v112_v44 = vld [vmem:[%s14789_s2 + $0x268] sm:$0xff]  ;;  %vm3135_vm9 = vcmask 31744   ;;  %vm3123_vm10 = vcmask 23552  }
   0xb   :  { %v113_v45 = vld [vmem:[%s14789_s2 + $0x2c0] sm:$0xff]  ;;  %v114_v46 = vld [vmem:[%s14789_s2 + $0x318] sm:$0xff]  ;;  %v264_v47 = vld [vmem:[%s14788_s1 + $0x28] sm:$0xff] }
   0xc   :  { %310 = vmatpush.msra.mxu2 %v264_v47  ;;  %v263_v48 = vld [vmem:[%s14788_s1 + $0x20] sm:$0xff] }
   0xe   :  { %132 = vperm.xlu2 %8473, %v9175_v20   ;;  %311 = vmatpush.msra.mxu2 %v263_v48 }
  0x11   :  { %8013 = vmatmul.msk.f32.gmra.mxu0 %vm35_vm0, %v28_v5 }
  0x16   :  { %147 = vperm.xlu2 %8473, %v9181_v26  }
  0x19   :  { %8014 = vmatmul.msk.f32.gmra.mxu0 %vm35_vm0, %v29_v6 }
  0x1e   :  { %157 = vperm.xlu2 %8473, %v9199_v32  }
  0x21   :  { %8015 = vmatmul.msk.f32.gmra.mxu0 %vm35_vm0, %v30_v7 }
  0x26   :  { %172 = vperm.xlu2 %8473, %v9221_v36  }
  0x60   :  { %v128_v49 = vpop.permute.xlu2 %127 }
  0x68   :  { %v133_v53 = vpop.permute.xlu2 %132 }
  0x70   :  { %v148_v1 = vpop.permute.xlu2 %147 }
  0x86   :  { %v65_v8 = vpop.f32.mrf.mxu0 }
  0x8e   :  { %v68_v9 = vpop.f32.mrf.mxu0 }
  0x8f   :  { %v8468_v13 = vpack.i.bf16 %v65_v8, %v68_v9 }
  0x96   :  { %v71_v10 = vpop.f32.mrf.mxu0 }
  0x9e   :  { %v74_v11 = vpop.f32.mrf.mxu0 }
  0x9f   :  { %v8463_v12 = vpack.i.bf16 %v71_v10, %v74_v11 }
  0xa1   :  { %8464 = vrot.lane.b32.xlu1 %v8463_v12, %s9072_s17  ;;  %8454 = vrot.lane.b32.xlu0 %v8463_v12, %s9073_s18 }
  0xa9   :  { %8469 = vrot.lane.b32.xlu1 %v8468_v13, %s9072_s17  ;;  %8459 = vrot.lane.b32.xlu0 %v8468_v13, %s9073_s18 }
  0xb1   :  { %142 = vperm.xlu1 %8475, %v9186_v27   ;;  %137 = vperm.xlu0 %8474, %v9191_v28  }
  0xb9   :  { %152 = vperm.xlu1 %8475, %v9204_v33   ;;  %162 = vperm.xlu0 %8474, %v9209_v34  }
  0xc1   :  { %167 = vperm.xlu1 %8475, %v9226_v37  }
 0x113   :  { %v8455_v16 = vpop.permute.xlu0 %8454  ;;  %v8465_v19 = vpop.permute.xlu1 %8464 }
 0x114   :  { %v8456_v17 = vunpack.i.l.bf16 %v8455_v16  ;;  %v8457_v18 = vunpack.i.h.bf16 %v8455_v16  ;;  %v8466_v24 = vunpack.i.l.bf16 %v8465_v19  ;;  %v8467_v29 = vunpack.i.h.bf16 %v8465_v19 }
 0x116   :  { %210 = vmatpush.msra.mxu1 %v8456_v17 }
 0x118   :  { %211 = vmatpush.msra.mxu1 %v8457_v18 }
 0x11b   :  { %v8460_v21 = vpop.permute.xlu0 %8459  ;;  %v8470_v25 = vpop.permute.xlu1 %8469 }
 0x11c   :  { %v8461_v22 = vunpack.i.l.bf16 %v8460_v21  ;;  %v8462_v23 = vunpack.i.h.bf16 %v8460_v21  ;;  %v8471_v30 = vunpack.i.l.bf16 %v8470_v25  ;;  %v8472_v31 = vunpack.i.h.bf16 %v8470_v25 }
 0x11e   :  { %212 = vmatpush.msra.mxu1 %v8461_v22 }
 0x120   :  { %213 = vmatpush.msra.mxu1 %v8462_v23 }
 0x122   :  { %214 = vmatpush.msra.mxu1 %v8466_v24 }
 0x123   :  { %v138_v57 = vpop.permute.xlu0 %137  ;;  %v143_v61 = vpop.permute.xlu1 %142 }
 0x124   :  { %215 = vmatpush.msra.mxu1 %v8467_v29 }
 0x126   :  { %216 = vmatpush.msra.mxu1 %v8471_v30 }
 0x128   :  { %217 = vmatpush.msra.mxu1 %v8472_v31 }
 0x12a   :  { %218 = vmatpush.msra.mxu1 %v74_v11 }
 0x12b   :  { %v153_v5 = vpop.permute.xlu1 %152  ;;  %v163_v13 = vpop.permute.xlu0 %162 }
 0x12c   :  { %219 = vmatpush.msra.mxu1 %v71_v10 }
 0x12e   :  { %220 = vmatpush.msra.mxu1 %v68_v9  ;;  %v158_v9 = vpop.permute.xlu2 %157 }
 0x130   :  { %221 = vmatpush.msra.mxu1 %v65_v8 }
 0x131   :  { %8016 = vmatmul.msk.f32.vlgmr.msra.gmra.mxu1 %vm175_vm1, %v105_v35 }
 0x133   :  { %v168_v19 = vpop.permute.xlu1 %167 }
 0x136   :  { %v173_v24 = vpop.permute.xlu2 %172 }
 0x139   :  { %8017 = vmatmul.msk.f32.gmra.mxu1 %vm175_vm1, %v106_v38 }
 0x141   :  { %8018 = vmatmul.msk.f32.gmra.mxu1 %vm175_vm1, %v107_v39 }
 0x149   :  { %8019 = vmatmul.msk.f32.gmra.mxu1 %vm175_vm1, %v108_v40 }
 0x151   :  { %8020 = vmatmul.msk.f32.gmra.mxu1 %vm175_vm1, %v109_v41 }
 0x159   :  { %8021 = vmatmul.msk.f32.gmra.mxu1 %vm175_vm1, %v110_v42 }
 0x161   :  { %8022 = vmatmul.msk.f32.gmra.mxu1 %vm175_vm1, %v111_v43 }
 0x169   :  { %8023 = vmatmul.msk.f32.gmra.mxu1 %vm175_vm1, %v112_v44 }
 0x171   :  { %8024 = vmatmul.msk.f32.gmra.mxu1 %vm175_vm1, %v113_v45 }
 0x179   :  { %8025 = vmatmul.msk.f32.gmra.mxu1 %vm175_vm1, %v114_v46 }
 0x1ae   :  { %v223_v50 = vpop.f32.mrf.mxu1 }
 0x1af   :  { %v224_v51 = vadd.f32 %v223_v50, %v128_v49 }
 0x1b1   :  { %v253_v52 = vmax.f32 %v224_v51, 0.0 }
 0x1b3   :  { %8026 = vmatmul.msk.f32.vlgmr.msra.gmra.mxu2 %vm265_vm2, %v253_v52 }
 0x1b6   :  { %v226_v54 = vpop.f32.mrf.mxu1 }
 0x1b7   :  { %v227_v55 = vadd.f32 %v226_v54, %v133_v53 }
 0x1b9   :  { %v254_v56 = vmax.f32 %v227_v55, 0.0 }
 0x1bb   :  { %8027 = vmatmul.msk.f32.gmra.mxu2 %vm265_vm2, %v254_v56 }
 0x1be   :  { %v229_v58 = vpop.f32.mrf.mxu1 }
 0x1bf   :  { %v230_v59 = vadd.f32 %v229_v58, %v138_v57 }
 0x1c1   :  { %v255_v60 = vmax.f32 %v230_v59, 0.0 }
 0x1c3   :  { %8028 = vmatmul.msk.f32.gmra.mxu2 %vm265_vm2, %v255_v60  ;;  %v14797_v60 = vmov 1  }
 0x1c4   :  { %8526 = vset.pattern.permute.xlu1 %v14797_v60  ;;  %8527 = vset.pattern.permute.xlu2 %v14797_v60 }
 0x1c5   :  { %8528 = vset.pattern.permute.xlu0 %v14797_v60 }
 0x1c6   :  { %v232_v62 = vpop.f32.mrf.mxu1 }
 0x1c7   :  { %v233_v63 = vadd.f32 %v232_v62, %v143_v61  ;;  %v413_v61 = vld [vmem:[%s14789_s2 + $0x8] sm:$0xff] }
 0x1c9   :  { %v256_v0 = vmax.f32 %v233_v63, 0.0 }
 0x1cb   :  { %8029 = vmatmul.msk.f32.gmra.mxu2 %vm265_vm2, %v256_v0 }
 0x1ce   :  { %v235_v2 = vpop.f32.mrf.mxu1 }
 0x1cf   :  { %v236_v3 = vadd.f32 %v235_v2, %v148_v1 }
 0x1d1   :  { %v257_v4 = vmax.f32 %v236_v3, 0.0 }
 0x1d3   :  { %8030 = vmatmul.msk.f32.gmra.mxu2 %vm265_vm2, %v257_v4 }
 0x1d6   :  { %v238_v6 = vpop.f32.mrf.mxu1 }
 0x1d7   :  { %v239_v7 = vadd.f32 %v238_v6, %v153_v5  ;;  %v415_v5 = vld [vmem:[%s14789_s2 + $0x60] sm:$0xff] }
 0x1d9   :  { %v258_v8 = vmax.f32 %v239_v7, 0.0 }
 0x1db   :  { %8031 = vmatmul.msk.f32.gmra.mxu2 %vm265_vm2, %v258_v8 }
 0x1de   :  { %v241_v10 = vpop.f32.mrf.mxu1 }
 0x1df   :  { %v242_v11 = vadd.f32 %v241_v10, %v158_v9 }
 0x1e1   :  { %v259_v12 = vmax.f32 %v242_v11, 0.0 }
 0x1e3   :  { %8032 = vmatmul.msk.f32.gmra.mxu2 %vm265_vm2, %v259_v12  ;;  %v417_v12 = vld [vmem:[%s14789_s2 + $0xb8] sm:$0xff] }
 0x1e6   :  { %v244_v16 = vpop.f32.mrf.mxu1 }
 0x1e7   :  { %v245_v17 = vadd.f32 %v244_v16, %v163_v13 }
 0x1e9   :  { %v260_v18 = vmax.f32 %v245_v17, 0.0 }
 0x1eb   :  { %8033 = vmatmul.msk.f32.gmra.mxu2 %vm265_vm2, %v260_v18 }
 0x1ee   :  { %v247_v21 = vpop.f32.mrf.mxu1 }
 0x1ef   :  { %v248_v22 = vadd.f32 %v247_v21, %v168_v19 }
 0x1f1   :  { %v261_v23 = vmax.f32 %v248_v22, 0.0  ;;  %v419_v22 = vld [vmem:[%s14789_s2 + $0x110] sm:$0xff] }
 0x1f3   :  { %8034 = vmatmul.msk.f32.gmra.mxu2 %vm265_vm2, %v261_v23 }
 0x1f6   :  { %v250_v25 = vpop.f32.mrf.mxu1 }
 0x1f7   :  { %v251_v29 = vadd.f32 %v250_v25, %v173_v24  ;;  %v414_v25 = vld [vmem:[%s14789_s2 + $0x10] sm:$0xff] }
 0x1f9   :  { %v262_v30 = vmax.f32 %v251_v29, 0.0  ;;  %v421_v29 = vld [vmem:[%s14789_s2 + $0x168] sm:$0xff] }
 0x1fb   :  { %8035 = vmatmul.msk.f32.gmra.mxu2 %vm265_vm2, %v262_v30  ;;  %v416_v30 = vld [vmem:[%s14789_s2 + $0x68] sm:$0xff] }
 0x236   :  { %v9282_v31 = vpop.f32.mrf.mxu2 }
 0x23e   :  { %v316_v35 = vpop.f32.mrf.mxu2 }
 0x23f   :  { %v8486_v38 = vpack.i.bf16 %v9282_v31, %v316_v35 }
 0x241   :  { %8487 = vrot.lane.b32.xlu2 %v8486_v38, %s9075_s21 }
 0x246   :  { %v319_v39 = vpop.f32.mrf.mxu2 }
 0x24e   :  { %v322_v40 = vpop.f32.mrf.mxu2 }
 0x24f   :  { %v8481_v41 = vpack.i.bf16 %v319_v39, %v322_v40 }
 0x251   :  { %8482 = vrot.lane.b32.xlu1 %v8481_v41, %s9075_s21 }
 0x256   :  { %v325_v42 = vpop.f32.mrf.mxu2 }
 0x25e   :  { %v328_v43 = vpop.f32.mrf.mxu2 }
 0x25f   :  { %v8501_v44 = vpack.i.bf16 %v325_v42, %v328_v43 }
 0x261   :  { %8502 = vrot.lane.b32.xlu2 %v8501_v44, %s9072_s17  ;;  %8477 = vrot.lane.b32.xlu0 %v8501_v44, %s9075_s21  ;;  %v431_v44 = vld [vmem:[%s14789_s2 + $0x320] sm:$0xff] }
 0x266   :  { %v331_v45 = vpop.f32.mrf.mxu2 }
 0x26e   :  { %v334_v46 = vpop.f32.mrf.mxu2 }
 0x26f   :  { %v8496_v47 = vpack.i.bf16 %v331_v45, %v334_v46 }
 0x271   :  { %8497 = vrot.lane.b32.xlu1 %v8496_v47, %s9072_s17 }
 0x276   :  { %v337_v48 = vpop.f32.mrf.mxu2 }
 0x279   :  { %8512 = vrot.lane.b32.xlu1 %v8486_v38, %s9072_s17  ;;  %v425_v38 = vld [vmem:[%s14789_s2 + $0x218] sm:$0xff] }
 0x27e   :  { %v340_v49 = vpop.f32.mrf.mxu2 }
 0x27f   :  { %v8516_v50 = vpack.i.bf16 %v337_v48, %v340_v49 }
 0x281   :  { %8517 = vrot.lane.b32.xlu2 %v8516_v50, %s9075_s21  ;;  %8492 = vrot.lane.b32.xlu0 %v8516_v50, %s9072_s17 }
 0x282   :  { %434 = vperm.xlu1 %8526, %v9166_v14  }
 0x289   :  { %8507 = vrot.lane.b32.xlu0 %v8481_v41, %s9072_s17  ;;  %438 = vperm.xlu2 %8527, %v9175_v20   ;;  %v422_v41 = vld [vmem:[%s14789_s2 + $0x170] sm:$0xff] }
 0x28a   :  { %446 = vperm.xlu1 %8526, %v9186_v27  }
 0x291   :  { %8522 = vrot.lane.b32.xlu0 %v8496_v47, %s9075_s21  ;;  %450 = vperm.xlu2 %8527, %v9181_v26   ;;  %v430_v47 = vld [vmem:[%s14789_s2 + $0x2d0] sm:$0xff] }
 0x292   :  { %454 = vperm.xlu1 %8526, %v9204_v33  }
 0x299   :  { %442 = vperm.xlu0 %8528, %v9191_v28   ;;  %458 = vperm.xlu2 %8527, %v9199_v32  }
 0x29a   :  { %466 = vperm.xlu1 %8526, %v9226_v37  }
 0x29b   :  { %v8488_v56 = vpop.permute.xlu2 %8487 }
 0x29c   :  { %v8489_v58 = vunpack.i.l.bf16 %v8488_v56  ;;  %v8490_v59 = vunpack.i.h.bf16 %v8488_v56 }
 0x2a1   :  { %462 = vperm.xlu0 %8528, %v9209_v34   ;;  %470 = vperm.xlu2 %8527, %v9221_v36  }
 0x2bb   :  { %v8503_v3 = vpop.permute.xlu2 %8502 }
 0x2bc   :  { %v8504_v6 = vunpack.i.l.bf16 %v8503_v3  ;;  %v8505_v8 = vunpack.i.h.bf16 %v8503_v3 }
 0x2c3   :  { %v8483_v53 = vpop.permute.xlu1 %8482 }
 0x2c4   :  { %v8484_v55 = vunpack.i.l.bf16 %v8483_v53  ;;  %v8485_v57 = vunpack.i.h.bf16 %v8483_v53 }
 0x2d3   :  { %v8478_v51 = vpop.permute.xlu0 %8477 }
 0x2d4   :  { %v8479_v52 = vunpack.i.l.bf16 %v8478_v51  ;;  %v8480_v54 = vunpack.i.h.bf16 %v8478_v51 }
 0x2d6   :  { %504 = vmatpush.msra.mxu3 %v8479_v52 }
 0x2d8   :  { %505 = vmatpush.msra.mxu3 %v8480_v54 }
 0x2da   :  { %506 = vmatpush.msra.mxu3 %v8484_v55 }
 0x2db   :  { %v8518_v16 = vpop.permute.xlu2 %8517 }
 0x2dc   :  { %507 = vmatpush.msra.mxu3 %v8485_v57  ;;  %v8519_v18 = vunpack.i.l.bf16 %v8518_v16  ;;  %v8520_v21 = vunpack.i.h.bf16 %v8518_v16 }
 0x2de   :  { %508 = vmatpush.msra.mxu3 %v8489_v58 }
 0x2e0   :  { %509 = vmatpush.msra.mxu3 %v8490_v59 }
 0x2e2   :  { %510 = vmatpush.msra.mxu3 %v340_v49  ;;  %v608_v49 = vld [vmem:[%s14788_s1 + $0x30] sm:$0xff] }
 0x2e3   :  { %v8498_v0 = vpop.permute.xlu1 %8497  ;;  %655 = vmatpush.msrb.mxu2 %v608_v49  ;;  %v439_v58 = vpop.permute.xlu2 %438 }
 0x2e4   :  { %511 = vmatpush.msra.mxu3 %v337_v48  ;;  %v8499_v2 = vunpack.i.l.bf16 %v8498_v0  ;;  %v8500_v4 = vunpack.i.h.bf16 %v8498_v0  ;;  %v432_v48 = vld [vmem:[%s14789_s2 + $0x328] sm:$0xff] }
 0x2e6   :  { %512 = vmatpush.msra.mxu3 %v334_v46  ;;  %v428_v46 = vld [vmem:[%s14789_s2 + $0x278] sm:$0xff] }
 0x2e8   :  { %513 = vmatpush.msra.mxu3 %v331_v45  ;;  %v426_v45 = vld [vmem:[%s14789_s2 + $0x220] sm:$0xff] }
 0x2ea   :  { %514 = vmatpush.msra.mxu3 %v328_v43  ;;  %v424_v43 = vld [vmem:[%s14789_s2 + $0x1c8] sm:$0xff] }
 0x2eb   :  { %v8513_v10 = vpop.permute.xlu1 %8512 }
 0x2ec   :  { %515 = vmatpush.msra.mxu3 %v325_v42  ;;  %v8514_v13 = vunpack.i.l.bf16 %v8513_v10  ;;  %v8515_v17 = vunpack.i.h.bf16 %v8513_v10  ;;  %v429_v42 = vld [vmem:[%s14789_s2 + $0x2c8] sm:$0xff] }
 0x2ee   :  { %516 = vmatpush.msra.mxu3 %v322_v40  ;;  %v427_v40 = vld [vmem:[%s14789_s2 + $0x270] sm:$0xff] }
 0x2f0   :  { %517 = vmatpush.msra.mxu3 %v319_v39  ;;  %v420_v39 = vld [vmem:[%s14789_s2 + $0x118] sm:$0xff] }
 0x2f2   :  { %518 = vmatpush.msra.mxu3 %v316_v35  ;;  %v418_v35 = vld [vmem:[%s14789_s2 + $0xc0] sm:$0xff] }
 0x2f3   :  { %v8493_v62 = vpop.permute.xlu0 %8492 }
 0x2f4   :  { %519 = vmatpush.msra.mxu3 %v9282_v31  ;;  %v8494_v63 = vunpack.i.l.bf16 %v8493_v62  ;;  %v8495_v1 = vunpack.i.h.bf16 %v8493_v62  ;;  %v423_v31 = vld [vmem:[%s14789_s2 + $0x1c0] sm:$0xff]  ;;  %v435_v52 = vpop.permute.xlu1 %434 }
 0x2f5   :  { %520 = vmatmul.f32.vlgmr.msra.gmra.mxu3 %v413_v61 }
 0x2f6   :  { %553 = vmatpush.msrb.mxu0 %v8494_v63 }
 0x2f8   :  { %554 = vmatpush.msrb.mxu0 %v8495_v1 }
 0x2fa   :  { %555 = vmatpush.msrb.mxu0 %v8499_v2 }
 0x2fb   :  { %v8508_v7 = vpop.permute.xlu0 %8507 }
 0x2fc   :  { %556 = vmatpush.msrb.mxu0 %v8500_v4  ;;  %v8509_v9 = vunpack.i.l.bf16 %v8508_v7  ;;  %v8510_v11 = vunpack.i.h.bf16 %v8508_v7  ;;  %v447_v7 = vpop.permute.xlu1 %446 }
 0x2fd   :  { %523 = vmatmul.f32.gmra.mxu3 %v415_v5 }
 0x2fe   :  { %557 = vmatpush.msrb.mxu0 %v8504_v6 }
 0x300   :  { %558 = vmatpush.msrb.mxu0 %v8505_v8 }
 0x302   :  { %559 = vmatpush.msrb.mxu0 %v8509_v9 }
 0x303   :  { %v8523_v19 = vpop.permute.xlu0 %8522 }
 0x304   :  { %560 = vmatpush.msrb.mxu0 %v8510_v11  ;;  %v8524_v23 = vunpack.i.l.bf16 %v8523_v19  ;;  %v8525_v24 = vunpack.i.h.bf16 %v8523_v19 }
 0x305   :  { %526 = vmatmul.f32.gmra.mxu3 %v417_v12 }
 0x306   :  { %561 = vmatpush.msrb.mxu0 %v8514_v13  ;;  %v451_v13 = vpop.permute.xlu2 %450 }
 0x308   :  { %562 = vmatpush.msrb.mxu0 %v8515_v17 }
 0x30a   :  { %563 = vmatpush.msrb.mxu0 %v8519_v18 }
 0x30b   :  { %v443_v1 = vpop.permute.xlu0 %442 }
 0x30c   :  { %564 = vmatpush.msrb.mxu0 %v8520_v21  ;;  %v455_v21 = vpop.permute.xlu1 %454 }
 0x30d   :  { %529 = vmatmul.f32.gmra.mxu3 %v419_v22 }
 0x30e   :  { %565 = vmatpush.msrb.mxu0 %v8524_v23 }
 0x310   :  { %566 = vmatpush.msrb.mxu0 %v8525_v24 }
 0x311   :  { %8036 = vmatmul.msk.f32.vlgmr.msrb.gmra.mxu0 %vm473_vm3, %v414_v25 }
 0x315   :  { %532 = vmatmul.f32.gmra.mxu3 %v421_v29 }
 0x319   :  { %8037 = vmatmul.msk.f32.gmra.mxu0 %vm473_vm3, %v416_v30  ;;  %v459_v30 = vpop.permute.xlu2 %458 }
 0x31d   :  { %535 = vmatmul.f32.gmra.mxu3 %v423_v31 }
 0x321   :  { %8038 = vmatmul.msk.f32.gmra.mxu0 %vm473_vm3, %v418_v35 }
 0x325   :  { %538 = vmatmul.f32.gmra.mxu3 %v425_v38 }
 0x329   :  { %8039 = vmatmul.msk.f32.gmra.mxu0 %vm473_vm3, %v420_v39 }
 0x32d   :  { %541 = vmatmul.f32.gmra.mxu3 %v427_v40 }
 0x331   :  { %8040 = vmatmul.msk.f32.gmra.mxu0 %vm473_vm3, %v422_v41  ;;  %v463_v41 = vpop.permute.xlu0 %462 }
 0x335   :  { %544 = vmatmul.f32.gmra.mxu3 %v429_v42 }
 0x339   :  { %8041 = vmatmul.msk.f32.gmra.mxu0 %vm473_vm3, %v424_v43 }
 0x33d   :  { %547 = vmatmul.f32.gmra.mxu3 %v431_v44 }
 0x341   :  { %8042 = vmatmul.msk.f32.gmra.mxu0 %vm473_vm3, %v426_v45 }
 0x349   :  { %8043 = vmatmul.msk.f32.gmra.mxu0 %vm473_vm3, %v428_v46 }
 0x351   :  { %8044 = vmatmul.msk.f32.gmra.mxu0 %vm473_vm3, %v430_v47  ;;  %v467_v47 = vpop.permute.xlu1 %466 }
 0x359   :  { %8045 = vmatmul.msk.f32.gmra.mxu0 %vm473_vm3, %v432_v48 }
 0x378   :  { %v521_v50 = vpop.f32.mrf.mxu3 }
 0x379   :  { %v522_v53 = vadd.f32 %v521_v50, %v435_v52 }
 0x380   :  { %v524_v51 = vpop.f32.mrf.mxu3 }
 0x381   :  { %v525_v59 = vadd.f32 %v524_v51, %v439_v58 }
 0x388   :  { %v527_v54 = vpop.f32.mrf.mxu3 }
 0x389   :  { %v528_v2 = vadd.f32 %v527_v54, %v443_v1 }
 0x38e   :  { %v568_v55 = vpop.f32.mrf.mxu0 }
 0x38f   :  { %v569_v56 = vadd.f32 %v568_v55, %v522_v53  ;;  %v471_v53 = vpop.permute.xlu2 %470 }
 0x390   :  { %v530_v61 = vpop.f32.mrf.mxu3 }
 0x391   :  { %v598_v57 = vmax.f32 %v569_v56, 0.0  ;;  %v531_v8 = vadd.f32 %v530_v61, %v447_v7 }
 0x393   :  { %8046 = vmatmul.msk.f32.vlgmr.msrb.gmra.mxu2 %vm609_vm4, %v598_v57 }
 0x396   :  { %v571_v62 = vpop.f32.mrf.mxu0 }
 0x397   :  { %v572_v63 = vadd.f32 %v571_v62, %v525_v59 }
 0x398   :  { %v533_v5 = vpop.f32.mrf.mxu3 }
 0x399   :  { %v599_v0 = vmax.f32 %v572_v63, 0.0  ;;  %v534_v16 = vadd.f32 %v533_v5, %v451_v13 }
 0x39b   :  { %8047 = vmatmul.msk.f32.gmra.mxu2 %vm609_vm4, %v599_v0 }
 0x39e   :  { %v574_v3 = vpop.f32.mrf.mxu0 }
 0x39f   :  { %v575_v4 = vadd.f32 %v574_v3, %v528_v2 }
 0x3a0   :  { %v536_v12 = vpop.f32.mrf.mxu3 }
 0x3a1   :  { %v600_v6 = vmax.f32 %v575_v4, 0.0  ;;  %v537_v23 = vadd.f32 %v536_v12, %v455_v21 }
 0x3a3   :  { %8048 = vmatmul.msk.f32.gmra.mxu2 %vm609_vm4, %v600_v6 }
 0x3a6   :  { %v577_v9 = vpop.f32.mrf.mxu0 }
 0x3a7   :  { %v578_v10 = vadd.f32 %v577_v9, %v531_v8 }
 0x3a8   :  { %v539_v22 = vpop.f32.mrf.mxu3 }
 0x3a9   :  { %v601_v11 = vmax.f32 %v578_v10, 0.0  ;;  %v540_v31 = vadd.f32 %v539_v22, %v459_v30 }
 0x3ab   :  { %8049 = vmatmul.msk.f32.gmra.mxu2 %vm609_vm4, %v601_v11 }
 0x3ae   :  { %v580_v17 = vpop.f32.mrf.mxu0 }
 0x3af   :  { %v581_v18 = vadd.f32 %v580_v17, %v534_v16 }
 0x3b0   :  { %v542_v35 = vpop.f32.mrf.mxu3 }
 0x3b1   :  { %v602_v19 = vmax.f32 %v581_v18, 0.0  ;;  %v543_v42 = vadd.f32 %v542_v35, %v463_v41 }
 0x3b3   :  { %8050 = vmatmul.msk.f32.gmra.mxu2 %vm609_vm4, %v602_v19 }
 0x3b6   :  { %v583_v24 = vpop.f32.mrf.mxu0 }
 0x3b7   :  { %v584_v25 = vadd.f32 %v583_v24, %v537_v23  ;;  %v14795_v23 = vmov 2  }
 0x3b8   :  { %v545_v45 = vpop.f32.mrf.mxu3  ;;  %8579 = vset.pattern.permute.xlu1 %v14795_v23  ;;  %8580 = vset.pattern.permute.xlu2 %v14795_v23 }
 0x3b9   :  { %v603_v29 = vmax.f32 %v584_v25, 0.0  ;;  %v546_v48 = vadd.f32 %v545_v45, %v467_v47  ;;  %8581 = vset.pattern.permute.xlu0 %v14795_v23  ;;  %v761_v47 = vld [vmem:[%s14789_s2 + $0xc8] sm:$0xff] }
 0x3bb   :  { %8051 = vmatmul.msk.f32.gmra.mxu2 %vm609_vm4, %v603_v29 }
 0x3be   :  { %v586_v38 = vpop.f32.mrf.mxu0 }
 0x3bf   :  { %v587_v39 = vadd.f32 %v586_v38, %v540_v31 }
 0x3c0   :  { %v548_v52 = vpop.f32.mrf.mxu3 }
 0x3c1   :  { %v604_v40 = vmax.f32 %v587_v39, 0.0  ;;  %v549_v54 = vadd.f32 %v548_v52, %v471_v53  ;;  %v768_v52 = vld [vmem:[%s14789_s2 + $0x1d8] sm:$0xff]  ;;  %v767_v53 = vld [vmem:[%s14789_s2 + $0x1d0] sm:$0xff] }
 0x3c3   :  { %8052 = vmatmul.msk.f32.gmra.mxu2 %vm609_vm4, %v604_v40 }
 0x3c6   :  { %v589_v43 = vpop.f32.mrf.mxu0 }
 0x3c7   :  { %v590_v44 = vadd.f32 %v589_v43, %v543_v42 }
 0x3c9   :  { %v605_v46 = vmax.f32 %v590_v44, 0.0 }
 0x3cb   :  { %8053 = vmatmul.msk.f32.gmra.mxu2 %vm609_vm4, %v605_v46  ;;  %v759_v46 = vld [vmem:[%s14789_s2 + $0x70] sm:$0xff] }
 0x3ce   :  { %v592_v49 = vpop.f32.mrf.mxu0 }
 0x3cf   :  { %v593_v50 = vadd.f32 %v592_v49, %v546_v48  ;;  %v764_v48 = vld [vmem:[%s14789_s2 + $0x128] sm:$0xff]  ;;  %v763_v49 = vld [vmem:[%s14789_s2 + $0x120] sm:$0xff] }
 0x3d1   :  { %v606_v51 = vmax.f32 %v593_v50, 0.0  ;;  %v766_v50 = vld [vmem:[%s14789_s2 + $0x180] sm:$0xff] }
 0x3d3   :  { %8054 = vmatmul.msk.f32.gmra.mxu2 %vm609_vm4, %v606_v51  ;;  %v765_v51 = vld [vmem:[%s14789_s2 + $0x178] sm:$0xff] }
 0x3d6   :  { %v595_v55 = vpop.f32.mrf.mxu0 }
 0x3d7   :  { %v596_v56 = vadd.f32 %v595_v55, %v549_v54  ;;  %v770_v54 = vld [vmem:[%s14789_s2 + $0x230] sm:$0xff]  ;;  %v769_v55 = vld [vmem:[%s14789_s2 + $0x228] sm:$0xff] }
 0x3d9   :  { %v607_v57 = vmax.f32 %v596_v56, 0.0  ;;  %v772_v56 = vld [vmem:[%s14789_s2 + $0x288] sm:$0xff] }
 0x3db   :  { %8055 = vmatmul.msk.f32.gmra.mxu2 %vm609_vm4, %v607_v57  ;;  %v771_v57 = vld [vmem:[%s14789_s2 + $0x280] sm:$0xff] }
 0x416   :  { %v9392_v58 = vpop.f32.mrf.mxu2 }
 0x41e   :  { %v9394_v59 = vpop.f32.mrf.mxu2 }
 0x41f   :  { %v8549_v9 = vpack.i.bf16 %v9392_v58, %v9394_v59 }
 0x426   :  { %v9396_v61 = vpop.f32.mrf.mxu2 }
 0x42e   :  { %v9398_v62 = vpop.f32.mrf.mxu2 }
 0x42f   :  { %v8529_v63 = vpack.i.bf16 %v9396_v61, %v9398_v62 }
 0x431   :  { %8530 = vrot.lane.b32.xlu2 %v8529_v63, %s9077_s24 }
 0x436   :  { %v9403_v0 = vpop.f32.mrf.mxu2 }
 0x43e   :  { %v9405_v1 = vpop.f32.mrf.mxu2 }
 0x43f   :  { %v8554_v2 = vpack.i.bf16 %v9403_v0, %v9405_v1 }
 0x441   :  { %8555 = vrot.lane.b32.xlu2 %v8554_v2, %s9075_s21  ;;  %8535 = vrot.lane.b32.xlu0 %v8554_v2, %s9077_s24 }
 0x446   :  { %v9411_v3 = vpop.f32.mrf.mxu2 }
 0x44e   :  { %v678_v4 = vpop.f32.mrf.mxu2 }
 0x44f   :  { %v8539_v5 = vpack.i.bf16 %v9411_v3, %v678_v4 }
 0x451   :  { %8540 = vrot.lane.b32.xlu0 %v8539_v5, %s9075_s21 }
 0x456   :  { %v681_v6 = vpop.f32.mrf.mxu2 }
 0x459   :  { %8560 = vrot.lane.b32.xlu0 %v8529_v63, %s9075_s21 }
 0x45e   :  { %v684_v7 = vpop.f32.mrf.mxu2 }
 0x45f   :  { %v8569_v8 = vpack.i.bf16 %v681_v6, %v684_v7 }
 0x461   :  { %8575 = vrot.lane.b32.xlu0 %v8539_v5, %s9077_s24  ;;  %8570 = vrot.lane.b32.xlu2 %v8569_v8, %s9077_s24 }
 0x462   :  { %8545 = vrot.lane.b32.xlu1 %v8569_v8, %s9075_s21 }
 0x469   :  { %778 = vperm.xlu2 %8580, %v9166_v14   ;;  %798 = vperm.xlu0 %8581, %v9204_v33  }
 0x46a   :  { %8550 = vrot.lane.b32.xlu1 %v8549_v9, %s9077_s24 }
 0x471   :  { %794 = vperm.xlu2 %8580, %v9181_v26   ;;  %806 = vperm.xlu0 %8581, %v9209_v34  }
 0x472   :  { %8565 = vrot.lane.b32.xlu1 %v8549_v9, %s9075_s21 }
 0x479   :  { %790 = vperm.xlu2 %8580, %v9186_v27   ;;  %v757_v27 = vld [vmem:[%s14789_s2 + $0x18] sm:$0xff] }
 0x47a   :  { %782 = vperm.xlu1 %8579, %v9175_v20  }
 0x481   :  { %802 = vperm.xlu2 %8580, %v9199_v32   ;;  %v762_v32 = vld [vmem:[%s14789_s2 + $0xd0] sm:$0xff] }
 0x482   :  { %814 = vperm.xlu1 %8579, %v9221_v36  }
 0x48a   :  { %810 = vperm.xlu1 %8579, %v9226_v37   ;;  %v758_v37 = vld [vmem:[%s14789_s2 + $0x20] sm:$0xff] }
 0x48b   :  { %v8531_v12 = vpop.permute.xlu2 %8530 }
 0x48c   :  { %v8532_v16 = vunpack.i.l.bf16 %v8531_v12  ;;  %v8533_v17 = vunpack.i.h.bf16 %v8531_v12 }
 0x492   :  { %786 = vperm.xlu1 %8579, %v9191_v28   ;;  %v760_v28 = vld [vmem:[%s14789_s2 + $0x78] sm:$0xff] }
 0x49b   :  { %v8556_v25 = vpop.permute.xlu2 %8555 }
 0x49c   :  { %v8557_v35 = vunpack.i.l.bf16 %v8556_v25  ;;  %v8558_v39 = vunpack.i.h.bf16 %v8556_v25 }
 0x4b3   :  { %v8536_v10 = vpop.permute.xlu0 %8535 }
 0x4b4   :  { %v8537_v11 = vunpack.i.l.bf16 %v8536_v10  ;;  %v8538_v13 = vunpack.i.h.bf16 %v8536_v10 }
 0x4b6   :  { %847 = vmatpush.msrb.mxu1 %v8537_v11 }
 0x4b8   :  { %848 = vmatpush.msrb.mxu1 %v8538_v13 }
 0x4ba   :  { %849 = vmatpush.msrb.mxu1 %v8532_v16 }
 0x4bb   :  { %v8571_v42 = vpop.permute.xlu2 %8570 }
 0x4bc   :  { %850 = vmatpush.msrb.mxu1 %v8533_v17  ;;  %v8572_v36 = vunpack.i.l.bf16 %v8571_v42  ;;  %v8573_v34 = vunpack.i.h.bf16 %v8571_v42 }
 0x4c3   :  { %v8541_v18 = vpop.permute.xlu0 %8540  ;;  %v779_v2 = vpop.permute.xlu2 %778 }
 0x4c4   :  { %v8542_v24 = vunpack.i.l.bf16 %v8541_v18  ;;  %v8543_v29 = vunpack.i.h.bf16 %v8541_v18 }
 0x4cb   :  { %v8561_v38 = vpop.permute.xlu0 %8560  ;;  %v795_v11 = vpop.permute.xlu2 %794 }
 0x4cc   :  { %v8562_v14 = vunpack.i.l.bf16 %v8561_v38  ;;  %v8563_v40 = vunpack.i.h.bf16 %v8561_v38 }
 0x4d3   :  { %v8576_v26 = vpop.permute.xlu0 %8575 }
 0x4d4   :  { %v8546_v19 = vpop.permute.xlu1 %8545  ;;  %v8577_v44 = vunpack.i.l.bf16 %v8576_v26  ;;  %v8578_v45 = vunpack.i.h.bf16 %v8576_v26 }
 0x4d5   :  { %v8547_v21 = vunpack.i.l.bf16 %v8546_v19  ;;  %v8548_v22 = vunpack.i.h.bf16 %v8546_v19 }
 0x4d7   :  { %896 = vmatpush.msrb.mxu3 %v8547_v21 }
 0x4d9   :  { %897 = vmatpush.msrb.mxu3 %v8548_v22  ;;  %v791_v22 = vpop.permute.xlu2 %790 }
 0x4db   :  { %898 = vmatpush.msrb.mxu3 %v8542_v24 }
 0x4dc   :  { %v8551_v30 = vpop.permute.xlu1 %8550 }
 0x4dd   :  { %899 = vmatpush.msrb.mxu3 %v8543_v29  ;;  %v8552_v31 = vunpack.i.l.bf16 %v8551_v30  ;;  %v8553_v20 = vunpack.i.h.bf16 %v8551_v30 }
 0x4df   :  { %851 = vmatpush.msrb.mxu1 %v8552_v31  ;;  %900 = vmatpush.msrb.mxu3 %v8557_v35 }
 0x4e1   :  { %852 = vmatpush.msrb.mxu1 %v8553_v20  ;;  %901 = vmatpush.msrb.mxu3 %v8558_v39 }
 0x4e3   :  { %853 = vmatpush.msrb.mxu1 %v684_v7  ;;  %902 = vmatpush.msrb.mxu3 %v8562_v14 }
 0x4e4   :  { %v8566_v33 = vpop.permute.xlu1 %8565 }
 0x4e5   :  { %854 = vmatpush.msrb.mxu1 %v681_v6  ;;  %903 = vmatpush.msrb.mxu3 %v8563_v40  ;;  %v8567_v41 = vunpack.i.l.bf16 %v8566_v33  ;;  %v8568_v43 = vunpack.i.h.bf16 %v8566_v33  ;;  %v799_v33 = vpop.permute.xlu0 %798 }
 0x4e7   :  { %855 = vmatpush.msrb.mxu1 %v678_v4  ;;  %904 = vmatpush.msrb.mxu3 %v8567_v41 }
 0x4e9   :  { %856 = vmatpush.msrb.mxu1 %v9411_v3  ;;  %905 = vmatpush.msrb.mxu3 %v8568_v43 }
 0x4eb   :  { %857 = vmatpush.msrb.mxu1 %v9405_v1  ;;  %906 = vmatpush.msrb.mxu3 %v8572_v36 }
 0x4ec   :  { %v783_v63 = vpop.permute.xlu1 %782 }
 0x4ed   :  { %858 = vmatpush.msrb.mxu1 %v9403_v0  ;;  %907 = vmatpush.msrb.mxu3 %v8573_v34 }
 0x4ef   :  { %859 = vmatpush.msrb.mxu1 %v9398_v62  ;;  %908 = vmatpush.msrb.mxu3 %v8577_v44  ;;  %v775_v62 = vld [vmem:[%s14789_s2 + $0x330] sm:$0xff] }
 0x4f1   :  { %860 = vmatpush.msrb.mxu1 %v9396_v61  ;;  %909 = vmatpush.msrb.mxu3 %v8578_v45  ;;  %v776_v61 = vld [vmem:[%s14789_s2 + $0x338] sm:$0xff] }
 0x4f2   :  { %8056 = vmatmul.msk.f32.vlgmr.msrb.gmra.mxu3 %vm473_vm3, %v758_v37 }
 0x4f3   :  { %861 = vmatpush.msrb.mxu1 %v9394_v59  ;;  %v773_v59 = vld [vmem:[%s14789_s2 + $0x2d8] sm:$0xff] }
 0x4f4   :  { %v9513_v0 = vpop.permute.xlu1 %814 }
 0x4f5   :  { %862 = vmatpush.msrb.mxu1 %v9392_v58  ;;  %v774_v58 = vld [vmem:[%s14789_s2 + $0x2e0] sm:$0xff] }
 0x4f6   :  { %863 = vmatmul.f32.vlgmr.msrb.gmra.mxu1 %v757_v27 }
 0x4fa   :  { %8057 = vmatmul.msk.f32.gmra.mxu3 %vm473_vm3, %v760_v28  ;;  %v803_v28 = vpop.permute.xlu2 %802 }
 0x4fc   :  { %v811_v5 = vpop.permute.xlu1 %810 }
 0x4fe   :  { %866 = vmatmul.f32.gmra.mxu1 %v759_v46 }
 0x502   :  { %8058 = vmatmul.msk.f32.gmra.mxu3 %vm473_vm3, %v762_v32  ;;  %v807_v32 = vpop.permute.xlu0 %806 }
 0x504   :  { %v787_v18 = vpop.permute.xlu1 %786 }
 0x506   :  { %869 = vmatmul.f32.gmra.mxu1 %v761_v47 }
 0x50a   :  { %8059 = vmatmul.msk.f32.gmra.mxu3 %vm473_vm3, %v764_v48 }
 0x50e   :  { %872 = vmatmul.f32.gmra.mxu1 %v763_v49 }
 0x512   :  { %8060 = vmatmul.msk.f32.gmra.mxu3 %vm473_vm3, %v766_v50 }
 0x516   :  { %875 = vmatmul.f32.gmra.mxu1 %v765_v51 }
 0x51a   :  { %8061 = vmatmul.msk.f32.gmra.mxu3 %vm473_vm3, %v768_v52 }
 0x51e   :  { %878 = vmatmul.f32.gmra.mxu1 %v767_v53 }
 0x522   :  { %8062 = vmatmul.msk.f32.gmra.mxu3 %vm473_vm3, %v770_v54 }
 0x526   :  { %881 = vmatmul.f32.gmra.mxu1 %v769_v55 }
 0x52a   :  { %8063 = vmatmul.msk.f32.gmra.mxu3 %vm473_vm3, %v772_v56 }
 0x52e   :  { %884 = vmatmul.f32.gmra.mxu1 %v771_v57 }
 0x532   :  { %8064 = vmatmul.msk.f32.gmra.mxu3 %vm473_vm3, %v774_v58 }
 0x536   :  { %887 = vmatmul.f32.gmra.mxu1 %v773_v59 }
 0x53a   :  { %8065 = vmatmul.msk.f32.gmra.mxu3 %vm473_vm3, %v776_v61 }
 0x53e   :  { %890 = vmatmul.f32.gmra.mxu1 %v775_v62 }
 0x573   :  { %v864_v1 = vpop.f32.mrf.mxu1 }
 0x574   :  { %v865_v4 = vadd.f32 %v864_v1, %v779_v2 }
 0x575   :  { %v911_v3 = vpop.f32.mrf.mxu3 }
 0x576   :  { %v9515_v7 = vadd.f32 %v911_v3, %v865_v4 }
 0x578   :  { %v941_v12 = vmax.f32 %v9515_v7, 0.0  ;;  %v1055_v7 = vld [vmem:[%s14790_s3 + $0x20] sm:$0xff] }
 0x57b   :  { %v867_v6 = vpop.f32.mrf.mxu1 }
 0x57c   :  { %v868_v8 = vadd.f32 %v867_v6, %v783_v63 }
 0x57d   :  { %v914_v9 = vpop.f32.mrf.mxu3 }
 0x57e   :  { %v9517_v10 = vadd.f32 %v914_v9, %v868_v8 }
 0x580   :  { %v942_v13 = vmax.f32 %v9517_v10, 0.0 }
 0x582   :  { %v9525_v16 = vpack.i.bf16 %v941_v12, %v942_v13 }
 0x583   :  { %v870_v17 = vpop.f32.mrf.mxu1 }
 0x584   :  { %8583 = vrot.lane.b32.xlu0 %v9525_v16, %s9079_s27  ;;  %v871_v21 = vadd.f32 %v870_v17, %v787_v18 }
 0x585   :  { %v917_v19 = vpop.f32.mrf.mxu3 }
 0x586   :  { %v9529_v25 = vadd.f32 %v917_v19, %v871_v21 }
 0x588   :  { %v943_v35 = vmax.f32 %v9529_v25, 0.0 }
 0x58b   :  { %v873_v24 = vpop.f32.mrf.mxu1 }
 0x58c   :  { %v874_v29 = vadd.f32 %v873_v24, %v791_v22 }
 0x58d   :  { %v920_v30 = vpop.f32.mrf.mxu3 }
 0x58e   :  { %v9531_v31 = vadd.f32 %v920_v30, %v874_v29 }
 0x590   :  { %v944_v38 = vmax.f32 %v9531_v31, 0.0  ;;  %v1052_v31 = vld [vmem:[%s14790_s3 + $0x8] sm:$0xff] }
 0x592   :  { %v8587_v20 = vpack.i.bf16 %v943_v35, %v944_v38 }
 0x593   :  { %v876_v39 = vpop.f32.mrf.mxu1 }
 0x594   :  { %8588 = vrot.lane.b32.xlu0 %v8587_v20, %s9080_s28  ;;  %v877_v40 = vadd.f32 %v876_v39, %v795_v11 }
 0x595   :  { %v923_v14 = vpop.f32.mrf.mxu3 }
 0x596   :  { %v9540_v42 = vadd.f32 %v923_v14, %v877_v40 }
 0x598   :  { %v945_v34 = vmax.f32 %v9540_v42, 0.0  ;;  %v1051_v42 = vld [vmem:[%s14790_s3] sm:$0xff] }
 0x59b   :  { %v879_v41 = vpop.f32.mrf.mxu1 }
 0x59c   :  { %v880_v43 = vadd.f32 %v879_v41, %v799_v33 }
 0x59d   :  { %v926_v36 = vpop.f32.mrf.mxu3 }
 0x59e   :  { %v9542_v26 = vadd.f32 %v926_v36, %v880_v43 }
 0x5a0   :  { %v946_v44 = vmax.f32 %v9542_v26, 0.0 }
 0x5a2   :  { %v8592_v45 = vpack.i.bf16 %v945_v34, %v946_v44 }
 0x5a3   :  { %v882_v37 = vpop.f32.mrf.mxu1 }
 0x5a4   :  { %8593 = vrot.lane.b32.xlu1 %v8592_v45, %s9080_s28  ;;  %8613 = vrot.lane.b32.xlu0 %v8592_v45, %s9081_s29  ;;  %v883_v46 = vadd.f32 %v882_v37, %v803_v28 }
 0x5a5   :  { %v929_v27 = vpop.f32.mrf.mxu3 }
 0x5a6   :  { %v9552_v48 = vadd.f32 %v929_v27, %v883_v46 }
 0x5a8   :  { %v947_v52 = vmax.f32 %v9552_v48, 0.0 }
 0x5ab   :  { %v885_v47 = vpop.f32.mrf.mxu1 }
 0x5ac   :  { %v886_v49 = vadd.f32 %v885_v47, %v807_v32 }
 0x5ad   :  { %v932_v50 = vpop.f32.mrf.mxu3 }
 0x5ae   :  { %v9554_v51 = vadd.f32 %v932_v50, %v886_v49 }
 0x5b0   :  { %v948_v53 = vmax.f32 %v9554_v51, 0.0 }
 0x5b2   :  { %v8597_v54 = vpack.i.bf16 %v947_v52, %v948_v53 }
 0x5b3   :  { %v888_v55 = vpop.f32.mrf.mxu1 }
 0x5b4   :  { %8598 = vrot.lane.b32.xlu1 %v8597_v54, %s9081_s29  ;;  %v889_v57 = vadd.f32 %v888_v55, %v811_v5  ;;  %v1058_v55 = vld [vmem:[%s14790_s3 + $0x38] sm:$0xff] }
 0x5b5   :  { %v935_v56 = vpop.f32.mrf.mxu3 }
 0x5b6   :  { %v936_v59 = vadd.f32 %v935_v56, %v889_v57  ;;  %v1057_v56 = vld [vmem:[%s14790_s3 + $0x30] sm:$0xff]  ;;  %v1056_v57 = vld [vmem:[%s14790_s3 + $0x28] sm:$0xff] }
 0x5b8   :  { %v949_v1 = vmax.f32 %v936_v59, 0.0  ;;  %v1060_v59 = vld [vmem:[%s14790_s3 + $0x48] sm:$0xff] }
 0x5bb   :  { %v891_v58 = vpop.f32.mrf.mxu1 }
 0x5bc   :  { %v892_v61 = vadd.f32 %v891_v58, %v9513_v0  ;;  %8618 = vrot.lane.b32.xlu1 %v8587_v20, %s9081_s29  ;;  %v1061_v58 = vld [vmem:[%s14790_s3 + $0x50] sm:$0xff] }
 0x5bd   :  { %v938_v62 = vpop.f32.mrf.mxu3 }
 0x5be   :  { %v939_v63 = vadd.f32 %v938_v62, %v892_v61  ;;  %v1059_v61 = vld [vmem:[%s14790_s3 + $0x40] sm:$0xff]  ;;  %v1064_v62 = vld [vmem:[%s14790_s3 + $0x68] sm:$0xff] }
 0x5c0   :  { %v950_v2 = vmax.f32 %v939_v63, 0.0  ;;  %v1063_v63 = vld [vmem:[%s14790_s3 + $0x60] sm:$0xff] }
 0x5c2   :  { %v8602_v3 = vpack.i.bf16 %v949_v1, %v950_v2 }
 0x5c4   :  { %8603 = vrot.lane.b32.xlu2 %v8602_v3, %s9081_s29  ;;  %8643 = vrot.lane.b32.xlu1 %v8602_v3, %s9079_s27 }
 0x5c5   :  { %8633 = vrot.lane.b32.xlu0 %v8602_v3, %s9080_s28  ;;  %v1066_v3 = vld [vmem:[%s14790_s3 + $0x78] sm:$0xff] }
 0x5cc   :  { %8648 = vrot.lane.b32.xlu1 %v8592_v45, %s9079_s27  ;;  %8608 = vrot.lane.b32.xlu2 %v9525_v16, %s9080_s28 }
 0x5cd   :  { %8638 = vrot.lane.b32.xlu0 %v8597_v54, %s9079_s27 }
 0x5d4   :  { %8623 = vrot.lane.b32.xlu2 %v9525_v16, %s9081_s29 }
 0x5dc   :  { %8628 = vrot.lane.b32.xlu2 %v8597_v54, %s9080_s28  ;;  %v1053_v54 = vld [vmem:[%s14790_s3 + $0x10] sm:$0xff] }
 0x5e4   :  { %8653 = vrot.lane.b32.xlu2 %v8587_v20, %s9079_s27 }
 0x5f6   :  { %v8584_v0 = vpop.permute.xlu0 %8583 }
 0x5f7   :  { %v8585_v4 = vunpack.i.l.bf16 %v8584_v0  ;;  %v8586_v5 = vunpack.i.h.bf16 %v8584_v0  ;;  %v1065_v0 = vld [vmem:[%s14790_s3 + $0x70] sm:$0xff] }
 0x5f9   :  { %1569 = vmatpush.msra.mxu2 %v8585_v4  ;;  %v1070_v4 = vld [vmem:[%s14790_s3 + $0x98] sm:$0xff] }
 0x5fb   :  { %1570 = vmatpush.msra.mxu2 %v8586_v5  ;;  %v1069_v5 = vld [vmem:[%s14790_s3 + $0x90] sm:$0xff] }
 0x606   :  { %v8589_v9 = vpop.permute.xlu0 %8588 }
 0x607   :  { %v8590_v17 = vunpack.i.l.bf16 %v8589_v9  ;;  %v8591_v18 = vunpack.i.h.bf16 %v8589_v9  ;;  %v1072_v9 = vld [vmem:[%s14790_s3 + $0xa8] sm:$0xff] }
 0x616   :  { %v8594_v6 = vpop.permute.xlu1 %8593  ;;  %v8614_v20 = vpop.permute.xlu0 %8613 }
 0x617   :  { %v8595_v8 = vunpack.i.l.bf16 %v8594_v6  ;;  %v8596_v11 = vunpack.i.h.bf16 %v8594_v6  ;;  %v8615_v40 = vunpack.i.l.bf16 %v8614_v20  ;;  %v8616_v33 = vunpack.i.h.bf16 %v8614_v20  ;;  %v1068_v6 = vld [vmem:[%s14790_s3 + $0x88] sm:$0xff]  ;;  %v1085_v20 = vld [vmem:[%s14790_s3 + $0x110] sm:$0xff] }
 0x619   :  { %1402 = vmatpush.msra.mxu0 %v8595_v8  ;;  %v1073_v8 = vld [vmem:[%s14790_s3 + $0xb0] sm:$0xff] }
 0x61b   :  { %1403 = vmatpush.msra.mxu0 %v8596_v11  ;;  %v1071_v11 = vld [vmem:[%s14790_s3 + $0xa0] sm:$0xff] }
 0x61d   :  { %1404 = vmatpush.msra.mxu0 %v8590_v17  ;;  %v1076_v17 = vld [vmem:[%s14790_s3 + $0xc8] sm:$0xff] }
 0x61e   :  { %v8604_v19 = vpop.permute.xlu2 %8603 }
 0x61f   :  { %v8605_v16 = vunpack.i.l.bf16 %v8604_v19  ;;  %1405 = vmatpush.msra.mxu0 %v8591_v18  ;;  %v8606_v21 = vunpack.i.h.bf16 %v8604_v19  ;;  %v1075_v18 = vld [vmem:[%s14790_s3 + $0xc0] sm:$0xff]  ;;  %v1074_v19 = vld [vmem:[%s14790_s3 + $0xb8] sm:$0xff] }
 0x621   :  { %1571 = vmatpush.msra.mxu2 %v8605_v16  ;;  %v1079_v16 = vld [vmem:[%s14790_s3 + $0xe0] sm:$0xff] }
 0x623   :  { %1572 = vmatpush.msra.mxu2 %v8606_v21  ;;  %v1078_v21 = vld [vmem:[%s14790_s3 + $0xd8] sm:$0xff] }
 0x626   :  { %v8599_v22 = vpop.permute.xlu1 %8598  ;;  %v8609_v24 = vpop.permute.xlu2 %8608 }
 0x627   :  { %v8600_v29 = vunpack.i.l.bf16 %v8599_v22  ;;  %v8610_v30 = vunpack.i.l.bf16 %v8609_v24  ;;  %v8601_v39 = vunpack.i.h.bf16 %v8599_v22  ;;  %v8611_v14 = vunpack.i.h.bf16 %v8609_v24  ;;  %v1077_v22 = vld [vmem:[%s14790_s3 + $0xd0] sm:$0xff]  ;;  %v1082_v24 = vld [vmem:[%s14790_s3 + $0xf8] sm:$0xff] }
 0x629   :  { %1406 = vmatpush.msra.mxu0 %v8610_v30  ;;  %1573 = vmatpush.msra.mxu2 %v8600_v29  ;;  %v1081_v29 = vld [vmem:[%s14790_s3 + $0xf0] sm:$0xff]  ;;  %v1080_v30 = vld [vmem:[%s14790_s3 + $0xe8] sm:$0xff] }
 0x62b   :  { %1407 = vmatpush.msra.mxu0 %v8611_v14  ;;  %1574 = vmatpush.msra.mxu2 %v8601_v39  ;;  %v1084_v39 = vld [vmem:[%s14790_s3 + $0x108] sm:$0xff]  ;;  %v1083_v14 = vld [vmem:[%s14790_s3 + $0x100] sm:$0xff] }
 0x62d   :  { %1408 = vmatpush.msra.mxu0 %v950_v2  ;;  %1575 = vmatpush.msra.mxu2 %v8615_v40  ;;  %v1067_v2 = vld [vmem:[%s14790_s3 + $0x80] sm:$0xff]  ;;  %v1088_v40 = vld [vmem:[%s14790_s3 + $0x128] sm:$0xff] }
 0x62e   :  { %v8619_v41 = vpop.permute.xlu1 %8618  ;;  %v8624_v36 = vpop.permute.xlu2 %8623 }
 0x62f   :  { %v8620_v43 = vunpack.i.l.bf16 %v8619_v41  ;;  %1409 = vmatpush.msra.mxu0 %v949_v1  ;;  %1576 = vmatpush.msra.mxu2 %v8616_v33  ;;  %v8621_v45 = vunpack.i.h.bf16 %v8619_v41  ;;  %v8625_v37 = vunpack.i.l.bf16 %v8624_v36  ;;  %v8626_v27 = vunpack.i.h.bf16 %v8624_v36  ;;  %v1062_v1 = vld [vmem:[%s14790_s3 + $0x58] sm:$0xff]  ;;  %v1087_v33 = vld [vmem:[%s14790_s3 + $0x120] sm:$0xff] }
 0x630   :  { %v1086_v41 = vld [vmem:[%s14790_s3 + $0x118] sm:$0xff] }
 0x631   :  { %1410 = vmatpush.msra.mxu0 %v948_v53  ;;  %1577 = vmatpush.msra.mxu2 %v8620_v43  ;;  %v1091_v43 = vld [vmem:[%s14790_s3 + $0x140] sm:$0xff]  ;;  %v1090_v36 = vld [vmem:[%s14790_s3 + $0x138] sm:$0xff] }
 0x633   :  { %1411 = vmatpush.msra.mxu0 %v947_v52  ;;  %1578 = vmatpush.msra.mxu2 %v8621_v45  ;;  %v1089_v45 = vld [vmem:[%s14790_s3 + $0x130] sm:$0xff] }
 0x635   :  { %1412 = vmatpush.msra.mxu0 %v946_v44  ;;  %1579 = vmatpush.msra.mxu2 %v8625_v37  ;;  %v1094_v37 = vld [vmem:[%s14790_s3 + $0x158] sm:$0xff] }
 0x636   :  { %v8644_v28 = vpop.permute.xlu1 %8643  ;;  %v8629_v50 = vpop.permute.xlu2 %8628 }
 0x637   :  { %v8645_v46 = vunpack.i.l.bf16 %v8644_v28  ;;  %v8634_v32 = vpop.permute.xlu0 %8633  ;;  %1413 = vmatpush.msra.mxu0 %v945_v34  ;;  %1580 = vmatpush.msra.mxu2 %v8626_v27  ;;  %v8646_v49 = vunpack.i.h.bf16 %v8644_v28  ;;  %v8630_v26 = vunpack.i.l.bf16 %v8629_v50  ;;  %v8631_v34 = vunpack.i.h.bf16 %v8629_v50  ;;  %v1093_v27 = vld [vmem:[%s14790_s3 + $0x150] sm:$0xff]  ;;  %v1092_v28 = vld [vmem:[%s14790_s3 + $0x148] sm:$0xff] }
 0x638   :  { %v8635_v47 = vunpack.i.l.bf16 %v8634_v32  ;;  %v8636_v48 = vunpack.i.h.bf16 %v8634_v32  ;;  %v1096_v32 = vld [vmem:[%s14790_s3 + $0x168] sm:$0xff] }
 0x639   :  { %1414 = vmatpush.msra.mxu0 %v944_v38  ;;  %1744 = vmatpush.msra.mxu1 %v8645_v46  ;;  %v1100_v50 = vld [vmem:[%s14790_s3 + $0x188] sm:$0xff] }
 0x63a   :  { %1581 = vmatpush.msra.mxu2 %v8635_v47  ;;  %v1095_v47 = vld [vmem:[%s14790_s3 + $0x160] sm:$0xff] }
 0x63b   :  { %1415 = vmatpush.msra.mxu0 %v943_v35  ;;  %1745 = vmatpush.msra.mxu1 %v8646_v49 }
 0x63c   :  { %1582 = vmatpush.msra.mxu2 %v8636_v48  ;;  %v1099_v48 = vld [vmem:[%s14790_s3 + $0x180] sm:$0xff] }
 0x63d   :  { %1416 = vmatpush.msra.mxu0 %v942_v13 }
 0x63e   :  { %1583 = vmatpush.msra.mxu2 %v8630_v26  ;;  %v8649_v35 = vpop.permute.xlu1 %8648  ;;  %v8654_v44 = vpop.permute.xlu2 %8653  ;;  %v1098_v26 = vld [vmem:[%s14790_s3 + $0x178] sm:$0xff] }
 0x63f   :  { %v8639_v38 = vpop.permute.xlu0 %8638  ;;  %1417 = vmatpush.msra.mxu0 %v941_v12  ;;  %v8650_v13 = vunpack.i.l.bf16 %v8649_v35  ;;  %v8651_v51 = vunpack.i.h.bf16 %v8649_v35  ;;  %v1054_v12 = vld [vmem:[%s14790_s3 + $0x18] sm:$0xff]  ;;  %v8655_v52 = vunpack.i.l.bf16 %v8654_v44  ;;  %v8656_v53 = vunpack.i.h.bf16 %v8654_v44  ;;  %v1101_v35 = vld [vmem:[%s14790_s3 + $0x190] sm:$0xff] }
 0x640   :  { %v8640_v25 = vunpack.i.l.bf16 %v8639_v38  ;;  %1584 = vmatpush.msra.mxu2 %v8631_v34  ;;  %1418 = vmatmul.f32.vlgmr.msra.gmra.mxu0 %v1051_v42  ;;  %v8641_v10 = vunpack.i.h.bf16 %v8639_v38  ;;  %v1103_v34 = vld [vmem:[%s14790_s3 + $0x1a0] sm:$0xff]  ;;  %v1102_v38 = vld [vmem:[%s14790_s3 + $0x198] sm:$0xff] }
 0x641   :  { %1585 = vmatmul.f32.vlgmr.msra.gmra.mxu2 %v1052_v31 }
 0x642   :  { %8410 = vmatpush.msrb.mxu2 %v8645_v46  ;;  %1746 = vmatpush.msra.mxu1 %v8640_v25  ;;  %v1097_v46 = vld [vmem:[%s14790_s3 + $0x170] sm:$0xff] }
 0x644   :  { %8411 = vmatpush.msrb.mxu2 %v8646_v49  ;;  %1747 = vmatpush.msra.mxu1 %v8641_v10 }
 0x646   :  { %8412 = vmatpush.msrb.mxu2 %v8640_v25  ;;  %1748 = vmatpush.msra.mxu1 %v8650_v13 }
 0x648   :  { %8413 = vmatpush.msrb.mxu2 %v8641_v10  ;;  %1749 = vmatpush.msra.mxu1 %v8651_v51 }
 0x649   :  { %1588 = vmatmul.f32.gmra.mxu2 %v1055_v7  ;;  %1421 = vmatmul.f32.gmra.mxu0 %v1054_v12  ;;  %v1104_v12 = vld [vmem:[%s14790_s3 + $0x1a8] sm:$0xff] }
 0x64a   :  { %8414 = vmatpush.msrb.mxu2 %v8650_v13  ;;  %1750 = vmatpush.msra.mxu1 %v8655_v52  ;;  %v1106_v13 = vld [vmem:[%s14790_s3 + $0x1b8] sm:$0xff] }
 0x64c   :  { %8415 = vmatpush.msrb.mxu2 %v8651_v51  ;;  %1751 = vmatpush.msra.mxu1 %v8656_v53  ;;  %v1105_v51 = vld [vmem:[%s14790_s3 + $0x1b0] sm:$0xff] }
 0x64d   :  { %8066 = vmatmul.msk.f32.vlgmr.msra.gmra.mxu1 %vm1251_vm5, %v1053_v54 }
 0x64e   :  { %8416 = vmatpush.msrb.mxu2 %v8655_v52 }
 0x650   :  { %8417 = vmatpush.msrb.mxu2 %v8656_v53  ;;  %v1109_v53 = vld [vmem:[%s14790_s3 + $0x1d0] sm:$0xff] }
 0x651   :  { %1591 = vmatmul.f32.gmra.mxu2 %v1058_v55  ;;  %1424 = vmatmul.f32.gmra.mxu0 %v1057_v56  ;;  %v1108_v55 = vld [vmem:[%s14790_s3 + $0x1c8] sm:$0xff] }
 0x655   :  { %8067 = vmatmul.msk.f32.gmra.mxu1 %vm1251_vm5, %v1056_v57  ;;  %v1107_v57 = vld [vmem:[%s14790_s3 + $0x1c0] sm:$0xff] }
 0x659   :  { %1594 = vmatmul.f32.gmra.mxu2 %v1061_v58  ;;  %1427 = vmatmul.f32.gmra.mxu0 %v1060_v59  ;;  %v1112_v59 = vld [vmem:[%s14790_s3 + $0x1e8] sm:$0xff] }
 0x65d   :  { %8068 = vmatmul.msk.f32.gmra.mxu1 %vm1251_vm5, %v1059_v61 }
 0x661   :  { %1597 = vmatmul.f32.gmra.mxu2 %v1064_v62  ;;  %1430 = vmatmul.f32.gmra.mxu0 %v1063_v63  ;;  %v1111_v62 = vld [vmem:[%s14790_s3 + $0x1e0] sm:$0xff] }
 0x665   :  { %8069 = vmatmul.msk.f32.gmra.mxu1 %vm1251_vm5, %v1062_v1  ;;  %v1110_v1 = vld [vmem:[%s14790_s3 + $0x1d8] sm:$0xff] }
 0x669   :  { %1600 = vmatmul.f32.gmra.mxu2 %v1067_v2  ;;  %1433 = vmatmul.f32.gmra.mxu0 %v1066_v3  ;;  %v1115_v3 = vld [vmem:[%s14790_s3 + $0x200] sm:$0xff] }
 0x66d   :  { %8070 = vmatmul.msk.f32.gmra.mxu1 %vm1251_vm5, %v1065_v0 }
 0x671   :  { %1603 = vmatmul.f32.gmra.mxu2 %v1070_v4  ;;  %1436 = vmatmul.f32.gmra.mxu0 %v1069_v5  ;;  %v1114_v4 = vld [vmem:[%s14790_s3 + $0x1f8] sm:$0xff] }
 0x675   :  { %8071 = vmatmul.msk.f32.gmra.mxu1 %vm1251_vm5, %v1068_v6  ;;  %v1113_v6 = vld [vmem:[%s14790_s3 + $0x1f0] sm:$0xff] }
 0x679   :  { %1606 = vmatmul.f32.gmra.mxu2 %v1073_v8  ;;  %1439 = vmatmul.f32.gmra.mxu0 %v1072_v9  ;;  %v1118_v9 = vld [vmem:[%s14790_s3 + $0x218] sm:$0xff] }
 0x67d   :  { %8072 = vmatmul.msk.f32.gmra.mxu1 %vm1251_vm5, %v1071_v11 }
 0x681   :  { %1609 = vmatmul.f32.gmra.mxu2 %v1076_v17  ;;  %1442 = vmatmul.f32.gmra.mxu0 %v1075_v18  ;;  %v1117_v17 = vld [vmem:[%s14790_s3 + $0x210] sm:$0xff] }
 0x685   :  { %8073 = vmatmul.msk.f32.gmra.mxu1 %vm1251_vm5, %v1074_v19  ;;  %v1116_v19 = vld [vmem:[%s14790_s3 + $0x208] sm:$0xff] }
 0x689   :  { %1612 = vmatmul.f32.gmra.mxu2 %v1079_v16  ;;  %1445 = vmatmul.f32.gmra.mxu0 %v1078_v21  ;;  %v9861_v21 = vld [vmem:[%s14793_s6 + $0x50] sm:$0xff] }
 0x68a   :  { %2213 = vrot.lane.b32.xlu0 %v9861_v21, %s9080_s28 }
 0x68d   :  { %8074 = vmatmul.msk.f32.gmra.mxu1 %vm1251_vm5, %v1077_v22  ;;  %v1121_v22 = vld [vmem:[%s14790_s3 + $0x230] sm:$0xff] }
 0x691   :  { %1615 = vmatmul.f32.gmra.mxu2 %v1082_v24  ;;  %1448 = vmatmul.f32.gmra.mxu0 %v1081_v29  ;;  %v1120_v29 = vld [vmem:[%s14790_s3 + $0x228] sm:$0xff] }
 0x695   :  { %8075 = vmatmul.msk.f32.gmra.mxu1 %vm1251_vm5, %v1080_v30 }
 0x699   :  { %1618 = vmatmul.f32.gmra.mxu2 %v1085_v20  ;;  %1451 = vmatmul.f32.gmra.mxu0 %v1084_v39  ;;  %v1119_v20 = vld [vmem:[%s14790_s3 + $0x220] sm:$0xff] }
 0x69d   :  { %8076 = vmatmul.msk.f32.gmra.mxu1 %vm1251_vm5, %v1083_v14  ;;  %v9884_v14 = vld [vmem:[%s14793_s6 + $0x58] sm:$0xff] }
 0x69e   :  { %2215 = vrot.lane.b32.xlu0 %v9884_v14, %s9080_s28 }
 0x6a1   :  { %1621 = vmatmul.f32.gmra.mxu2 %v1088_v40  ;;  %1454 = vmatmul.f32.gmra.mxu0 %v1087_v33  ;;  %v1124_v40 = vld [vmem:[%s14790_s3 + $0x248] sm:$0xff]  ;;  %v1209_v33 = vld [vmem:[%s14793_s6 + $0x40] sm:$0xff] }
 0x6a5   :  { %8077 = vmatmul.msk.f32.gmra.mxu1 %vm1251_vm5, %v1086_v41 }
 0x6a9   :  { %1624 = vmatmul.f32.gmra.mxu2 %v1091_v43  ;;  %1457 = vmatmul.f32.gmra.mxu0 %v1090_v36  ;;  %v1123_v43 = vld [vmem:[%s14790_s3 + $0x240] sm:$0xff] }
 0x6ad   :  { %8078 = vmatmul.msk.f32.gmra.mxu1 %vm1251_vm5, %v1089_v45 }
 0x6b1   :  { %1627 = vmatmul.f32.gmra.mxu2 %v1094_v37  ;;  %1460 = vmatmul.f32.gmra.mxu0 %v1093_v27  ;;  %v1122_v37 = vld [vmem:[%s14790_s3 + $0x238] sm:$0xff] }
 0x6b5   :  { %8079 = vmatmul.msk.f32.gmra.mxu1 %vm1251_vm5, %v1092_v28 }
 0x6b9   :  { %1630 = vmatmul.f32.gmra.mxu2 %v1097_v46  ;;  %1463 = vmatmul.f32.gmra.mxu0 %v1096_v32  ;;  %v9906_v46 = vld [vmem:[%s14793_s6 + $0x60] sm:$0xff] }
 0x6ba   :  { %v1127_v32 = vld [vmem:[%s14790_s3 + $0x260] sm:$0xff]  ;;  %2217 = vrot.lane.b32.xlu0 %v9906_v46, %s9080_s28 }
 0x6bd   :  { %8080 = vmatmul.msk.f32.gmra.mxu1 %vm1251_vm5, %v1095_v47  ;;  %v9748_v49 = vpop.f32.mrf.mxu0 }
 0x6c1   :  { %1633 = vmatmul.f32.gmra.mxu2 %v1100_v50  ;;  %1466 = vmatmul.f32.gmra.mxu0 %v1099_v48  ;;  %v1126_v50 = vld [vmem:[%s14790_s3 + $0x258] sm:$0xff] }
 0x6c4   :  { %v9759_v42 = vpop.f32.mrf.mxu2 }
 0x6c5   :  { %8081 = vmatmul.msk.f32.gmra.mxu1 %vm1251_vm5, %v1098_v26  ;;  %v1125_v26 = vld [vmem:[%s14790_s3 + $0x250] sm:$0xff] }
 0x6c6   :  { %v9765_v31 = vpop.f32.mrf.mxu0 }
 0x6c9   :  { %1636 = vmatmul.f32.gmra.mxu2 %v1103_v34  ;;  %1469 = vmatmul.f32.gmra.mxu0 %v1102_v38 }
 0x6ca   :  { %v9770_v25 = vpop.f32.mrf.mxu1 }
 0x6cc   :  { %v9775_v10 = vpop.f32.mrf.mxu2 }
 0x6cd   :  { %8082 = vmatmul.msk.f32.gmra.mxu1 %vm1251_vm5, %v1101_v35  ;;  %v9929_v35 = vld [vmem:[%s14793_s6 + $0x68] sm:$0xff] }
 0x6ce   :  { %v9781_v44 = vpop.f32.mrf.mxu0  ;;  %2219 = vrot.lane.b32.xlu0 %v9929_v35, %s9080_s28 }
 0x6d1   :  { %1639 = vmatmul.f32.gmra.mxu2 %v1106_v13  ;;  %1472 = vmatmul.f32.gmra.mxu0 %v1105_v51  ;;  %v1130_v13 = vld [vmem:[%s14790_s3 + $0x278] sm:$0xff] }
 0x6d2   :  { %v9786_v7 = vpop.f32.mrf.mxu1 }
 0x6d4   :  { %v9791_v52 = vpop.f32.mrf.mxu2 }
 0x6d5   :  { %8083 = vmatmul.msk.f32.gmra.mxu1 %vm1251_vm5, %v1104_v12  ;;  %v1129_v12 = vld [vmem:[%s14790_s3 + $0x270] sm:$0xff] }
 0x6d6   :  { %v9797_v54 = vpop.f32.mrf.mxu0 }
 0x6d9   :  { %1642 = vmatmul.f32.gmra.mxu2 %v1109_v53  ;;  %1475 = vmatmul.f32.gmra.mxu0 %v1108_v55  ;;  %v1128_v55 = vld [vmem:[%s14790_s3 + $0x268] sm:$0xff] }
 0x6da   :  { %v9802_v56 = vpop.f32.mrf.mxu1 }
 0x6dc   :  { %v9807_v58 = vpop.f32.mrf.mxu2 }
 0x6dd   :  { %8084 = vmatmul.msk.f32.gmra.mxu1 %vm1251_vm5, %v1107_v57 }
 0x6de   :  { %v9813_v61 = vpop.f32.mrf.mxu0 }
 0x6e1   :  { %1645 = vmatmul.f32.gmra.mxu2 %v1112_v59  ;;  %1478 = vmatmul.f32.gmra.mxu0 %v1111_v62  ;;  %v1215_v59 = vld [vmem:[%s14793_s6 + $0x70] sm:$0xff] }
 0x6e2   :  { %v9818_v63 = vpop.f32.mrf.mxu1  ;;  %v1133_v62 = vld [vmem:[%s14790_s3 + $0x290] sm:$0xff]  ;;  %2221 = vrot.lane.b32.xlu0 %v1215_v59, %s9080_s28 }
 0x6e4   :  { %v9823_v2 = vpop.f32.mrf.mxu2 }
 0x6e5   :  { %8085 = vmatmul.msk.f32.gmra.mxu1 %vm1251_vm5, %v1110_v1 }
 0x6e6   :  { %v9829_v0 = vpop.f32.mrf.mxu0 }
 0x6e9   :  { %1648 = vmatmul.f32.gmra.mxu2 %v1115_v3  ;;  %1481 = vmatmul.f32.gmra.mxu0 %v1114_v4  ;;  %v1132_v3 = vld [vmem:[%s14790_s3 + $0x288] sm:$0xff] }
 0x6ea   :  { %v9834_v5 = vpop.f32.mrf.mxu1 }
 0x6ec   :  { %v9839_v8 = vpop.f32.mrf.mxu2 }
 0x6ed   :  { %8086 = vmatmul.msk.f32.gmra.mxu1 %vm1251_vm5, %v1113_v6  ;;  %v1131_v6 = vld [vmem:[%s14790_s3 + $0x280] sm:$0xff] }
 0x6ee   :  { %v9845_v11 = vpop.f32.mrf.mxu0 }
 0x6f1   :  { %1651 = vmatmul.f32.gmra.mxu2 %v1118_v9  ;;  %1484 = vmatmul.f32.gmra.mxu0 %v1117_v17  ;;  %v9971_v17 = vld [vmem:[%s14793_s6] sm:$0xff] }
 0x6f2   :  { %v9850_v18 = vpop.f32.mrf.mxu1  ;;  %2193 = vrot.lane.b32.xlu0 %v9971_v17, %s9080_s28 }
 0x6f4   :  { %v9855_v16 = vpop.f32.mrf.mxu2 }
 0x6f5   :  { %8087 = vmatmul.msk.f32.gmra.mxu1 %vm1251_vm5, %v1116_v19  ;;  %v1136_v19 = vld [vmem:[%s14790_s3 + $0x2a8] sm:$0xff] }
 0x6f6   :  { %v9866_v24 = vpop.f32.mrf.mxu0 }
 0x6f9   :  { %1654 = vmatmul.f32.gmra.mxu2 %v1121_v22  ;;  %1487 = vmatmul.f32.gmra.mxu0 %v1120_v29  ;;  %v1135_v29 = vld [vmem:[%s14790_s3 + $0x2a0] sm:$0xff] }
 0x6fa   :  { %v9873_v30 = vpop.f32.mrf.mxu1 }
 0x6fc   :  { %v9878_v39 = vpop.f32.mrf.mxu2 }
 0x6fd   :  { %8088 = vmatmul.msk.f32.gmra.mxu1 %vm1251_vm5, %v1119_v20 }
 0x6fe   :  { %v1443_v41 = vpop.f32.mrf.mxu0 }
 0x6ff   :  { %v1444_v36 = vadd.f32 %v1443_v41, %v1209_v33  ;;  %v1139_v41 = vld [vmem:[%s14790_s3 + $0x2c0] sm:$0xff] }
 0x701   :  { %1657 = vmatmul.f32.gmra.mxu2 %v1124_v40  ;;  %1490 = vmatmul.f32.gmra.mxu0 %v1123_v43  ;;  %v1134_v40 = vld [vmem:[%s14790_s3 + $0x298] sm:$0xff] }
 0x702   :  { %v9897_v45 = vpop.f32.mrf.mxu1 }
 0x704   :  { %v1610_v27 = vpop.f32.mrf.mxu2 }
 0x705   :  { %v1611_v28 = vadd.f32 %v1610_v27, %v1444_v36  ;;  %8089 = vmatmul.msk.f32.gmra.mxu1 %vm1251_vm5, %v1122_v37  ;;  %v1138_v36 = vld [vmem:[%s14790_s3 + $0x2b8] sm:$0xff]  ;;  %v1137_v27 = vld [vmem:[%s14790_s3 + $0x2b0] sm:$0xff] }
 0x706   :  { %v9911_v47 = vpop.f32.mrf.mxu0 }
 0x709   :  { %1660 = vmatmul.f32.gmra.mxu2 %v1127_v32  ;;  %1493 = vmatmul.f32.gmra.mxu0 %v1126_v50  ;;  %v10003_v32 = vld [vmem:[%s14793_s6 + $0xa0] sm:$0xff]  ;;  %v1142_v50 = vld [vmem:[%s14790_s3 + $0x2d8] sm:$0xff] }
 0x70a   :  { %v1777_v48 = vpop.f32.mrf.mxu1  ;;  %2233 = vrot.lane.b32.xlu1 %v10003_v32, %s9080_s28 }
 0x70b   :  { %v9921_v34 = vadd.f32 %v1777_v48, %v1611_v28 }
 0x70c   :  { %v9923_v38 = vpop.f32.mrf.mxu2 }
 0x70d   :  { %8090 = vmatmul.msk.f32.gmra.mxu1 %vm1251_vm5, %v1125_v26  ;;  %v1141_v26 = vld [vmem:[%s14790_s3 + $0x2d0] sm:$0xff] }
 0x70e   :  { %v9934_v51 = vpop.f32.mrf.mxu0 }
 0x711   :  { %1663 = vmatmul.f32.gmra.mxu2 %v1130_v13  ;;  %1496 = vmatmul.f32.gmra.mxu0 %v1129_v12  ;;  %v1140_v12 = vld [vmem:[%s14790_s3 + $0x2c8] sm:$0xff] }
 0x712   :  { %v9941_v53 = vpop.f32.mrf.mxu1 }
 0x714   :  { %v9946_v57 = vpop.f32.mrf.mxu2 }
 0x715   :  { %8091 = vmatmul.msk.f32.gmra.mxu1 %vm1251_vm5, %v1128_v55 }
 0x716   :  { %v9955_v1 = vpop.f32.mrf.mxu0 }
 0x717   :  { %v1453_v23 = vadd.f32 %v9955_v1, %v9884_v14 }
 0x719   :  { %1666 = vmatmul.f32.gmra.mxu2 %v1133_v62  ;;  %1499 = vmatmul.f32.gmra.mxu0 %v1132_v3  ;;  %v10020_v62 = vld [vmem:[%s14793_s6 + $0xa8] sm:$0xff]  ;;  %v1145_v3 = vld [vmem:[%s14790_s3 + $0x2f0] sm:$0xff] }
 0x71a   :  { %v9961_v4 = vpop.f32.mrf.mxu1  ;;  %14805 = vst [vmem:[#allocation5_spill] sm:$0xff] %v10020_v62  ;;  %2235 = vrot.lane.b32.xlu1 %v10020_v62, %s9080_s28 }
 0x71c   :  { %v9966_v9 = vpop.f32.mrf.mxu2 }
 0x71d   :  { %8092 = vmatmul.msk.f32.gmra.mxu1 %vm1251_vm5, %v1131_v6  ;;  %v1620_v14 = vadd.f32 %v9966_v9, %v1453_v23  ;;  %v10087_v23 = vld [vmem:[%s14793_s6 + $0xb8] sm:$0xff] }
 0x71e   :  { %v1455_v22 = vpop.f32.mrf.mxu0  ;;  %v1150_v9 = vld [vmem:[%s14790_s3 + $0x318] sm:$0xff] }
 0x721   :  { %1669 = vmatmul.f32.gmra.mxu2 %v1136_v19  ;;  %1502 = vmatmul.f32.gmra.mxu0 %v1135_v29  ;;  %v1144_v19 = vld [vmem:[%s14790_s3 + $0x2e8] sm:$0xff]  ;;  %v10033_v29 = vld [vmem:[%s14793_s6 + $0x78] sm:$0xff] }
 0x722   :  { %v9982_v20 = vpop.f32.mrf.mxu1 }
 0x724   :  { %v1622_v33 = vpop.f32.mrf.mxu2 }
 0x725   :  { %8093 = vmatmul.msk.f32.gmra.mxu1 %vm1251_vm5, %v1134_v40 }
 0x726   :  { %v1458_v43 = vpop.f32.mrf.mxu0 }
 0x729   :  { %1672 = vmatmul.f32.gmra.mxu2 %v1139_v41  ;;  %1505 = vmatmul.f32.gmra.mxu0 %v1138_v36  ;;  %v1143_v41 = vld [vmem:[%s14790_s3 + $0x2e0] sm:$0xff] }
 0x72a   :  { %v9994_v37 = vpop.f32.mrf.mxu1 }
 0x72c   :  { %v1625_v28 = vpop.f32.mrf.mxu2 }
 0x72d   :  { %8094 = vmatmul.msk.f32.gmra.mxu1 %vm1251_vm5, %v1137_v27 }
 0x72e   :  { %v1461_v48 = vpop.f32.mrf.mxu0 }
 0x72f   :  { %v1462_v36 = vadd.f32 %v1461_v48, %v1215_v59  ;;  %v10052_v59 = vld [vmem:[%s14793_s6 + $0x80] sm:$0xff] }
 0x731   :  { %1675 = vmatmul.f32.gmra.mxu2 %v1142_v50  ;;  %1508 = vmatmul.f32.gmra.mxu0 %v1141_v26  ;;  %v1459_v26 = vadd.f32 %v1458_v43, %v9929_v35  ;;  %v1147_v35 = vld [vmem:[%s14790_s3 + $0x300] sm:$0xff]  ;;  %v1456_v43 = vadd.f32 %v1455_v22, %v9906_v46  ;;  %v1450_v46 = vadd.f32 %v9934_v51, %v9861_v21 }
 0x732   :  { %v1792_v13 = vpop.f32.mrf.mxu1  ;;  %v1151_v21 = vld [vmem:[%s14790_s3 + $0x320] sm:$0xff] }
 0x733   :  { %v1626_v60 = vadd.f32 %v1625_v28, %v1459_v26  ;;  %v1623_v22 = vadd.f32 %v1622_v33, %v1456_v43  ;;  %v1207_v33 = vld [vmem:[%s14793_s6 + $0x30] sm:$0xff] }
 0x734   :  { %v1628_v55 = vpop.f32.mrf.mxu2 }
 0x735   :  { %8095 = vmatmul.msk.f32.gmra.mxu1 %vm1251_vm5, %v1140_v12  ;;  %v10044_v12 = vld [vmem:[%s14793_s6 + $0xb0] sm:$0xff]  ;;  %v1793_v1 = vadd.f32 %v1792_v13, %v1626_v60  ;;  %v1790_v60 = vadd.f32 %v9994_v37, %v1623_v22 }
 0x736   :  { %v1464_v6 = vpop.f32.mrf.mxu0  ;;  %14806 = vst [vmem:[#allocation6_spill] sm:$0xff] %v10044_v12  ;;  %2237 = vrot.lane.b32.xlu1 %v10044_v12, %s9080_s28  ;;  %v1146_v12 = vld [vmem:[%s14790_s3 + $0x2f8] sm:$0xff] }
 0x737   :  { %v1465_v27 = vadd.f32 %v1464_v6, %v10033_v29  ;;  %v1629_v6 = vadd.f32 %v1628_v55, %v1462_v36  ;;  %v1916_v37 = vmax.f32 %v1793_v1, 0.0 }
 0x739   :  { %1678 = vmatmul.f32.gmra.mxu2 %v1145_v3  ;;  %1511 = vmatmul.f32.gmra.mxu0 %v1144_v19  ;;  %v1148_v3 = vld [vmem:[%s14790_s3 + $0x308] sm:$0xff] }
 0x73a   :  { %v1795_v40 = vpop.f32.mrf.mxu1 }
 0x73b   :  { %v1796_v55 = vadd.f32 %v1795_v40, %v1629_v6  ;;  %v1206_v40 = vld [vmem:[%s14793_s6 + $0x28] sm:$0xff]  ;;  %v10122_v6 = vld [vmem:[%s14793_s6 + $0x18] sm:$0xff] }
 0x73c   :  { %v1631_v50 = vpop.f32.mrf.mxu2 }
 0x73d   :  { %8096 = vmatmul.msk.f32.gmra.mxu1 %vm1251_vm5, %v1143_v41  ;;  %v1632_v19 = vadd.f32 %v1631_v50, %v1465_v27  ;;  %v1210_v41 = vld [vmem:[%s14793_s6 + $0x48] sm:$0xff] }
 0x73e   :  { %v1467_v48 = vpop.f32.mrf.mxu0  ;;  %v1447_v27 = vadd.f32 %v9911_v47, %v1210_v41  ;;  %v1917_v47 = vmax.f32 %v1796_v55, 0.0  ;;  %2239 = vrot.lane.b32.xlu1 %v10087_v23, %s9080_s28  ;;  %v10136_v55 = vld [vmem:[%s14793_s6 + $0xc0] sm:$0xff] }
 0x73f   :  { %v1468_v15 = vadd.f32 %v1467_v48, %v10052_v59  ;;  %v1149_v48 = vld [vmem:[%s14790_s3 + $0x310] sm:$0xff] }
 0x741   :  { %1681 = vmatmul.f32.gmra.mxu2 %v1148_v3  ;;  %1514 = vmatmul.f32.gmra.mxu0 %v1147_v35  ;;  %v1208_v3 = vld [vmem:[%s14793_s6 + $0x38] sm:$0xff]  ;;  %v1915_v35 = vmax.f32 %v1790_v60, 0.0 }
 0x742   :  { %v1798_v62 = vpop.f32.mrf.mxu1  ;;  %v1441_v13 = vadd.f32 %v9866_v24, %v1208_v3  ;;  %v1438_v24 = vadd.f32 %v9845_v11, %v1207_v33 }
 0x743   :  { %v1799_v36 = vadd.f32 %v1798_v62, %v1632_v19  ;;  %v1614_v62 = vadd.f32 %v9923_v38, %v1447_v27  ;;  %v1435_v19 = vadd.f32 %v9829_v0, %v1206_v40  ;;  %v10141_v0 = vld [vmem:[%s14793_s6 + $0xf0] sm:$0xff] }
 0x744   :  { %v1634_v50 = vpop.f32.mrf.mxu2  ;;  %v1608_v11 = vadd.f32 %v9878_v39, %v1441_v13  ;;  %v1153_v27 = vld [vmem:[%s14790_s3 + $0x330] sm:$0xff]  ;;  %2253 = vrot.lane.b32.xlu2 %v10141_v0, %s9080_s28 }
 0x745   :  { %v1918_v28 = vmax.f32 %v1799_v36, 0.0  ;;  %v10073_v26 = vadd.f32 %v1634_v50, %v1468_v15  ;;  %8097 = vmatmul.msk.f32.gmra.mxu1 %vm1251_vm5, %v1146_v12  ;;  %v1617_v15 = vadd.f32 %v9946_v57, %v1450_v46  ;;  %v1787_v57 = vadd.f32 %v9982_v20, %v1620_v14  ;;  %v10115_v20 = vld [vmem:[%s14793_s6 + $0x20] sm:$0xff]  ;;  %v1154_v46 = vld [vmem:[%s14790_s3 + $0x338] sm:$0xff]  ;;  %v10154_v50 = vld [vmem:[%s14793_s6 + $0x10] sm:$0xff] }
 0x746   :  { %v10082_v51 = vpop.f32.mrf.mxu0  ;;  %v1432_v39 = vadd.f32 %v9813_v61, %v10115_v20  ;;  %2241 = vrot.lane.b32.xlu1 %v10136_v55, %s9080_s28  ;;  %v1429_v61 = vadd.f32 %v9797_v54, %v10122_v6  ;;  %v1775_v14 = vadd.f32 %v9897_v45, %v1608_v11  ;;  %v1426_v54 = vadd.f32 %v9781_v44, %v10154_v50  ;;  %v1157_v44 = vld [vmem:[%s14790_s3 + $0x350] sm:$0xff] }
 0x747   :  { %2433 = vmatpush.msra.mxu3 %v1918_v28  ;;  %v1784_v38 = vadd.f32 %v9961_v4, %v1617_v15  ;;  %v1781_v4 = vadd.f32 %v9941_v53, %v1614_v62  ;;  %v1914_v41 = vmax.f32 %v1787_v57, 0.0  ;;  %v1605_v53 = vadd.f32 %v9855_v16, %v1438_v24  ;;  %v1202_v28 = vld [vmem:[%s14793_s6 + $0x8] sm:$0xff] }
 0x748   :  { %v1602_v16 = vadd.f32 %v9839_v8, %v1435_v19  ;;  %v1599_v8 = vadd.f32 %v9823_v2, %v1432_v39  ;;  %v1911_v15 = vmax.f32 %v9921_v34, 0.0  ;;  %v1910_v13 = vmax.f32 %v1775_v14, 0.0  ;;  %v1156_v62 = vld [vmem:[%s14790_s3 + $0x348] sm:$0xff]  ;;  %v14807_v14 = vld [vmem:[#allocation5_spill] sm:$0xff] }
 0x749   :  { %1684 = vmatmul.f32.gmra.mxu2 %v1151_v21  ;;  %2434 = vmatpush.msra.mxu3 %v1917_v47  ;;  %v1913_v36 = vmax.f32 %v1784_v38, 0.0  ;;  %v1912_v1 = vmax.f32 %v1781_v4, 0.0  ;;  %v1152_v21 = vld [vmem:[%s14790_s3 + $0x328] sm:$0xff]  ;;  %v1772_v45 = vadd.f32 %v9873_v30, %v1605_v53  ;;  %v1423_v47 = vadd.f32 %v9765_v31, %v1202_v28  ;;  %v10189_v30 = vld [vmem:[%s14793_s6 + $0xf8] sm:$0xff] }
 0x74a   :  { %v10105_v12 = vpop.f32.mrf.mxu1  ;;  %1517 = vmatmul.f32.gmra.mxu0 %v1150_v9  ;;  %v1596_v9 = vadd.f32 %v9807_v58, %v1429_v61  ;;  %v1769_v33 = vadd.f32 %v9850_v18, %v1602_v16  ;;  %v1420_v31 = vadd.f32 %v9748_v49, %v9971_v17  ;;  %v1593_v58 = vadd.f32 %v9791_v52, %v1426_v54  ;;  %v1160_v24 = vld [vmem:[%s14790_s3 + $0x368] sm:$0xff]  ;;  %v10253_v61 = vld [vmem:[%s14793_s6 + $0x118] sm:$0xff]  ;;  %v1957_v54 = vld [vmem:[%s14791_s4 + $0x20] sm:$0xff] }
 0x74b   :  { %2435 = vmatpush.msra.mxu3 %v1916_v37  ;;  %v1766_v18 = vadd.f32 %v9834_v5, %v1599_v8  ;;  %v1909_v34 = vmax.f32 %v1772_v45, 0.0  ;;  %v1590_v57 = vadd.f32 %v9775_v10, %v1423_v47  ;;  %v1155_v5 = vld [vmem:[%s14790_s3 + $0x340] sm:$0xff]  ;;  %v1162_v16 = vld [vmem:[%s14790_s3 + $0x378] sm:$0xff]  ;;  %2263 = vrot.lane.b32.xlu0 %v10253_v61, %s9080_s28  ;;  %v10282_v47 = vld [vmem:[%s14793_s6 + $0x110] sm:$0xff] }
 0x74c   :  { %v10117_v43 = vpop.f32.mrf.mxu2  ;;  %2255 = vrot.lane.b32.xlu2 %v10189_v30, %s9080_s28  ;;  %v1763_v49 = vadd.f32 %v9818_v63, %v1596_v9  ;;  %v1908_v17 = vmax.f32 %v1769_v33, 0.0  ;;  %v1587_v37 = vadd.f32 %v9759_v42, %v1420_v31  ;;  %v10221_v42 = vld [vmem:[%s14793_s6 + $0x100] sm:$0xff]  ;;  %v1165_v9 = vld [vmem:[%s14790_s3 + $0x390] sm:$0xff]  ;;  %v14808_v33 = vld [vmem:[#allocation6_spill] sm:$0xff] }
 0x74d   :  { %8098 = vmatmul.msk.f32.gmra.mxu1 %vm1251_vm5, %v1149_v48  ;;  %2436 = vmatpush.msra.mxu3 %v1915_v35  ;;  %v1907_v40 = vmax.f32 %v1766_v18, 0.0  ;;  %v1757_v10 = vadd.f32 %v9786_v7, %v1590_v57  ;;  %v1159_v7 = vld [vmem:[%s14790_s3 + $0x360] sm:$0xff]  ;;  %v1164_v31 = vld [vmem:[%s14790_s3 + $0x388] sm:$0xff] }
 0x74e   :  { %v10131_v22 = vpop.f32.mrf.mxu0  ;;  %2223 = vrot.lane.b32.xlu1 %v10033_v29, %s9080_s28  ;;  %v1760_v29 = vadd.f32 %v9802_v56, %v1593_v58  ;;  %v1906_v63 = vmax.f32 %v1763_v49, 0.0  ;;  %v1754_v56 = vadd.f32 %v9770_v25, %v1587_v37  ;;  %v1158_v25 = vld [vmem:[%s14790_s3 + $0x358] sm:$0xff]  ;;  %v1168_v57 = vld [vmem:[%s14790_s3 + $0x3a8] sm:$0xff]  ;;  %v1965_v37 = vld [vmem:[%s14791_s4 + $0x60] sm:$0xff] }
 0x74f   :  { %2437 = vmatpush.msra.mxu3 %v1914_v41  ;;  %v1904_v19 = vmax.f32 %v1757_v10, 0.0 }
 0x750   :  { %v1905_v35 = vmax.f32 %v1760_v29, 0.0  ;;  %v1903_v41 = vmax.f32 %v1754_v56, 0.0  ;;  %v1170_v56 = vld [vmem:[%s14790_s3 + $0x3b8] sm:$0xff] }
 0x751   :  { %1687 = vmatmul.f32.gmra.mxu2 %v1154_v46  ;;  %2438 = vmatpush.msra.mxu3 %v1913_v36  ;;  %v1953_v46 = vld [vmem:[%s14791_s4] sm:$0xff] }
 0x752   :  { %v10165_v3 = vpop.f32.mrf.mxu1  ;;  %1520 = vmatmul.f32.gmra.mxu0 %v1153_v27  ;;  %v10248_v27 = vld [vmem:[%s14793_s6 + $0x108] sm:$0xff] }
 0x753   :  { %2439 = vmatpush.msra.mxu3 %v1912_v1  ;;  %2199 = vrot.lane.b32.xlu0 %v10122_v6, %s9080_s28  ;;  %v1961_v6 = vld [vmem:[%s14791_s4 + $0x40] sm:$0xff] }
 0x754   :  { %v10175_v60 = vpop.f32.mrf.mxu2  ;;  %2257 = vrot.lane.b32.xlu2 %v10221_v42, %s9080_s28 }
 0x755   :  { %8099 = vmatmul.msk.f32.gmra.mxu1 %vm1251_vm5, %v1152_v21  ;;  %2440 = vmatpush.msra.mxu3 %v1911_v15  ;;  %v1161_v21 = vld [vmem:[%s14790_s3 + $0x370] sm:$0xff] }
 0x756   :  { %v10184_v2 = vpop.f32.mrf.mxu0  ;;  %2195 = vrot.lane.b32.xlu1 %v1202_v28, %s9080_s28 }
 0x757   :  { %2441 = vmatpush.msra.mxu3 %v1910_v13 }
 0x759   :  { %1690 = vmatmul.f32.gmra.mxu2 %v1157_v44  ;;  %2442 = vmatpush.msra.mxu3 %v1909_v34  ;;  %v1169_v34 = vld [vmem:[%s14790_s3 + $0x3b0] sm:$0xff] }
 0x75a   :  { %v10204_v52 = vpop.f32.mrf.mxu1  ;;  %1523 = vmatmul.f32.gmra.mxu0 %v1156_v62 }
 0x75b   :  { %2443 = vmatpush.msra.mxu3 %v1908_v17 }
 0x75c   :  { %v10211_v48 = vpop.f32.mrf.mxu2  ;;  %2259 = vrot.lane.b32.xlu2 %v10248_v27, %s9080_s28 }
 0x75d   :  { %8100 = vmatmul.msk.f32.gmra.mxu1 %vm1251_vm5, %v1155_v5  ;;  %2444 = vmatpush.msra.mxu3 %v1907_v40  ;;  %v1167_v5 = vld [vmem:[%s14790_s3 + $0x3a0] sm:$0xff] }
 0x75e   :  { %v1479_v38 = vpop.f32.mrf.mxu0  ;;  %2225 = vrot.lane.b32.xlu1 %v10052_v59, %s9080_s28  ;;  %v1166_v59 = vld [vmem:[%s14790_s3 + $0x398] sm:$0xff] }
 0x75f   :  { %2445 = vmatpush.msra.mxu3 %v1906_v63  ;;  %v1480_v11 = vadd.f32 %v10003_v32, %v1479_v38  ;;  %v1163_v32 = vld [vmem:[%s14790_s3 + $0x380] sm:$0xff] }
 0x761   :  { %1693 = vmatmul.f32.gmra.mxu2 %v1160_v24  ;;  %2446 = vmatpush.msra.mxu3 %v1905_v35  ;;  %v1171_v24 = vld [vmem:[%s14790_s3 + $0x3c0] sm:$0xff] }
 0x762   :  { %v10231_v4 = vpop.f32.mrf.mxu1  ;;  %1526 = vmatmul.f32.gmra.mxu0 %v1159_v7  ;;  %v1969_v35 = vld [vmem:[%s14791_s4 + $0x80] sm:$0xff] }
 0x763   :  { %2447 = vmatpush.msra.mxu3 %v1904_v19 }
 0x764   :  { %v1646_v39 = vpop.f32.mrf.mxu2  ;;  %2261 = vrot.lane.b32.xlu2 %v10282_v47, %s9080_s28 }
 0x765   :  { %v10239_v53 = vadd.f32 %v1646_v39, %v1480_v11  ;;  %8101 = vmatmul.msk.f32.gmra.mxu1 %vm1251_vm5, %v1158_v25  ;;  %2448 = vmatpush.msra.mxu3 %v1903_v41  ;;  %v1174_v11 = vld [vmem:[%s14790_s3 + $0x3d8] sm:$0xff]  ;;  %v10356_v25 = vld [vmem:[%s14793_s6 + $0xd0] sm:$0xff] }
 0x766   :  { %2449 = vmatmul.f32.vlgmr.msra.gmra.mxu3 %v1953_v46  ;;  %v1482_v36 = vpop.f32.mrf.mxu0  ;;  %2201 = vrot.lane.b32.xlu1 %v10115_v20, %s9080_s28  ;;  %v1226_v20 = vld [vmem:[%s14793_s6 + $0xc8] sm:$0xff]  ;;  %v1173_v39 = vld [vmem:[%s14790_s3 + $0x3d0] sm:$0xff] }
 0x767   :  { %v1483_v1 = vadd.f32 %v14807_v14, %v1482_v36  ;;  %v1178_v14 = vld [vmem:[%s14790_s3 + $0x3f8] sm:$0xff] }
 0x769   :  { %1696 = vmatmul.f32.gmra.mxu2 %v1163_v32  ;;  %v1973_v32 = vld [vmem:[%s14791_s4 + $0xa0] sm:$0xff] }
 0x76a   :  { %v10265_v28 = vpop.f32.mrf.mxu1  ;;  %1529 = vmatmul.f32.gmra.mxu0 %v1162_v16 }
 0x76c   :  { %v1649_v8 = vpop.f32.mrf.mxu2  ;;  %2243 = vrot.lane.b32.xlu2 %v1226_v20, %s9080_s28 }
 0x76d   :  { %v10273_v45 = vadd.f32 %v1649_v8, %v1483_v1  ;;  %8102 = vmatmul.msk.f32.gmra.mxu1 %vm1251_vm5, %v1161_v21  ;;  %v10379_v21 = vld [vmem:[%s14793_s6 + $0x88] sm:$0xff] }
 0x76e   :  { %2452 = vmatmul.f32.gmra.mxu3 %v1957_v54  ;;  %v1485_v15 = vpop.f32.mrf.mxu0  ;;  %v1177_v54 = vld [vmem:[%s14790_s3 + $0x3f0] sm:$0xff] }
 0x76f   :  { %v1486_v13 = vadd.f32 %v14808_v33, %v1485_v15  ;;  %v1977_v15 = vld [vmem:[%s14791_s4 + $0xc0] sm:$0xff]  ;;  %v1181_v33 = vld [vmem:[%s14790_s3 + $0x410] sm:$0xff] }
 0x771   :  { %1699 = vmatmul.f32.gmra.mxu2 %v1166_v59  ;;  %v1176_v59 = vld [vmem:[%s14790_s3 + $0x3e8] sm:$0xff] }
 0x772   :  { %v10294_v44 = vpop.f32.mrf.mxu1  ;;  %1532 = vmatmul.f32.gmra.mxu0 %v1165_v9 }
 0x774   :  { %v1652_v58 = vpop.f32.mrf.mxu2  ;;  %2197 = vrot.lane.b32.xlu2 %v10154_v50, %s9080_s28  ;;  %v1175_v50 = vld [vmem:[%s14790_s3 + $0x3e0] sm:$0xff] }
 0x775   :  { %v10302_v18 = vadd.f32 %v1652_v58, %v1486_v13  ;;  %8103 = vmatmul.msk.f32.gmra.mxu1 %vm1251_vm5, %v1164_v31  ;;  %v1180_v31 = vld [vmem:[%s14790_s3 + $0x408] sm:$0xff]  ;;  %v1179_v58 = vld [vmem:[%s14790_s3 + $0x400] sm:$0xff] }
 0x776   :  { %2455 = vmatmul.f32.gmra.mxu3 %v1961_v6  ;;  %v1488_v62 = vpop.f32.mrf.mxu0 }
 0x777   :  { %v1489_v49 = vadd.f32 %v10087_v23, %v1488_v62  ;;  %v1172_v23 = vld [vmem:[%s14790_s3 + $0x3c8] sm:$0xff] }
 0x778   :  { %v1184_v62 = vld [vmem:[%s14790_s3 + $0x428] sm:$0xff] }
 0x779   :  { %1702 = vmatmul.f32.gmra.mxu2 %v1169_v34 }
 0x77a   :  { %v10316_v17 = vpop.f32.mrf.mxu1  ;;  %1535 = vmatmul.f32.gmra.mxu0 %v1168_v57 }
 0x77c   :  { %v1655_v29 = vpop.f32.mrf.mxu2  ;;  %2245 = vrot.lane.b32.xlu2 %v10356_v25, %s9080_s28 }
 0x77d   :  { %v10324_v40 = vadd.f32 %v1655_v29, %v1489_v49  ;;  %8104 = vmatmul.msk.f32.gmra.mxu1 %vm1251_vm5, %v1167_v5  ;;  %v1183_v49 = vld [vmem:[%s14790_s3 + $0x420] sm:$0xff] }
 0x77e   :  { %2458 = vmatmul.f32.gmra.mxu3 %v1965_v37  ;;  %v1491_v10 = vpop.f32.mrf.mxu0  ;;  %v1182_v37 = vld [vmem:[%s14790_s3 + $0x418] sm:$0xff]  ;;  %v1985_v29 = vld [vmem:[%s14791_s4 + $0x100] sm:$0xff] }
 0x77f   :  { %v1492_v63 = vadd.f32 %v10136_v55, %v1491_v10  ;;  %v1187_v10 = vld [vmem:[%s14790_s3 + $0x440] sm:$0xff] }
 0x781   :  { %1705 = vmatmul.f32.gmra.mxu2 %v1172_v23 }
 0x782   :  { %v10336_v38 = vpop.f32.mrf.mxu1  ;;  %1538 = vmatmul.f32.gmra.mxu0 %v1171_v24  ;;  %v1186_v24 = vld [vmem:[%s14790_s3 + $0x438] sm:$0xff] }
 0x784   :  { %v1658_v55 = vpop.f32.mrf.mxu2  ;;  %2227 = vrot.lane.b32.xlu2 %v10379_v21, %s9080_s28 }
 0x785   :  { %v10344_v7 = vadd.f32 %v1658_v55, %v1492_v63  ;;  %8105 = vmatmul.msk.f32.gmra.mxu1 %vm1251_vm5, %v1170_v56  ;;  %v1989_v55 = vld [vmem:[%s14791_s4 + $0x120] sm:$0xff] }
 0x786   :  { %2461 = vmatmul.f32.gmra.mxu3 %v1969_v35  ;;  %v1494_v19 = vpop.f32.mrf.mxu0  ;;  %v1185_v35 = vld [vmem:[%s14790_s3 + $0x430] sm:$0xff] }
 0x787   :  { %v1495_v41 = vadd.f32 %v1494_v19, %v1226_v20  ;;  %v1981_v20 = vld [vmem:[%s14791_s4 + $0xe0] sm:$0xff]  ;;  %v1190_v19 = vld [vmem:[%s14790_s3 + $0x458] sm:$0xff] }
 0x789   :  { %1708 = vmatmul.f32.gmra.mxu2 %v1175_v50 }
 0x78a   :  { %v10360_v46 = vpop.f32.mrf.mxu1  ;;  %1541 = vmatmul.f32.gmra.mxu0 %v1174_v11 }
 0x78c   :  { %v1661_v36 = vpop.f32.mrf.mxu2 }
 0x78d   :  { %v10368_v16 = vadd.f32 %v1661_v36, %v1495_v41  ;;  %8106 = vmatmul.msk.f32.gmra.mxu1 %vm1251_vm5, %v1173_v39  ;;  %v1189_v41 = vld [vmem:[%s14790_s3 + $0x450] sm:$0xff]  ;;  %v1993_v36 = vld [vmem:[%s14791_s4 + $0x140] sm:$0xff] }
 0x78e   :  { %2464 = vmatmul.f32.gmra.mxu3 %v1973_v32  ;;  %v10374_v1 = vpop.f32.mrf.mxu0  ;;  %v1188_v32 = vld [vmem:[%s14790_s3 + $0x448] sm:$0xff] }
 0x791   :  { %1711 = vmatmul.f32.gmra.mxu2 %v1178_v14 }
 0x792   :  { %v10386_v8 = vpop.f32.mrf.mxu1  ;;  %1544 = vmatmul.f32.gmra.mxu0 %v1177_v54  ;;  %v1193_v54 = vld [vmem:[%s14790_s3 + $0x470] sm:$0xff] }
 0x794   :  { %v10394_v9 = vpop.f32.mrf.mxu2 }
 0x795   :  { %8107 = vmatmul.msk.f32.gmra.mxu1 %vm1251_vm5, %v1176_v59 }
 0x796   :  { %2467 = vmatmul.f32.gmra.mxu3 %v1977_v15  ;;  %v10400_v13 = vpop.f32.mrf.mxu0  ;;  %v1192_v15 = vld [vmem:[%s14790_s3 + $0x468] sm:$0xff] }
 0x799   :  { %1714 = vmatmul.f32.gmra.mxu2 %v1181_v33  ;;  %v1230_v33 = vld [vmem:[%s14793_s6 + $0xe8] sm:$0xff] }
 0x79a   :  { %v10405_v6 = vpop.f32.mrf.mxu1  ;;  %1547 = vmatmul.f32.gmra.mxu0 %v1180_v31 }
 0x79c   :  { %v10413_v34 = vpop.f32.mrf.mxu2 }
 0x79d   :  { %8108 = vmatmul.msk.f32.gmra.mxu1 %vm1251_vm5, %v1179_v58  ;;  %v1229_v58 = vld [vmem:[%s14793_s6 + $0xe0] sm:$0xff] }
 0x79e   :  { %2470 = vmatmul.f32.gmra.mxu3 %v1981_v20  ;;  %v1503_v57 = vpop.f32.mrf.mxu0 }
 0x7a1   :  { %1717 = vmatmul.f32.gmra.mxu2 %v1184_v62  ;;  %v1191_v62 = vld [vmem:[%s14790_s3 + $0x460] sm:$0xff] }
 0x7a2   :  { %v10422_v5 = vpop.f32.mrf.mxu1  ;;  %1550 = vmatmul.f32.gmra.mxu0 %v1183_v49 }
 0x7a4   :  { %v1670_v23 = vpop.f32.mrf.mxu2 }
 0x7a5   :  { %8109 = vmatmul.msk.f32.gmra.mxu1 %vm1251_vm5, %v1182_v37 }
 0x7a6   :  { %2473 = vmatmul.f32.gmra.mxu3 %v1985_v29  ;;  %v1506_v63 = vpop.f32.mrf.mxu0  ;;  %v1997_v29 = vld [vmem:[%s14791_s4 + $0x160] sm:$0xff] }
 0x7a7   :  { %v1507_v49 = vadd.f32 %v1506_v63, %v1230_v33  ;;  %v1196_v63 = vld [vmem:[%s14790_s3 + $0x488] sm:$0xff] }
 0x7a9   :  { %1720 = vmatmul.f32.gmra.mxu2 %v1187_v10 }
 0x7aa   :  { %v1837_v56 = vpop.f32.mrf.mxu1  ;;  %1553 = vmatmul.f32.gmra.mxu0 %v1186_v24  ;;  %v1504_v24 = vadd.f32 %v1503_v57, %v1229_v58  ;;  %v1498_v57 = vadd.f32 %v10374_v1, %v10356_v25  ;;  %v10502_v1 = vld [vmem:[%s14793_s6 + $0x120] sm:$0xff] }
 0x7ab   :  { %2265 = vrot.lane.b32.xlu0 %v10502_v1, %s9080_s28 }
 0x7ac   :  { %v1673_v50 = vpop.f32.mrf.mxu2  ;;  %v1665_v33 = vadd.f32 %v10394_v9, %v1498_v57 }
 0x7ad   :  { %8110 = vmatmul.msk.f32.gmra.mxu1 %vm1251_vm5, %v1185_v35 }
 0x7ae   :  { %2476 = vmatmul.f32.gmra.mxu3 %v1989_v55  ;;  %v1509_v11 = vpop.f32.mrf.mxu0 }
 0x7af   :  { %v1510_v31 = vadd.f32 %v10141_v0, %v1509_v11  ;;  %v1228_v0 = vld [vmem:[%s14793_s6 + $0xd8] sm:$0xff] }
 0x7b1   :  { %1723 = vmatmul.f32.gmra.mxu2 %v1190_v19  ;;  %v1674_v19 = vadd.f32 %v1673_v50, %v1507_v49 }
 0x7b2   :  { %v1840_v39 = vpop.f32.mrf.mxu1  ;;  %1556 = vmatmul.f32.gmra.mxu0 %v1189_v41  ;;  %v1195_v41 = vld [vmem:[%s14790_s3 + $0x480] sm:$0xff] }
 0x7b3   :  { %2247 = vrot.lane.b32.xlu0 %v1228_v0, %s9080_s28 }
 0x7b4   :  { %v1676_v14 = vpop.f32.mrf.mxu2 }
 0x7b5   :  { %8111 = vmatmul.msk.f32.gmra.mxu1 %vm1251_vm5, %v1188_v32  ;;  %v1677_v35 = vadd.f32 %v1676_v14, %v1510_v31  ;;  %v1671_v32 = vadd.f32 %v1670_v23, %v1504_v24 }
 0x7b6   :  { %2479 = vmatmul.f32.gmra.mxu3 %v1993_v36  ;;  %v1512_v59 = vpop.f32.mrf.mxu0 }
 0x7b7   :  { %v1513_v37 = vadd.f32 %v10189_v30, %v1512_v59  ;;  %v1501_v30 = vadd.f32 %v10400_v13, %v1228_v0  ;;  %v1841_v59 = vadd.f32 %v1840_v39, %v1674_v19  ;;  %v2001_v13 = vld [vmem:[%s14791_s4 + $0x180] sm:$0xff]  ;;  %v1838_v31 = vadd.f32 %v1837_v56, %v1671_v32  ;;  %v1198_v56 = vld [vmem:[%s14790_s3 + $0x498] sm:$0xff] }
 0x7b8   :  { %v1823_v19 = vadd.f32 %v10336_v38, %v10324_v40  ;;  %v1471_v40 = vadd.f32 %v10082_v51, %v10379_v21  ;;  %v1817_v32 = vadd.f32 %v10294_v44, %v10273_v45 }
 0x7b9   :  { %1726 = vmatmul.f32.gmra.mxu2 %v1193_v54  ;;  %v1668_v54 = vadd.f32 %v10413_v34, %v1501_v30  ;;  %v1199_v34 = vld [vmem:[%s14790_s3 + $0x4a0] sm:$0xff]  ;;  %v1932_v39 = vmax.f32 %v1841_v59, 0.0 }
 0x7ba   :  { %v1843_v20 = vpop.f32.mrf.mxu1  ;;  %1559 = vmatmul.f32.gmra.mxu0 %v1192_v15  ;;  %v1924_v44 = vmax.f32 %v1817_v32, 0.0  ;;  %v2041_v32 = vld [vmem:[%s14791_s4 + $0x2c0] sm:$0xff] }
 0x7bb   :  { %v1844_v36 = vadd.f32 %v1843_v20, %v1677_v35  ;;  %v1835_v23 = vadd.f32 %v10422_v5, %v1668_v54  ;;  %v1832_v20 = vadd.f32 %v10405_v6, %v1665_v33  ;;  %v2005_v5 = vld [vmem:[%s14791_s4 + $0x1a0] sm:$0xff]  ;;  %v1220_v6 = vld [vmem:[%s14793_s6 + $0x98] sm:$0xff] }
 0x7bc   :  { %v1679_v10 = vpop.f32.mrf.mxu2  ;;  %v1194_v35 = vld [vmem:[%s14790_s3 + $0x478] sm:$0xff] }
 0x7bd   :  { %8112 = vmatmul.msk.f32.gmra.mxu1 %vm1251_vm5, %v1191_v62  ;;  %v1680_v11 = vadd.f32 %v1679_v10, %v1513_v37  ;;  %v1933_v58 = vmax.f32 %v1844_v36, 0.0  ;;  %v1931_v62 = vmax.f32 %v1838_v31, 0.0  ;;  %v1930_v37 = vmax.f32 %v1835_v23, 0.0 }
 0x7be   :  { %2482 = vmatmul.f32.gmra.mxu3 %v1997_v29  ;;  %v10484_v55 = vpop.f32.mrf.mxu0  ;;  %v1829_v10 = vadd.f32 %v10386_v8, %v10368_v16  ;;  %v1929_v24 = vmax.f32 %v1832_v20, 0.0  ;;  %v1219_v16 = vld [vmem:[%s14793_s6 + $0x90] sm:$0xff]  ;;  %v1477_v8 = vadd.f32 %v10184_v2, %v1220_v6  ;;  %v2009_v2 = vld [vmem:[%s14791_s4 + $0x1c0] sm:$0xff]  ;;  %v1814_v36 = vadd.f32 %v10265_v28, %v10239_v53 }
 0x7bf   :  { %v2013_v53 = vld [vmem:[%s14791_s4 + $0x1e0] sm:$0xff] }
 0x7c0   :  { %v1644_v38 = vadd.f32 %v10211_v48, %v1477_v8  ;;  %v1638_v48 = vadd.f32 %v10117_v43, %v1471_v40  ;;  %v2029_v6 = vld [vmem:[%s14791_s4 + $0x260] sm:$0xff] }
 0x7c1   :  { %1729 = vmatmul.f32.gmra.mxu2 %v1196_v63  ;;  %v1826_v63 = vadd.f32 %v10360_v46, %v10344_v7  ;;  %v1474_v7 = vadd.f32 %v10131_v22, %v1219_v16  ;;  %v1820_v46 = vadd.f32 %v10316_v17, %v10302_v18  ;;  %v1926_v22 = vmax.f32 %v1823_v19, 0.0  ;;  %v1197_v18 = vld [vmem:[%s14790_s3 + $0x490] sm:$0xff]  ;;  %v2033_v19 = vld [vmem:[%s14791_s4 + $0x280] sm:$0xff] }
 0x7c2   :  { %v1846_v14 = vpop.f32.mrf.mxu1  ;;  %1562 = vmatmul.f32.gmra.mxu0 %v1195_v41  ;;  %v1811_v45 = vadd.f32 %v10231_v4, %v1644_v38  ;;  %v1805_v43 = vadd.f32 %v10165_v3, %v1638_v48  ;;  %v1200_v4 = vld [vmem:[%s14790_s3 + $0x4a8] sm:$0xff] }
 0x7c3   :  { %v1847_v15 = vadd.f32 %v1846_v14, %v1680_v11  ;;  %v1928_v11 = vmax.f32 %v1829_v10, 0.0  ;;  %v1927_v41 = vmax.f32 %v1826_v63, 0.0  ;;  %v1641_v17 = vadd.f32 %v10175_v60, %v1474_v7 }
 0x7c4   :  { %v10496_v50 = vpop.f32.mrf.mxu2  ;;  %v1925_v14 = vmax.f32 %v1820_v46, 0.0  ;;  %v1923_v60 = vmax.f32 %v1814_v36, 0.0  ;;  %v1922_v59 = vmax.f32 %v1811_v45, 0.0  ;;  %v1920_v33 = vmax.f32 %v1805_v43, 0.0 }
 0x7c5   :  { %14809 = vst [vmem:[#allocation5_spill] sm:$0xff] %v10496_v50  ;;  %v1934_v25 = vmax.f32 %v1847_v15, 0.0  ;;  %v1808_v54 = vadd.f32 %v10204_v52, %v1641_v17  ;;  %v1802_v52 = vadd.f32 %v10105_v12, %v10073_v26  ;;  %v1243_v50 = vld [vmem:[%s14793_s6 + $0x150] sm:$0xff] }
 0x7c6   :  { %2485 = vmatmul.f32.gmra.mxu3 %v2001_v13 }
 0x7c7   :  { %2570 = vmatpush.msrb.mxu3 %v1934_v25  ;;  %v10510_v9 = vpop.f32.mrf.mxu0  ;;  %v1921_v15 = vmax.f32 %v1808_v54, 0.0  ;;  %v1919_v3 = vmax.f32 %v1802_v52, 0.0  ;;  %v2053_v52 = vld [vmem:[%s14791_s4 + $0x320] sm:$0xff] }
 0x7c9   :  { %1732 = vmatmul.f32.gmra.mxu2 %v1199_v34  ;;  %2571 = vmatpush.msrb.mxu3 %v1933_v58  ;;  %v2017_v58 = vld [vmem:[%s14791_s4 + $0x200] sm:$0xff] }
 0x7ca   :  { %v10516_v49 = vpop.f32.mrf.mxu1  ;;  %1565 = vmatmul.f32.gmra.mxu0 %v1198_v56  ;;  %v2021_v34 = vld [vmem:[%s14791_s4 + $0x220] sm:$0xff] }
 0x7cb   :  { %14810 = vst [vmem:[#allocation6_spill] sm:$0xff] %v10516_v49  ;;  %2572 = vmatpush.msrb.mxu3 %v1932_v39 }
 0x7cc   :  { %v10521_v29 = vpop.f32.mrf.mxu2 }
 0x7cd   :  { %2573 = vmatpush.msrb.mxu3 %v1931_v62  ;;  %v2025_v62 = vld [vmem:[%s14791_s4 + $0x240] sm:$0xff] }
 0x7ce   :  { %2488 = vmatmul.f32.gmra.mxu3 %v2005_v5 }
 0x7cf   :  { %2574 = vmatpush.msrb.mxu3 %v1930_v37  ;;  %v10534_v30 = vpop.f32.mrf.mxu0 }
 0x7d1   :  { %8113 = vmatmul.msk.f32.vlgmr.msrb.gmra.mxu2 %vm1251_vm5, %v1194_v35  ;;  %2575 = vmatpush.msrb.mxu3 %v1929_v24 }
 0x7d2   :  { %v10543_v0 = vpop.f32.mrf.mxu1 }
 0x7d3   :  { %14811 = vst [vmem:[#allocation7_spill] sm:$0xff] %v10543_v0  ;;  %2576 = vmatpush.msrb.mxu3 %v1928_v11 }
 0x7d4   :  { %v10551_v57 = vpop.f32.mrf.mxu2 }
 0x7d5   :  { %2577 = vmatpush.msrb.mxu3 %v1927_v41  ;;  %v2037_v41 = vld [vmem:[%s14791_s4 + $0x2a0] sm:$0xff] }
 0x7d6   :  { %2491 = vmatmul.f32.gmra.mxu3 %v2009_v2 }
 0x7d7   :  { %2578 = vmatpush.msrb.mxu3 %v1926_v22  ;;  %v10564_v51 = vpop.f32.mrf.mxu0 }
 0x7d9   :  { %8114 = vmatmul.msk.f32.gmra.mxu2 %vm1251_vm5, %v1197_v18  ;;  %2579 = vmatpush.msrb.mxu3 %v1925_v14  ;;  %v2045_v14 = vld [vmem:[%s14791_s4 + $0x2e0] sm:$0xff] }
 0x7da   :  { %v10569_v21 = vpop.f32.mrf.mxu1 }
 0x7db   :  { %14812 = vst [vmem:[#allocation8_spill] sm:$0xff] %v10569_v21  ;;  %2580 = vmatpush.msrb.mxu3 %v1924_v44 }
 0x7dc   :  { %v10575_v28 = vpop.f32.mrf.mxu2 }
 0x7dd   :  { %2581 = vmatpush.msrb.mxu3 %v1923_v60  ;;  %v2049_v60 = vld [vmem:[%s14791_s4 + $0x300] sm:$0xff] }
 0x7de   :  { %2494 = vmatmul.f32.gmra.mxu3 %v2013_v53 }
 0x7df   :  { %2582 = vmatpush.msrb.mxu3 %v1922_v59  ;;  %v10583_v13 = vpop.f32.mrf.mxu0 }
 0x7e1   :  { %8115 = vmatmul.msk.f32.gmra.mxu2 %vm1251_vm5, %v1200_v4  ;;  %2583 = vmatpush.msrb.mxu3 %v1921_v15 }
 0x7e2   :  { %v10586_v31 = vpop.f32.mrf.mxu1 }
 0x7e3   :  { %2584 = vmatpush.msrb.mxu3 %v1920_v33 }
 0x7e4   :  { %v10591_v25 = vpop.f32.mrf.mxu2 }
 0x7e5   :  { %2585 = vmatpush.msrb.mxu3 %v1919_v3 }
 0x7e6   :  { %2497 = vmatmul.f32.gmra.mxu3 %v2017_v58  ;;  %v2057_v58 = vld [vmem:[%s14791_s4 + $0x340] sm:$0xff] }
 0x7e7   :  { %v10593_v26 = vpop.f32.mrf.mxu0 }
 0x7e9   :  { %v10595_v12 = vpop.f32.mrf.mxu3 }
 0x7ea   :  { %14813 = vst [vmem:[#allocation9_spill] sm:$0xff] %v10595_v12  ;;  %v10600_v23 = vpop.f32.mrf.mxu1  ;;  %v1244_v12 = vld [vmem:[%s14793_s6 + $0x158] sm:$0xff] }
 0x7ec   :  { %v10602_v39 = vpop.f32.mrf.mxu2 }
 0x7ee   :  { %2500 = vmatmul.f32.gmra.mxu3 %v2021_v34 }
 0x7ef   :  { %v10604_v56 = vpop.f32.mrf.mxu0 }
 0x7f1   :  { %v10606_v20 = vpop.f32.mrf.mxu3 }
 0x7f2   :  { %14814 = vst [vmem:[#allocation10_spill] sm:$0xff] %v10606_v20  ;;  %v10613_v5 = vpop.f32.mrf.mxu1 }
 0x7f4   :  { %v10611_v37 = vpop.f32.mrf.mxu2 }
 0x7f6   :  { %2503 = vmatmul.f32.gmra.mxu3 %v2025_v62 }
 0x7f7   :  { %v10615_v10 = vpop.f32.mrf.mxu0 }
 0x7f9   :  { %v10617_v24 = vpop.f32.mrf.mxu3 }
 0x7fa   :  { %14815 = vst [vmem:[#allocation11_spill] sm:$0xff] %v10617_v24  ;;  %v10624_v63 = vpop.f32.mrf.mxu1 }
 0x7fc   :  { %v10622_v35 = vpop.f32.mrf.mxu2 }
 0x7fe   :  { %2506 = vmatmul.f32.gmra.mxu3 %v2029_v6 }
 0x7ff   :  { %v10628_v8 = vpop.f32.mrf.mxu0 }
 0x801   :  { %v10626_v16 = vpop.f32.mrf.mxu3 }
 0x802   :  { %14816 = vst [vmem:[#allocation12_spill] sm:$0xff] %v10626_v16  ;;  %v10637_v46 = vpop.f32.mrf.mxu1 }
 0x804   :  { %v10633_v11 = vpop.f32.mrf.mxu2 }
 0x806   :  { %2509 = vmatmul.f32.gmra.mxu3 %v2033_v19  ;;  %v2061_v19 = vld [vmem:[%s14791_s4 + $0x360] sm:$0xff] }
 0x807   :  { %v10642_v2 = vpop.f32.mrf.mxu0 }
 0x809   :  { %v10635_v7 = vpop.f32.mrf.mxu3 }
 0x80a   :  { %14817 = vst [vmem:[#allocation13_spill] sm:$0xff] %v10635_v7  ;;  %v10651_v22 = vpop.f32.mrf.mxu1 }
 0x80c   :  { %v10644_v40 = vpop.f32.mrf.mxu2 }
 0x80e   :  { %2512 = vmatmul.f32.gmra.mxu3 %v2037_v41 }
 0x80f   :  { %v1545_v17 = vpop.f32.mrf.mxu0 }
 0x811   :  { %v10646_v38 = vpop.f32.mrf.mxu3 }
 0x812   :  { %14818 = vst [vmem:[#allocation14_spill] sm:$0xff] %v10646_v38  ;;  %v10662_v45 = vpop.f32.mrf.mxu1  ;;  %v1248_v38 = vld [vmem:[%s14793_s6 + $0x178] sm:$0xff] }
 0x814   :  { %v10653_v18 = vpop.f32.mrf.mxu2 }
 0x816   :  { %2515 = vmatmul.f32.gmra.mxu3 %v2041_v32 }
 0x817   :  { %v1548_v44 = vpop.f32.mrf.mxu0 }
 0x819   :  { %v10655_v36 = vpop.f32.mrf.mxu3 }
 0x81a   :  { %14819 = vst [vmem:[#allocation15_spill] sm:$0xff] %v10655_v36  ;;  %v10669_v43 = vpop.f32.mrf.mxu1 }
 0x81c   :  { %v10660_v48 = vpop.f32.mrf.mxu2 }
 0x81e   :  { %2518 = vmatmul.f32.gmra.mxu3 %v2045_v14 }
 0x81f   :  { %v1551_v4 = vpop.f32.mrf.mxu0 }
 0x821   :  { %v10664_v54 = vpop.f32.mrf.mxu3 }
 0x822   :  { %14820 = vst [vmem:[#allocation16_spill] sm:$0xff] %v10664_v54  ;;  %v10678_v3 = vpop.f32.mrf.mxu1 }
 0x824   :  { %v1718_v53 = vpop.f32.mrf.mxu2 }
 0x826   :  { %2521 = vmatmul.f32.gmra.mxu3 %v2049_v60 }
 0x827   :  { %v1554_v34 = vpop.f32.mrf.mxu0 }
 0x829   :  { %v10671_v59 = vpop.f32.mrf.mxu3 }
 0x82a   :  { %14821 = vst [vmem:[#allocation17_spill] sm:$0xff] %v10671_v59  ;;  %v1885_v41 = vpop.f32.mrf.mxu1 }
 0x82c   :  { %v1721_v15 = vpop.f32.mrf.mxu2 }
 0x82e   :  { %2524 = vmatmul.f32.gmra.mxu3 %v2053_v52  ;;  %v2065_v52 = vld [vmem:[%s14791_s4 + $0x380] sm:$0xff] }
 0x82f   :  { %v1557_v14 = vpop.f32.mrf.mxu0 }
 0x831   :  { %v10676_v33 = vpop.f32.mrf.mxu3 }
 0x832   :  { %14822 = vst [vmem:[#allocation18_spill] sm:$0xff] %v10676_v33  ;;  %v1888_v59 = vpop.f32.mrf.mxu1 }
 0x834   :  { %v1724_v62 = vpop.f32.mrf.mxu2 }
 0x836   :  { %2527 = vmatmul.f32.gmra.mxu3 %v2057_v58  ;;  %v1247_v58 = vld [vmem:[%s14793_s6 + $0x170] sm:$0xff] }
 0x837   :  { %v1560_v54 = vpop.f32.mrf.mxu0 }
 0x838   :  { %v1561_v16 = vadd.f32 %v1560_v54, %v1248_v38  ;;  %v1242_v38 = vld [vmem:[%s14793_s6 + $0x148] sm:$0xff]  ;;  %v1549_v54 = vadd.f32 %v1548_v44, %v1244_v12  ;;  %v1240_v12 = vld [vmem:[%s14793_s6 + $0x138] sm:$0xff] }
 0x839   :  { %v10683_v6 = vpop.f32.mrf.mxu3 }
 0x83a   :  { %14823 = vst [vmem:[#allocation19_spill] sm:$0xff] %v10683_v6  ;;  %v1245_v6 = vld [vmem:[%s14793_s6 + $0x160] sm:$0xff] }
 0x83b   :  { %v1552_v24 = vadd.f32 %v1551_v4, %v1245_v6 }
 0x83c   :  { %v1727_v32 = vpop.f32.mrf.mxu2 }
 0x83d   :  { %v1728_v0 = vadd.f32 %v1727_v32, %v1561_v16  ;;  %v1719_v4 = vadd.f32 %v1718_v53, %v1552_v24  ;;  %v1241_v32 = vld [vmem:[%s14793_s6 + $0x140] sm:$0xff] }
 0x83e   :  { %2530 = vmatmul.f32.gmra.mxu3 %v2061_v19  ;;  %v1246_v19 = vld [vmem:[%s14793_s6 + $0x168] sm:$0xff] }
 0x83f   :  { %v1886_v24 = vadd.f32 %v1885_v41, %v1719_v4  ;;  %v1250_v41 = vld [vmem:[%s14793_s6 + $0x188] sm:$0xff] }
 0x841   :  { %v10688_v60 = vpop.f32.mrf.mxu3 }
 0x842   :  { %14824 = vst [vmem:[#allocation20_spill] sm:$0xff] %v10688_v60  ;;  %v1558_v60 = vadd.f32 %v1557_v14, %v1247_v58  ;;  %v1891_v14 = vpop.f32.mrf.mxu1  ;;  %v1563_v58 = vpop.f32.mrf.mxu0 }
 0x844   :  { %v10693_v33 = vpop.f32.mrf.mxu2  ;;  %v1725_v20 = vadd.f32 %v1724_v62, %v1558_v60  ;;  %v2073_v62 = vld [vmem:[%s14791_s4 + $0x3c0] sm:$0xff]  ;;  %v1543_v60 = vadd.f32 %v10642_v2, %v1242_v38 }
 0x846   :  { %2533 = vmatmul.f32.gmra.mxu3 %v2065_v52  ;;  %v2069_v52 = vld [vmem:[%s14791_s4 + $0x3a0] sm:$0xff] }
 0x849   :  { %v10698_v36 = vpop.f32.mrf.mxu3 }
 0x84a   :  { %14825 = vst [vmem:[#allocation21_spill] sm:$0xff] %v10698_v36  ;;  %v1555_v36 = vadd.f32 %v1554_v34, %v1246_v19  ;;  %v1892_v34 = vadd.f32 %v1891_v14, %v1725_v20  ;;  %v1716_v20 = vadd.f32 %v10660_v48, %v1549_v54  ;;  %v1537_v48 = vadd.f32 %v10615_v10, %v1240_v12  ;;  %v1566_v19 = vpop.f32.mrf.mxu0  ;;  %v2077_v10 = vld [vmem:[%s14791_s4 + $0x3e0] sm:$0xff] }
 0x84b   :  { %v1947_v14 = vmax.f32 %v1886_v24, 0.0 }
 0x84c   :  { %v10712_v7 = vpop.f32.mrf.mxu2  ;;  %v1722_v49 = vadd.f32 %v1721_v15, %v1555_v36  ;;  %v1546_v36 = vadd.f32 %v1545_v17, %v1243_v50  ;;  %v1949_v44 = vmax.f32 %v1892_v34, 0.0  ;;  %v1249_v50 = vld [vmem:[%s14793_s6 + $0x180] sm:$0xff] }
 0x84d   :  { %v1564_v38 = vadd.f32 %v1563_v58, %v1249_v50 }
 0x84e   :  { %2536 = vmatmul.f32.gmra.mxu3 %v2069_v52  ;;  %v1889_v16 = vadd.f32 %v1888_v59, %v1722_v49  ;;  %v1540_v49 = vadd.f32 %v10628_v8, %v1241_v32  ;;  %v1239_v59 = vld [vmem:[%s14793_s6 + $0x130] sm:$0xff]  ;;  %v1238_v8 = vld [vmem:[%s14793_s6 + $0x128] sm:$0xff]  ;;  %v1883_v52 = vadd.f32 %v10678_v3, %v1716_v20  ;;  %v1704_v3 = vadd.f32 %v10622_v35, %v1537_v48 }
 0x84f   :  { %v1534_v4 = vadd.f32 %v10604_v56, %v1239_v59  ;;  %v1528_v56 = vadd.f32 %v10583_v13, %v10502_v1  ;;  %v1525_v35 = vadd.f32 %v10253_v61, %v10564_v51  ;;  %v2081_v1 = vld [vmem:[%s14791_s4 + $0x400] sm:$0xff]  ;;  %v1522_v13 = vadd.f32 %v10282_v47, %v10534_v30 }
 0x850   :  { %v1948_v17 = vmax.f32 %v1889_v16, 0.0  ;;  %v1707_v34 = vadd.f32 %v10633_v11, %v1540_v49  ;;  %v1731_v16 = vadd.f32 %v10693_v33, %v1564_v38  ;;  %v1871_v33 = vadd.f32 %v10637_v46, %v1704_v3  ;;  %v2105_v3 = vld [vmem:[%s14791_s4 + $0x4c0] sm:$0xff] }
 0x851   :  { %v10717_v21 = vpop.f32.mrf.mxu3  ;;  %v1701_v11 = vadd.f32 %v10611_v37, %v1534_v4  ;;  %v1692_v46 = vadd.f32 %v10575_v28, %v1525_v35  ;;  %v1516_v47 = vadd.f32 %v10221_v42, %v10484_v55  ;;  %v1689_v30 = vadd.f32 %v10551_v57, %v1522_v13  ;;  %v2085_v42 = vld [vmem:[%s14791_s4 + $0x420] sm:$0xff]  ;;  %v1956_v4 = vld [vmem:[%s14791_s4 + $0x18] sm:$0xff]  ;;  %v1967_v35 = vld [vmem:[%s14791_s4 + $0x70] sm:$0xff] }
 0x852   :  { %v1942_v24 = vmax.f32 %v1871_v33, 0.0  ;;  %v14826_v55 = vld [vmem:[#allocation5_spill] sm:$0xff]  ;;  %v1972_v33 = vld [vmem:[%s14791_s4 + $0x98] sm:$0xff] }
 0x853   :  { %v1683_v57 = vadd.f32 %v14826_v55, %v1516_v47  ;;  %v1976_v13 = vld [vmem:[%s14791_s4 + $0xb8] sm:$0xff] }
 0x854   :  { %v1894_v6 = vpop.f32.mrf.mxu2  ;;  %v1988_v47 = vld [vmem:[%s14791_s4 + $0x118] sm:$0xff] }
 0x855   :  { %v1895_v15 = vadd.f32 %v1894_v6, %v1728_v0  ;;  %v1713_v0 = vadd.f32 %v10653_v18, %v1546_v36  ;;  %v1710_v18 = vadd.f32 %v10644_v40, %v1543_v60  ;;  %v1567_v6 = vadd.f32 %v1566_v19, %v1250_v41  ;;  %v1996_v55 = vld [vmem:[%s14791_s4 + $0x158] sm:$0xff] }
 0x856   :  { %2539 = vmatmul.f32.gmra.mxu3 %v2073_v62  ;;  %v1531_v40 = vadd.f32 %v10593_v26, %v1238_v8  ;;  %v1946_v36 = vmax.f32 %v1883_v52, 0.0  ;;  %v2089_v8 = vld [vmem:[%s14791_s4 + $0x440] sm:$0xff] }
 0x857   :  { %v1950_v53 = vmax.f32 %v1895_v15, 0.0  ;;  %v1880_v62 = vadd.f32 %v10669_v43, %v1713_v0  ;;  %v1877_v58 = vadd.f32 %v10662_v45, %v1710_v18  ;;  %v1874_v43 = vadd.f32 %v10651_v22, %v1707_v34  ;;  %v14828_v0 = vld [vmem:[#allocation7_spill] sm:$0xff]  ;;  %v2101_v34 = vld [vmem:[%s14791_s4 + $0x4a0] sm:$0xff] }
 0x858   :  { %v1734_v32 = vadd.f32 %v10712_v7, %v1567_v6  ;;  %v1698_v45 = vadd.f32 %v10602_v39, %v1531_v40  ;;  %v1695_v7 = vadd.f32 %v10591_v25, %v1528_v56  ;;  %v1868_v22 = vadd.f32 %v10624_v63, %v1701_v11  ;;  %v1960_v40 = vld [vmem:[%s14791_s4 + $0x38] sm:$0xff]  ;;  %v2109_v56 = vld [vmem:[%s14791_s4 + $0x4e0] sm:$0xff]  ;;  %v1963_v11 = vld [vmem:[%s14791_s4 + $0x50] sm:$0xff] }
 0x859   :  { %v10741_v2 = vpop.f32.mrf.mxu3  ;;  %2707 = vmatpush.msrb.mxu0 %v1950_v53  ;;  %v1945_v15 = vmax.f32 %v1880_v62, 0.0  ;;  %v1944_v60 = vmax.f32 %v1877_v58, 0.0  ;;  %v1943_v61 = vmax.f32 %v1874_v43, 0.0  ;;  %v1519_v39 = vadd.f32 %v10248_v27, %v10510_v9  ;;  %v1955_v62 = vld [vmem:[%s14791_s4 + $0x10] sm:$0xff] }
 0x85a   :  { %v1865_v20 = vadd.f32 %v10613_v5, %v1698_v45  ;;  %v1862_v25 = vadd.f32 %v10600_v23, %v1695_v7  ;;  %v1941_v63 = vmax.f32 %v1868_v22, 0.0  ;;  %v1859_v9 = vadd.f32 %v10586_v31, %v1692_v46  ;;  %v14827_v5 = vld [vmem:[#allocation8_spill] sm:$0xff]  ;;  %v1959_v58 = vld [vmem:[%s14791_s4 + $0x30] sm:$0xff] }
 0x85b   :  { %2708 = vmatpush.msrb.mxu0 %v1949_v44  ;;  %v1686_v27 = vadd.f32 %v10521_v29, %v1519_v39  ;;  %v1856_v23 = vadd.f32 %v14827_v5, %v1689_v30  ;;  %v14829_v29 = vld [vmem:[#allocation6_spill] sm:$0xff]  ;;  %v1975_v7 = vld [vmem:[%s14791_s4 + $0xb0] sm:$0xff] }
 0x85c   :  { %v1897_v54 = vpop.f32.mrf.mxu2  ;;  %v1940_v28 = vmax.f32 %v1865_v20, 0.0  ;;  %v1939_v49 = vmax.f32 %v1862_v25, 0.0  ;;  %v1938_v59 = vmax.f32 %v1859_v9, 0.0  ;;  %v1850_v31 = vadd.f32 %v14829_v29, %v1683_v57  ;;  %v1979_v39 = vld [vmem:[%s14791_s4 + $0xd0] sm:$0xff]  ;;  %v1984_v20 = vld [vmem:[%s14791_s4 + $0xf8] sm:$0xff]  ;;  %v1974_v30 = vld [vmem:[%s14791_s4 + $0xa8] sm:$0xff] }
 0x85d   :  { %2709 = vmatpush.msrb.mxu0 %v1948_v17  ;;  %v1898_v12 = vadd.f32 %v1897_v54, %v1731_v16  ;;  %v1853_v17 = vadd.f32 %v14828_v0, %v1686_v27  ;;  %v1937_v48 = vmax.f32 %v1856_v23, 0.0  ;;  %v1964_v16 = vld [vmem:[%s14791_s4 + $0x58] sm:$0xff]  ;;  %v1987_v25 = vld [vmem:[%s14791_s4 + $0x110] sm:$0xff]  ;;  %v1978_v9 = vld [vmem:[%s14791_s4 + $0xc8] sm:$0xff] }
 0x85e   :  { %2542 = vmatmul.f32.gmra.mxu3 %v2077_v10  ;;  %v1935_v18 = vmax.f32 %v1850_v31, 0.0  ;;  %v2097_v10 = vld [vmem:[%s14791_s4 + $0x480] sm:$0xff]  ;;  %v1992_v27 = vld [vmem:[%s14791_s4 + $0x138] sm:$0xff]  ;;  %v1982_v57 = vld [vmem:[%s14791_s4 + $0xe8] sm:$0xff] }
 0x85f   :  { %2710 = vmatpush.msrb.mxu0 %v1947_v14  ;;  %v1951_v44 = vmax.f32 %v1898_v12, 0.0  ;;  %v1936_v19 = vmax.f32 %v1853_v17, 0.0  ;;  %v2093_v14 = vld [vmem:[%s14791_s4 + $0x460] sm:$0xff]  ;;  %v1971_v12 = vld [vmem:[%s14791_s4 + $0x90] sm:$0xff]  ;;  %v1986_v0 = vld [vmem:[%s14791_s4 + $0x108] sm:$0xff] }
 0x860   :  { %v1995_v5 = vld [vmem:[%s14791_s4 + $0x150] sm:$0xff]  ;;  %v2004_v29 = vld [vmem:[%s14791_s4 + $0x198] sm:$0xff]  ;;  %v1990_v31 = vld [vmem:[%s14791_s4 + $0x128] sm:$0xff] }
 0x861   :  { %v10770_v26 = vpop.f32.mrf.mxu3  ;;  %2711 = vmatpush.msrb.mxu0 %v1946_v36  ;;  %v1999_v17 = vld [vmem:[%s14791_s4 + $0x170] sm:$0xff] }
 0x863   :  { %2712 = vmatpush.msrb.mxu0 %v1945_v15  ;;  %v1968_v15 = vld [vmem:[%s14791_s4 + $0x78] sm:$0xff] }
 0x864   :  { %v1900_v37 = vpop.f32.mrf.mxu2 }
 0x865   :  { %v1901_v51 = vadd.f32 %v1900_v37, %v1734_v32  ;;  %2713 = vmatpush.msrb.mxu0 %v1944_v60  ;;  %v1954_v32 = vld [vmem:[%s14791_s4 + $0x8] sm:$0xff] }
 0x866   :  { %2545 = vmatmul.f32.gmra.mxu3 %v2081_v1  ;;  %v1958_v60 = vld [vmem:[%s14791_s4 + $0x28] sm:$0xff] }
 0x867   :  { %v1952_v53 = vmax.f32 %v1901_v51, 0.0  ;;  %2714 = vmatpush.msrb.mxu0 %v1943_v61  ;;  %v1962_v37 = vld [vmem:[%s14791_s4 + $0x48] sm:$0xff]  ;;  %v1980_v61 = vld [vmem:[%s14791_s4 + $0xd8] sm:$0xff] }
 0x868   :  { %v1966_v51 = vld [vmem:[%s14791_s4 + $0x68] sm:$0xff] }
 0x869   :  { %v10791_v50 = vpop.f32.mrf.mxu3  ;;  %2715 = vmatpush.msrb.mxu0 %v1942_v24  ;;  %2858 = vmatpush.msra.mxu2 %v1952_v53  ;;  %v1970_v24 = vld [vmem:[%s14791_s4 + $0x88] sm:$0xff] }
 0x86b   :  { %2716 = vmatpush.msrb.mxu0 %v1941_v63  ;;  %2859 = vmatpush.msra.mxu2 %v1951_v44  ;;  %v1983_v44 = vld [vmem:[%s14791_s4 + $0xf0] sm:$0xff] }
 0x86c   :  { %8116 = vmatmul.msk.f32.vlgmr.msra.gmra.mxu2 %vm265_vm2, %v1956_v4  ;;  %v2007_v4 = vld [vmem:[%s14791_s4 + $0x1b0] sm:$0xff] }
 0x86d   :  { %2717 = vmatpush.msrb.mxu0 %v1940_v28  ;;  %v1991_v28 = vld [vmem:[%s14791_s4 + $0x130] sm:$0xff] }
 0x86e   :  { %2548 = vmatmul.f32.gmra.mxu3 %v2085_v42 }
 0x86f   :  { %2718 = vmatpush.msrb.mxu0 %v1939_v49  ;;  %v2000_v49 = vld [vmem:[%s14791_s4 + $0x178] sm:$0xff] }
 0x871   :  { %v10802_v41 = vpop.f32.mrf.mxu3  ;;  %2719 = vmatpush.msrb.mxu0 %v1938_v59 }
 0x873   :  { %2720 = vmatpush.msrb.mxu0 %v1937_v48  ;;  %v2003_v48 = vld [vmem:[%s14791_s4 + $0x190] sm:$0xff] }
 0x874   :  { %8117 = vmatmul.msk.f32.gmra.mxu2 %vm265_vm2, %v1960_v40  ;;  %v2012_v40 = vld [vmem:[%s14791_s4 + $0x1d8] sm:$0xff] }
 0x875   :  { %2721 = vmatpush.msrb.mxu0 %v1936_v19  ;;  %v10973_v19 = vpop.permute.xlu1 %2233 }
 0x876   :  { %2551 = vmatmul.f32.gmra.mxu3 %v2089_v8 }
 0x877   :  { %2722 = vmatpush.msrb.mxu0 %v1935_v18  ;;  %v2008_v18 = vld [vmem:[%s14791_s4 + $0x1b8] sm:$0xff] }
 0x878   :  { %2723 = vmatmul.f32.vlgmr.msrb.gmra.mxu0 %v1955_v62 }
 0x879   :  { %v10807_v52 = vpop.f32.mrf.mxu3 }
 0x87a   :  { %14830 = vst [vmem:[#allocation5_spill] sm:$0xff] %v10807_v52 }
 0x87c   :  { %8118 = vmatmul.msk.f32.gmra.mxu2 %vm265_vm2, %v1964_v16 }
 0x87e   :  { %2554 = vmatmul.f32.gmra.mxu3 %v2093_v14  ;;  %v10980_v14 = vpop.permute.xlu0 %2213 }
 0x880   :  { %2726 = vmatmul.f32.gmra.mxu0 %v1959_v58  ;;  %v1998_v58 = vld [vmem:[%s14791_s4 + $0x168] sm:$0xff] }
 0x881   :  { %v10812_v38 = vpop.f32.mrf.mxu3 }
 0x882   :  { %14831 = vst [vmem:[#allocation8_spill] sm:$0xff] %v10812_v38  ;;  %v2040_v38 = vld [vmem:[%s14791_s4 + $0x2b8] sm:$0xff] }
 0x884   :  { %8119 = vmatmul.msk.f32.gmra.mxu2 %vm265_vm2, %v1968_v15  ;;  %v2016_v15 = vld [vmem:[%s14791_s4 + $0x1f8] sm:$0xff] }
 0x886   :  { %2557 = vmatmul.f32.gmra.mxu3 %v2097_v10  ;;  %v1994_v10 = vld [vmem:[%s14791_s4 + $0x148] sm:$0xff]  ;;  %v11002_v16 = vpop.permute.xlu0 %2215 }
 0x888   :  { %2729 = vmatmul.f32.gmra.mxu0 %v1963_v11 }
 0x889   :  { %v10817_v54 = vpop.f32.mrf.mxu3 }
 0x88c   :  { %8120 = vmatmul.msk.f32.gmra.mxu2 %vm265_vm2, %v1972_v33 }
 0x88e   :  { %2560 = vmatmul.f32.gmra.mxu3 %v2101_v34  ;;  %v10989_v34 = vpop.permute.xlu2 %2253 }
 0x890   :  { %2732 = vmatmul.f32.gmra.mxu0 %v1967_v35  ;;  %v2002_v35 = vld [vmem:[%s14791_s4 + $0x188] sm:$0xff] }
 0x891   :  { %v10829_v6 = vpop.f32.mrf.mxu3 }
 0x894   :  { %8121 = vmatmul.msk.f32.gmra.mxu2 %vm265_vm2, %v1976_v13 }
 0x896   :  { %2563 = vmatmul.f32.gmra.mxu3 %v2105_v3  ;;  %v10996_v3 = vpop.permute.xlu1 %2235 }
 0x898   :  { %2735 = vmatmul.f32.gmra.mxu0 %v1971_v12  ;;  %v11023_v12 = vpop.permute.xlu0 %2217 }
 0x899   :  { %v10841_v36 = vpop.f32.mrf.mxu3 }
 0x89c   :  { %8122 = vmatmul.msk.f32.gmra.mxu2 %vm265_vm2, %v1980_v61 }
 0x89e   :  { %2566 = vmatmul.f32.gmra.mxu3 %v2109_v56  ;;  %v2011_v56 = vld [vmem:[%s14791_s4 + $0x1d0] sm:$0xff]  ;;  %v11018_v33 = vpop.permute.xlu1 %2237 }
 0x8a0   :  { %2738 = vmatmul.f32.gmra.mxu0 %v1975_v7  ;;  %v2006_v7 = vld [vmem:[%s14791_s4 + $0x1a8] sm:$0xff] }
 0x8a1   :  { %v10853_v43 = vpop.f32.mrf.mxu3 }
 0x8a4   :  { %8123 = vmatmul.msk.f32.gmra.mxu2 %vm265_vm2, %v1984_v20  ;;  %v2019_v20 = vld [vmem:[%s14791_s4 + $0x210] sm:$0xff] }
 0x8a6   :  { %2586 = vmatmul.f32.vlgmr.msrb.gmra.mxu3 %v1954_v32  ;;  %v11012_v32 = vpop.permute.xlu2 %2255 }
 0x8a8   :  { %2741 = vmatmul.f32.gmra.mxu0 %v1979_v39 }
 0x8a9   :  { %v10865_v45 = vpop.f32.mrf.mxu3 }
 0x8ac   :  { %8124 = vmatmul.msk.f32.gmra.mxu2 %vm265_vm2, %v1988_v47 }
 0x8ae   :  { %2589 = vmatmul.f32.gmra.mxu3 %v1958_v60  ;;  %v2015_v60 = vld [vmem:[%s14791_s4 + $0x1f0] sm:$0xff] }
 0x8b0   :  { %2744 = vmatmul.f32.gmra.mxu0 %v1983_v44  ;;  %v11041_v44 = vpop.permute.xlu0 %2219 }
 0x8b1   :  { %v10877_v1 = vpop.f32.mrf.mxu3 }
 0x8b4   :  { %8125 = vmatmul.msk.f32.gmra.mxu2 %vm265_vm2, %v1992_v27 }
 0x8b6   :  { %2592 = vmatmul.f32.gmra.mxu3 %v1962_v37  ;;  %v2020_v37 = vld [vmem:[%s14791_s4 + $0x218] sm:$0xff] }
 0x8b8   :  { %2747 = vmatmul.f32.gmra.mxu0 %v1987_v25  ;;  %v2010_v25 = vld [vmem:[%s14791_s4 + $0x1c8] sm:$0xff] }
 0x8b9   :  { %v10889_v22 = vpop.f32.mrf.mxu3 }
 0x8bc   :  { %8126 = vmatmul.msk.f32.gmra.mxu2 %vm265_vm2, %v1996_v55 }
 0x8be   :  { %2595 = vmatmul.f32.gmra.mxu3 %v1966_v51  ;;  %v11034_v51 = vpop.permute.xlu2 %2257 }
 0x8c0   :  { %2750 = vmatmul.f32.gmra.mxu0 %v1991_v28  ;;  %v2023_v28 = vld [vmem:[%s14791_s4 + $0x230] sm:$0xff] }
 0x8c1   :  { %v10901_v46 = vpop.f32.mrf.mxu3 }
 0x8c4   :  { %8127 = vmatmul.msk.f32.gmra.mxu2 %vm265_vm2, %v2000_v49  ;;  %v2028_v49 = vld [vmem:[%s14791_s4 + $0x258] sm:$0xff] }
 0x8c6   :  { %2598 = vmatmul.f32.gmra.mxu3 %v1970_v24  ;;  %v11039_v24 = vpop.permute.xlu1 %2239  ;;  %v11055_v55 = vpop.permute.xlu2 %2259 }
 0x8c8   :  { %2753 = vmatmul.f32.gmra.mxu0 %v1995_v5 }
 0x8c9   :  { %v10913_v53 = vpop.f32.mrf.mxu3 }
 0x8ca   :  { %14832 = vst [vmem:[#allocation7_spill] sm:$0xff] %v10913_v53  ;;  %v2076_v53 = vld [vmem:[%s14791_s4 + $0x3d8] sm:$0xff] }
 0x8cc   :  { %8128 = vmatmul.msk.f32.gmra.mxu2 %vm265_vm2, %v2004_v29 }
 0x8ce   :  { %2601 = vmatmul.f32.gmra.mxu3 %v1974_v30  ;;  %v2024_v30 = vld [vmem:[%s14791_s4 + $0x238] sm:$0xff] }
 0x8d0   :  { %2756 = vmatmul.f32.gmra.mxu0 %v1999_v17  ;;  %v2014_v17 = vld [vmem:[%s14791_s4 + $0x1e8] sm:$0xff] }
 0x8d1   :  { %v10925_v63 = vpop.f32.mrf.mxu3 }
 0x8d2   :  { %14833 = vst [vmem:[#allocation6_spill] sm:$0xff] %v10925_v63 }
 0x8d4   :  { %8129 = vmatmul.msk.f32.gmra.mxu2 %vm265_vm2, %v2008_v18  ;;  %v11073_v18 = vpop.permute.xlu2 %2261 }
 0x8d6   :  { %2604 = vmatmul.f32.gmra.mxu3 %v1978_v9 }
 0x8d8   :  { %2759 = vmatmul.f32.gmra.mxu0 %v2003_v48  ;;  %v2027_v48 = vld [vmem:[%s14791_s4 + $0x250] sm:$0xff] }
 0x8d9   :  { %v10937_v42 = vpop.f32.mrf.mxu3 }
 0x8dc   :  { %8130 = vmatmul.msk.f32.gmra.mxu2 %vm265_vm2, %v2012_v40 }
 0x8de   :  { %2607 = vmatmul.f32.gmra.mxu3 %v1982_v57  ;;  %v11057_v57 = vpop.permute.xlu1 %2241 }
 0x8e0   :  { %2762 = vmatmul.f32.gmra.mxu0 %v2007_v4  ;;  %v2032_v4 = vld [vmem:[%s14791_s4 + $0x278] sm:$0xff] }
 0x8e1   :  { %v10949_v23 = vpop.f32.mrf.mxu3 }
 0x8e4   :  { %8131 = vmatmul.msk.f32.gmra.mxu2 %vm265_vm2, %v2016_v15 }
 0x8e6   :  { %2610 = vmatmul.f32.gmra.mxu3 %v1986_v0  ;;  %v11064_v0 = vpop.permute.xlu0 %2221  ;;  %v11080_v40 = vpop.permute.xlu1 %2223 }
 0x8e8   :  { %2765 = vmatmul.f32.gmra.mxu0 %v2011_v56 }
 0x8e9   :  { %v10961_v59 = vpop.f32.mrf.mxu3 }
 0x8ec   :  { %8132 = vmatmul.msk.f32.gmra.mxu2 %vm265_vm2, %v2020_v37  ;;  %v14837_v37 = vld [vmem:[#allocation9_spill] sm:$0xff] }
 0x8ee   :  { %2613 = vmatmul.f32.gmra.mxu3 %v1990_v31  ;;  %v2194_v15 = vpop.permute.xlu0 %2193 }
 0x8ef   :  { %v2861_v39 = vpop.f32.mrf.mxu2 }
 0x8f0   :  { %2768 = vmatmul.f32.gmra.mxu0 %v2015_v60  ;;  %v2031_v60 = vld [vmem:[%s14791_s4 + $0x270] sm:$0xff] }
 0x8f1   :  { %v10975_v8 = vpop.f32.mrf.mxu3 }
 0x8f4   :  { %8133 = vmatmul.msk.f32.gmra.mxu2 %vm265_vm2, %v2024_v30 }
 0x8f5   :  { %v2724_v61 = vpop.f32.mrf.mxu0 }
 0x8f6   :  { %2616 = vmatmul.f32.gmra.mxu3 %v1994_v10 }
 0x8f7   :  { %v2864_v9 = vpop.f32.mrf.mxu2 }
 0x8f8   :  { %2771 = vmatmul.f32.gmra.mxu0 %v2019_v20 }
 0x8f9   :  { %v10991_v62 = vpop.f32.mrf.mxu3 }
 0x8fc   :  { %8134 = vmatmul.msk.f32.gmra.mxu2 %vm265_vm2, %v2028_v49  ;;  %v2022_v49 = vld [vmem:[%s14791_s4 + $0x228] sm:$0xff] }
 0x8fd   :  { %v2727_v27 = vpop.f32.mrf.mxu0 }
 0x8fe   :  { %2619 = vmatmul.f32.gmra.mxu3 %v1998_v58  ;;  %v2018_v58 = vld [vmem:[%s14791_s4 + $0x208] sm:$0xff] }
 0x8ff   :  { %v2867_v31 = vpop.f32.mrf.mxu2 }
 0x900   :  { %2774 = vmatmul.f32.gmra.mxu0 %v2023_v28  ;;  %v11093_v28 = vpop.permute.xlu2 %2243 }
 0x901   :  { %v11007_v11 = vpop.f32.mrf.mxu3 }
 0x904   :  { %8135 = vmatmul.msk.f32.gmra.mxu2 %vm265_vm2, %v2032_v4  ;;  %v2196_v4 = vpop.permute.xlu1 %2195 }
 0x905   :  { %v2730_v29 = vpop.f32.mrf.mxu0 }
 0x906   :  { %2622 = vmatmul.f32.gmra.mxu3 %v2002_v35 }
 0x907   :  { %v2870_v35 = vpop.f32.mrf.mxu2 }
 0x908   :  { %2777 = vmatmul.f32.gmra.mxu0 %v2027_v48 }
 0x909   :  { %v11025_v13 = vpop.f32.mrf.mxu3 }
 0x90d   :  { %v2733_v56 = vpop.f32.mrf.mxu0 }
 0x90e   :  { %2625 = vmatmul.f32.gmra.mxu3 %v2006_v7  ;;  %v2451_v7 = vadd.f32 %v14837_v37, %v2194_v15  ;;  %v14839_v37 = vld [vmem:[#allocation10_spill] sm:$0xff] }
 0x90f   :  { %v2873_v15 = vpop.f32.mrf.mxu2 }
 0x910   :  { %2780 = vmatmul.f32.gmra.mxu0 %v2031_v60  ;;  %v2035_v60 = vld [vmem:[%s14791_s4 + $0x290] sm:$0xff] }
 0x911   :  { %v11043_v47 = vpop.f32.mrf.mxu3 }
 0x912   :  { %14834 = vst [vmem:[#allocation22_spill] sm:$0xff] %v11043_v47 }
 0x915   :  { %v2736_v48 = vpop.f32.mrf.mxu0 }
 0x916   :  { %2628 = vmatmul.f32.gmra.mxu3 %v2010_v25  ;;  %v2036_v25 = vld [vmem:[%s14791_s4 + $0x298] sm:$0xff] }
 0x917   :  { %8136 = vmatmul.msk.f32.gmra.mxu2 %vm265_vm2, %v2036_v25 }
 0x918   :  { %2783 = vmatmul.f32.gmra.mxu0 %v2035_v60 }
 0x919   :  { %v11059_v5 = vpop.f32.mrf.mxu3 }
 0x91a   :  { %14835 = vst [vmem:[#allocation23_spill] sm:$0xff] %v11059_v5 }
 0x91e   :  { %2631 = vmatmul.f32.gmra.mxu3 %v2014_v17 }
 0x91f   :  { %8137 = vmatmul.msk.f32.gmra.mxu2 %vm265_vm2, %v2040_v38  ;;  %v2044_v38 = vld [vmem:[%s14791_s4 + $0x2d8] sm:$0xff] }
 0x921   :  { %v11075_v10 = vpop.f32.mrf.mxu3 }
 0x922   :  { %14836 = vst [vmem:[#allocation24_spill] sm:$0xff] %v11075_v10 }
 0x926   :  { %2634 = vmatmul.f32.gmra.mxu3 %v2018_v58 }
 0x927   :  { %8138 = vmatmul.msk.f32.gmra.mxu2 %vm265_vm2, %v2044_v38 }
 0x929   :  { %v2587_v20 = vpop.f32.mrf.mxu3 }
 0x92a   :  { %v2588_v30 = vadd.f32 %v2587_v20, %v2451_v7  ;;  %v2454_v7 = vadd.f32 %v14839_v37, %v2196_v4  ;;  %v11118_v4 = vpop.f32.mrf.mxu2  ;;  %v2039_v37 = vld [vmem:[%s14791_s4 + $0x2b0] sm:$0xff] }
 0x92b   :  { %14842 = vst [vmem:[#allocation26_spill] sm:$0xff] %v11118_v4  ;;  %2786 = vmatmul.f32.gmra.mxu0 %v2039_v37 }
 0x92c   :  { %v2725_v17 = vadd.f32 %v2724_v61, %v2588_v30  ;;  %v11108_v61 = vpop.permute.xlu0 %2263 }
 0x92e   :  { %v11099_v58 = vadd.f32 %v2861_v39, %v2725_v17  ;;  %2637 = vmatmul.f32.gmra.mxu3 %v2022_v49  ;;  %v2026_v39 = vld [vmem:[%s14791_s4 + $0x248] sm:$0xff]  ;;  %v11114_v49 = vpop.f32.mrf.mxu0  ;;  %v2198_v17 = vpop.permute.xlu2 %2197 }
 0x92f   :  { %14840 = vst [vmem:[#allocation10_spill] sm:$0xff] %v11114_v49 }
 0x930   :  { %14838 = vst [vmem:[#allocation9_spill] sm:$0xff] %v11099_v58 }
 0x931   :  { %v2590_v20 = vpop.f32.mrf.mxu3 }
 0x932   :  { %v2591_v25 = vadd.f32 %v2590_v20, %v2454_v7  ;;  %v14843_v7 = vld [vmem:[#allocation11_spill] sm:$0xff] }
 0x933   :  { %v2457_v20 = vadd.f32 %v14843_v7, %v2198_v17  ;;  %v11137_v17 = vpop.f32.mrf.mxu2  ;;  %v14847_v7 = vld [vmem:[#allocation12_spill] sm:$0xff] }
 0x934   :  { %v2728_v30 = vadd.f32 %v2727_v27, %v2591_v25  ;;  %v11127_v25 = vpop.permute.xlu1 %2225  ;;  %v2200_v37 = vpop.permute.xlu0 %2199  ;;  %14846 = vst [vmem:[#allocation28_spill] sm:$0xff] %v11137_v17 }
 0x936   :  { %v11116_v60 = vadd.f32 %v2864_v9, %v2728_v30  ;;  %2640 = vmatmul.f32.gmra.mxu3 %v2026_v39  ;;  %v2030_v9 = vld [vmem:[%s14791_s4 + $0x268] sm:$0xff]  ;;  %v11133_v30 = vpop.f32.mrf.mxu0 }
 0x937   :  { %14844 = vst [vmem:[#allocation11_spill] sm:$0xff] %v11133_v30  ;;  %v2071_v30 = vld [vmem:[%s14791_s4 + $0x3b0] sm:$0xff] }
 0x938   :  { %14841 = vst [vmem:[#allocation25_spill] sm:$0xff] %v11116_v60 }
 0x939   :  { %v2593_v63 = vpop.f32.mrf.mxu3 }
 0x93a   :  { %v2594_v27 = vadd.f32 %v2593_v63, %v2457_v20  ;;  %v2043_v63 = vld [vmem:[%s14791_s4 + $0x2d0] sm:$0xff]  ;;  %v2460_v20 = vadd.f32 %v14847_v7, %v2200_v37 }
 0x93b   :  { %2789 = vmatmul.f32.gmra.mxu0 %v2043_v63  ;;  %v11154_v37 = vpop.f32.mrf.mxu2  ;;  %v2047_v63 = vld [vmem:[%s14791_s4 + $0x2f0] sm:$0xff] }
 0x93c   :  { %v2731_v39 = vadd.f32 %v2730_v29, %v2594_v27  ;;  %v2048_v29 = vld [vmem:[%s14791_s4 + $0x2f8] sm:$0xff]  ;;  %14850 = vst [vmem:[#allocation30_spill] sm:$0xff] %v11154_v37  ;;  %v2054_v37 = vld [vmem:[%s14791_s4 + $0x328] sm:$0xff] }
 0x93d   :  { %8139 = vmatmul.msk.f32.gmra.mxu2 %vm265_vm2, %v2048_v29 }
 0x93e   :  { %v11135_v4 = vadd.f32 %v2867_v31, %v2731_v39  ;;  %2643 = vmatmul.f32.gmra.mxu3 %v2030_v9  ;;  %v2034_v31 = vld [vmem:[%s14791_s4 + $0x288] sm:$0xff]  ;;  %v11150_v9 = vpop.f32.mrf.mxu0  ;;  %v2202_v39 = vpop.permute.xlu1 %2201 }
 0x93f   :  { %14848 = vst [vmem:[#allocation12_spill] sm:$0xff] %v11150_v9  ;;  %v2067_v9 = vld [vmem:[%s14791_s4 + $0x390] sm:$0xff] }
 0x940   :  { %14845 = vst [vmem:[#allocation27_spill] sm:$0xff] %v11135_v4 }
 0x941   :  { %v2596_v49 = vpop.f32.mrf.mxu3 }
 0x942   :  { %v2597_v38 = vadd.f32 %v2596_v49, %v2460_v20  ;;  %v14851_v49 = vld [vmem:[#allocation13_spill] sm:$0xff] }
 0x943   :  { %2792 = vmatmul.f32.gmra.mxu0 %v2047_v63  ;;  %v2463_v7 = vadd.f32 %v14851_v49, %v2202_v39  ;;  %v11171_v63 = vpop.f32.mrf.mxu2  ;;  %v2051_v39 = vld [vmem:[%s14791_s4 + $0x310] sm:$0xff] }
 0x944   :  { %v2734_v27 = vadd.f32 %v2733_v56, %v2597_v38  ;;  %v2052_v56 = vld [vmem:[%s14791_s4 + $0x318] sm:$0xff]  ;;  %14854 = vst [vmem:[#allocation32_spill] sm:$0xff] %v11171_v63  ;;  %v2063_v63 = vld [vmem:[%s14791_s4 + $0x370] sm:$0xff] }
 0x945   :  { %8140 = vmatmul.msk.f32.gmra.mxu2 %vm265_vm2, %v2052_v56  ;;  %v2055_v56 = vld [vmem:[%s14791_s4 + $0x330] sm:$0xff] }
 0x946   :  { %v11152_v17 = vadd.f32 %v2870_v35, %v2734_v27  ;;  %2646 = vmatmul.f32.gmra.mxu3 %v2034_v31  ;;  %v2038_v35 = vld [vmem:[%s14791_s4 + $0x2a8] sm:$0xff]  ;;  %v11167_v31 = vpop.f32.mrf.mxu0 }
 0x947   :  { %14852 = vst [vmem:[#allocation13_spill] sm:$0xff] %v11167_v31  ;;  %v2068_v31 = vld [vmem:[%s14791_s4 + $0x398] sm:$0xff] }
 0x948   :  { %14849 = vst [vmem:[#allocation29_spill] sm:$0xff] %v11152_v17 }
 0x949   :  { %v2599_v20 = vpop.f32.mrf.mxu3 }
 0x94a   :  { %v2600_v29 = vadd.f32 %v2599_v20, %v2463_v7  ;;  %v2056_v7 = vld [vmem:[%s14791_s4 + $0x338] sm:$0xff] }
 0x94b   :  { %2795 = vmatmul.f32.gmra.mxu0 %v2051_v39  ;;  %v11187_v20 = vpop.f32.mrf.mxu2 }
 0x94c   :  { %v2737_v38 = vadd.f32 %v2736_v48, %v2600_v29  ;;  %v2042_v48 = vld [vmem:[%s14791_s4 + $0x2c8] sm:$0xff]  ;;  %14857 = vst [vmem:[#allocation35_spill] sm:$0xff] %v11187_v20  ;;  %v2064_v20 = vld [vmem:[%s14791_s4 + $0x378] sm:$0xff] }
 0x94d   :  { %8141 = vmatmul.msk.f32.gmra.mxu2 %vm265_vm2, %v2056_v7 }
 0x94e   :  { %v11169_v27 = vadd.f32 %v2873_v15, %v2737_v38  ;;  %2649 = vmatmul.f32.gmra.mxu3 %v2038_v35  ;;  %v11185_v15 = vpop.f32.mrf.mxu0  ;;  %v2060_v35 = vld [vmem:[%s14791_s4 + $0x358] sm:$0xff]  ;;  %v2046_v38 = vld [vmem:[%s14791_s4 + $0x2e8] sm:$0xff] }
 0x94f   :  { %14856 = vst [vmem:[#allocation34_spill] sm:$0xff] %v11185_v15  ;;  %v2050_v15 = vld [vmem:[%s14791_s4 + $0x308] sm:$0xff] }
 0x950   :  { %14853 = vst [vmem:[#allocation31_spill] sm:$0xff] %v11169_v27 }
 0x951   :  { %v11176_v49 = vpop.f32.mrf.mxu3 }
 0x952   :  { %14855 = vst [vmem:[#allocation33_spill] sm:$0xff] %v11176_v49 }
 0x953   :  { %2798 = vmatmul.f32.gmra.mxu0 %v2055_v56  ;;  %v2891_v7 = vpop.f32.mrf.mxu2 }
 0x955   :  { %8142 = vmatmul.msk.f32.gmra.mxu2 %vm265_vm2, %v2060_v35 }
 0x956   :  { %2652 = vmatmul.f32.gmra.mxu3 %v2042_v48  ;;  %v2754_v39 = vpop.f32.mrf.mxu0  ;;  %v2059_v48 = vld [vmem:[%s14791_s4 + $0x350] sm:$0xff] }
 0x959   :  { %v11192_v29 = vpop.f32.mrf.mxu3 }
 0x95a   :  { %14858 = vst [vmem:[#allocation36_spill] sm:$0xff] %v11192_v29 }
 0x95b   :  { %2801 = vmatmul.f32.gmra.mxu0 %v2059_v48 }
 0x95d   :  { %8143 = vmatmul.msk.f32.gmra.mxu2 %vm265_vm2, %v2064_v20 }
 0x95e   :  { %2655 = vmatmul.f32.gmra.mxu3 %v2046_v38  ;;  %v2757_v35 = vpop.f32.mrf.mxu0  ;;  %v2894_v38 = vpop.f32.mrf.mxu2 }
 0x961   :  { %v11204_v56 = vpop.f32.mrf.mxu3 }
 0x962   :  { %14859 = vst [vmem:[#allocation37_spill] sm:$0xff] %v11204_v56  ;;  %v2058_v56 = vld [vmem:[%s14791_s4 + $0x348] sm:$0xff] }
 0x963   :  { %2804 = vmatmul.f32.gmra.mxu0 %v2063_v63 }
 0x965   :  { %8144 = vmatmul.msk.f32.gmra.mxu2 %vm265_vm2, %v2068_v31 }
 0x966   :  { %2658 = vmatmul.f32.gmra.mxu3 %v2050_v15  ;;  %v2760_v20 = vpop.f32.mrf.mxu0  ;;  %v2897_v15 = vpop.f32.mrf.mxu2 }
 0x969   :  { %v11216_v48 = vpop.f32.mrf.mxu3 }
 0x96a   :  { %14860 = vst [vmem:[#allocation38_spill] sm:$0xff] %v11216_v48  ;;  %v2072_v48 = vld [vmem:[%s14791_s4 + $0x3b8] sm:$0xff] }
 0x96b   :  { %2807 = vmatmul.f32.gmra.mxu0 %v2067_v9  ;;  %v14862_v9 = vld [vmem:[#allocation19_spill] sm:$0xff] }
 0x96d   :  { %8145 = vmatmul.msk.f32.gmra.mxu2 %vm265_vm2, %v2072_v48  ;;  %v2062_v48 = vld [vmem:[%s14791_s4 + $0x368] sm:$0xff] }
 0x96e   :  { %2661 = vmatmul.f32.gmra.mxu3 %v2054_v37  ;;  %v2763_v31 = vpop.f32.mrf.mxu0  ;;  %v2900_v37 = vpop.f32.mrf.mxu2 }
 0x971   :  { %v11228_v63 = vpop.f32.mrf.mxu3 }
 0x972   :  { %14861 = vst [vmem:[#allocation39_spill] sm:$0xff] %v11228_v63  ;;  %v2481_v63 = vadd.f32 %v14862_v9, %v10980_v14  ;;  %v2075_v14 = vld [vmem:[%s14791_s4 + $0x3d0] sm:$0xff] }
 0x973   :  { %2810 = vmatmul.f32.gmra.mxu0 %v2071_v30 }
 0x975   :  { %8146 = vmatmul.msk.f32.gmra.mxu2 %vm265_vm2, %v2076_v53 }
 0x976   :  { %2664 = vmatmul.f32.gmra.mxu3 %v2058_v56  ;;  %v11249_v49 = vpop.f32.mrf.mxu0  ;;  %v11251_v30 = vpop.f32.mrf.mxu2 }
 0x979   :  { %v2617_v29 = vpop.f32.mrf.mxu3 }
 0x97a   :  { %v2618_v52 = vadd.f32 %v2617_v29, %v2481_v63  ;;  %v14863_v29 = vld [vmem:[#allocation20_spill] sm:$0xff] }
 0x97b   :  { %2813 = vmatmul.f32.gmra.mxu0 %v2075_v14  ;;  %v2484_v63 = vadd.f32 %v14863_v29, %v11002_v16  ;;  %v14864_v14 = vld [vmem:[#allocation21_spill] sm:$0xff] }
 0x97c   :  { %v2755_v56 = vadd.f32 %v2754_v39, %v2618_v52  ;;  %v2080_v52 = vld [vmem:[%s14791_s4 + $0x3f8] sm:$0xff]  ;;  %v2066_v39 = vld [vmem:[%s14791_s4 + $0x388] sm:$0xff]  ;;  %v2487_v29 = vadd.f32 %v14864_v14, %v11023_v12 }
 0x97d   :  { %8147 = vmatmul.msk.f32.gmra.mxu2 %vm265_vm2, %v2080_v52 }
 0x97e   :  { %v2892_v27 = vadd.f32 %v2891_v7, %v2755_v56  ;;  %2667 = vmatmul.f32.gmra.mxu3 %v2062_v48  ;;  %v11266_v48 = vpop.f32.mrf.mxu0  ;;  %v11268_v16 = vpop.f32.mrf.mxu2 }
 0x980   :  { %2991 = vrot.lane.b32.xlu2 %v2892_v27, %s9082_s11  ;;  %v2079_v27 = vld [vmem:[%s14791_s4 + $0x3f0] sm:$0xff] }
 0x981   :  { %v2620_v9 = vpop.f32.mrf.mxu3 }
 0x982   :  { %v2621_v53 = vadd.f32 %v2620_v9, %v2484_v63 }
 0x983   :  { %2816 = vmatmul.f32.gmra.mxu0 %v2079_v27 }
 0x984   :  { %v2758_v7 = vadd.f32 %v2757_v35, %v2621_v53  ;;  %v2084_v35 = vld [vmem:[%s14791_s4 + $0x418] sm:$0xff] }
 0x985   :  { %8148 = vmatmul.msk.f32.gmra.mxu2 %vm265_vm2, %v2084_v35 }
 0x986   :  { %v2895_v56 = vadd.f32 %v2894_v38, %v2758_v7  ;;  %2670 = vmatmul.f32.gmra.mxu3 %v2066_v39  ;;  %v2070_v38 = vld [vmem:[%s14791_s4 + $0x3a8] sm:$0xff]  ;;  %v11283_v52 = vpop.f32.mrf.mxu0  ;;  %v11285_v12 = vpop.f32.mrf.mxu2  ;;  %v2083_v7 = vld [vmem:[%s14791_s4 + $0x410] sm:$0xff] }
 0x988   :  { %2993 = vrot.lane.b32.xlu0 %v2895_v56, %s9082_s11  ;;  %v2490_v56 = vadd.f32 %v10717_v21, %v11041_v44  ;;  %v2087_v44 = vld [vmem:[%s14791_s4 + $0x430] sm:$0xff] }
 0x989   :  { %v2623_v63 = vpop.f32.mrf.mxu3 }
 0x98a   :  { %v2624_v9 = vadd.f32 %v2623_v63, %v2487_v29 }
 0x98b   :  { %2819 = vmatmul.f32.gmra.mxu0 %v2083_v7 }
 0x98c   :  { %v2761_v53 = vadd.f32 %v2760_v20, %v2624_v9  ;;  %v2088_v20 = vld [vmem:[%s14791_s4 + $0x438] sm:$0xff] }
 0x98d   :  { %8149 = vmatmul.msk.f32.gmra.mxu2 %vm265_vm2, %v2088_v20 }
 0x98e   :  { %v2898_v39 = vadd.f32 %v2897_v15, %v2761_v53  ;;  %2673 = vmatmul.f32.gmra.mxu3 %v2070_v38  ;;  %v2074_v15 = vld [vmem:[%s14791_s4 + $0x3c8] sm:$0xff]  ;;  %v11300_v63 = vpop.f32.mrf.mxu0  ;;  %v11302_v21 = vpop.f32.mrf.mxu2  ;;  %v2092_v38 = vld [vmem:[%s14791_s4 + $0x458] sm:$0xff] }
 0x98f   :  { %14865 = vst [vmem:[#allocation19_spill] sm:$0xff] %v11302_v21 }
 0x990   :  { %2995 = vrot.lane.b32.xlu1 %v2898_v39, %s9082_s11  ;;  %v2091_v39 = vld [vmem:[%s14791_s4 + $0x450] sm:$0xff] }
 0x991   :  { %v2626_v27 = vpop.f32.mrf.mxu3 }
 0x992   :  { %v2627_v14 = vadd.f32 %v2626_v27, %v2490_v56  ;;  %v2096_v56 = vld [vmem:[%s14791_s4 + $0x478] sm:$0xff]  ;;  %v2082_v27 = vld [vmem:[%s14791_s4 + $0x408] sm:$0xff] }
 0x993   :  { %2822 = vmatmul.f32.gmra.mxu0 %v2087_v44  ;;  %v2086_v44 = vld [vmem:[%s14791_s4 + $0x428] sm:$0xff] }
 0x994   :  { %v2764_v29 = vadd.f32 %v2763_v31, %v2627_v14  ;;  %v2078_v31 = vld [vmem:[%s14791_s4 + $0x3e8] sm:$0xff] }
 0x995   :  { %8150 = vmatmul.msk.f32.gmra.mxu2 %vm265_vm2, %v2092_v38 }
 0x996   :  { %v2901_v9 = vadd.f32 %v2900_v37, %v2764_v29  ;;  %2676 = vmatmul.f32.gmra.mxu3 %v2074_v15  ;;  %v11317_v37 = vpop.f32.mrf.mxu0  ;;  %v11319_v53 = vpop.f32.mrf.mxu2  ;;  %v2095_v15 = vld [vmem:[%s14791_s4 + $0x470] sm:$0xff] }
 0x997   :  { %14866 = vst [vmem:[#allocation20_spill] sm:$0xff] %v11317_v37  ;;  %v2098_v37 = vld [vmem:[%s14791_s4 + $0x488] sm:$0xff] }
 0x998   :  { %2997 = vrot.lane.b32.xlu2 %v2901_v9, %s9082_s11  ;;  %14867 = vst [vmem:[#allocation21_spill] sm:$0xff] %v11319_v53  ;;  %v2100_v9 = vld [vmem:[%s14791_s4 + $0x498] sm:$0xff] }
 0x999   :  { %v11308_v35 = vpop.f32.mrf.mxu3 }
 0x99b   :  { %2825 = vmatmul.f32.gmra.mxu0 %v2091_v39  ;;  %v2099_v39 = vld [vmem:[%s14791_s4 + $0x490] sm:$0xff] }
 0x99d   :  { %8151 = vmatmul.msk.f32.gmra.mxu2 %vm265_vm2, %v2096_v56 }
 0x99e   :  { %2679 = vmatmul.f32.gmra.mxu3 %v2078_v31  ;;  %v11333_v14 = vpop.f32.mrf.mxu0  ;;  %v11335_v20 = vpop.f32.mrf.mxu2 }
 0x99f   :  { %14868 = vst [vmem:[#allocation40_spill] sm:$0xff] %v11333_v14 }
 0x9a0   :  { %14869 = vst [vmem:[#allocation41_spill] sm:$0xff] %v11335_v20 }
 0x9a1   :  { %v11324_v7 = vpop.f32.mrf.mxu3 }
 0x9a3   :  { %2828 = vmatmul.f32.gmra.mxu0 %v2095_v15 }
 0x9a5   :  { %8152 = vmatmul.msk.f32.gmra.mxu2 %vm265_vm2, %v2100_v9  ;;  %v2094_v9 = vld [vmem:[%s14791_s4 + $0x468] sm:$0xff] }
 0x9a6   :  { %2682 = vmatmul.f32.gmra.mxu3 %v2082_v27  ;;  %v2784_v38 = vpop.f32.mrf.mxu0  ;;  %v2921_v31 = vpop.f32.mrf.mxu2  ;;  %v2090_v27 = vld [vmem:[%s14791_s4 + $0x448] sm:$0xff] }
 0x9a9   :  { %v11340_v29 = vpop.f32.mrf.mxu3 }
 0x9ab   :  { %2831 = vmatmul.f32.gmra.mxu0 %v2099_v39 }
 0x9ae   :  { %2685 = vmatmul.f32.gmra.mxu3 %v2086_v44  ;;  %v2787_v15 = vpop.f32.mrf.mxu0  ;;  %v2924_v20 = vpop.f32.mrf.mxu2 }
 0x9b1   :  { %v11352_v56 = vpop.f32.mrf.mxu3 }
 0x9b6   :  { %2688 = vmatmul.f32.gmra.mxu3 %v2090_v27  ;;  %v2927_v39 = vpop.f32.mrf.mxu2  ;;  %v2511_v27 = vadd.f32 %v10817_v54, %v10973_v19  ;;  %v2517_v19 = vadd.f32 %v10841_v36, %v11018_v33 }
 0x9b8   :  { %v2790_v44 = vpop.f32.mrf.mxu0 }
 0x9b9   :  { %v11357_v14 = vpop.f32.mrf.mxu3 }
 0x9ba   :  { %14870 = vst [vmem:[#allocation42_spill] sm:$0xff] %v11357_v14 }
 0x9be   :  { %2691 = vmatmul.f32.gmra.mxu3 %v2094_v9  ;;  %v2514_v9 = vadd.f32 %v10829_v6, %v10996_v3 }
 0x9c0   :  { %v2793_v17 = vpop.f32.mrf.mxu0  ;;  %v2930_v4 = vpop.f32.mrf.mxu2 }
 0x9c1   :  { %v11362_v53 = vpop.f32.mrf.mxu3 }
 0x9c2   :  { %14871 = vst [vmem:[#allocation43_spill] sm:$0xff] %v11362_v53 }
 0x9c6   :  { %2694 = vmatmul.f32.gmra.mxu3 %v2098_v37 }
 0x9c8   :  { %v11372_v58 = vpop.f32.mrf.mxu0  ;;  %v11374_v21 = vpop.f32.mrf.mxu2 }
 0x9c9   :  { %v2647_v10 = vpop.f32.mrf.mxu3 }
 0x9ca   :  { %v2648_v14 = vadd.f32 %v2647_v10, %v2511_v27  ;;  %v2108_v27 = vld [vmem:[%s14791_s4 + $0x4d8] sm:$0xff] }
 0x9cc   :  { %v2785_v47 = vadd.f32 %v2784_v38, %v2648_v14 }
 0x9ce   :  { %v2922_v60 = vadd.f32 %v2921_v31, %v2785_v47 }
 0x9d0   :  { %3031 = vrot.lane.b32.xlu0 %v2922_v60, %s9083_s8  ;;  %v11379_v6 = vpop.f32.mrf.mxu0  ;;  %v11381_v60 = vpop.f32.mrf.mxu2 }
 0x9d1   :  { %v2650_v53 = vpop.f32.mrf.mxu3 }
 0x9d2   :  { %v2651_v5 = vadd.f32 %v2650_v53, %v2514_v9  ;;  %v2520_v53 = vadd.f32 %v10853_v43, %v11039_v24  ;;  %v2104_v43 = vld [vmem:[%s14791_s4 + $0x4b8] sm:$0xff] }
 0x9d3   :  { %8153 = vmatmul.msk.f32.gmra.mxu2 %vm265_vm2, %v2104_v43  ;;  %v2111_v43 = vld [vmem:[%s14791_s4 + $0x4f0] sm:$0xff] }
 0x9d4   :  { %v2788_v37 = vadd.f32 %v2787_v15, %v2651_v5 }
 0x9d6   :  { %v2925_v54 = vadd.f32 %v2924_v20, %v2788_v37 }
 0x9d8   :  { %3033 = vrot.lane.b32.xlu1 %v2925_v54, %s9083_s8  ;;  %v11386_v36 = vpop.f32.mrf.mxu0  ;;  %v11389_v15 = vpop.f32.mrf.mxu2  ;;  %v2107_v54 = vld [vmem:[%s14791_s4 + $0x4d0] sm:$0xff] }
 0x9d9   :  { %v2653_v47 = vpop.f32.mrf.mxu3 }
 0x9da   :  { %v2654_v10 = vadd.f32 %v2653_v47, %v2517_v19 }
 0x9db   :  { %8154 = vmatmul.msk.f32.gmra.mxu2 %vm265_vm2, %v2108_v27 }
 0x9dc   :  { %v2791_v14 = vadd.f32 %v2790_v44, %v2654_v10  ;;  %v2102_v44 = vld [vmem:[%s14791_s4 + $0x4a8] sm:$0xff] }
 0x9dd   :  { %2697 = vmatmul.f32.gmra.mxu3 %v2102_v44 }
 0x9de   :  { %v2928_v3 = vadd.f32 %v2927_v39, %v2791_v14  ;;  %v2103_v39 = vld [vmem:[%s14791_s4 + $0x4b0] sm:$0xff] }
 0x9df   :  { %2834 = vmatmul.f32.gmra.mxu0 %v2103_v39 }
 0x9e0   :  { %3035 = vrot.lane.b32.xlu2 %v2928_v3, %s9083_s8  ;;  %v11411_v9 = vpop.f32.mrf.mxu2 }
 0x9e1   :  { %v2656_v5 = vpop.f32.mrf.mxu3 }
 0x9e2   :  { %v2657_v20 = vadd.f32 %v2656_v5, %v2520_v53  ;;  %v2110_v5 = vld [vmem:[%s14791_s4 + $0x4e8] sm:$0xff] }
 0x9e4   :  { %v2794_v38 = vadd.f32 %v2793_v17, %v2657_v20  ;;  %v2106_v17 = vld [vmem:[%s14791_s4 + $0x4c8] sm:$0xff]  ;;  %v2112_v20 = vld [vmem:[%s14791_s4 + $0x4f8] sm:$0xff] }
 0x9e5   :  { %2700 = vmatmul.f32.gmra.mxu3 %v2106_v17  ;;  %8155 = vmatmul.msk.f32.gmra.mxu2 %vm265_vm2, %v2112_v20  ;;  %v2541_v17 = vadd.f32 %v10937_v42, %v10989_v34  ;;  %v2544_v20 = vadd.f32 %v10949_v23, %v11012_v32  ;;  %v2150_v42 = vld [vmem:[%s14793_s6 + $0x128] sm:$0xff]  ;;  %v2547_v23 = vadd.f32 %v10961_v59, %v11034_v51 }
 0x9e6   :  { %v2931_v31 = vadd.f32 %v2930_v4, %v2794_v38  ;;  %v11400_v4 = vpop.f32.mrf.mxu0  ;;  %v2118_v59 = vld [vmem:[%s14793_s6 + $0x28] sm:$0xff] }
 0x9e7   :  { %2837 = vmatmul.f32.gmra.mxu0 %v2107_v54 }
 0x9e8   :  { %3037 = vrot.lane.b32.xlu0 %v2931_v31, %s9083_s8  ;;  %v11421_v47 = vpop.f32.mrf.mxu2 }
 0x9e9   :  { %v2659_v33 = vpop.f32.mrf.mxu3  ;;  %14873 = vst [vmem:[#allocation45_spill] sm:$0xff] %v11421_v47 }
 0x9ed   :  { %2703 = vmatmul.f32.gmra.mxu3 %v2110_v5 }
 0x9ee   :  { %v11419_v19 = vpop.f32.mrf.mxu0 }
 0x9ef   :  { %14872 = vst [vmem:[#allocation44_spill] sm:$0xff] %v11419_v19  ;;  %2840 = vmatmul.f32.gmra.mxu0 %v2111_v43  ;;  %v2523_v43 = vadd.f32 %v10865_v45, %v11057_v57  ;;  %v2493_v45 = vadd.f32 %v10741_v2, %v11064_v0 }
 0x9f0   :  { %v11427_v3 = vpop.f32.mrf.mxu2 }
 0x9f1   :  { %v11398_v24 = vpop.f32.mrf.mxu3  ;;  %14875 = vst [vmem:[#allocation47_spill] sm:$0xff] %v11427_v3 }
 0x9f6   :  { %v11425_v14 = vpop.f32.mrf.mxu0 }
 0x9f7   :  { %14874 = vst [vmem:[#allocation46_spill] sm:$0xff] %v11425_v14 }
 0x9f8   :  { %v2951_v44 = vpop.f32.mrf.mxu2 }
 0x9f9   :  { %v11414_v37 = vpop.f32.mrf.mxu3 }
 0x9fe   :  { %v2814_v38 = vpop.f32.mrf.mxu0 }
 0xa00   :  { %v2954_v5 = vpop.f32.mrf.mxu2 }
 0xa01   :  { %v11423_v10 = vpop.f32.mrf.mxu3 }
 0xa06   :  { %v2817_v27 = vpop.f32.mrf.mxu0 }
 0xa08   :  { %v2957_v34 = vpop.f32.mrf.mxu2 }
 0xa09   :  { %v11429_v53 = vpop.f32.mrf.mxu3 }
 0xa0a   :  { %14876 = vst [vmem:[#allocation48_spill] sm:$0xff] %v11429_v53 }
 0xa0e   :  { %v2820_v19 = vpop.f32.mrf.mxu0 }
 0xa10   :  { %v2960_v51 = vpop.f32.mrf.mxu2 }
 0xa11   :  { %v11438_v31 = vpop.f32.mrf.mxu3 }
 0xa12   :  { %14877 = vst [vmem:[#allocation49_spill] sm:$0xff] %v11438_v31 }
 0xa19   :  { %v2677_v39 = vpop.f32.mrf.mxu3 }
 0xa1a   :  { %v2678_v54 = vadd.f32 %v2677_v39, %v2541_v17  ;;  %v2550_v17 = vadd.f32 %v10975_v8, %v11055_v55  ;;  %v2151_v39 = vld [vmem:[%s14793_s6 + $0x130] sm:$0xff]  ;;  %v2553_v8 = vadd.f32 %v10991_v62, %v11073_v18  ;;  %v2141_v62 = vld [vmem:[%s14793_s6 + $0xe0] sm:$0xff] }
 0xa1b   :  { %v2131_v18 = vld [vmem:[%s14793_s6 + $0x90] sm:$0xff] }
 0xa1c   :  { %v2815_v3 = vadd.f32 %v2814_v38, %v2678_v54  ;;  %v2660_v38 = vadd.f32 %v2659_v33, %v2523_v43 }
 0xa1e   :  { %v2952_v14 = vadd.f32 %v2951_v44, %v2815_v3  ;;  %v2630_v44 = vadd.f32 %v11308_v35, %v2493_v45 }
 0xa20   :  { %3071 = vrot.lane.b32.xlu1 %v2952_v14, %s9084_s14  ;;  %v2797_v14 = vadd.f32 %v11372_v58, %v2660_v38  ;;  %v2767_v0 = vadd.f32 %v11249_v49, %v2630_v44  ;;  %v2963_v49 = vpop.f32.mrf.mxu2  ;;  %v2119_v44 = vld [vmem:[%s14793_s6 + $0x30] sm:$0xff] }
 0xa21   :  { %v2680_v31 = vpop.f32.mrf.mxu3 }
 0xa22   :  { %v2681_v47 = vadd.f32 %v2680_v31, %v2544_v20  ;;  %v2934_v33 = vadd.f32 %v11374_v21, %v2797_v14  ;;  %v2904_v35 = vadd.f32 %v11251_v30, %v2767_v0  ;;  %v2496_v30 = vadd.f32 %v10770_v26, %v11080_v40  ;;  %v2266_v14 = vpop.permute.xlu0 %2265 }
 0xa23   :  { %v2556_v26 = vadd.f32 %v11007_v11, %v11108_v61  ;;  %v2499_v61 = vadd.f32 %v10791_v50, %v11127_v25  ;;  %v3134_v50 = vld [vmem:[%s14788_s1 + $0x38] sm:$0xf] }
 0xa24   :  { %v2818_v53 = vadd.f32 %v2817_v27, %v2681_v47  ;;  %v2823_v47 = vpop.f32.mrf.mxu0  ;;  %v2633_v43 = vadd.f32 %v11324_v7, %v2496_v30  ;;  %8156 = vmatpush.msk.msrb.mxu1 %vm3166_vm6, %v3134_v50 }
 0xa26   :  { %v2955_v3 = vadd.f32 %v2954_v5, %v2818_v53  ;;  %v2526_v5 = vadd.f32 %v10877_v1, %v11093_v28  ;;  %v2770_v28 = vadd.f32 %v11266_v48, %v2633_v43  ;;  %v2142_v48 = vld [vmem:[%s14793_s6 + $0xe8] sm:$0xff] }
 0xa28   :  { %2267 = vrot.lane.b32.xlu1 %v2150_v42, %s9080_s28  ;;  %3073 = vrot.lane.b32.xlu2 %v2955_v3, %s9084_s14  ;;  %v2663_v42 = vadd.f32 %v11398_v24, %v2526_v5  ;;  %v2966_v7 = vpop.f32.mrf.mxu2  ;;  %v2907_v24 = vadd.f32 %v11268_v16, %v2770_v28  ;;  %v2132_v16 = vld [vmem:[%s14793_s6 + $0x98] sm:$0xff] }
 0xa29   :  { %v2683_v32 = vpop.f32.mrf.mxu3 }
 0xa2a   :  { %v2684_v31 = vadd.f32 %v2683_v32, %v2547_v23  ;;  %v2800_v38 = vadd.f32 %v11379_v6, %v2663_v42  ;;  %v2152_v6 = vld [vmem:[%s14793_s6 + $0x138] sm:$0xff] }
 0xa2c   :  { %v2821_v57 = vadd.f32 %v2820_v19, %v2684_v31  ;;  %v2826_v27 = vpop.f32.mrf.mxu0  ;;  %v2937_v32 = vadd.f32 %v11381_v60, %v2800_v38  ;;  %v2246_v60 = vpop.permute.xlu2 %2245  ;;  %v2636_v31 = vadd.f32 %v11340_v29, %v2499_v61  ;;  %v2559_v29 = vadd.f32 %v11025_v13, %v2266_v14 }
 0xa2d   :  { %v2248_v13 = vpop.permute.xlu0 %2247 }
 0xa2e   :  { %v2958_v53 = vadd.f32 %v2957_v34, %v2821_v57  ;;  %v2773_v25 = vadd.f32 %v11283_v52, %v2636_v31  ;;  %v2529_v57 = vadd.f32 %v10889_v22, %v2246_v60  ;;  %v14882_v60 = vld [vmem:[#allocation22_spill] sm:$0xff] }
 0xa30   :  { %3039 = vrot.lane.b32.xlu1 %v2934_v33, %s9083_s8  ;;  %3075 = vrot.lane.b32.xlu0 %v2958_v53, %s9084_s14  ;;  %v2666_v33 = vadd.f32 %v11414_v37, %v2529_v57  ;;  %v2532_v37 = vadd.f32 %v10901_v46, %v2248_v13 }
 0xa31   :  { %2203 = vrot.lane.b32.xlu2 %v2118_v59, %s9080_s28  ;;  %v2686_v2 = vpop.f32.mrf.mxu3  ;;  %v2910_v59 = vadd.f32 %v11285_v12, %v2773_v25 }
 0xa32   :  { %v2687_v58 = vadd.f32 %v2686_v2, %v2550_v17  ;;  %v2803_v52 = vadd.f32 %v11386_v36, %v2666_v33  ;;  %v2969_v2 = vpop.f32.mrf.mxu2 }
 0xa34   :  { %v2824_v21 = vadd.f32 %v2823_v47, %v2687_v58  ;;  %v2829_v40 = vpop.f32.mrf.mxu0  ;;  %v2120_v47 = vld [vmem:[%s14793_s6 + $0x38] sm:$0xff]  ;;  %v2228_v22 = vpop.permute.xlu2 %2227  ;;  %v2940_v12 = vadd.f32 %v11389_v15, %v2803_v52 }
 0xa35   :  { %v2502_v0 = vadd.f32 %v10802_v41, %v2228_v22 }
 0xa36   :  { %v2961_v19 = vadd.f32 %v2960_v51, %v2824_v21  ;;  %v2669_v21 = vadd.f32 %v11423_v10, %v2532_v37 }
 0xa37   :  { %v2639_v58 = vadd.f32 %v11352_v56, %v2502_v0  ;;  %v14878_v56 = vld [vmem:[#allocation19_spill] sm:$0xff] }
 0xa38   :  { %3077 = vrot.lane.b32.xlu1 %v2961_v19, %s9084_s14  ;;  %2999 = vrot.lane.b32.xlu0 %v2904_v35, %s9082_s11  ;;  %v2121_v19 = vld [vmem:[%s14793_s6 + $0x40] sm:$0xff]  ;;  %v2806_v46 = vadd.f32 %v11400_v4, %v2669_v21  ;;  %v2994_v4 = vpop.permute.xlu0 %2993  ;;  %v14886_v21 = vld [vmem:[#allocation14_spill] sm:$0xff] }
 0xa39   :  { %2269 = vrot.lane.b32.xlu2 %v2151_v39, %s9080_s28  ;;  %v2689_v55 = vpop.f32.mrf.mxu3  ;;  %v2776_v41 = vadd.f32 %v11300_v63, %v2639_v58  ;;  %v2122_v39 = vld [vmem:[%s14793_s6 + $0x48] sm:$0xff]  ;;  %v2996_v63 = vpop.permute.xlu1 %2995  ;;  %v14885_v58 = vld [vmem:[#allocation24_spill] sm:$0xff] }
 0xa3a   :  { %v2690_v54 = vadd.f32 %v2689_v55, %v2553_v8  ;;  %v2943_v15 = vadd.f32 %v11411_v9, %v2806_v46 }
 0xa3b   :  { %v2913_v36 = vadd.f32 %v14878_v56, %v2776_v41 }
 0xa3c   :  { %v2827_v20 = vadd.f32 %v2826_v27, %v2690_v54  ;;  %v2832_v51 = vpop.f32.mrf.mxu0  ;;  %v2992_v10 = vpop.permute.xlu2 %2991 }
 0xa3e   :  { %v2964_v34 = vadd.f32 %v2963_v49, %v2827_v20 }
 0xa40   :  { %2249 = vrot.lane.b32.xlu1 %v2141_v62, %s9080_s28  ;;  %2229 = vrot.lane.b32.xlu0 %v2131_v18, %s9080_s28  ;;  %v14879_v62 = vld [vmem:[#allocation9_spill] sm:$0xff] }
 0xa41   :  { %3079 = vrot.lane.b32.xlu2 %v2964_v34, %s9084_s14  ;;  %v2692_v1 = vpop.f32.mrf.mxu3  ;;  %v3102_v18 = vsel %vm3101_vm7, %v14879_v62, %v2992_v10  ;;  %v14892_v62 = vld [vmem:[#allocation48_spill] sm:$0xff] }
 0xa42   :  { %v2693_v3 = vadd.f32 %v2692_v1, %v2556_v26  ;;  %v3032_v20 = vpop.permute.xlu0 %3031 }
 0xa43   :  { %v3113_v43 = vsel %vm3112_vm8, %v3102_v18, %v3032_v20 }
 0xa44   :  { %v2830_v23 = vadd.f32 %v2829_v40, %v2693_v3  ;;  %v2998_v27 = vpop.permute.xlu2 %2997  ;;  %v14880_v40 = vld [vmem:[#allocation23_spill] sm:$0xff] }
 0xa46   :  { %v2967_v11 = vadd.f32 %v2966_v7, %v2830_v23 }
 0xa48   :  { %3041 = vrot.lane.b32.xlu1 %v2937_v32, %s9083_s8  ;;  %3001 = vrot.lane.b32.xlu0 %v2907_v24, %s9082_s11  ;;  %v14881_v24 = vld [vmem:[#allocation25_spill] sm:$0xff] }
 0xa49   :  { %3081 = vrot.lane.b32.xlu2 %v2967_v11, %s9084_s14  ;;  %v2695_v45 = vpop.f32.mrf.mxu3  ;;  %v3103_v32 = vsel %vm3101_vm7, %v14881_v24, %v2994_v4  ;;  %v14889_v4 = vld [vmem:[#allocation7_spill] sm:$0xff] }
 0xa4a   :  { %v2696_v53 = vadd.f32 %v2695_v45, %v2559_v29  ;;  %v3034_v54 = vpop.permute.xlu1 %3033  ;;  %v14883_v45 = vld [vmem:[#allocation27_spill] sm:$0xff] }
 0xa4b   :  { %v3114_v11 = vsel %vm3112_vm8, %v3103_v32, %v3034_v54  ;;  %v3104_v57 = vsel %vm3101_vm7, %v14883_v45, %v2996_v63  ;;  %v14890_v54 = vld [vmem:[#allocation5_spill] sm:$0xff] }
 0xa4c   :  { %v2833_v17 = vadd.f32 %v2832_v51, %v2696_v53  ;;  %v3036_v8 = vpop.permute.xlu2 %3035  ;;  %v14884_v51 = vld [vmem:[#allocation29_spill] sm:$0xff] }
 0xa4d   :  { %v3105_v22 = vsel %vm3101_vm7, %v14884_v51, %v2998_v27  ;;  %v14901_v45 = vld [vmem:[#allocation49_spill] sm:$0xff] }
 0xa4e   :  { %v2970_v35 = vadd.f32 %v2969_v2, %v2833_v17 }
 0xa50   :  { %2251 = vrot.lane.b32.xlu1 %v2142_v48, %s9080_s28  ;;  %2231 = vrot.lane.b32.xlu0 %v2132_v16, %s9080_s28 }
 0xa51   :  { %2271 = vrot.lane.b32.xlu2 %v2152_v6, %s9080_s28 }
 0xa56   :  { %v2972_v5 = vpop.f32.mrf.mxu2 }
 0xa58   :  { %2207 = vrot.lane.b32.xlu1 %v2120_v47, %s9080_s28  ;;  %2205 = vrot.lane.b32.xlu0 %v2119_v44, %s9080_s28  ;;  %v3115_v47 = vsel %vm3112_vm8, %v3104_v57, %v3036_v8 }
 0xa59   :  { %3003 = vrot.lane.b32.xlu2 %v2910_v59, %s9082_s11 }
 0xa5a   :  { %v3038_v61 = vpop.permute.xlu0 %3037 }
 0xa5b   :  { %v3116_v13 = vsel %vm3112_vm8, %v3105_v22, %v3038_v61  ;;  %v14905_v22 = vld [vmem:[#allocation41_spill] sm:$0xff] }
 0xa5c   :  { %v2835_v9 = vpop.f32.mrf.mxu0 }
 0xa5e   :  { %v2975_v7 = vpop.f32.mrf.mxu2 }
 0xa60   :  { %3083 = vrot.lane.b32.xlu1 %v2970_v35, %s9084_s14  ;;  %3043 = vrot.lane.b32.xlu0 %v2940_v12, %s9083_s8  ;;  %v2698_v49 = vpop.f32.mrf.mxu3 }
 0xa61   :  { %2209 = vrot.lane.b32.xlu2 %v2121_v19, %s9080_s28  ;;  %v14887_v19 = vld [vmem:[#allocation31_spill] sm:$0xff] }
 0xa64   :  { %v2838_v38 = vpop.f32.mrf.mxu0 }
 0xa68   :  { %3045 = vrot.lane.b32.xlu1 %v2943_v15, %s9083_s8  ;;  %3005 = vrot.lane.b32.xlu0 %v2913_v36, %s9082_s11  ;;  %v2701_v1 = vpop.f32.mrf.mxu3  ;;  %v2978_v36 = vpop.f32.mrf.mxu2 }
 0xa6c   :  { %v2841_v46 = vpop.f32.mrf.mxu0 }
 0xa70   :  { %2211 = vrot.lane.b32.xlu0 %v2122_v39, %s9080_s28  ;;  %v2704_v37 = vpop.f32.mrf.mxu3  ;;  %v14888_v39 = vld [vmem:[#allocation33_spill] sm:$0xff] }
 0xa82   :  { %v3074_v55 = vpop.permute.xlu2 %3073 }
 0xa83   :  { %v3125_v6 = vsel %vm3123_vm10, %v3114_v11, %v3074_v55 }
 0xa8b   :  { %v2204_v30 = vpop.permute.xlu2 %2203 }
 0xa8c   :  { %v2466_v35 = vadd.f32 %v14886_v21, %v2204_v30  ;;  %v14909_v21 = vld [vmem:[#allocation11_spill] sm:$0xff] }
 0xa8e   :  { %v2603_v27 = vadd.f32 %v14888_v39, %v2466_v35 }
 0xa92   :  { %v3072_v42 = vpop.permute.xlu1 %3071 }
 0xa93   :  { %v3124_v34 = vsel %vm3123_vm10, %v3113_v43, %v3072_v42  ;;  %v2270_v26 = vpop.permute.xlu2 %2269  ;;  %v14893_v43 = vld [vmem:[#allocation42_spill] sm:$0xff] }
 0xa94   :  { %v2565_v28 = vadd.f32 %v14880_v40, %v2270_v26  ;;  %8157 = vmatmul.msk.f32.vlgmr.msrb.gmra.mxu1 %vm3135_vm9, %v3124_v34  ;;  %v14894_v34 = vld [vmem:[#allocation44_spill] sm:$0xff] }
 0xa96   :  { %v2702_v3 = vadd.f32 %v2701_v1, %v2565_v28  ;;  %v14895_v1 = vld [vmem:[#allocation20_spill] sm:$0xff]  ;;  %v14896_v28 = vld [vmem:[#allocation26_spill] sm:$0xff] }
 0xa98   :  { %v2839_v23 = vadd.f32 %v2838_v38, %v2702_v3  ;;  %v14897_v3 = vld [vmem:[#allocation21_spill] sm:$0xff] }
 0xa9a   :  { %v2976_v48 = vadd.f32 %v2975_v7, %v2839_v23  ;;  %v2268_v16 = vpop.permute.xlu1 %2267  ;;  %v14898_v23 = vld [vmem:[#allocation45_spill] sm:$0xff] }
 0xa9b   :  { %v2562_v14 = vadd.f32 %v14882_v60, %v2268_v16  ;;  %v3080_v31 = vpop.permute.xlu2 %3079 }
 0xa9c   :  { %3087 = vrot.lane.b32.xlu0 %v2976_v48, %s9084_s14  ;;  %8158 = vmatmul.msk.f32.gmra.mxu1 %vm3135_vm9, %v3125_v6 }
 0xa9d   :  { %v2699_v50 = vadd.f32 %v2698_v49, %v2562_v14  ;;  %v14899_v14 = vld [vmem:[#allocation6_spill] sm:$0xff] }
 0xa9f   :  { %v2836_v25 = vadd.f32 %v2835_v9, %v2699_v50  ;;  %v14900_v50 = vld [vmem:[#allocation8_spill] sm:$0xff] }
 0xaa1   :  { %v2973_v29 = vadd.f32 %v2972_v5, %v2836_v25  ;;  %v14891_v5 = vld [vmem:[#allocation10_spill] sm:$0xff] }
 0xaa2   :  { %v3040_v44 = vpop.permute.xlu1 %3039  ;;  %v3076_v33 = vpop.permute.xlu0 %3075  ;;  %v2740_v20 = vadd.f32 %v14891_v5, %v2603_v27  ;;  %v14911_v27 = vld [vmem:[#allocation16_spill] sm:$0xff] }
 0xaa3   :  { %v3126_v53 = vsel %vm3123_vm10, %v3115_v47, %v3076_v33  ;;  %v3082_v59 = vpop.permute.xlu2 %3081  ;;  %3085 = vrot.lane.b32.xlu2 %v2973_v29, %s9084_s14  ;;  %v14902_v29 = vld [vmem:[#allocation43_spill] sm:$0xff] }
 0xaa4   :  { %8159 = vmatmul.msk.f32.gmra.mxu1 %vm3135_vm9, %v3126_v53  ;;  %v2877_v38 = vadd.f32 %v14896_v28, %v2740_v20  ;;  %v14904_v53 = vld [vmem:[#allocation40_spill] sm:$0xff] }
 0xaaa   :  { %v3078_v52 = vpop.permute.xlu1 %3077  ;;  %v3000_v17 = vpop.permute.xlu0 %2999 }
 0xaab   :  { %v3127_v2 = vsel %vm3123_vm10, %v3116_v13, %v3078_v52  ;;  %v2272_v0 = vpop.permute.xlu2 %2271  ;;  %v3106_v41 = vsel %vm3101_vm7, %v14887_v19, %v3000_v17  ;;  %v14906_v52 = vld [vmem:[#allocation47_spill] sm:$0xff]  ;;  %v14910_v19 = vld [vmem:[#allocation28_spill] sm:$0xff] }
 0xaac   :  { %v2568_v12 = vadd.f32 %v14885_v58, %v2272_v0  ;;  %8160 = vmatmul.msk.f32.gmra.mxu1 %vm3135_vm9, %v3127_v2  ;;  %v3117_v15 = vsel %vm3112_vm8, %v3106_v41, %v3040_v44  ;;  %v14903_v44 = vld [vmem:[#allocation46_spill] sm:$0xff]  ;;  %v14907_v0 = vld [vmem:[#allocation15_spill] sm:$0xff]  ;;  %v14908_v58 = vld [vmem:[#allocation36_spill] sm:$0xff] }
 0xaad   :  { %v3128_v30 = vsel %vm3123_vm10, %v3117_v15, %v3080_v31 }
 0xaae   :  { %v2705_v56 = vadd.f32 %v2704_v37, %v2568_v12 }
 0xab0   :  { %v2842_v10 = vadd.f32 %v2841_v46, %v2705_v56 }
 0xab2   :  { %v2979_v8 = vadd.f32 %v2978_v36, %v2842_v10  ;;  %v2250_v63 = vpop.permute.xlu1 %2249  ;;  %v2230_v55 = vpop.permute.xlu0 %2229 }
 0xab3   :  { %v2535_v49 = vadd.f32 %v14889_v4, %v2250_v63  ;;  %v2505_v9 = vadd.f32 %v14890_v54, %v2230_v55  ;;  %v3004_v46 = vpop.permute.xlu2 %3003  ;;  %v14912_v63 = vld [vmem:[#allocation37_spill] sm:$0xff]  ;;  %v14913_v4 = vld [vmem:[#allocation12_spill] sm:$0xff] }
 0xab4   :  { %3089 = vrot.lane.b32.xlu0 %v2979_v8, %s9084_s14  ;;  %8161 = vmatmul.msk.f32.gmra.mxu1 %vm3135_vm9, %v3128_v30  ;;  %v14914_v30 = vld [vmem:[#allocation30_spill] sm:$0xff] }
 0xab5   :  { %v2672_v18 = vadd.f32 %v14892_v62, %v2535_v49  ;;  %v2642_v42 = vadd.f32 %v14893_v43, %v2505_v9 }
 0xab7   :  { %v2809_v26 = vadd.f32 %v14894_v34, %v2672_v18  ;;  %v2779_v40 = vadd.f32 %v14895_v1, %v2642_v42 }
 0xab9   :  { %v2916_v7 = vadd.f32 %v14897_v3, %v2779_v40  ;;  %v2946_v24 = vadd.f32 %v14898_v23, %v2809_v26  ;;  %v14915_v40 = vld [vmem:[#allocation17_spill] sm:$0xff]  ;;  %v14916_v3 = vld [vmem:[#allocation38_spill] sm:$0xff] }
 0xaba   :  { %v3042_v32 = vpop.permute.xlu1 %3041  ;;  %v3002_v11 = vpop.permute.xlu0 %3001 }
 0xabb   :  { %v3107_v61 = vsel %vm3101_vm7, %v2877_v38, %v3002_v11  ;;  %3007 = vrot.lane.b32.xlu1 %v2916_v7, %s9082_s11  ;;  %3047 = vrot.lane.b32.xlu2 %v2946_v24, %s9083_s8  ;;  %v2210_v54 = vpop.permute.xlu2 %2209  ;;  %v14917_v24 = vld [vmem:[#allocation13_spill] sm:$0xff] }
 0xabc   :  { %v3118_v48 = vsel %vm3112_vm8, %v3107_v61, %v3042_v32  ;;  %v2475_v28 = vadd.f32 %v14915_v40, %v2210_v54  ;;  %v3263_v40 = vld [vmem:[%s14789_s2 + $0x130] sm:$0xff] }
 0xabd   :  { %v3129_v16 = vsel %vm3123_vm10, %v3118_v48, %v3082_v59  ;;  %v14918_v48 = vld [vmem:[#allocation32_spill] sm:$0xff] }
 0xabe   :  { %8162 = vmatmul.msk.f32.gmra.mxu1 %vm3135_vm9, %v3129_v16  ;;  %v2612_v7 = vadd.f32 %v14916_v3, %v2475_v28  ;;  %v3265_v28 = vld [vmem:[%s14789_s2 + $0x188] sm:$0xff]  ;;  %v3269_v3 = vld [vmem:[%s14789_s2 + $0x238] sm:$0xff] }
 0xac0   :  { %v2749_v32 = vadd.f32 %v14917_v24, %v2612_v7  ;;  %v3271_v7 = vld [vmem:[%s14789_s2 + $0x290] sm:$0xff]  ;;  %v3275_v24 = vld [vmem:[%s14789_s2 + $0x340] sm:$0xff] }
 0xac2   :  { %v2252_v6 = vpop.permute.xlu1 %2251  ;;  %v2232_v60 = vpop.permute.xlu0 %2231  ;;  %v2886_v16 = vadd.f32 %v14918_v48, %v2749_v32 }
 0xac3   :  { %v2538_v31 = vadd.f32 %v14899_v14, %v2252_v6  ;;  %v2508_v25 = vadd.f32 %v14900_v50, %v2232_v60 }
 0xac5   :  { %v2675_v57 = vadd.f32 %v14901_v45, %v2538_v31  ;;  %v2645_v47 = vadd.f32 %v14902_v29, %v2508_v25  ;;  %v14919_v25 = vld [vmem:[#allocation18_spill] sm:$0xff] }
 0xac7   :  { %v2812_v33 = vadd.f32 %v14903_v44, %v2675_v57  ;;  %v2782_v51 = vadd.f32 %v14904_v53, %v2645_v47  ;;  %v14920_v47 = vld [vmem:[#allocation39_spill] sm:$0xff] }
 0xac9   :  { %v2919_v13 = vadd.f32 %v14905_v22, %v2782_v51  ;;  %v2949_v59 = vadd.f32 %v14906_v52, %v2812_v33  ;;  %v14921_v33 = vld [vmem:[#allocation34_spill] sm:$0xff] }
 0xaca   :  { %v2208_v17 = vpop.permute.xlu1 %2207  ;;  %v2206_v2 = vpop.permute.xlu0 %2205 }
 0xacb   :  { %v2469_v37 = vadd.f32 %v14907_v0, %v2206_v2  ;;  %3009 = vrot.lane.b32.xlu1 %v2919_v13, %s9082_s11  ;;  %3049 = vrot.lane.b32.xlu2 %v2949_v59, %s9083_s8  ;;  %v2472_v8 = vadd.f32 %v14911_v27, %v2208_v17  ;;  %v14922_v13 = vld [vmem:[#allocation35_spill] sm:$0xff] }
 0xacd   :  { %v2606_v12 = vadd.f32 %v14908_v58, %v2469_v37  ;;  %v2609_v55 = vadd.f32 %v14912_v63, %v2472_v8  ;;  %v9085_v63 = vmov 3  }
 0xace   :  { %8682 = vset.pattern.permute.xlu0 %v9085_v63  ;;  %8683 = vset.pattern.permute.xlu1 %v9085_v63 }
 0xacf   :  { %v2743_v35 = vadd.f32 %v14909_v21, %v2606_v12  ;;  %v2746_v49 = vadd.f32 %v14913_v4, %v2609_v55  ;;  %v11670_v55 = vld [vmem:[%s14792_s5] sm:$0xff]  ;;  %8684 = vset.pattern.permute.xlu2 %v9085_v63 }
 0xad1   :  { %v2880_v41 = vadd.f32 %v14910_v19, %v2743_v35  ;;  %v2883_v5 = vadd.f32 %v14914_v30, %v2746_v49  ;;  %v11678_v49 = vld [vmem:[%s14792_s5 + $0x10] sm:$0xff]  ;;  %v11691_v30 = vld [vmem:[%s14792_s5 + $0x20] sm:$0xff] }
 0xad2   :  { %v3044_v56 = vpop.permute.xlu0 %3043  ;;  %v3084_v15 = vpop.permute.xlu1 %3083 }
 0xad3   :  { %v3108_v36 = vsel %vm3101_vm7, %v2880_v41, %v3004_v46 }
 0xad4   :  { %v3119_v10 = vsel %vm3112_vm8, %v3108_v36, %v3044_v56 }
 0xad5   :  { %v3130_v39 = vsel %vm3123_vm10, %v3119_v10, %v3084_v15 }
 0xad6   :  { %8163 = vmatmul.msk.f32.gmra.mxu1 %vm3135_vm9, %v3130_v39 }
 0xada   :  { %v3006_v9 = vpop.permute.xlu0 %3005  ;;  %v3046_v20 = vpop.permute.xlu1 %3045 }
 0xadb   :  { %v3109_v62 = vsel %vm3101_vm7, %v2883_v5, %v3006_v9  ;;  %v11685_v9 = vld [vmem:[%s14792_s5 + $0x28] sm:$0xff] }
 0xadc   :  { %v3120_v18 = vsel %vm3112_vm8, %v3109_v62, %v3046_v20  ;;  %v11697_v5 = vld [vmem:[%s14792_s5 + $0x8] sm:$0xff]  ;;  %v11704_v20 = vld [vmem:[%s14792_s5 + $0x40] sm:$0xff]  ;;  %v11711_v62 = vld [vmem:[%s14792_s5 + $0x38] sm:$0xff] }
 0xae2   :  { %v2212_v23 = vpop.permute.xlu0 %2211 }
 0xae3   :  { %v2478_v45 = vadd.f32 %v14919_v25, %v2212_v23  ;;  %v3273_v23 = vld [vmem:[%s14789_s2 + $0x2e8] sm:$0xff] }
 0xae5   :  { %v2615_v44 = vadd.f32 %v14920_v47, %v2478_v45  ;;  %v3266_v45 = vld [vmem:[%s14789_s2 + $0x190] sm:$0xff]  ;;  %v3270_v47 = vld [vmem:[%s14789_s2 + $0x240] sm:$0xff] }
 0xae7   :  { %v2752_v53 = vadd.f32 %v14921_v33, %v2615_v44  ;;  %v3272_v33 = vld [vmem:[%s14789_s2 + $0x298] sm:$0xff] }
 0xae9   :  { %v2889_v52 = vadd.f32 %v14922_v13, %v2752_v53  ;;  %v3276_v13 = vld [vmem:[%s14789_s2 + $0x348] sm:$0xff] }
 0xafd   :  { %v3086_v43 = vpop.permute.xlu2 %3085 }
 0xafe   :  { %v3131_v42 = vsel %vm3123_vm10, %v3120_v18, %v3086_v43  ;;  %v3257_v18 = vld [vmem:[%s14789_s2 + $0x28] sm:$0xff]  ;;  %v11722_v43 = vld [vmem:[%s14792_s5 + $0x18] sm:$0xff] }
 0xaff   :  { %8164 = vmatmul.msk.f32.gmra.mxu1 %vm3135_vm9, %v3131_v42  ;;  %v3259_v42 = vld [vmem:[%s14789_s2 + $0x80] sm:$0xff] }
 0xb0e   :  { %v3088_v31 = vpop.permute.xlu0 %3087 }
 0xb11   :  { %v11634_v34 = vpop.f32.mrf.mxu1 }
 0xb15   :  { %v3048_v60 = vpop.permute.xlu2 %3047 }
 0xb19   :  { %v11636_v26 = vpop.f32.mrf.mxu1 }
 0xb1a   :  { %v8667_v1 = vpack.i.bf16 %v11634_v34, %v11636_v26 }
 0xb1c   :  { %8668 = vrot.lane.b32.xlu0 %v8667_v1, %s9075_s21  ;;  %v11740_v1 = vld [vmem:[%s14792_s5 + $0x48] sm:$0xff] }
 0xb21   :  { %v11642_v38 = vpop.f32.mrf.mxu1 }
 0xb24   :  { %3278 = vperm.xlu0 %8682, %v11670_v55  }
 0xb25   :  { %v3050_v17 = vpop.permute.xlu2 %3049 }
 0xb26   :  { %v3090_v0 = vpop.permute.xlu0 %3089 }
 0xb29   :  { %v11646_v11 = vpop.f32.mrf.mxu1 }
 0xb2a   :  { %v8662_v61 = vpack.i.bf16 %v11642_v38, %v11646_v11 }
 0xb2c   :  { %8663 = vrot.lane.b32.xlu2 %v8662_v61, %s9075_s21  ;;  %3298 = vperm.xlu0 %8682, %v11685_v9  }
 0xb2d   :  { %v3008_v6 = vpop.permute.xlu1 %3007 }
 0xb2e   :  { %v3110_v14 = vsel %vm3101_vm7, %v2886_v16, %v3008_v6 }
 0xb2f   :  { %v3121_v50 = vsel %vm3112_vm8, %v3110_v14, %v3048_v60  ;;  %v3258_v60 = vld [vmem:[%s14789_s2 + $0x30] sm:$0xff]  ;;  %v3260_v14 = vld [vmem:[%s14789_s2 + $0x88] sm:$0xff] }
 0xb30   :  { %v3132_v57 = vsel %vm3123_vm10, %v3121_v50, %v3088_v31  ;;  %v3262_v31 = vld [vmem:[%s14789_s2 + $0xe0] sm:$0xff]  ;;  %v3264_v50 = vld [vmem:[%s14789_s2 + $0x138] sm:$0xff] }
 0xb31   :  { %8165 = vmatmul.msk.f32.gmra.mxu1 %vm3135_vm9, %v3132_v57  ;;  %v3199_v29 = vpop.f32.mrf.mxu1 }
 0xb34   :  { %3310 = vperm.xlu0 %8682, %v11704_v20  }
 0xb3b   :  { %v3202_v51 = vpop.f32.mrf.mxu1 }
 0xb3c   :  { %v8657_v22 = vpack.i.bf16 %v3199_v29, %v3202_v51 }
 0xb3d   :  { %v3010_v59 = vpop.permute.xlu1 %3009 }
 0xb3e   :  { %v3111_v2 = vsel %vm3101_vm7, %v2889_v52, %v3010_v59  ;;  %8658 = vrot.lane.b32.xlu1 %v8657_v22, %s9075_s21 }
 0xb3f   :  { %v3122_v37 = vsel %vm3112_vm8, %v3111_v2, %v3050_v17  ;;  %v3461_v2 = vld [vmem:[%s14788_s1 + $0x40] sm:$0xff] }
 0xb40   :  { %v3133_v58 = vsel %vm3123_vm10, %v3122_v37, %v3090_v0 }
 0xb41   :  { %8166 = vmatmul.msk.f32.gmra.mxu1 %vm3135_vm9, %v3133_v58 }
 0xb53   :  { %v3205_v12 = vpop.f32.mrf.mxu1 }
 0xb7c   :  { %v3208_v21 = vpop.f32.mrf.mxu1 }
 0xb7d   :  { %v8677_v35 = vpack.i.bf16 %v3205_v12, %v3208_v21 }
 0xb7f   :  { %8678 = vrot.lane.b32.xlu2 %v8677_v35, %s9075_s21 }
 0xb86   :  { %v8664_v46 = vpop.permute.xlu2 %8663 }
 0xb87   :  { %v8665_v36 = vunpack.i.l.bf16 %v8664_v46  ;;  %v8666_v39 = vunpack.i.h.bf16 %v8664_v46  ;;  %3286 = vperm.xlu2 %8684, %v11678_v49  }
 0xb8e   :  { %v8669_v15 = vpop.permute.xlu0 %8668 }
 0xb8f   :  { %v8670_v27 = vunpack.i.l.bf16 %v8669_v15  ;;  %v8671_v8 = vunpack.i.h.bf16 %v8669_v15  ;;  %3294 = vperm.xlu2 %8684, %v11691_v30  }
 0xb96   :  { %v3279_v58 = vpop.permute.xlu0 %3278 }
 0xb97   :  { %3306 = vperm.xlu2 %8684, %v11711_v62  }
 0xbae   :  { %v3211_v10 = vpop.f32.mrf.mxu1 }
 0xbb0   :  { %v8659_v19 = vpop.permute.xlu1 %8658 }
 0xbb1   :  { %v8660_v41 = vunpack.i.l.bf16 %v8659_v19  ;;  %v8661_v56 = vunpack.i.h.bf16 %v8659_v19 }
 0xbb3   :  { %3347 = vmatpush.msra.mxu1 %v8660_v41 }
 0xbb5   :  { %3348 = vmatpush.msra.mxu1 %v8661_v56 }
 0xbb7   :  { %3349 = vmatpush.msra.mxu1 %v8665_v36 }
 0xbb9   :  { %3350 = vmatpush.msra.mxu1 %v8666_v39 }
 0xbbb   :  { %3351 = vmatpush.msra.mxu1 %v8670_v27 }
 0xbbd   :  { %3352 = vmatpush.msra.mxu1 %v8671_v8 }
 0xbbe   :  { %v3214_v4 = vpop.f32.mrf.mxu1 }
 0xbbf   :  { %v8672_v54 = vpack.i.bf16 %v3211_v10, %v3214_v4  ;;  %3353 = vmatpush.msra.mxu1 %v3214_v4 }
 0xbc1   :  { %8673 = vrot.lane.b32.xlu1 %v8672_v54, %s9075_s21  ;;  %3354 = vmatpush.msra.mxu1 %v3211_v10 }
 0xbc3   :  { %3355 = vmatpush.msra.mxu1 %v3208_v21 }
 0xbc5   :  { %3356 = vmatpush.msra.mxu1 %v3205_v12 }
 0xbc7   :  { %3357 = vmatpush.msra.mxu1 %v3202_v51  ;;  %v3274_v51 = vld [vmem:[%s14789_s2 + $0x2f0] sm:$0xff] }
 0xbc9   :  { %3358 = vmatpush.msra.mxu1 %v3199_v29  ;;  %3282 = vperm.xlu1 %8683, %v11697_v5   ;;  %v3268_v29 = vld [vmem:[%s14789_s2 + $0x1e8] sm:$0xff] }
 0xbcb   :  { %3359 = vmatpush.msra.mxu1 %v11646_v11 }
 0xbcd   :  { %3360 = vmatpush.msra.mxu1 %v11642_v38  ;;  %v3267_v38 = vld [vmem:[%s14789_s2 + $0x1e0] sm:$0xff] }
 0xbcf   :  { %3361 = vmatpush.msra.mxu1 %v11636_v26  ;;  %v11731_v26 = vld [vmem:[%s14792_s5 + $0x30] sm:$0xff] }
 0xbd1   :  { %3362 = vmatpush.msra.mxu1 %v11634_v34  ;;  %3290 = vperm.xlu1 %8683, %v11722_v43   ;;  %v3261_v34 = vld [vmem:[%s14789_s2 + $0xd8] sm:$0xff] }
 0xbd2   :  { %3363 = vmatmul.f32.vlgmr.msra.gmra.mxu1 %v3257_v18 }
 0xbd9   :  { %3302 = vperm.xlu1 %8683, %v11731_v26   ;;  %v8679_v61 = vpop.permute.xlu2 %8678 }
 0xbda   :  { %3366 = vmatmul.f32.gmra.mxu1 %v3259_v42  ;;  %v8680_v16 = vunpack.i.l.bf16 %v8679_v61  ;;  %v8681_v6 = vunpack.i.h.bf16 %v8679_v61 }
 0xbe1   :  { %3314 = vperm.xlu1 %8683, %v11740_v1   ;;  %v3287_v39 = vpop.permute.xlu2 %3286 }
 0xbe2   :  { %3369 = vmatmul.f32.gmra.mxu1 %v3261_v34 }
 0xbea   :  { %3372 = vmatmul.f32.gmra.mxu1 %v3263_v40 }
 0xbf2   :  { %3375 = vmatmul.f32.gmra.mxu1 %v3265_v28 }
 0xbfa   :  { %3378 = vmatmul.f32.gmra.mxu1 %v3267_v38 }
 0xc02   :  { %3381 = vmatmul.f32.gmra.mxu1 %v3269_v3 }
 0xc0a   :  { %3384 = vmatmul.f32.gmra.mxu1 %v3271_v7  ;;  %v3295_v7 = vpop.permute.xlu2 %3294 }
 0xc12   :  { %3387 = vmatmul.f32.gmra.mxu1 %v3273_v23 }
 0xc1a   :  { %3390 = vmatmul.f32.gmra.mxu1 %v3275_v24 }
 0xc33   :  { %v8674_v32 = vpop.permute.xlu1 %8673 }
 0xc34   :  { %v8675_v11 = vunpack.i.l.bf16 %v8674_v32  ;;  %v8676_v48 = vunpack.i.h.bf16 %v8674_v32 }
 0xc36   :  { %3406 = vmatpush.msrb.mxu1 %v8675_v11 }
 0xc38   :  { %3407 = vmatpush.msrb.mxu1 %v8676_v48  ;;  %v3299_v48 = vpop.permute.xlu0 %3298 }
 0xc3a   :  { %3408 = vmatpush.msrb.mxu1 %v8680_v16 }
 0xc3b   :  { %v3283_v41 = vpop.permute.xlu1 %3282 }
 0xc3c   :  { %3409 = vmatpush.msrb.mxu1 %v8681_v6 }
 0xc3d   :  { %8167 = vmatmul.msk.f32.vlgmr.msrb.gmra.mxu1 %vm35_vm0, %v3258_v60 }
 0xc3e   :  { %3507 = vmatpush.msra.mxu1 %v3461_v2 }
 0xc43   :  { %v3291_v42 = vpop.permute.xlu1 %3290 }
 0xc45   :  { %8168 = vmatmul.msk.f32.gmra.mxu1 %vm35_vm0, %v3260_v14 }
 0xc4d   :  { %8169 = vmatmul.msk.f32.gmra.mxu1 %vm35_vm0, %v3262_v31 }
 0xc4f   :  { %v3364_v25 = vpop.f32.mrf.mxu1 }
 0xc50   :  { %v3365_v12 = vadd.f32 %v3364_v25, %v3279_v58 }
 0xc55   :  { %8170 = vmatmul.msk.f32.gmra.mxu1 %vm35_vm0, %v3264_v50  ;;  %v3303_v50 = vpop.permute.xlu1 %3302 }
 0xc57   :  { %v3367_v57 = vpop.f32.mrf.mxu1 }
 0xc58   :  { %v3368_v56 = vadd.f32 %v3367_v57, %v3283_v41 }
 0xc5d   :  { %8171 = vmatmul.msk.f32.gmra.mxu1 %vm35_vm0, %v3266_v45 }
 0xc5f   :  { %v3370_v44 = vpop.f32.mrf.mxu1 }
 0xc60   :  { %v3371_v8 = vadd.f32 %v3370_v44, %v3287_v39  ;;  %v3307_v44 = vpop.permute.xlu2 %3306 }
 0xc65   :  { %8172 = vmatmul.msk.f32.gmra.mxu1 %vm35_vm0, %v3268_v29 }
 0xc67   :  { %v3373_v53 = vpop.f32.mrf.mxu1 }
 0xc68   :  { %v3374_v40 = vadd.f32 %v3373_v53, %v3291_v42 }
 0xc6d   :  { %8173 = vmatmul.msk.f32.gmra.mxu1 %vm35_vm0, %v3270_v47 }
 0xc6f   :  { %v3376_v22 = vpop.f32.mrf.mxu1 }
 0xc70   :  { %v3377_v24 = vadd.f32 %v3376_v22, %v3295_v7 }
 0xc75   :  { %8174 = vmatmul.msk.f32.gmra.mxu1 %vm35_vm0, %v3272_v33 }
 0xc77   :  { %v3379_v52 = vpop.f32.mrf.mxu1 }
 0xc78   :  { %v3380_v6 = vadd.f32 %v3379_v52, %v3299_v48  ;;  %v3311_v52 = vpop.permute.xlu0 %3310 }
 0xc7d   :  { %8175 = vmatmul.msk.f32.gmra.mxu1 %vm35_vm0, %v3274_v51 }
 0xc7f   :  { %v3382_v59 = vpop.f32.mrf.mxu1 }
 0xc80   :  { %v3383_v45 = vadd.f32 %v3382_v59, %v3303_v50  ;;  %v3584_v50 = vld [vmem:[%s14789_s2 + $0xf0] sm:$0xff] }
 0xc85   :  { %8176 = vmatmul.msk.f32.gmra.mxu1 %vm35_vm0, %v3276_v13 }
 0xc87   :  { %v3385_v17 = vpop.f32.mrf.mxu1 }
 0xc88   :  { %v3386_v53 = vadd.f32 %v3385_v17, %v3307_v44  ;;  %v3590_v44 = vld [vmem:[%s14789_s2 + $0x1f8] sm:$0xff] }
 0xc8f   :  { %v3388_v0 = vpop.f32.mrf.mxu1 }
 0xc90   :  { %v3389_v58 = vadd.f32 %v3388_v0, %v3311_v52  ;;  %v3596_v52 = vld [vmem:[%s14789_s2 + $0x300] sm:$0xff] }
 0xc97   :  { %v11807_v37 = vpop.f32.mrf.mxu1 }
 0xcba   :  { %v3411_v21 = vpop.f32.mrf.mxu1 }
 0xcbb   :  { %v3412_v35 = vadd.f32 %v3411_v21, %v3365_v12 }
 0xcbd   :  { %v3441_v19 = vmul.f32 0.01, %v3412_v35 }
 0xcbf   :  { %v3451_v46 = vmax.f32 %v3412_v35, %v3441_v19  ;;  %v3315_v35 = vpop.permute.xlu1 %3314 }
 0xcc0   :  { %v3392_v41 = vadd.f32 %v11807_v37, %v3315_v35  ;;  %v4023_v35 = vld [vmem:[%s14788_s1 + $0x18] sm:$0xff] }
 0xcc1   :  { %8177 = vmatmul.msk.f32.vlgmr.msra.gmra.mxu1 %vm609_vm4, %v3451_v46 }
 0xcc2   :  { %v3414_v36 = vpop.f32.mrf.mxu1 }
 0xcc3   :  { %v3415_v15 = vadd.f32 %v3414_v36, %v3368_v56 }
 0xcc5   :  { %v3442_v10 = vmul.f32 0.01, %v3415_v15 }
 0xcc7   :  { %v3452_v27 = vmax.f32 %v3415_v15, %v3442_v10 }
 0xcc9   :  { %8178 = vmatmul.msk.f32.gmra.mxu1 %vm609_vm4, %v3452_v27 }
 0xcca   :  { %v3417_v4 = vpop.f32.mrf.mxu1 }
 0xccb   :  { %v3418_v54 = vadd.f32 %v3417_v4, %v3371_v8 }
 0xccd   :  { %v3443_v18 = vmul.f32 0.01, %v3418_v54 }
 0xccf   :  { %v3453_v34 = vmax.f32 %v3418_v54, %v3443_v18 }
 0xcd1   :  { %8179 = vmatmul.msk.f32.gmra.mxu1 %vm609_vm4, %v3453_v34 }
 0xcd2   :  { %v3420_v28 = vpop.f32.mrf.mxu1 }
 0xcd3   :  { %v3421_v38 = vadd.f32 %v3420_v28, %v3374_v40 }
 0xcd5   :  { %v3444_v3 = vmul.f32 0.01, %v3421_v38 }
 0xcd7   :  { %v3454_v23 = vmax.f32 %v3421_v38, %v3444_v3  ;;  %v14803_v3 = vmov 4  }
 0xcd8   :  { %8710 = vset.pattern.permute.xlu1 %v14803_v3  ;;  %8712 = vset.pattern.permute.xlu0 %v14803_v3 }
 0xcd9   :  { %8180 = vmatmul.msk.f32.gmra.mxu1 %vm609_vm4, %v3454_v23  ;;  %8711 = vset.pattern.permute.xlu2 %v14803_v3 }
 0xcda   :  { %v3423_v32 = vpop.f32.mrf.mxu1 }
 0xcdb   :  { %v3424_v11 = vadd.f32 %v3423_v32, %v3377_v24 }
 0xcdd   :  { %v3445_v61 = vmul.f32 0.01, %v3424_v11 }
 0xcdf   :  { %v3455_v16 = vmax.f32 %v3424_v11, %v3445_v61 }
 0xce1   :  { %8181 = vmatmul.msk.f32.gmra.mxu1 %vm609_vm4, %v3455_v16  ;;  %v3581_v16 = vld [vmem:[%s14789_s2 + $0x90] sm:$0xff] }
 0xce2   :  { %v3426_v60 = vpop.f32.mrf.mxu1 }
 0xce3   :  { %v3427_v14 = vadd.f32 %v3426_v60, %v3380_v6  ;;  %v3580_v6 = vld [vmem:[%s14789_s2 + $0x40] sm:$0xff]  ;;  %v3583_v60 = vld [vmem:[%s14789_s2 + $0xe8] sm:$0xff] }
 0xce5   :  { %v3446_v31 = vmul.f32 0.01, %v3427_v14 }
 0xce7   :  { %v3456_v25 = vmax.f32 %v3427_v14, %v3446_v31  ;;  %v3582_v14 = vld [vmem:[%s14789_s2 + $0x98] sm:$0xff]  ;;  %v3585_v31 = vld [vmem:[%s14789_s2 + $0x140] sm:$0xff] }
 0xce9   :  { %8182 = vmatmul.msk.f32.gmra.mxu1 %vm609_vm4, %v3456_v25  ;;  %v3587_v25 = vld [vmem:[%s14789_s2 + $0x198] sm:$0xff] }
 0xcea   :  { %v3429_v57 = vpop.f32.mrf.mxu1 }
 0xceb   :  { %v3430_v29 = vadd.f32 %v3429_v57, %v3383_v45  ;;  %v3586_v45 = vld [vmem:[%s14789_s2 + $0x148] sm:$0xff]  ;;  %v3589_v57 = vld [vmem:[%s14789_s2 + $0x1f0] sm:$0xff] }
 0xced   :  { %v3447_v47 = vmul.f32 0.01, %v3430_v29 }
 0xcef   :  { %v3457_v33 = vmax.f32 %v3430_v29, %v3447_v47  ;;  %v3588_v29 = vld [vmem:[%s14789_s2 + $0x1a0] sm:$0xff]  ;;  %v3591_v47 = vld [vmem:[%s14789_s2 + $0x248] sm:$0xff] }
 0xcf1   :  { %8183 = vmatmul.msk.f32.gmra.mxu1 %vm609_vm4, %v3457_v33  ;;  %v3593_v33 = vld [vmem:[%s14789_s2 + $0x2a0] sm:$0xff] }
 0xcf2   :  { %v3432_v51 = vpop.f32.mrf.mxu1 }
 0xcf3   :  { %v3433_v22 = vadd.f32 %v3432_v51, %v3386_v53  ;;  %v3592_v53 = vld [vmem:[%s14789_s2 + $0x250] sm:$0xff]  ;;  %v3595_v51 = vld [vmem:[%s14789_s2 + $0x2f8] sm:$0xff] }
 0xcf5   :  { %v3448_v13 = vmul.f32 0.01, %v3433_v22 }
 0xcf7   :  { %v3458_v2 = vmax.f32 %v3433_v22, %v3448_v13  ;;  %v3594_v22 = vld [vmem:[%s14789_s2 + $0x2a8] sm:$0xff]  ;;  %v3597_v13 = vld [vmem:[%s14789_s2 + $0x350] sm:$0xff] }
 0xcf9   :  { %8184 = vmatmul.msk.f32.gmra.mxu1 %vm609_vm4, %v3458_v2  ;;  %v3598_v2 = vld [vmem:[%s14789_s2 + $0x358] sm:$0xff] }
 0xcfa   :  { %v3435_v12 = vpop.f32.mrf.mxu1 }
 0xcfb   :  { %v3436_v59 = vadd.f32 %v3435_v12, %v3389_v58  ;;  %v3784_v58 = vld [vmem:[%s14788_s1 + $0x50] sm:$0xff]  ;;  %v3783_v12 = vld [vmem:[%s14788_s1 + $0x48] sm:$0xff] }
 0xcfc   :  { %3829 = vmatpush.msrb.mxu2 %v3784_v58 }
 0xcfd   :  { %v3449_v21 = vmul.f32 0.01, %v3436_v59 }
 0xcfe   :  { %3830 = vmatpush.msrb.mxu2 %v3783_v12 }
 0xcff   :  { %v3459_v19 = vmax.f32 %v3436_v59, %v3449_v21 }
 0xd01   :  { %8185 = vmatmul.msk.f32.gmra.mxu1 %vm609_vm4, %v3459_v19 }
 0xd02   :  { %v3438_v17 = vpop.f32.mrf.mxu1 }
 0xd03   :  { %v3439_v46 = vadd.f32 %v3438_v17, %v3392_v41  ;;  %v4022_v17 = vld [vmem:[%s14788_s1 + $0x10] sm:$0xff] }
 0xd05   :  { %v3450_v56 = vmul.f32 0.01, %v3439_v46 }
 0xd07   :  { %v3460_v36 = vmax.f32 %v3439_v46, %v3450_v56  ;;  %v4021_v56 = vld [vmem:[%s14788_s1 + $0x8] sm:$0xff] }
 0xd09   :  { %8186 = vmatmul.msk.f32.gmra.mxu1 %vm609_vm4, %v3460_v36 }
 0xd3e   :  { %v11820_v15 = vpop.f32.mrf.mxu1 }
 0xd46   :  { %v3512_v0 = vpop.f32.mrf.mxu1 }
 0xd47   :  { %v8695_v10 = vpack.i.bf16 %v11820_v15, %v3512_v0 }
 0xd49   :  { %8696 = vrot.lane.b32.xlu1 %v8695_v10, %s9072_s17  ;;  %v4016_v10 = vld [vmem:[%s14787_s0 + $0x20] sm:$0xff] }
 0xd4e   :  { %v3515_v39 = vpop.f32.mrf.mxu1 }
 0xd51   :  { %3600 = vperm.xlu1 %8710, %v11670_v55  }
 0xd56   :  { %v3518_v27 = vpop.f32.mrf.mxu1 }
 0xd57   :  { %v8690_v8 = vpack.i.bf16 %v3515_v39, %v3518_v27 }
 0xd59   :  { %8691 = vrot.lane.b32.xlu0 %v8690_v8, %s9072_s17  ;;  %3612 = vperm.xlu1 %8710, %v11722_v43  }
 0xd5e   :  { %v3521_v37 = vpop.f32.mrf.mxu1 }
 0xd61   :  { %3620 = vperm.xlu1 %8710, %v11685_v9  }
 0xd66   :  { %v3524_v4 = vpop.f32.mrf.mxu1 }
 0xd67   :  { %v8685_v54 = vpack.i.bf16 %v3521_v37, %v3524_v4 }
 0xd69   :  { %8686 = vrot.lane.b32.xlu2 %v8685_v54, %s9072_s17  ;;  %3632 = vperm.xlu1 %8710, %v11704_v20   ;;  %v3579_v20 = vld [vmem:[%s14789_s2 + $0x38] sm:$0xff] }
 0xd6e   :  { %v3527_v18 = vpop.f32.mrf.mxu1 }
 0xd76   :  { %v3530_v42 = vpop.f32.mrf.mxu1 }
 0xd77   :  { %v8705_v34 = vpack.i.bf16 %v3527_v18, %v3530_v42 }
 0xd79   :  { %8706 = vrot.lane.b32.xlu0 %v8705_v34, %s9072_s17 }
 0xd7e   :  { %v3533_v40 = vpop.f32.mrf.mxu1 }
 0xd81   :  { %3608 = vperm.xlu0 %8712, %v11678_v49  }
 0xd86   :  { %v3536_v28 = vpop.f32.mrf.mxu1 }
 0xd87   :  { %v8700_v38 = vpack.i.bf16 %v3533_v40, %v3536_v28 }
 0xd89   :  { %8701 = vrot.lane.b32.xlu2 %v8700_v38, %s9072_s17  ;;  %3628 = vperm.xlu0 %8712, %v11711_v62  }
 0xd91   :  { %3604 = vperm.xlu2 %8711, %v11697_v5   ;;  %v14923_v5 = vmov 0  }
 0xd92   :  { %8758 = vset.pattern.permute.xlu0 %v14923_v5  ;;  %8759 = vset.pattern.permute.xlu1 %v14923_v5 }
 0xd99   :  { %3616 = vperm.xlu2 %8711, %v11691_v30  }
 0xda1   :  { %3624 = vperm.xlu2 %8711, %v11731_v26  }
 0xda9   :  { %3636 = vperm.xlu2 %8711, %v11740_v1  }
 0xdb1   :  { %8760 = vset.pattern.permute.xlu2 %v14923_v5 }
 0xdbb   :  { %v8697_v55 = vpop.permute.xlu1 %8696 }
 0xdbc   :  { %v8698_v48 = vunpack.i.l.bf16 %v8697_v55  ;;  %v8699_v49 = vunpack.i.h.bf16 %v8697_v55 }
 0xdc3   :  { %v8687_v7 = vpop.permute.xlu2 %8686  ;;  %v3601_v59 = vpop.permute.xlu1 %3600 }
 0xdc4   :  { %v8688_v23 = vunpack.i.l.bf16 %v8687_v7  ;;  %v8689_v24 = vunpack.i.h.bf16 %v8687_v7 }
 0xdc6   :  { %3669 = vmatpush.msra.mxu3 %v8688_v23 }
 0xdc8   :  { %3670 = vmatpush.msra.mxu3 %v8689_v24 }
 0xdcb   :  { %v8692_v32 = vpop.permute.xlu0 %8691 }
 0xdcc   :  { %v8693_v11 = vunpack.i.l.bf16 %v8692_v32  ;;  %v8694_v61 = vunpack.i.h.bf16 %v8692_v32  ;;  %v4018_v32 = vld [vmem:[%s14787_s0 + $0x30] sm:$0xff] }
 0xdce   :  { %3671 = vmatpush.msra.mxu3 %v8693_v11  ;;  %v3613_v11 = vpop.permute.xlu1 %3612 }
 0xdd0   :  { %3672 = vmatpush.msra.mxu3 %v8694_v61 }
 0xdd2   :  { %3673 = vmatpush.msra.mxu3 %v8698_v48 }
 0xdd4   :  { %3674 = vmatpush.msra.mxu3 %v8699_v49 }
 0xdd6   :  { %3675 = vmatpush.msra.mxu3 %v3536_v28 }
 0xdd8   :  { %3676 = vmatpush.msra.mxu3 %v3533_v40 }
 0xdda   :  { %3677 = vmatpush.msra.mxu3 %v3530_v42  ;;  %v4017_v42 = vld [vmem:[%s14787_s0 + $0x28] sm:$0xff] }
 0xddc   :  { %3678 = vmatpush.msra.mxu3 %v3527_v18 }
 0xdde   :  { %3679 = vmatpush.msra.mxu3 %v3524_v4 }
 0xde0   :  { %3680 = vmatpush.msra.mxu3 %v3521_v37 }
 0xde2   :  { %3681 = vmatpush.msra.mxu3 %v3518_v27 }
 0xde3   :  { %v8702_v30 = vpop.permute.xlu2 %8701 }
 0xde4   :  { %v8703_v9 = vunpack.i.l.bf16 %v8702_v30  ;;  %3682 = vmatpush.msra.mxu3 %v3515_v39  ;;  %v8704_v62 = vunpack.i.h.bf16 %v8702_v30 }
 0xde6   :  { %3683 = vmatpush.msra.mxu3 %v3512_v0  ;;  %3728 = vmatpush.msra.mxu0 %v8703_v9  ;;  %v4019_v9 = vld [vmem:[%s14787_s0 + $0x38] sm:$0xff] }
 0xde8   :  { %3684 = vmatpush.msra.mxu3 %v11820_v15  ;;  %3729 = vmatpush.msra.mxu0 %v8704_v62  ;;  %v4020_v15 = vld [vmem:[%s14788_s1] sm:$0xff] }
 0xde9   :  { %3685 = vmatmul.f32.vlgmr.msra.gmra.mxu3 %v3579_v20 }
 0xdeb   :  { %v8707_v43 = vpop.permute.xlu0 %8706  ;;  %v3605_v39 = vpop.permute.xlu2 %3604 }
 0xdec   :  { %v8708_v26 = vunpack.i.l.bf16 %v8707_v43  ;;  %v8709_v1 = vunpack.i.h.bf16 %v8707_v43 }
 0xdee   :  { %3730 = vmatpush.msra.mxu0 %v8708_v26 }
 0xdf0   :  { %3731 = vmatpush.msra.mxu0 %v8709_v1 }
 0xdf1   :  { %3688 = vmatmul.f32.gmra.mxu3 %v3581_v16  ;;  %8187 = vmatmul.msk.f32.vlgmr.msra.gmra.mxu0 %vm35_vm0, %v3580_v6 }
 0xdf2   :  { %4048 = vmatpush.msrb.mxu0 %v4023_v35 }
 0xdf3   :  { %v3609_v34 = vpop.permute.xlu0 %3608  ;;  %v3617_v62 = vpop.permute.xlu2 %3616 }
 0xdf4   :  { %4049 = vmatpush.msrb.mxu0 %v4022_v17 }
 0xdf6   :  { %4050 = vmatpush.msrb.mxu0 %v4021_v56 }
 0xdf8   :  { %4051 = vmatpush.msrb.mxu0 %v4020_v15 }
 0xdf9   :  { %3691 = vmatmul.f32.gmra.mxu3 %v3583_v60  ;;  %8188 = vmatmul.msk.f32.gmra.mxu0 %vm35_vm0, %v3582_v14  ;;  %v3621_v60 = vpop.permute.xlu1 %3620 }
 0xe01   :  { %3694 = vmatmul.f32.gmra.mxu3 %v3585_v31  ;;  %8189 = vmatmul.msk.f32.gmra.mxu0 %vm35_vm0, %v3584_v50  ;;  %v3633_v35 = vpop.permute.xlu1 %3632 }
 0xe09   :  { %3697 = vmatmul.f32.gmra.mxu3 %v3587_v25  ;;  %8190 = vmatmul.msk.f32.gmra.mxu0 %vm35_vm0, %v3586_v45 }
 0xe11   :  { %3700 = vmatmul.f32.gmra.mxu3 %v3589_v57  ;;  %8191 = vmatmul.msk.f32.gmra.mxu0 %vm35_vm0, %v3588_v29  ;;  %v3625_v29 = vpop.permute.xlu2 %3624 }
 0xe19   :  { %3703 = vmatmul.f32.gmra.mxu3 %v3591_v47  ;;  %8192 = vmatmul.msk.f32.gmra.mxu0 %vm35_vm0, %v3590_v44  ;;  %v3637_v15 = vpop.permute.xlu2 %3636 }
 0xe21   :  { %3706 = vmatmul.f32.gmra.mxu3 %v3593_v33  ;;  %8193 = vmatmul.msk.f32.gmra.mxu0 %vm35_vm0, %v3592_v53 }
 0xe29   :  { %3709 = vmatmul.f32.gmra.mxu3 %v3595_v51  ;;  %8194 = vmatmul.msk.f32.gmra.mxu0 %vm35_vm0, %v3594_v22 }
 0xe31   :  { %3712 = vmatmul.f32.gmra.mxu3 %v3597_v13  ;;  %8195 = vmatmul.msk.f32.gmra.mxu0 %vm35_vm0, %v3596_v52  ;;  %v3629_v13 = vpop.permute.xlu0 %3628 }
 0xe39   :  { %8196 = vmatmul.msk.f32.gmra.mxu0 %vm35_vm0, %v3598_v2 }
 0xe41   :  { %8211 = vmatmul.msk.f32.vlgmr.msrb.gmra.mxu0 %vm35_vm0, %v4016_v10 }
 0xe49   :  { %8212 = vmatmul.msk.f32.gmra.mxu0 %vm35_vm0, %v4017_v42 }
 0xe51   :  { %8213 = vmatmul.msk.f32.gmra.mxu0 %vm35_vm0, %v4018_v32 }
 0xe59   :  { %8214 = vmatmul.msk.f32.gmra.mxu0 %vm35_vm0, %v4019_v9 }
 0xe6c   :  { %v3686_v21 = vpop.f32.mrf.mxu3 }
 0xe6d   :  { %v3687_v19 = vadd.f32 %v3686_v21, %v3601_v59 }
 0xe6e   :  { %v3733_v41 = vpop.f32.mrf.mxu0 }
 0xe6f   :  { %v3734_v46 = vadd.f32 %v3733_v41, %v3687_v19 }
 0xe71   :  { %v3763_v36 = vmul.f32 0.01, %v3734_v46 }
 0xe73   :  { %v3773_v0 = vmax.f32 %v3734_v46, %v3763_v36 }
 0xe74   :  { %v3689_v27 = vpop.f32.mrf.mxu3 }
 0xe75   :  { %v3690_v8 = vadd.f32 %v3689_v27, %v3605_v39  ;;  %8197 = vmatmul.msk.f32.vlgmr.msrb.gmra.mxu2 %vm265_vm2, %v3773_v0 }
 0xe76   :  { %v3736_v37 = vpop.f32.mrf.mxu0 }
 0xe77   :  { %v3737_v4 = vadd.f32 %v3736_v37, %v3690_v8 }
 0xe79   :  { %v3764_v54 = vmul.f32 0.01, %v3737_v4 }
 0xe7b   :  { %v3774_v18 = vmax.f32 %v3737_v4, %v3764_v54 }
 0xe7c   :  { %v3692_v40 = vpop.f32.mrf.mxu3 }
 0xe7d   :  { %v3693_v28 = vadd.f32 %v3692_v40, %v3609_v34  ;;  %8198 = vmatmul.msk.f32.gmra.mxu2 %vm265_vm2, %v3774_v18 }
 0xe7e   :  { %v3739_v38 = vpop.f32.mrf.mxu0 }
 0xe7f   :  { %v3740_v7 = vadd.f32 %v3739_v38, %v3693_v28 }
 0xe81   :  { %v3765_v23 = vmul.f32 0.01, %v3740_v7 }
 0xe83   :  { %v3775_v24 = vmax.f32 %v3740_v7, %v3765_v23 }
 0xe84   :  { %v3695_v55 = vpop.f32.mrf.mxu3 }
 0xe85   :  { %v3696_v61 = vadd.f32 %v3695_v55, %v3613_v11  ;;  %8199 = vmatmul.msk.f32.gmra.mxu2 %vm265_vm2, %v3775_v24 }
 0xe86   :  { %v3742_v48 = vpop.f32.mrf.mxu0 }
 0xe87   :  { %v3743_v49 = vadd.f32 %v3742_v48, %v3696_v61 }
 0xe89   :  { %v3766_v5 = vmul.f32 0.01, %v3743_v49 }
 0xe8b   :  { %v3776_v30 = vmax.f32 %v3743_v49, %v3766_v5 }
 0xe8c   :  { %v3698_v20 = vpop.f32.mrf.mxu3 }
 0xe8d   :  { %v3699_v43 = vadd.f32 %v3698_v20, %v3617_v62  ;;  %8200 = vmatmul.msk.f32.gmra.mxu2 %vm265_vm2, %v3776_v30 }
 0xe8e   :  { %v3745_v26 = vpop.f32.mrf.mxu0 }
 0xe8f   :  { %v3746_v1 = vadd.f32 %v3745_v26, %v3699_v43 }
 0xe91   :  { %v3767_v16 = vmul.f32 0.01, %v3746_v1 }
 0xe93   :  { %v3777_v6 = vmax.f32 %v3746_v1, %v3767_v16 }
 0xe94   :  { %v3701_v14 = vpop.f32.mrf.mxu3 }
 0xe95   :  { %v3702_v31 = vadd.f32 %v3701_v14, %v3621_v60  ;;  %8201 = vmatmul.msk.f32.gmra.mxu2 %vm265_vm2, %v3777_v6 }
 0xe96   :  { %v3748_v50 = vpop.f32.mrf.mxu0 }
 0xe97   :  { %v3749_v25 = vadd.f32 %v3748_v50, %v3702_v31  ;;  %v11992_v50 = vld [vmem:[%s14792_s5] sm:$0xff] }
 0xe99   :  { %v3768_v45 = vmul.f32 0.01, %v3749_v25 }
 0xe9b   :  { %v3778_v57 = vmax.f32 %v3749_v25, %v3768_v45  ;;  %v11997_v25 = vld [vmem:[%s14792_s5 + $0x8] sm:$0xff] }
 0xe9c   :  { %v3704_v47 = vpop.f32.mrf.mxu3 }
 0xe9d   :  { %v3705_v44 = vadd.f32 %v3704_v47, %v3625_v29  ;;  %8202 = vmatmul.msk.f32.gmra.mxu2 %vm265_vm2, %v3778_v57  ;;  %v12004_v29 = vld [vmem:[%s14792_s5 + $0x28] sm:$0xff]  ;;  %v12009_v47 = vld [vmem:[%s14792_s5 + $0x18] sm:$0xff] }
 0xe9e   :  { %v3751_v33 = vpop.f32.mrf.mxu0 }
 0xe9f   :  { %v3752_v53 = vadd.f32 %v3751_v33, %v3705_v44  ;;  %v3902_v44 = vld [vmem:[%s14789_s2 + $0x48] sm:$0xff] }
 0xea1   :  { %v3769_v51 = vmul.f32 0.01, %v3752_v53 }
 0xea3   :  { %v3779_v22 = vmax.f32 %v3752_v53, %v3769_v51 }
 0xea4   :  { %v3707_v52 = vpop.f32.mrf.mxu3 }
 0xea5   :  { %v3708_v2 = vadd.f32 %v3707_v52, %v3629_v13  ;;  %8203 = vmatmul.msk.f32.gmra.mxu2 %vm265_vm2, %v3779_v22 }
 0xea6   :  { %v3754_v58 = vpop.f32.mrf.mxu0 }
 0xea7   :  { %v3755_v12 = vadd.f32 %v3754_v58, %v3708_v2  ;;  %v12025_v58 = vld [vmem:[%s14792_s5 + $0x40] sm:$0xff] }
 0xea9   :  { %v3770_v59 = vmul.f32 0.01, %v3755_v12 }
 0xeab   :  { %v3780_v21 = vmax.f32 %v3755_v12, %v3770_v59  ;;  %v12030_v12 = vld [vmem:[%s14792_s5 + $0x30] sm:$0xff] }
 0xeac   :  { %v3710_v19 = vpop.f32.mrf.mxu3 }
 0xead   :  { %v3711_v41 = vadd.f32 %v3710_v19, %v3633_v35  ;;  %8204 = vmatmul.msk.f32.gmra.mxu2 %vm265_vm2, %v3780_v21 }
 0xeae   :  { %v3757_v17 = vpop.f32.mrf.mxu0 }
 0xeaf   :  { %v3758_v46 = vadd.f32 %v3757_v17, %v3711_v41  ;;  %v3904_v41 = vld [vmem:[%s14789_s2 + $0xa0] sm:$0xff] }
 0xeb1   :  { %v3771_v56 = vmul.f32 0.01, %v3758_v46 }
 0xeb3   :  { %v3781_v36 = vmax.f32 %v3758_v46, %v3771_v56 }
 0xeb4   :  { %v3713_v0 = vpop.f32.mrf.mxu3 }
 0xeb5   :  { %v3714_v10 = vadd.f32 %v3713_v0, %v3637_v15  ;;  %8205 = vmatmul.msk.f32.gmra.mxu2 %vm265_vm2, %v3781_v36  ;;  %v12040_v36 = vld [vmem:[%s14792_s5 + $0x48] sm:$0xff]  ;;  %v14924_v0 = vmov 1  }
 0xeb6   :  { %v3760_v39 = vpop.f32.mrf.mxu0 }
 0xeb7   :  { %v3761_v27 = vadd.f32 %v3760_v39, %v3714_v10  ;;  %v3906_v39 = vld [vmem:[%s14789_s2 + $0xf8] sm:$0xff] }
 0xeb9   :  { %v3772_v8 = vmul.f32 0.01, %v3761_v27 }
 0xebb   :  { %v3782_v37 = vmax.f32 %v3761_v27, %v3772_v8  ;;  %v4093_v27 = vld [vmem:[%s14789_s2] sm:$0xff]  ;;  %v12059_v8 = vld [vmem:[%s14792_s5 + $0x10] sm:$0xff] }
 0xebd   :  { %8206 = vmatmul.msk.f32.gmra.mxu2 %vm265_vm2, %v3782_v37  ;;  %v4094_v37 = vld [vmem:[%s14789_s2 + $0x58] sm:$0xff] }
 0xebe   :  { %v11959_v4 = vpop.f32.mrf.mxu0 }
 0xec6   :  { %v11963_v18 = vpop.f32.mrf.mxu0 }
 0xec7   :  { %v8733_v32 = vpack.i.bf16 %v11959_v4, %v11963_v18 }
 0xece   :  { %v11969_v40 = vpop.f32.mrf.mxu0 }
 0xed6   :  { %v11974_v38 = vpop.f32.mrf.mxu0 }
 0xed7   :  { %v8738_v7 = vpack.i.bf16 %v11969_v40, %v11974_v38 }
 0xef8   :  { %v11961_v54 = vpop.f32.mrf.mxu2 }
 0xf00   :  { %v11965_v42 = vpop.f32.mrf.mxu2 }
 0xf01   :  { %v8723_v34 = vpack.i.bf16 %v11961_v54, %v11965_v42 }
 0xf03   :  { %8724 = vrot.lane.b32.xlu2 %v8723_v34, %s9073_s18  ;;  %v4097_v34 = vld [vmem:[%s14789_s2 + $0x160] sm:$0xff] }
 0xf08   :  { %v11972_v28 = vpop.f32.mrf.mxu2 }
 0xf0b   :  { %8739 = vrot.lane.b32.xlu2 %v8738_v7, %s9072_s17 }
 0xf10   :  { %v3841_v23 = vpop.f32.mrf.mxu2 }
 0xf11   :  { %v8718_v24 = vpack.i.bf16 %v11972_v28, %v3841_v23 }
 0xf13   :  { %8719 = vrot.lane.b32.xlu1 %v8718_v24, %s9073_s18  ;;  %v4101_v24 = vld [vmem:[%s14789_s2 + $0x2c0] sm:$0xff] }
 0xf18   :  { %v3844_v11 = vpop.f32.mrf.mxu2 }
 0xf1b   :  { %8734 = vrot.lane.b32.xlu1 %v8733_v32, %s9073_s18 }
 0xf20   :  { %v3847_v55 = vpop.f32.mrf.mxu2 }
 0xf21   :  { %v8713_v61 = vpack.i.bf16 %v3844_v11, %v3847_v55 }
 0xf23   :  { %8714 = vrot.lane.b32.xlu0 %v8713_v61, %s9073_s18  ;;  %v3909_v61 = vld [vmem:[%s14789_s2 + $0x158] sm:$0xff] }
 0xf28   :  { %v3850_v48 = vpop.f32.mrf.mxu2 }
 0xf2b   :  { %8729 = vrot.lane.b32.xlu0 %v8738_v7, %s9073_s18  ;;  %v3903_v7 = vld [vmem:[%s14789_s2 + $0x50] sm:$0xff] }
 0xf30   :  { %v3853_v49 = vpop.f32.mrf.mxu2 }
 0xf31   :  { %v8753_v5 = vpack.i.bf16 %v3850_v48, %v3853_v49 }
 0xf33   :  { %8744 = vrot.lane.b32.xlu0 %v8733_v32, %s9072_s17  ;;  %8754 = vrot.lane.b32.xlu2 %v8753_v5, %s9073_s18  ;;  %v4102_v32 = vld [vmem:[%s14789_s2 + $0x318] sm:$0xff] }
 0xf38   :  { %v3856_v30 = vpop.f32.mrf.mxu2 }
 0xf3b   :  { %4115 = vperm.xlu0 %8758, %v11992_v50   ;;  %4125 = vperm.xlu2 %8760, %v12059_v8  }
 0xf40   :  { %v3859_v9 = vpop.f32.mrf.mxu2 }
 0xf41   :  { %v8748_v62 = vpack.i.bf16 %v3856_v30, %v3859_v9 }
 0xf43   :  { %8749 = vrot.lane.b32.xlu1 %v8748_v62, %s9073_s18  ;;  %4140 = vperm.xlu0 %8758, %v12004_v29  }
 0xf4b   :  { %4120 = vperm.xlu1 %8759, %v11997_v25   ;;  %4155 = vperm.xlu0 %8758, %v12025_v58  }
 0xf53   :  { %4130 = vperm.xlu1 %8759, %v12009_v47   ;;  %8811 = vset.pattern.permute.xlu0 %v14924_v0 }
 0xf5b   :  { %4145 = vperm.xlu1 %8759, %v12030_v12  }
 0xf5d   :  { %v8725_v6 = vpop.permute.xlu2 %8724 }
 0xf5e   :  { %v8726_v14 = vunpack.i.l.bf16 %v8725_v6  ;;  %v8727_v31 = vunpack.i.h.bf16 %v8725_v6 }
 0xf63   :  { %4160 = vperm.xlu1 %8759, %v12040_v36  }
 0xf65   :  { %v8740_v45 = vpop.permute.xlu2 %8739 }
 0xf66   :  { %v8741_v17 = vunpack.i.l.bf16 %v8740_v45  ;;  %v8742_v56 = vunpack.i.h.bf16 %v8740_v45 }
 0xf6b   :  { %8812 = vset.pattern.permute.xlu1 %v14924_v0 }
 0xf85   :  { %v8720_v26 = vpop.permute.xlu1 %8719 }
 0xf86   :  { %v8721_v16 = vunpack.i.l.bf16 %v8720_v26  ;;  %v8722_v60 = vunpack.i.h.bf16 %v8720_v26 }
 0xf8d   :  { %v8735_v57 = vpop.permute.xlu1 %8734  ;;  %v8755_v13 = vpop.permute.xlu2 %8754 }
 0xf8e   :  { %v8756_v59 = vunpack.i.l.bf16 %v8755_v13  ;;  %v8736_v21 = vunpack.i.l.bf16 %v8735_v57  ;;  %v8757_v35 = vunpack.i.h.bf16 %v8755_v13  ;;  %v8737_v19 = vunpack.i.h.bf16 %v8735_v57 }
 0xf95   :  { %v8715_v20 = vpop.permute.xlu0 %8714 }
 0xf96   :  { %v8716_v43 = vunpack.i.l.bf16 %v8715_v20  ;;  %v8717_v1 = vunpack.i.h.bf16 %v8715_v20 }
 0xf98   :  { %3946 = vmatpush.msrb.mxu1 %v8716_v43  ;;  %8418 = vmatpush.msrb.mxu3 %v8716_v43 }
 0xf9a   :  { %3947 = vmatpush.msrb.mxu1 %v8717_v1  ;;  %8419 = vmatpush.msrb.mxu3 %v8717_v1 }
 0xf9c   :  { %3948 = vmatpush.msrb.mxu1 %v8721_v16  ;;  %8420 = vmatpush.msrb.mxu3 %v8721_v16 }
 0xf9d   :  { %v8730_v33 = vpop.permute.xlu0 %8729 }
 0xf9e   :  { %3949 = vmatpush.msrb.mxu1 %v8722_v60  ;;  %8421 = vmatpush.msrb.mxu3 %v8722_v60  ;;  %v8731_v51 = vunpack.i.l.bf16 %v8730_v33  ;;  %v8732_v52 = vunpack.i.h.bf16 %v8730_v33 }
 0xfa0   :  { %3950 = vmatpush.msrb.mxu1 %v8726_v14  ;;  %8422 = vmatpush.msrb.mxu3 %v8726_v14  ;;  %v4126_v14 = vpop.permute.xlu2 %4125 }
 0xfa2   :  { %3951 = vmatpush.msrb.mxu1 %v8727_v31  ;;  %8423 = vmatpush.msrb.mxu3 %v8727_v31 }
 0xfa4   :  { %3952 = vmatpush.msrb.mxu1 %v3859_v9  ;;  %8424 = vmatpush.msrb.mxu3 %v3859_v9 }
 0xfa5   :  { %v8745_v46 = vpop.permute.xlu0 %8744 }
 0xfa6   :  { %3953 = vmatpush.msrb.mxu1 %v3856_v30  ;;  %8425 = vmatpush.msrb.mxu3 %v3856_v30  ;;  %v8746_v15 = vunpack.i.l.bf16 %v8745_v46  ;;  %v8747_v10 = vunpack.i.h.bf16 %v8745_v46 }
 0xfa8   :  { %3954 = vmatpush.msrb.mxu1 %v3853_v49  ;;  %8426 = vmatpush.msrb.mxu3 %v3853_v49  ;;  %v4250_v49 = vld [vmem:[%s14788_s1 + $0x20] sm:$0xff] }
 0xfaa   :  { %3955 = vmatpush.msrb.mxu1 %v3850_v48  ;;  %8427 = vmatpush.msrb.mxu3 %v3850_v48  ;;  %v4251_v48 = vld [vmem:[%s14788_s1 + $0x28] sm:$0xff] }
 0xfac   :  { %3956 = vmatpush.msrb.mxu1 %v3847_v55  ;;  %8428 = vmatpush.msrb.mxu3 %v3847_v55  ;;  %v3907_v55 = vld [vmem:[%s14789_s2 + $0x100] sm:$0xff] }
 0xfad   :  { %v4116_v62 = vpop.permute.xlu0 %4115 }
 0xfae   :  { %3957 = vmatpush.msrb.mxu1 %v3844_v11  ;;  %8429 = vmatpush.msrb.mxu3 %v3844_v11  ;;  %v3905_v11 = vld [vmem:[%s14789_s2 + $0xa8] sm:$0xff] }
 0xfb0   :  { %3958 = vmatpush.msrb.mxu1 %v3841_v23  ;;  %8430 = vmatpush.msrb.mxu3 %v3841_v23  ;;  %v4100_v23 = vld [vmem:[%s14789_s2 + $0x268] sm:$0xff] }
 0xfb2   :  { %3959 = vmatpush.msrb.mxu1 %v11972_v28  ;;  %8431 = vmatpush.msrb.mxu3 %v11972_v28  ;;  %v3908_v28 = vld [vmem:[%s14789_s2 + $0x150] sm:$0xff] }
 0xfb4   :  { %3960 = vmatpush.msrb.mxu1 %v11965_v42  ;;  %8432 = vmatpush.msrb.mxu3 %v11965_v42  ;;  %v4096_v42 = vld [vmem:[%s14789_s2 + $0x108] sm:$0xff] }
 0xfb5   :  { %v8750_v53 = vpop.permute.xlu1 %8749 }
 0xfb6   :  { %v8751_v22 = vunpack.i.l.bf16 %v8750_v53  ;;  %3961 = vmatpush.msrb.mxu1 %v11961_v54  ;;  %8433 = vmatpush.msrb.mxu3 %v11961_v54  ;;  %v8752_v2 = vunpack.i.h.bf16 %v8750_v53  ;;  %v12069_v54 = vld [vmem:[%s14792_s5 + $0x20] sm:$0xff] }
 0xfb7   :  { %3962 = vmatmul.f32.vlgmr.msrb.gmra.mxu1 %v3902_v44  ;;  %4135 = vperm.xlu2 %8760, %v12069_v54  }
 0xfb8   :  { %4197 = vmatpush.msra.mxu1 %v8731_v51  ;;  %3987 = vmatpush.msra.mxu3 %v8751_v22 }
 0xfb9   :  { %3971 = vmatmul.f32.vlgmr.msrb.gmra.mxu3 %v3908_v28 }
 0xfba   :  { %4198 = vmatpush.msra.mxu1 %v8732_v52  ;;  %3988 = vmatpush.msra.mxu3 %v8752_v2 }
 0xfbc   :  { %4199 = vmatpush.msra.mxu1 %v8736_v21  ;;  %3989 = vmatpush.msra.mxu3 %v8756_v59  ;;  %v4141_v59 = vpop.permute.xlu0 %4140 }
 0xfbd   :  { %v4121_v1 = vpop.permute.xlu1 %4120 }
 0xfbe   :  { %4200 = vmatpush.msra.mxu1 %v8737_v19  ;;  %3990 = vmatpush.msra.mxu3 %v8757_v35 }
 0xfbf   :  { %3965 = vmatmul.f32.gmra.mxu1 %v3904_v41 }
 0xfc0   :  { %4201 = vmatpush.msra.mxu1 %v8741_v17  ;;  %4296 = vmatpush.msrb.mxu3 %v4251_v48 }
 0xfc1   :  { %8207 = vmatmul.msk.f32.vlgmr.msra.gmra.mxu3 %vm35_vm0, %v3903_v7 }
 0xfc2   :  { %4202 = vmatpush.msra.mxu1 %v8742_v56  ;;  %4297 = vmatpush.msrb.mxu3 %v4250_v49 }
 0xfc4   :  { %4203 = vmatpush.msra.mxu1 %v8746_v15 }
 0xfc5   :  { %v4131_v44 = vpop.permute.xlu1 %4130 }
 0xfc6   :  { %4204 = vmatpush.msra.mxu1 %v8747_v10 }
 0xfc7   :  { %3968 = vmatmul.f32.gmra.mxu1 %v3906_v39 }
 0xfc8   :  { %4205 = vmatpush.msra.mxu1 %v11974_v38  ;;  %v4099_v38 = vld [vmem:[%s14789_s2 + $0x210] sm:$0xff] }
 0xfc9   :  { %8208 = vmatmul.msk.f32.gmra.mxu3 %vm35_vm0, %v3905_v11 }
 0xfca   :  { %4206 = vmatpush.msra.mxu1 %v11969_v40  ;;  %v4098_v40 = vld [vmem:[%s14789_s2 + $0x1b8] sm:$0xff] }
 0xfcc   :  { %4207 = vmatpush.msra.mxu1 %v11963_v18  ;;  %v12079_v18 = vld [vmem:[%s14792_s5 + $0x38] sm:$0xff] }
 0xfcd   :  { %4150 = vperm.xlu2 %8760, %v12079_v18   ;;  %v4146_v41 = vpop.permute.xlu1 %4145 }
 0xfce   :  { %4208 = vmatpush.msra.mxu1 %v11959_v4  ;;  %v4095_v4 = vld [vmem:[%s14789_s2 + $0xb0] sm:$0xff] }
 0xfcf   :  { %8215 = vmatmul.msk.f32.vlgmr.msra.gmra.mxu1 %vm175_vm1, %v4093_v27  ;;  %v4156_v27 = vpop.permute.xlu0 %4155 }
 0xfd1   :  { %8209 = vmatmul.msk.f32.gmra.mxu3 %vm35_vm0, %v3907_v55 }
 0xfd5   :  { %8813 = vset.pattern.permute.xlu2 %v14924_v0 }
 0xfd7   :  { %8216 = vmatmul.msk.f32.gmra.mxu1 %vm175_vm1, %v4094_v37 }
 0xfd9   :  { %8210 = vmatmul.msk.f32.gmra.mxu3 %vm35_vm0, %v3909_v61 }
 0xfdf   :  { %8217 = vmatmul.msk.f32.gmra.mxu1 %vm175_vm1, %v4095_v4 }
 0xfe7   :  { %8218 = vmatmul.msk.f32.gmra.mxu1 %vm175_vm1, %v4096_v42 }
 0xfef   :  { %8219 = vmatmul.msk.f32.gmra.mxu1 %vm175_vm1, %v4097_v34  ;;  %v4161_v34 = vpop.permute.xlu1 %4160 }
 0xff7   :  { %8220 = vmatmul.msk.f32.gmra.mxu1 %vm175_vm1, %v4098_v40 }
 0xfff   :  { %8221 = vmatmul.msk.f32.gmra.mxu1 %vm175_vm1, %v4099_v38 }
0x1007   :  { %8222 = vmatmul.msk.f32.gmra.mxu1 %vm175_vm1, %v4100_v23 }
0x100f   :  { %8223 = vmatmul.msk.f32.gmra.mxu1 %vm175_vm1, %v4101_v24 }
0x1011   :  { %v4136_v22 = vpop.permute.xlu2 %4135 }
0x1017   :  { %8224 = vmatmul.msk.f32.gmra.mxu1 %vm175_vm1, %v4102_v32 }
0x1027   :  { %v4151_v15 = vpop.permute.xlu2 %4150 }
0x1034   :  { %v12136_v5 = vpop.f32.mrf.mxu1 }
0x1035   :  { %14925 = vst [vmem:[#allocation19_spill] sm:$0xff] %v12136_v5 }
0x103c   :  { %v12138_v30 = vpop.f32.mrf.mxu1  ;;  %v12152_v7 = vpop.f32.mrf.mxu3 }
0x103d   :  { %14926 = vst [vmem:[#allocation9_spill] sm:$0xff] %v12138_v30 }
0x103e   :  { %14928 = vst [vmem:[#allocation25_spill] sm:$0xff] %v12152_v7  ;;  %v6040_v7 = vld [vmem:[%s14791_s4 + $0x340] sm:$0xff] }
0x1044   :  { %v12140_v9 = vpop.f32.mrf.mxu1  ;;  %v12154_v23 = vpop.f32.mrf.mxu3 }
0x1045   :  { %14927 = vst [vmem:[#allocation23_spill] sm:$0xff] %v12140_v9  ;;  %v6036_v9 = vld [vmem:[%s14791_s4 + $0x320] sm:$0xff] }
0x1046   :  { %14929 = vst [vmem:[#allocation22_spill] sm:$0xff] %v12154_v23 }
0x104c   :  { %v4210_v20 = vpop.f32.mrf.mxu1  ;;  %v12156_v24 = vpop.f32.mrf.mxu3 }
0x104d   :  { %v4211_v43 = vadd.f32 %v4210_v20, %v4116_v62  ;;  %14930 = vst [vmem:[#allocation27_spill] sm:$0xff] %v12156_v24 }
0x104f   :  { %v4240_v26 = vmax.f32 %v4211_v43, 0.0 }
0x1051   :  { %8225 = vmatmul.msk.f32.vlgmr.msrb.gmra.mxu3 %vm265_vm2, %v4240_v26 }
0x1054   :  { %v4213_v16 = vpop.f32.mrf.mxu1  ;;  %v12158_v32 = vpop.f32.mrf.mxu3 }
0x1055   :  { %v4214_v6 = vadd.f32 %v4213_v16, %v4121_v1  ;;  %14931 = vst [vmem:[#allocation29_spill] sm:$0xff] %v12158_v32 }
0x1057   :  { %v4241_v60 = vmax.f32 %v4214_v6, 0.0 }
0x1059   :  { %8226 = vmatmul.msk.f32.gmra.mxu3 %vm265_vm2, %v4241_v60 }
0x105c   :  { %v4216_v31 = vpop.f32.mrf.mxu1  ;;  %v12160_v11 = vpop.f32.mrf.mxu3 }
0x105d   :  { %v4217_v45 = vadd.f32 %v4216_v31, %v4126_v14  ;;  %14932 = vst [vmem:[#allocation24_spill] sm:$0xff] %v12160_v11 }
0x105f   :  { %v4242_v57 = vmax.f32 %v4217_v45, 0.0 }
0x1061   :  { %8227 = vmatmul.msk.f32.gmra.mxu3 %vm265_vm2, %v4242_v57  ;;  %v14933_v57 = vmov 2  }
0x1064   :  { %v4219_v33 = vpop.f32.mrf.mxu1 }
0x1065   :  { %v4220_v53 = vadd.f32 %v4219_v33, %v4131_v44 }
0x1067   :  { %v4243_v51 = vmax.f32 %v4220_v53, 0.0 }
0x1069   :  { %8228 = vmatmul.msk.f32.gmra.mxu3 %vm265_vm2, %v4243_v51 }
0x106c   :  { %v4222_v13 = vpop.f32.mrf.mxu1 }
0x106d   :  { %v4223_v52 = vadd.f32 %v4222_v13, %v4136_v22 }
0x106f   :  { %v4244_v2 = vmax.f32 %v4223_v52, 0.0 }
0x1071   :  { %8229 = vmatmul.msk.f32.gmra.mxu3 %vm265_vm2, %v4244_v2 }
0x1074   :  { %v4225_v21 = vpop.f32.mrf.mxu1 }
0x1075   :  { %v4226_v35 = vadd.f32 %v4225_v21, %v4141_v59 }
0x1077   :  { %v4245_v19 = vmax.f32 %v4226_v35, 0.0 }
0x1079   :  { %8230 = vmatmul.msk.f32.gmra.mxu3 %vm265_vm2, %v4245_v19 }
0x107c   :  { %v4228_v17 = vpop.f32.mrf.mxu1 }
0x107d   :  { %v4229_v46 = vadd.f32 %v4228_v17, %v4146_v41 }
0x107f   :  { %v4246_v56 = vmax.f32 %v4229_v46, 0.0 }
0x1081   :  { %8231 = vmatmul.msk.f32.gmra.mxu3 %vm265_vm2, %v4246_v56 }
0x1084   :  { %v4231_v0 = vpop.f32.mrf.mxu1 }
0x1085   :  { %v4232_v10 = vadd.f32 %v4231_v0, %v4151_v15 }
0x1087   :  { %v4247_v39 = vmax.f32 %v4232_v10, 0.0 }
0x1089   :  { %8232 = vmatmul.msk.f32.gmra.mxu3 %vm265_vm2, %v4247_v39 }
0x108c   :  { %v4234_v37 = vpop.f32.mrf.mxu1 }
0x108d   :  { %v4235_v4 = vadd.f32 %v4234_v37, %v4156_v27 }
0x108f   :  { %v4248_v42 = vmax.f32 %v4235_v4, 0.0 }
0x1091   :  { %8233 = vmatmul.msk.f32.gmra.mxu3 %vm265_vm2, %v4248_v42 }
0x1094   :  { %v4237_v40 = vpop.f32.mrf.mxu1 }
0x1095   :  { %v4238_v28 = vadd.f32 %v4237_v40, %v4161_v34 }
0x1097   :  { %v4249_v38 = vmax.f32 %v4238_v28, 0.0 }
0x1099   :  { %8234 = vmatmul.msk.f32.gmra.mxu3 %vm265_vm2, %v4249_v38 }
0x10d4   :  { %v12162_v55 = vpop.f32.mrf.mxu3 }
0x10dc   :  { %v12164_v61 = vpop.f32.mrf.mxu3 }
0x10dd   :  { %v8781_v45 = vpack.i.bf16 %v12162_v55, %v12164_v61 }
0x10e4   :  { %v12166_v48 = vpop.f32.mrf.mxu3 }
0x10ec   :  { %v12168_v49 = vpop.f32.mrf.mxu3 }
0x10ed   :  { %v8761_v62 = vpack.i.bf16 %v12166_v48, %v12168_v49 }
0x10ef   :  { %8762 = vrot.lane.b32.xlu1 %v8761_v62, %s9075_s21 }
0x10f4   :  { %v12173_v20 = vpop.f32.mrf.mxu3 }
0x10fc   :  { %v12175_v43 = vpop.f32.mrf.mxu3 }
0x10fd   :  { %v8786_v26 = vpack.i.bf16 %v12173_v20, %v12175_v43 }
0x10ff   :  { %8787 = vrot.lane.b32.xlu1 %v8786_v26, %s9072_s17  ;;  %8767 = vrot.lane.b32.xlu2 %v8786_v26, %s9075_s21 }
0x1104   :  { %v12181_v1 = vpop.f32.mrf.mxu3 }
0x110c   :  { %v12183_v16 = vpop.f32.mrf.mxu3 }
0x110d   :  { %v8771_v6 = vpack.i.bf16 %v12181_v1, %v12183_v16 }
0x110f   :  { %8772 = vrot.lane.b32.xlu2 %v8771_v6, %s9072_s17 }
0x1114   :  { %v4323_v60 = vpop.f32.mrf.mxu3 }
0x1117   :  { %8792 = vrot.lane.b32.xlu2 %v8761_v62, %s9072_s17 }
0x111c   :  { %v4326_v14 = vpop.f32.mrf.mxu3 }
0x111d   :  { %v8801_v31 = vpack.i.bf16 %v4323_v60, %v4326_v14 }
0x111f   :  { %8807 = vrot.lane.b32.xlu2 %v8771_v6, %s9075_s21  ;;  %8802 = vrot.lane.b32.xlu1 %v8801_v31, %s9075_s21  ;;  %v4408_v6 = vld [vmem:[%s14789_s2 + $0x170] sm:$0xff] }
0x1120   :  { %8777 = vrot.lane.b32.xlu0 %v8801_v31, %s9072_s17  ;;  %v4409_v31 = vld [vmem:[%s14789_s2 + $0x1c0] sm:$0xff] }
0x1127   :  { %4424 = vperm.xlu1 %8812, %v11997_v25   ;;  %4428 = vperm.xlu2 %8813, %v12059_v8  }
0x1128   :  { %8782 = vrot.lane.b32.xlu0 %v8781_v45, %s9075_s21 }
0x112f   :  { %4432 = vperm.xlu1 %8812, %v12009_v47   ;;  %4436 = vperm.xlu2 %8813, %v12069_v54  }
0x1130   :  { %8797 = vrot.lane.b32.xlu0 %v8781_v45, %s9072_s17  ;;  %v4412_v45 = vld [vmem:[%s14789_s2 + $0x220] sm:$0xff] }
0x1137   :  { %4444 = vperm.xlu1 %8812, %v12030_v12   ;;  %4448 = vperm.xlu2 %8813, %v12079_v18  }
0x1138   :  { %4420 = vperm.xlu0 %8811, %v11992_v50  }
0x113f   :  { %4456 = vperm.xlu1 %8812, %v12040_v36   ;;  %8866 = vset.pattern.permute.xlu2 %v14933_v57 }
0x1140   :  { %4440 = vperm.xlu0 %8811, %v12004_v29  }
0x1147   :  { %8865 = vset.pattern.permute.xlu1 %v14933_v57 }
0x1148   :  { %4452 = vperm.xlu0 %8811, %v12025_v58  }
0x1150   :  { %8864 = vset.pattern.permute.xlu0 %v14933_v57  ;;  %v4411_v57 = vld [vmem:[%s14789_s2 + $0x218] sm:$0xff] }
0x1159   :  { %v8768_v44 = vpop.permute.xlu2 %8767 }
0x115a   :  { %v8769_v33 = vunpack.i.l.bf16 %v8768_v44  ;;  %v8770_v53 = vunpack.i.h.bf16 %v8768_v44  ;;  %v4414_v44 = vld [vmem:[%s14789_s2 + $0x278] sm:$0xff] }
0x115c   :  { %4489 = vmatpush.msra.mxu0 %v8769_v33  ;;  %v4413_v33 = vld [vmem:[%s14789_s2 + $0x270] sm:$0xff] }
0x115e   :  { %4490 = vmatpush.msra.mxu0 %v8770_v53  ;;  %v4416_v53 = vld [vmem:[%s14789_s2 + $0x2d0] sm:$0xff] }
0x1161   :  { %v8763_v51 = vpop.permute.xlu1 %8762 }
0x1162   :  { %v8764_v22 = vunpack.i.l.bf16 %v8763_v51  ;;  %v8765_v13 = vunpack.i.h.bf16 %v8763_v51  ;;  %v4415_v51 = vld [vmem:[%s14789_s2 + $0x2c8] sm:$0xff] }
0x1164   :  { %4491 = vmatpush.msra.mxu0 %v8764_v22  ;;  %v4418_v22 = vld [vmem:[%s14789_s2 + $0x328] sm:$0xff] }
0x1166   :  { %4492 = vmatpush.msra.mxu0 %v8765_v13  ;;  %v4417_v13 = vld [vmem:[%s14789_s2 + $0x320] sm:$0xff] }
0x1169   :  { %v8773_v52 = vpop.permute.xlu2 %8772 }
0x116a   :  { %v8774_v35 = vunpack.i.l.bf16 %v8773_v52  ;;  %v8775_v41 = vunpack.i.h.bf16 %v8773_v52  ;;  %v4593_v52 = vld [vmem:[%s14788_s1 + $0x30] sm:$0xff] }
0x116b   :  { %4639 = vmatpush.msrb.mxu1 %v4593_v52 }
0x1171   :  { %v8788_v19 = vpop.permute.xlu1 %8787  ;;  %v8793_v15 = vpop.permute.xlu2 %8792 }
0x1172   :  { %v8789_v46 = vunpack.i.l.bf16 %v8788_v19  ;;  %v8790_v0 = vunpack.i.h.bf16 %v8788_v19  ;;  %v8794_v39 = vunpack.i.l.bf16 %v8793_v15  ;;  %v8795_v27 = vunpack.i.h.bf16 %v8793_v15 }
0x1179   :  { %v8808_v28 = vpop.permute.xlu2 %8807 }
0x117a   :  { %v8809_v62 = vunpack.i.l.bf16 %v8808_v28  ;;  %v8810_v26 = vunpack.i.h.bf16 %v8808_v28 }
0x1191   :  { %v8803_v42 = vpop.permute.xlu1 %8802 }
0x1192   :  { %v8778_v2 = vpop.permute.xlu0 %8777  ;;  %v8804_v40 = vunpack.i.l.bf16 %v8803_v42  ;;  %v8805_v38 = vunpack.i.h.bf16 %v8803_v42 }
0x1193   :  { %v8779_v59 = vunpack.i.l.bf16 %v8778_v2  ;;  %v8780_v21 = vunpack.i.h.bf16 %v8778_v2 }
0x1195   :  { %4538 = vmatpush.msra.mxu2 %v8779_v59 }
0x1197   :  { %4539 = vmatpush.msra.mxu2 %v8780_v21 }
0x1199   :  { %4540 = vmatpush.msra.mxu2 %v8774_v35 }
0x119a   :  { %v8783_v17 = vpop.permute.xlu0 %8782 }
0x119b   :  { %v8784_v56 = vunpack.i.l.bf16 %v8783_v17  ;;  %4541 = vmatpush.msra.mxu2 %v8775_v41  ;;  %v8785_v10 = vunpack.i.h.bf16 %v8783_v17  ;;  %v4425_v17 = vpop.permute.xlu1 %4424 }
0x119d   :  { %4493 = vmatpush.msra.mxu0 %v8784_v56  ;;  %4542 = vmatpush.msra.mxu2 %v8789_v46 }
0x119f   :  { %4494 = vmatpush.msra.mxu0 %v8785_v10  ;;  %4543 = vmatpush.msra.mxu2 %v8790_v0 }
0x11a1   :  { %4495 = vmatpush.msra.mxu0 %v4326_v14  ;;  %4544 = vmatpush.msra.mxu2 %v8794_v39  ;;  %v4410_v14 = vld [vmem:[%s14789_s2 + $0x1c8] sm:$0xff]  ;;  %v4429_v39 = vpop.permute.xlu2 %4428 }
0x11a2   :  { %v8798_v37 = vpop.permute.xlu0 %8797 }
0x11a3   :  { %v8799_v4 = vunpack.i.l.bf16 %v8798_v37  ;;  %4496 = vmatpush.msra.mxu0 %v4323_v60  ;;  %4545 = vmatpush.msra.mxu2 %v8795_v27  ;;  %v8800_v34 = vunpack.i.h.bf16 %v8798_v37  ;;  %v4407_v60 = vld [vmem:[%s14789_s2 + $0x168] sm:$0xff] }
0x11a5   :  { %4497 = vmatpush.msra.mxu0 %v12183_v16  ;;  %4546 = vmatpush.msra.mxu2 %v8799_v4  ;;  %v4400_v16 = vld [vmem:[%s14789_s2 + $0x10] sm:$0xff] }
0x11a7   :  { %4498 = vmatpush.msra.mxu0 %v12181_v1  ;;  %4547 = vmatpush.msra.mxu2 %v8800_v34  ;;  %v4405_v1 = vld [vmem:[%s14789_s2 + $0x110] sm:$0xff] }
0x11a9   :  { %4499 = vmatpush.msra.mxu0 %v12175_v43  ;;  %4548 = vmatpush.msra.mxu2 %v8804_v40  ;;  %v4406_v43 = vld [vmem:[%s14789_s2 + $0x118] sm:$0xff]  ;;  %v4433_v40 = vpop.permute.xlu1 %4432 }
0x11aa   :  { %v4421_v2 = vpop.permute.xlu0 %4420 }
0x11ab   :  { %4500 = vmatpush.msra.mxu0 %v12173_v20  ;;  %4549 = vmatpush.msra.mxu2 %v8805_v38  ;;  %v4399_v20 = vld [vmem:[%s14789_s2 + $0x8] sm:$0xff] }
0x11ad   :  { %4501 = vmatpush.msra.mxu0 %v12168_v49  ;;  %4550 = vmatpush.msra.mxu2 %v8809_v62  ;;  %v4402_v49 = vld [vmem:[%s14789_s2 + $0x68] sm:$0xff] }
0x11af   :  { %4502 = vmatpush.msra.mxu0 %v12166_v48  ;;  %4551 = vmatpush.msra.mxu2 %v8810_v26  ;;  %v4401_v48 = vld [vmem:[%s14789_s2 + $0x60] sm:$0xff] }
0x11b0   :  { %8235 = vmatmul.msk.f32.vlgmr.msra.gmra.mxu2 %vm473_vm3, %v4400_v16 }
0x11b1   :  { %4503 = vmatpush.msra.mxu0 %v12164_v61  ;;  %v4404_v61 = vld [vmem:[%s14789_s2 + $0xc0] sm:$0xff] }
0x11b3   :  { %4504 = vmatpush.msra.mxu0 %v12162_v55  ;;  %v4403_v55 = vld [vmem:[%s14789_s2 + $0xb8] sm:$0xff] }
0x11b4   :  { %4505 = vmatmul.f32.vlgmr.msra.gmra.mxu0 %v4399_v20  ;;  %v4437_v20 = vpop.permute.xlu2 %4436 }
0x11b8   :  { %8236 = vmatmul.msk.f32.gmra.mxu2 %vm473_vm3, %v4402_v49 }
0x11bc   :  { %4508 = vmatmul.f32.gmra.mxu0 %v4401_v48 }
0x11c0   :  { %8237 = vmatmul.msk.f32.gmra.mxu2 %vm473_vm3, %v4404_v61 }
0x11c4   :  { %4511 = vmatmul.f32.gmra.mxu0 %v4403_v55 }
0x11c8   :  { %8238 = vmatmul.msk.f32.gmra.mxu2 %vm473_vm3, %v4406_v43 }
0x11cc   :  { %4514 = vmatmul.f32.gmra.mxu0 %v4405_v1  ;;  %v4441_v1 = vpop.permute.xlu0 %4440 }
0x11d0   :  { %8239 = vmatmul.msk.f32.gmra.mxu2 %vm473_vm3, %v4408_v6 }
0x11d4   :  { %4517 = vmatmul.f32.gmra.mxu0 %v4407_v60 }
0x11d8   :  { %8240 = vmatmul.msk.f32.gmra.mxu2 %vm473_vm3, %v4410_v14 }
0x11dc   :  { %4520 = vmatmul.f32.gmra.mxu0 %v4409_v31 }
0x11e0   :  { %8241 = vmatmul.msk.f32.gmra.mxu2 %vm473_vm3, %v4412_v45 }
0x11e4   :  { %4523 = vmatmul.f32.gmra.mxu0 %v4411_v57  ;;  %v4445_v57 = vpop.permute.xlu1 %4444 }
0x11e8   :  { %8242 = vmatmul.msk.f32.gmra.mxu2 %vm473_vm3, %v4414_v44 }
0x11ec   :  { %4526 = vmatmul.f32.gmra.mxu0 %v4413_v33 }
0x11f0   :  { %8243 = vmatmul.msk.f32.gmra.mxu2 %vm473_vm3, %v4416_v53 }
0x11f4   :  { %4529 = vmatmul.f32.gmra.mxu0 %v4415_v51 }
0x11f8   :  { %8244 = vmatmul.msk.f32.gmra.mxu2 %vm473_vm3, %v4418_v22 }
0x11fc   :  { %4532 = vmatmul.f32.gmra.mxu0 %v4417_v13  ;;  %v4449_v13 = vpop.permute.xlu2 %4448 }
0x1231   :  { %v4506_v59 = vpop.f32.mrf.mxu0 }
0x1232   :  { %v4507_v21 = vadd.f32 %v4506_v59, %v4421_v2 }
0x1233   :  { %v4553_v35 = vpop.f32.mrf.mxu2 }
0x1234   :  { %v4554_v19 = vadd.f32 %v4553_v35, %v4507_v21 }
0x1236   :  { %v4583_v41 = vmax.f32 %v4554_v19, 0.0  ;;  %v4453_v19 = vpop.permute.xlu0 %4452 }
0x1238   :  { %8245 = vmatmul.msk.f32.vlgmr.msrb.gmra.mxu1 %vm609_vm4, %v4583_v41 }
0x1239   :  { %v4509_v46 = vpop.f32.mrf.mxu0 }
0x123a   :  { %v4510_v56 = vadd.f32 %v4509_v46, %v4425_v17 }
0x123b   :  { %v4556_v15 = vpop.f32.mrf.mxu2 }
0x123c   :  { %v4557_v0 = vadd.f32 %v4556_v15, %v4510_v56 }
0x123e   :  { %v4584_v10 = vmax.f32 %v4557_v0, 0.0  ;;  %v4457_v0 = vpop.permute.xlu1 %4456 }
0x1240   :  { %8246 = vmatmul.msk.f32.gmra.mxu1 %vm609_vm4, %v4584_v10 }
0x1241   :  { %v4512_v27 = vpop.f32.mrf.mxu0 }
0x1242   :  { %v4513_v37 = vadd.f32 %v4512_v27, %v4429_v39 }
0x1243   :  { %v4559_v4 = vpop.f32.mrf.mxu2 }
0x1244   :  { %v4560_v42 = vadd.f32 %v4559_v4, %v4513_v37 }
0x1246   :  { %v4585_v34 = vmax.f32 %v4560_v42, 0.0 }
0x1248   :  { %8247 = vmatmul.msk.f32.gmra.mxu1 %vm609_vm4, %v4585_v34 }
0x1249   :  { %v4515_v28 = vpop.f32.mrf.mxu0 }
0x124a   :  { %v4516_v38 = vadd.f32 %v4515_v28, %v4433_v40 }
0x124b   :  { %v4562_v62 = vpop.f32.mrf.mxu2 }
0x124c   :  { %v4563_v26 = vadd.f32 %v4562_v62, %v4516_v38 }
0x124e   :  { %v4586_v16 = vmax.f32 %v4563_v26, 0.0 }
0x1250   :  { %8248 = vmatmul.msk.f32.gmra.mxu1 %vm609_vm4, %v4586_v16 }
0x1251   :  { %v4518_v49 = vpop.f32.mrf.mxu0 }
0x1252   :  { %v4519_v48 = vadd.f32 %v4518_v49, %v4437_v20 }
0x1253   :  { %v4565_v61 = vpop.f32.mrf.mxu2 }
0x1254   :  { %v4566_v55 = vadd.f32 %v4565_v61, %v4519_v48 }
0x1256   :  { %v4587_v43 = vmax.f32 %v4566_v55, 0.0 }
0x1258   :  { %8249 = vmatmul.msk.f32.gmra.mxu1 %vm609_vm4, %v4587_v43 }
0x1259   :  { %v4521_v6 = vpop.f32.mrf.mxu0 }
0x125a   :  { %v4522_v60 = vadd.f32 %v4521_v6, %v4441_v1 }
0x125b   :  { %v4568_v14 = vpop.f32.mrf.mxu2 }
0x125c   :  { %v4569_v31 = vadd.f32 %v4568_v14, %v4522_v60  ;;  %v4741_v60 = vld [vmem:[%s14789_s2 + $0x18] sm:$0xff] }
0x125e   :  { %v4588_v45 = vmax.f32 %v4569_v31, 0.0 }
0x1260   :  { %8250 = vmatmul.msk.f32.gmra.mxu1 %vm609_vm4, %v4588_v45 }
0x1261   :  { %v4524_v44 = vpop.f32.mrf.mxu0 }
0x1262   :  { %v4525_v33 = vadd.f32 %v4524_v44, %v4445_v57  ;;  %v4743_v44 = vld [vmem:[%s14789_s2 + $0x70] sm:$0xff] }
0x1263   :  { %v4571_v53 = vpop.f32.mrf.mxu2 }
0x1264   :  { %v4572_v51 = vadd.f32 %v4571_v53, %v4525_v33 }
0x1266   :  { %v4589_v22 = vmax.f32 %v4572_v51, 0.0 }
0x1268   :  { %8251 = vmatmul.msk.f32.gmra.mxu1 %vm609_vm4, %v4589_v22 }
0x1269   :  { %v4527_v52 = vpop.f32.mrf.mxu0 }
0x126a   :  { %v4528_v2 = vadd.f32 %v4527_v52, %v4449_v13 }
0x126b   :  { %v4574_v59 = vpop.f32.mrf.mxu2 }
0x126c   :  { %v4575_v21 = vadd.f32 %v4574_v59, %v4528_v2  ;;  %v4745_v2 = vld [vmem:[%s14789_s2 + $0xc8] sm:$0xff] }
0x126e   :  { %v4590_v35 = vmax.f32 %v4575_v21, 0.0 }
0x1270   :  { %8252 = vmatmul.msk.f32.gmra.mxu1 %vm609_vm4, %v4590_v35 }
0x1271   :  { %v4530_v41 = vpop.f32.mrf.mxu0 }
0x1272   :  { %v4531_v17 = vadd.f32 %v4530_v41, %v4453_v19 }
0x1273   :  { %v4577_v46 = vpop.f32.mrf.mxu2 }
0x1274   :  { %v4578_v56 = vadd.f32 %v4577_v46, %v4531_v17  ;;  %v4747_v46 = vld [vmem:[%s14789_s2 + $0x120] sm:$0xff] }
0x1276   :  { %v4591_v15 = vmax.f32 %v4578_v56, 0.0 }
0x1278   :  { %8253 = vmatmul.msk.f32.gmra.mxu1 %vm609_vm4, %v4591_v15 }
0x1279   :  { %v4533_v10 = vpop.f32.mrf.mxu0 }
0x127a   :  { %v4534_v39 = vadd.f32 %v4533_v10, %v4457_v0  ;;  %v4742_v0 = vld [vmem:[%s14789_s2 + $0x20] sm:$0xff]  ;;  %v4749_v10 = vld [vmem:[%s14789_s2 + $0x178] sm:$0xff] }
0x127b   :  { %v4580_v27 = vpop.f32.mrf.mxu2 }
0x127c   :  { %v4581_v37 = vadd.f32 %v4580_v27, %v4534_v39  ;;  %v4744_v39 = vld [vmem:[%s14789_s2 + $0x78] sm:$0xff]  ;;  %v4751_v27 = vld [vmem:[%s14789_s2 + $0x1d0] sm:$0xff] }
0x127e   :  { %v4592_v4 = vmax.f32 %v4581_v37, 0.0  ;;  %v4746_v37 = vld [vmem:[%s14789_s2 + $0xd0] sm:$0xff] }
0x1280   :  { %8254 = vmatmul.msk.f32.gmra.mxu1 %vm609_vm4, %v4592_v4  ;;  %v4753_v4 = vld [vmem:[%s14789_s2 + $0x228] sm:$0xff] }
0x12b5   :  { %v12300_v42 = vpop.f32.mrf.mxu1 }
0x12bd   :  { %v4644_v34 = vpop.f32.mrf.mxu1 }
0x12be   :  { %v8824_v40 = vpack.i.bf16 %v12300_v42, %v4644_v34 }
0x12c0   :  { %8825 = vrot.lane.b32.xlu1 %v8824_v40, %s9077_s24 }
0x12c5   :  { %v4647_v28 = vpop.f32.mrf.mxu1 }
0x12cd   :  { %v4650_v38 = vpop.f32.mrf.mxu1 }
0x12ce   :  { %v8819_v62 = vpack.i.bf16 %v4647_v28, %v4650_v38 }
0x12d0   :  { %8820 = vrot.lane.b32.xlu0 %v8819_v62, %s9077_s24 }
0x12d5   :  { %v4653_v26 = vpop.f32.mrf.mxu1 }
0x12dd   :  { %v4656_v16 = vpop.f32.mrf.mxu1 }
0x12de   :  { %v8839_v20 = vpack.i.bf16 %v4653_v26, %v4656_v16 }
0x12e0   :  { %8840 = vrot.lane.b32.xlu1 %v8839_v20, %s9075_s21  ;;  %8815 = vrot.lane.b32.xlu2 %v8839_v20, %s9077_s24  ;;  %v4758_v20 = vld [vmem:[%s14789_s2 + $0x2e0] sm:$0xff] }
0x12e5   :  { %v4659_v49 = vpop.f32.mrf.mxu1 }
0x12ed   :  { %v4662_v48 = vpop.f32.mrf.mxu1 }
0x12ee   :  { %v8834_v61 = vpack.i.bf16 %v4659_v49, %v4662_v48 }
0x12f0   :  { %8835 = vrot.lane.b32.xlu0 %v8834_v61, %s9075_s21 }
0x12f5   :  { %v4665_v55 = vpop.f32.mrf.mxu1 }
0x12f8   :  { %8850 = vrot.lane.b32.xlu0 %v8824_v40, %s9075_s21  ;;  %v4750_v40 = vld [vmem:[%s14789_s2 + $0x180] sm:$0xff] }
0x12fd   :  { %v4668_v43 = vpop.f32.mrf.mxu1 }
0x12fe   :  { %v8854_v1 = vpack.i.bf16 %v4665_v55, %v4668_v43 }
0x1300   :  { %8855 = vrot.lane.b32.xlu1 %v8854_v1, %s9077_s24  ;;  %8830 = vrot.lane.b32.xlu2 %v8854_v1, %s9075_s21 }
0x1301   :  { %4782 = vperm.xlu0 %8864, %v12004_v29  }
0x1308   :  { %8845 = vrot.lane.b32.xlu2 %v8819_v62, %s9075_s21  ;;  %4778 = vperm.xlu1 %8865, %v12069_v54   ;;  %v4759_v62 = vld [vmem:[%s14789_s2 + $0x330] sm:$0xff] }
0x1309   :  { %4762 = vperm.xlu0 %8864, %v11992_v50  }
0x1310   :  { %8860 = vrot.lane.b32.xlu2 %v8834_v61, %s9077_s24  ;;  %4770 = vperm.xlu1 %8865, %v12059_v8  }
0x1311   :  { %4790 = vperm.xlu0 %8864, %v12079_v18  }
0x1318   :  { %4774 = vperm.xlu2 %8866, %v12009_v47   ;;  %4798 = vperm.xlu1 %8865, %v12040_v36  }
0x1319   :  { %8968 = vset.pattern.permute.xlu0 %v9085_v63 }
0x1320   :  { %4766 = vperm.xlu2 %8866, %v11997_v25   ;;  %4786 = vperm.xlu1 %8865, %v12030_v12  }
0x1328   :  { %4794 = vperm.xlu2 %8866, %v12025_v58   ;;  %8969 = vset.pattern.permute.xlu1 %v9085_v63 }
0x1330   :  { %8967 = vset.pattern.permute.xlu2 %v9085_v63 }
0x1332   :  { %v8826_v36 = vpop.permute.xlu1 %8825 }
0x1333   :  { %v8827_v6 = vunpack.i.l.bf16 %v8826_v36  ;;  %v8828_v25 = vunpack.i.h.bf16 %v8826_v36 }
0x133a   :  { %v8816_v50 = vpop.permute.xlu2 %8815 }
0x133b   :  { %v8817_v29 = vunpack.i.l.bf16 %v8816_v50  ;;  %v8818_v8 = vunpack.i.h.bf16 %v8816_v50 }
0x133d   :  { %4831 = vmatpush.msra.mxu3 %v8817_v29 }
0x133f   :  { %4832 = vmatpush.msra.mxu3 %v8818_v8 }
0x1342   :  { %v8821_v47 = vpop.permute.xlu0 %8820 }
0x1343   :  { %v8822_v54 = vunpack.i.l.bf16 %v8821_v47  ;;  %v8823_v18 = vunpack.i.h.bf16 %v8821_v47 }
0x1345   :  { %4833 = vmatpush.msra.mxu3 %v8822_v54 }
0x1347   :  { %4834 = vmatpush.msra.mxu3 %v8823_v18 }
0x1349   :  { %4835 = vmatpush.msra.mxu3 %v8827_v6 }
0x134b   :  { %4836 = vmatpush.msra.mxu3 %v8828_v25 }
0x134d   :  { %4837 = vmatpush.msra.mxu3 %v4668_v43 }
0x134f   :  { %4838 = vmatpush.msra.mxu3 %v4665_v55 }
0x1351   :  { %4839 = vmatpush.msra.mxu3 %v4662_v48 }
0x1352   :  { %v8841_v45 = vpop.permute.xlu1 %8840 }
0x1353   :  { %4840 = vmatpush.msra.mxu3 %v4659_v49  ;;  %v8842_v33 = vunpack.i.l.bf16 %v8841_v45  ;;  %v8843_v51 = vunpack.i.h.bf16 %v8841_v45  ;;  %v4760_v49 = vld [vmem:[%s14789_s2 + $0x338] sm:$0xff] }
0x1355   :  { %4841 = vmatpush.msra.mxu3 %v4656_v16  ;;  %v4756_v16 = vld [vmem:[%s14789_s2 + $0x288] sm:$0xff] }
0x1357   :  { %4842 = vmatpush.msra.mxu3 %v4653_v26  ;;  %v4754_v26 = vld [vmem:[%s14789_s2 + $0x230] sm:$0xff] }
0x1359   :  { %4843 = vmatpush.msra.mxu3 %v4650_v38  ;;  %v4752_v38 = vld [vmem:[%s14789_s2 + $0x1d8] sm:$0xff] }
0x135a   :  { %v8831_v63 = vpop.permute.xlu2 %8830 }
0x135b   :  { %v8832_v58 = vunpack.i.l.bf16 %v8831_v63  ;;  %4844 = vmatpush.msra.mxu3 %v4647_v28  ;;  %v8833_v12 = vunpack.i.h.bf16 %v8831_v63  ;;  %v4757_v28 = vld [vmem:[%s14789_s2 + $0x2d8] sm:$0xff] }
0x135d   :  { %4845 = vmatpush.msra.mxu3 %v4644_v34  ;;  %4880 = vmatpush.msrb.mxu0 %v8832_v58  ;;  %v4755_v34 = vld [vmem:[%s14789_s2 + $0x280] sm:$0xff] }
0x135f   :  { %4846 = vmatpush.msra.mxu3 %v12300_v42  ;;  %4881 = vmatpush.msrb.mxu0 %v8833_v12  ;;  %v4748_v42 = vld [vmem:[%s14789_s2 + $0x128] sm:$0xff] }
0x1360   :  { %4847 = vmatmul.f32.vlgmr.msra.gmra.mxu3 %v4741_v60 }
0x1362   :  { %v8836_v14 = vpop.permute.xlu0 %8835  ;;  %v8846_v53 = vpop.permute.xlu2 %8845 }
0x1363   :  { %v8837_v31 = vunpack.i.l.bf16 %v8836_v14  ;;  %v8838_v57 = vunpack.i.h.bf16 %v8836_v14  ;;  %v8847_v22 = vunpack.i.l.bf16 %v8846_v53  ;;  %v8848_v52 = vunpack.i.h.bf16 %v8846_v53 }
0x1365   :  { %4882 = vmatpush.msrb.mxu0 %v8837_v31 }
0x1367   :  { %4883 = vmatpush.msrb.mxu0 %v8838_v57 }
0x1368   :  { %4850 = vmatmul.f32.gmra.mxu3 %v4743_v44 }
0x1369   :  { %4884 = vmatpush.msrb.mxu0 %v8842_v33 }
0x136a   :  { %v8851_v13 = vpop.permute.xlu0 %8850  ;;  %v8861_v41 = vpop.permute.xlu2 %8860 }
0x136b   :  { %4885 = vmatpush.msrb.mxu0 %v8843_v51  ;;  %v8852_v59 = vunpack.i.l.bf16 %v8851_v13  ;;  %v8853_v21 = vunpack.i.h.bf16 %v8851_v13  ;;  %v8862_v56 = vunpack.i.l.bf16 %v8861_v41  ;;  %v8863_v15 = vunpack.i.h.bf16 %v8861_v41 }
0x136d   :  { %4886 = vmatpush.msrb.mxu0 %v8847_v22 }
0x136f   :  { %4887 = vmatpush.msrb.mxu0 %v8848_v52 }
0x1370   :  { %4853 = vmatmul.f32.gmra.mxu3 %v4745_v2 }
0x1371   :  { %4888 = vmatpush.msrb.mxu0 %v8852_v59 }
0x1372   :  { %v8856_v35 = vpop.permute.xlu1 %8855  ;;  %v4775_v43 = vpop.permute.xlu2 %4774 }
0x1373   :  { %v8857_v19 = vunpack.i.l.bf16 %v8856_v35  ;;  %4889 = vmatpush.msrb.mxu0 %v8853_v21  ;;  %v8858_v17 = vunpack.i.h.bf16 %v8856_v35  ;;  %v4783_v55 = vpop.permute.xlu0 %4782 }
0x1375   :  { %4890 = vmatpush.msrb.mxu0 %v8857_v19 }
0x1377   :  { %4891 = vmatpush.msrb.mxu0 %v8858_v17 }
0x1378   :  { %4856 = vmatmul.f32.gmra.mxu3 %v4747_v46 }
0x1379   :  { %4892 = vmatpush.msrb.mxu0 %v8862_v56 }
0x137a   :  { %v4767_v8 = vpop.permute.xlu2 %4766  ;;  %v4779_v36 = vpop.permute.xlu1 %4778 }
0x137b   :  { %4893 = vmatpush.msrb.mxu0 %v8863_v15  ;;  %v4763_v50 = vpop.permute.xlu0 %4762 }
0x137c   :  { %8255 = vmatmul.msk.f32.vlgmr.msrb.gmra.mxu0 %vm473_vm3, %v4742_v0 }
0x1380   :  { %4859 = vmatmul.f32.gmra.mxu3 %v4749_v10 }
0x1382   :  { %v4771_v14 = vpop.permute.xlu1 %4770 }
0x1384   :  { %8256 = vmatmul.msk.f32.gmra.mxu0 %vm473_vm3, %v4744_v39 }
0x1388   :  { %4862 = vmatmul.f32.gmra.mxu3 %v4751_v27 }
0x138a   :  { %v4799_v19 = vpop.permute.xlu1 %4798 }
0x138c   :  { %8257 = vmatmul.msk.f32.gmra.mxu0 %vm473_vm3, %v4746_v37 }
0x1390   :  { %4865 = vmatmul.f32.gmra.mxu3 %v4753_v4  ;;  %v4791_v4 = vpop.permute.xlu0 %4790 }
0x1392   :  { %v4787_v39 = vpop.permute.xlu1 %4786 }
0x1394   :  { %8258 = vmatmul.msk.f32.gmra.mxu0 %vm473_vm3, %v4748_v42 }
0x1398   :  { %4868 = vmatmul.f32.gmra.mxu3 %v4755_v34 }
0x139c   :  { %8259 = vmatmul.msk.f32.gmra.mxu0 %vm473_vm3, %v4750_v40 }
0x13a0   :  { %4871 = vmatmul.f32.gmra.mxu3 %v4757_v28 }
0x13a4   :  { %8260 = vmatmul.msk.f32.gmra.mxu0 %vm473_vm3, %v4752_v38 }
0x13a8   :  { %4874 = vmatmul.f32.gmra.mxu3 %v4759_v62 }
0x13ac   :  { %8261 = vmatmul.msk.f32.gmra.mxu0 %vm473_vm3, %v4754_v26 }
0x13b4   :  { %8262 = vmatmul.msk.f32.gmra.mxu0 %vm473_vm3, %v4756_v16 }
0x13bc   :  { %8263 = vmatmul.msk.f32.gmra.mxu0 %vm473_vm3, %v4758_v20 }
0x13c4   :  { %8264 = vmatmul.msk.f32.gmra.mxu0 %vm473_vm3, %v4760_v49 }
0x13e3   :  { %v4848_v48 = vpop.f32.mrf.mxu3 }
0x13e4   :  { %v4849_v47 = vadd.f32 %v4848_v48, %v4763_v50  ;;  %v4795_v48 = vpop.permute.xlu2 %4794 }
0x13eb   :  { %v4851_v61 = vpop.f32.mrf.mxu3 }
0x13ec   :  { %v4852_v54 = vadd.f32 %v4851_v61, %v4767_v8 }
0x13f3   :  { %v4854_v1 = vpop.f32.mrf.mxu3 }
0x13f4   :  { %v4855_v57 = vadd.f32 %v4854_v1, %v4771_v14 }
0x13f9   :  { %v4895_v29 = vpop.f32.mrf.mxu0 }
0x13fa   :  { %v12397_v18 = vadd.f32 %v4895_v29, %v4849_v47 }
0x13fb   :  { %v4857_v6 = vpop.f32.mrf.mxu3 }
0x13fc   :  { %v4925_v58 = vmax.f32 %v12397_v18, 0.0  ;;  %v4858_v44 = vadd.f32 %v4857_v6, %v4775_v43 }
0x1401   :  { %v4898_v25 = vpop.f32.mrf.mxu0 }
0x1402   :  { %v12399_v63 = vadd.f32 %v4898_v25, %v4852_v54 }
0x1403   :  { %v4860_v45 = vpop.f32.mrf.mxu3 }
0x1404   :  { %v4926_v12 = vmax.f32 %v12399_v63, 0.0  ;;  %v4861_v21 = vadd.f32 %v4860_v45, %v4779_v36 }
0x1406   :  { %v8867_v60 = vpack.i.bf16 %v4925_v58, %v4926_v12 }
0x1408   :  { %8868 = vrot.lane.b32.xlu1 %v8867_v60, %s9080_s28 }
0x1409   :  { %v4901_v31 = vpop.f32.mrf.mxu0 }
0x140a   :  { %v12408_v33 = vadd.f32 %v4901_v31, %v4855_v57 }
0x140b   :  { %v4863_v52 = vpop.f32.mrf.mxu3 }
0x140c   :  { %v4927_v22 = vmax.f32 %v12408_v33, 0.0  ;;  %v4864_v35 = vadd.f32 %v4863_v52, %v4783_v55 }
0x1411   :  { %v4904_v53 = vpop.f32.mrf.mxu0 }
0x1412   :  { %v12410_v51 = vadd.f32 %v4904_v53, %v4858_v44 }
0x1413   :  { %v4866_v41 = vpop.f32.mrf.mxu3 }
0x1414   :  { %v4928_v13 = vmax.f32 %v12410_v51, 0.0  ;;  %v4867_v42 = vadd.f32 %v4866_v41, %v4787_v39  ;;  %v5038_v51 = vld [vmem:[%s14790_s3 + $0x18] sm:$0xff] }
0x1416   :  { %v8872_v2 = vpack.i.bf16 %v4927_v22, %v4928_v13 }
0x1418   :  { %8873 = vrot.lane.b32.xlu0 %v8872_v2, %s9080_s28 }
0x1419   :  { %v4907_v59 = vpop.f32.mrf.mxu0 }
0x141a   :  { %v12419_v17 = vadd.f32 %v4907_v59, %v4861_v21  ;;  %v5035_v21 = vld [vmem:[%s14790_s3] sm:$0xff] }
0x141b   :  { %v4869_v27 = vpop.f32.mrf.mxu3 }
0x141c   :  { %v4929_v15 = vmax.f32 %v12419_v17, 0.0  ;;  %v4870_v34 = vadd.f32 %v4869_v27, %v4791_v4  ;;  %v5044_v4 = vld [vmem:[%s14790_s3 + $0x48] sm:$0xff] }
0x1421   :  { %v4910_v46 = vpop.f32.mrf.mxu0 }
0x1422   :  { %v12421_v56 = vadd.f32 %v4910_v46, %v4864_v35 }
0x1423   :  { %v4872_v62 = vpop.f32.mrf.mxu3 }
0x1424   :  { %v4930_v0 = vmax.f32 %v12421_v56, 0.0  ;;  %v4873_v55 = vadd.f32 %v4872_v62, %v4795_v48 }
0x1426   :  { %v8877_v10 = vpack.i.bf16 %v4929_v15, %v4930_v0 }
0x1428   :  { %8878 = vrot.lane.b32.xlu2 %v8877_v10, %s9080_s28 }
0x1429   :  { %v4913_v37 = vpop.f32.mrf.mxu0 }
0x142a   :  { %v4914_v40 = vadd.f32 %v4913_v37, %v4867_v42 }
0x142b   :  { %v4875_v61 = vpop.f32.mrf.mxu3 }
0x142c   :  { %v4931_v26 = vmax.f32 %v4914_v40, 0.0  ;;  %v4876_v43 = vadd.f32 %v4875_v61, %v4799_v19 }
0x1430   :  { %8883 = vrot.lane.b32.xlu2 %v8867_v60, %s9079_s27 }
0x1431   :  { %v4916_v28 = vpop.f32.mrf.mxu0 }
0x1432   :  { %v4917_v38 = vadd.f32 %v4916_v28, %v4870_v34 }
0x1434   :  { %v4932_v16 = vmax.f32 %v4917_v38, 0.0 }
0x1436   :  { %v8892_v20 = vpack.i.bf16 %v4931_v26, %v4932_v16 }
0x1438   :  { %8888 = vrot.lane.b32.xlu2 %v8877_v10, %s9081_s29  ;;  %8893 = vrot.lane.b32.xlu1 %v8892_v20, %s9081_s29 }
0x1439   :  { %v4919_v49 = vpop.f32.mrf.mxu0 }
0x143a   :  { %v4920_v1 = vadd.f32 %v4919_v49, %v4873_v55  ;;  %v5047_v49 = vld [vmem:[%s14790_s3 + $0x60] sm:$0xff] }
0x143c   :  { %v4933_v8 = vmax.f32 %v4920_v1, 0.0 }
0x1440   :  { %8903 = vrot.lane.b32.xlu2 %v8892_v20, %s9079_s27  ;;  %8898 = vrot.lane.b32.xlu1 %v8872_v2, %s9081_s29 }
0x1441   :  { %v4922_v50 = vpop.f32.mrf.mxu0 }
0x1442   :  { %v4923_v29 = vadd.f32 %v4922_v50, %v4876_v43  ;;  %v5037_v50 = vld [vmem:[%s14790_s3 + $0x10] sm:$0xff] }
0x1444   :  { %v4934_v47 = vmax.f32 %v4923_v29, 0.0  ;;  %v5036_v29 = vld [vmem:[%s14790_s3 + $0x8] sm:$0xff] }
0x1446   :  { %v8907_v54 = vpack.i.bf16 %v4933_v8, %v4934_v47 }
0x1448   :  { %8908 = vrot.lane.b32.xlu0 %v8907_v54, %s9081_s29  ;;  %8928 = vrot.lane.b32.xlu2 %v8907_v54, %s9080_s28 }
0x1449   :  { %8923 = vrot.lane.b32.xlu1 %v8877_v10, %s9079_s27 }
0x1450   :  { %8913 = vrot.lane.b32.xlu0 %v8907_v54, %s9079_s27  ;;  %v5039_v54 = vld [vmem:[%s14790_s3 + $0x20] sm:$0xff] }
0x1451   :  { %8938 = vrot.lane.b32.xlu1 %v8892_v20, %s9080_s28 }
0x1458   :  { %8918 = vrot.lane.b32.xlu0 %v8867_v60, %s9081_s29 }
0x1460   :  { %8933 = vrot.lane.b32.xlu0 %v8872_v2, %s9079_s27 }
0x147a   :  { %v8869_v44 = vpop.permute.xlu1 %8868 }
0x147b   :  { %v8870_v59 = vunpack.i.l.bf16 %v8869_v44  ;;  %v8871_v60 = vunpack.i.h.bf16 %v8869_v44  ;;  %v5049_v44 = vld [vmem:[%s14790_s3 + $0x70] sm:$0xff] }
0x1482   :  { %v8879_v36 = vpop.permute.xlu2 %8878 }
0x1483   :  { %v8880_v6 = vunpack.i.l.bf16 %v8879_v36  ;;  %v8881_v25 = vunpack.i.h.bf16 %v8879_v36  ;;  %v5053_v36 = vld [vmem:[%s14790_s3 + $0x90] sm:$0xff] }
0x1485   :  { %5385 = vmatpush.msrb.mxu2 %v8880_v6  ;;  %v5043_v6 = vld [vmem:[%s14790_s3 + $0x40] sm:$0xff] }
0x1487   :  { %5386 = vmatpush.msrb.mxu2 %v8881_v25  ;;  %v5042_v25 = vld [vmem:[%s14790_s3 + $0x38] sm:$0xff] }
0x148a   :  { %v8874_v14 = vpop.permute.xlu0 %8873  ;;  %v8884_v31 = vpop.permute.xlu2 %8883 }
0x148b   :  { %v8875_v45 = vunpack.i.l.bf16 %v8874_v14  ;;  %v8885_v57 = vunpack.i.l.bf16 %v8884_v31  ;;  %v8876_v53 = vunpack.i.h.bf16 %v8874_v14  ;;  %v8886_v52 = vunpack.i.h.bf16 %v8884_v31  ;;  %v5056_v14 = vld [vmem:[%s14790_s3 + $0xa8] sm:$0xff]  ;;  %v5046_v31 = vld [vmem:[%s14790_s3 + $0x58] sm:$0xff] }
0x148d   :  { %5387 = vmatpush.msrb.mxu2 %v8875_v45  ;;  %5552 = vmatpush.msra.mxu1 %v8885_v57  ;;  %v5045_v45 = vld [vmem:[%s14790_s3 + $0x50] sm:$0xff]  ;;  %v5059_v57 = vld [vmem:[%s14790_s3 + $0xc0] sm:$0xff] }
0x148f   :  { %5388 = vmatpush.msrb.mxu2 %v8876_v53  ;;  %5553 = vmatpush.msra.mxu1 %v8886_v52  ;;  %v5048_v53 = vld [vmem:[%s14790_s3 + $0x68] sm:$0xff]  ;;  %v5062_v52 = vld [vmem:[%s14790_s3 + $0xd8] sm:$0xff] }
0x1491   :  { %5389 = vmatpush.msrb.mxu2 %v8870_v59  ;;  %v5052_v59 = vld [vmem:[%s14790_s3 + $0x88] sm:$0xff] }
0x1492   :  { %v8889_v35 = vpop.permute.xlu2 %8888 }
0x1493   :  { %5390 = vmatpush.msrb.mxu2 %v8871_v60  ;;  %v8890_v17 = vunpack.i.l.bf16 %v8889_v35  ;;  %v8891_v56 = vunpack.i.h.bf16 %v8889_v35  ;;  %v5051_v60 = vld [vmem:[%s14790_s3 + $0x80] sm:$0xff]  ;;  %v5054_v35 = vld [vmem:[%s14790_s3 + $0x98] sm:$0xff] }
0x1495   :  { %5391 = vmatpush.msrb.mxu2 %v4934_v47  ;;  %v5040_v47 = vld [vmem:[%s14790_s3 + $0x28] sm:$0xff] }
0x1497   :  { %5392 = vmatpush.msrb.mxu2 %v4933_v8  ;;  %v5050_v8 = vld [vmem:[%s14790_s3 + $0x78] sm:$0xff] }
0x1499   :  { %5393 = vmatpush.msrb.mxu2 %v4932_v16 }
0x149a   :  { %v8904_v19 = vpop.permute.xlu2 %8903 }
0x149b   :  { %5394 = vmatpush.msrb.mxu2 %v4931_v26  ;;  %v8905_v10 = vunpack.i.l.bf16 %v8904_v19  ;;  %v8906_v27 = vunpack.i.h.bf16 %v8904_v19  ;;  %v5063_v19 = vld [vmem:[%s14790_s3 + $0xe0] sm:$0xff] }
0x149d   :  { %5395 = vmatpush.msrb.mxu2 %v4930_v0 }
0x149f   :  { %5396 = vmatpush.msrb.mxu2 %v4929_v15 }
0x14a1   :  { %5397 = vmatpush.msrb.mxu2 %v4928_v13 }
0x14a2   :  { %v8929_v28 = vpop.permute.xlu2 %8928 }
0x14a3   :  { %5398 = vmatpush.msrb.mxu2 %v4927_v22  ;;  %v8930_v26 = vunpack.i.l.bf16 %v8929_v28  ;;  %v8931_v20 = vunpack.i.h.bf16 %v8929_v28  ;;  %v5089_v28 = vld [vmem:[%s14790_s3 + $0x1b0] sm:$0xff] }
0x14a5   :  { %5399 = vmatpush.msrb.mxu2 %v4926_v12 }
0x14a7   :  { %5400 = vmatpush.msrb.mxu2 %v4925_v58  ;;  %v5041_v58 = vld [vmem:[%s14790_s3 + $0x30] sm:$0xff] }
0x14a8   :  { %5401 = vmatmul.f32.vlgmr.msrb.gmra.mxu2 %v5035_v21  ;;  %v5055_v21 = vld [vmem:[%s14790_s3 + $0xa0] sm:$0xff] }
0x14aa   :  { %v8894_v2 = vpop.permute.xlu1 %8893 }
0x14ab   :  { %v8895_v12 = vunpack.i.l.bf16 %v8894_v2  ;;  %v8896_v18 = vunpack.i.h.bf16 %v8894_v2  ;;  %v5065_v2 = vld [vmem:[%s14790_s3 + $0xf0] sm:$0xff] }
0x14b0   :  { %5404 = vmatmul.f32.gmra.mxu2 %v5038_v51  ;;  %v5068_v51 = vld [vmem:[%s14790_s3 + $0x108] sm:$0xff] }
0x14b2   :  { %v8899_v22 = vpop.permute.xlu1 %8898 }
0x14b3   :  { %v8900_v39 = vunpack.i.l.bf16 %v8899_v22  ;;  %v8901_v37 = vunpack.i.h.bf16 %v8899_v22  ;;  %v5071_v22 = vld [vmem:[%s14790_s3 + $0x120] sm:$0xff] }
0x14b8   :  { %5407 = vmatmul.f32.gmra.mxu2 %v5041_v58  ;;  %v5064_v58 = vld [vmem:[%s14790_s3 + $0xe8] sm:$0xff] }
0x14ba   :  { %v8909_v13 = vpop.permute.xlu0 %8908 }
0x14bb   :  { %v8910_v33 = vunpack.i.l.bf16 %v8909_v13  ;;  %v8911_v63 = vunpack.i.h.bf16 %v8909_v13  ;;  %v8924_v0 = vpop.permute.xlu1 %8923  ;;  %v5058_v13 = vld [vmem:[%s14790_s3 + $0xb8] sm:$0xff] }
0x14bc   :  { %v8925_v34 = vunpack.i.l.bf16 %v8924_v0  ;;  %v8926_v38 = vunpack.i.h.bf16 %v8924_v0  ;;  %v5069_v0 = vld [vmem:[%s14790_s3 + $0x110] sm:$0xff] }
0x14bd   :  { %5554 = vmatpush.msra.mxu1 %v8910_v33  ;;  %v5057_v33 = vld [vmem:[%s14790_s3 + $0xb0] sm:$0xff] }
0x14bf   :  { %5555 = vmatpush.msra.mxu1 %v8911_v63  ;;  %v5061_v63 = vld [vmem:[%s14790_s3 + $0xd0] sm:$0xff] }
0x14c0   :  { %5410 = vmatmul.f32.gmra.mxu2 %v5044_v4  ;;  %v5086_v4 = vld [vmem:[%s14790_s3 + $0x198] sm:$0xff] }
0x14c1   :  { %5556 = vmatpush.msra.mxu1 %v8895_v12  ;;  %v5060_v12 = vld [vmem:[%s14790_s3 + $0xc8] sm:$0xff] }
0x14c2   :  { %v8914_v41 = vpop.permute.xlu0 %8913 }
0x14c3   :  { %v8915_v46 = vunpack.i.l.bf16 %v8914_v41  ;;  %5557 = vmatpush.msra.mxu1 %v8896_v18  ;;  %v8916_v15 = vunpack.i.h.bf16 %v8914_v41  ;;  %v8939_v16 = vpop.permute.xlu1 %8938  ;;  %v5074_v18 = vld [vmem:[%s14790_s3 + $0x138] sm:$0xff]  ;;  %v5077_v41 = vld [vmem:[%s14790_s3 + $0x150] sm:$0xff] }
0x14c4   :  { %v8940_v61 = vunpack.i.l.bf16 %v8939_v16  ;;  %v8941_v43 = vunpack.i.h.bf16 %v8939_v16  ;;  %v5092_v16 = vld [vmem:[%s14790_s3 + $0x1c8] sm:$0xff] }
0x14c5   :  { %5558 = vmatpush.msra.mxu1 %v8890_v17  ;;  %5727 = vmatpush.msrb.mxu3 %v8915_v46  ;;  %v5067_v17 = vld [vmem:[%s14790_s3 + $0x100] sm:$0xff]  ;;  %v5066_v46 = vld [vmem:[%s14790_s3 + $0xf8] sm:$0xff] }
0x14c7   :  { %5559 = vmatpush.msra.mxu1 %v8891_v56  ;;  %5728 = vmatpush.msrb.mxu3 %v8916_v15  ;;  %v5080_v56 = vld [vmem:[%s14790_s3 + $0x168] sm:$0xff]  ;;  %v5070_v15 = vld [vmem:[%s14790_s3 + $0x118] sm:$0xff] }
0x14c8   :  { %5413 = vmatmul.f32.gmra.mxu2 %v5047_v49  ;;  %v5081_v49 = vld [vmem:[%s14790_s3 + $0x170] sm:$0xff] }
0x14c9   :  { %5560 = vmatpush.msra.mxu1 %v8900_v39  ;;  %5729 = vmatpush.msrb.mxu3 %v8905_v10  ;;  %v5083_v10 = vld [vmem:[%s14790_s3 + $0x180] sm:$0xff]  ;;  %v5073_v39 = vld [vmem:[%s14790_s3 + $0x130] sm:$0xff] }
0x14ca   :  { %v8919_v42 = vpop.permute.xlu0 %8918 }
0x14cb   :  { %v8920_v40 = vunpack.i.l.bf16 %v8919_v42  ;;  %5561 = vmatpush.msra.mxu1 %v8901_v37  ;;  %5730 = vmatpush.msrb.mxu3 %v8906_v27  ;;  %v8921_v62 = vunpack.i.h.bf16 %v8919_v42  ;;  %v5072_v27 = vld [vmem:[%s14790_s3 + $0x128] sm:$0xff] }
0x14cc   :  { %v5076_v42 = vld [vmem:[%s14790_s3 + $0x148] sm:$0xff] }
0x14cd   :  { %5562 = vmatpush.msra.mxu1 %v8920_v40  ;;  %5731 = vmatpush.msrb.mxu3 %v8925_v34  ;;  %v5075_v34 = vld [vmem:[%s14790_s3 + $0x140] sm:$0xff] }
0x14cf   :  { %5563 = vmatpush.msra.mxu1 %v8921_v62  ;;  %5732 = vmatpush.msrb.mxu3 %v8926_v38  ;;  %v5079_v38 = vld [vmem:[%s14790_s3 + $0x160] sm:$0xff]  ;;  %v5078_v62 = vld [vmem:[%s14790_s3 + $0x158] sm:$0xff] }
0x14d0   :  { %5416 = vmatmul.f32.gmra.mxu2 %v5050_v8 }
0x14d1   :  { %5564 = vmatpush.msra.mxu1 %v8930_v26 }
0x14d2   :  { %v8934_v48 = vpop.permute.xlu0 %8933 }
0x14d3   :  { %v8935_v55 = vunpack.i.l.bf16 %v8934_v48  ;;  %5565 = vmatpush.msra.mxu1 %v8931_v20  ;;  %v8936_v1 = vunpack.i.h.bf16 %v8934_v48  ;;  %v5082_v20 = vld [vmem:[%s14790_s3 + $0x178] sm:$0xff] }
0x14d5   :  { %5566 = vmatpush.msra.mxu1 %v8940_v61  ;;  %5733 = vmatpush.msrb.mxu3 %v8935_v55  ;;  %v12625_v61 = vld [vmem:[%s14793_s6] sm:$0xff] }
0x14d7   :  { %5567 = vmatpush.msra.mxu1 %v8941_v43  ;;  %5734 = vmatpush.msrb.mxu3 %v8936_v1  ;;  %v5095_v43 = vld [vmem:[%s14790_s3 + $0x1e0] sm:$0xff]  ;;  %v5085_v1 = vld [vmem:[%s14790_s3 + $0x190] sm:$0xff] }
0x14d8   :  { %8265 = vmatmul.msk.f32.vlgmr.msrb.gmra.mxu3 %vm1251_vm5, %v5037_v50  ;;  %5568 = vmatmul.f32.vlgmr.msra.gmra.mxu1 %v5036_v29  ;;  %v5084_v29 = vld [vmem:[%s14790_s3 + $0x188] sm:$0xff] }
0x14d9   :  { %5419 = vmatmul.f32.gmra.mxu2 %v5053_v36 }
0x14e0   :  { %8266 = vmatmul.msk.f32.gmra.mxu3 %vm1251_vm5, %v5040_v47  ;;  %5571 = vmatmul.f32.gmra.mxu1 %v5039_v54  ;;  %v12641_v54 = vld [vmem:[%s14793_s6 + $0x8] sm:$0xff] }
0x14e1   :  { %5422 = vmatmul.f32.gmra.mxu2 %v5056_v14  ;;  %v5098_v14 = vld [vmem:[%s14790_s3 + $0x1f8] sm:$0xff] }
0x14e8   :  { %8267 = vmatmul.msk.f32.gmra.mxu3 %vm1251_vm5, %v5043_v6  ;;  %5574 = vmatmul.f32.gmra.mxu1 %v5042_v25 }
0x14e9   :  { %5425 = vmatmul.f32.gmra.mxu2 %v5059_v57  ;;  %v5087_v57 = vld [vmem:[%s14790_s3 + $0x1a0] sm:$0xff] }
0x14f0   :  { %8268 = vmatmul.msk.f32.gmra.mxu3 %vm1251_vm5, %v5046_v31  ;;  %5577 = vmatmul.f32.gmra.mxu1 %v5045_v45  ;;  %v5088_v31 = vld [vmem:[%s14790_s3 + $0x1a8] sm:$0xff] }
0x14f1   :  { %5428 = vmatmul.f32.gmra.mxu2 %v5062_v52  ;;  %v12659_v52 = vld [vmem:[%s14793_s6 + $0x10] sm:$0xff] }
0x14f8   :  { %8269 = vmatmul.msk.f32.gmra.mxu3 %vm1251_vm5, %v5049_v44  ;;  %5580 = vmatmul.f32.gmra.mxu1 %v5048_v53 }
0x14f9   :  { %5431 = vmatmul.f32.gmra.mxu2 %v5065_v2 }
0x1500   :  { %8270 = vmatmul.msk.f32.gmra.mxu3 %vm1251_vm5, %v5052_v59  ;;  %5583 = vmatmul.f32.gmra.mxu1 %v5051_v60 }
0x1501   :  { %5434 = vmatmul.f32.gmra.mxu2 %v5068_v51 }
0x1508   :  { %8271 = vmatmul.msk.f32.gmra.mxu3 %vm1251_vm5, %v5055_v21  ;;  %5586 = vmatmul.f32.gmra.mxu1 %v5054_v35  ;;  %v5101_v21 = vld [vmem:[%s14790_s3 + $0x210] sm:$0xff]  ;;  %v5091_v35 = vld [vmem:[%s14790_s3 + $0x1c0] sm:$0xff] }
0x1509   :  { %5437 = vmatmul.f32.gmra.mxu2 %v5071_v22 }
0x1510   :  { %8272 = vmatmul.msk.f32.gmra.mxu3 %vm1251_vm5, %v5058_v13  ;;  %5589 = vmatmul.f32.gmra.mxu1 %v5057_v33  ;;  %v5090_v13 = vld [vmem:[%s14790_s3 + $0x1b8] sm:$0xff] }
0x1511   :  { %5440 = vmatmul.f32.gmra.mxu2 %v5074_v18 }
0x1518   :  { %8273 = vmatmul.msk.f32.gmra.mxu3 %vm1251_vm5, %v5061_v63  ;;  %5592 = vmatmul.f32.gmra.mxu1 %v5060_v12  ;;  %v12677_v63 = vld [vmem:[%s14793_s6 + $0x18] sm:$0xff] }
0x1519   :  { %5443 = vmatmul.f32.gmra.mxu2 %v5077_v41  ;;  %v5094_v41 = vld [vmem:[%s14790_s3 + $0x1d8] sm:$0xff] }
0x1520   :  { %8274 = vmatmul.msk.f32.gmra.mxu3 %vm1251_vm5, %v5064_v58  ;;  %5595 = vmatmul.f32.gmra.mxu1 %v5063_v19  ;;  %v5104_v19 = vld [vmem:[%s14790_s3 + $0x228] sm:$0xff] }
0x1521   :  { %5446 = vmatmul.f32.gmra.mxu2 %v5080_v56 }
0x1528   :  { %8275 = vmatmul.msk.f32.gmra.mxu3 %vm1251_vm5, %v5067_v17  ;;  %5598 = vmatmul.f32.gmra.mxu1 %v5066_v46  ;;  %v5093_v46 = vld [vmem:[%s14790_s3 + $0x1d0] sm:$0xff] }
0x1529   :  { %5449 = vmatmul.f32.gmra.mxu2 %v5083_v10 }
0x152b   :  { %v5402_v37 = vpop.f32.mrf.mxu2 }
0x152c   :  { %v5403_v55 = vadd.f32 %v5402_v37, %v12625_v61  ;;  %v5107_v37 = vld [vmem:[%s14790_s3 + $0x240] sm:$0xff] }
0x1530   :  { %8276 = vmatmul.msk.f32.gmra.mxu3 %vm1251_vm5, %v5070_v15  ;;  %5601 = vmatmul.f32.gmra.mxu1 %v5069_v0  ;;  %v12695_v0 = vld [vmem:[%s14793_s6 + $0x20] sm:$0xff] }
0x1531   :  { %5452 = vmatmul.f32.gmra.mxu2 %v5086_v4  ;;  %v5097_v4 = vld [vmem:[%s14790_s3 + $0x1f0] sm:$0xff] }
0x1533   :  { %v5405_v40 = vpop.f32.mrf.mxu2 }
0x1534   :  { %v5406_v25 = vadd.f32 %v5405_v40, %v12641_v54 }
0x1538   :  { %8277 = vmatmul.msk.f32.gmra.mxu3 %vm1251_vm5, %v5073_v39  ;;  %5604 = vmatmul.f32.gmra.mxu1 %v5072_v27 }
0x1539   :  { %5455 = vmatmul.f32.gmra.mxu2 %v5089_v28 }
0x153b   :  { %v5408_v26 = vpop.f32.mrf.mxu2 }
0x153c   :  { %v5409_v2 = vadd.f32 %v5408_v26, %v12659_v52 }
0x1540   :  { %8278 = vmatmul.msk.f32.gmra.mxu3 %vm1251_vm5, %v5076_v42  ;;  %5607 = vmatmul.f32.gmra.mxu1 %v5075_v34  ;;  %v5096_v34 = vld [vmem:[%s14790_s3 + $0x1e8] sm:$0xff] }
0x1541   :  { %5458 = vmatmul.f32.gmra.mxu2 %v5092_v16 }
0x1543   :  { %v5411_v48 = vpop.f32.mrf.mxu2 }
0x1544   :  { %v5412_v58 = vadd.f32 %v5411_v48, %v12677_v63 }
0x1548   :  { %8279 = vmatmul.msk.f32.gmra.mxu3 %vm1251_vm5, %v5079_v38  ;;  %5610 = vmatmul.f32.gmra.mxu1 %v5078_v62  ;;  %v5190_v38 = vld [vmem:[%s14793_s6 + $0x28] sm:$0xff] }
0x1549   :  { %5461 = vmatmul.f32.gmra.mxu2 %v5095_v43 }
0x154b   :  { %v5414_v8 = vpop.f32.mrf.mxu2 }
0x154c   :  { %v5415_v27 = vadd.f32 %v5414_v8, %v12695_v0 }
0x1550   :  { %8280 = vmatmul.msk.f32.gmra.mxu3 %vm1251_vm5, %v5082_v20  ;;  %5613 = vmatmul.f32.gmra.mxu1 %v5081_v49  ;;  %v5110_v20 = vld [vmem:[%s14790_s3 + $0x258] sm:$0xff]  ;;  %v5100_v49 = vld [vmem:[%s14790_s3 + $0x208] sm:$0xff] }
0x1551   :  { %5464 = vmatmul.f32.gmra.mxu2 %v5098_v14 }
0x1553   :  { %v5417_v44 = vpop.f32.mrf.mxu2 }
0x1554   :  { %v5418_v16 = vadd.f32 %v5417_v44, %v5190_v38  ;;  %v5112_v38 = vld [vmem:[%s14790_s3 + $0x268] sm:$0xff] }
0x1555   :  { %v5569_v50 = vpop.f32.mrf.mxu1 }
0x1556   :  { %v5570_v47 = vadd.f32 %v5569_v50, %v5403_v55  ;;  %v5099_v55 = vld [vmem:[%s14790_s3 + $0x200] sm:$0xff]  ;;  %v5191_v50 = vld [vmem:[%s14793_s6 + $0x30] sm:$0xff] }
0x1558   :  { %8281 = vmatmul.msk.f32.gmra.mxu3 %vm1251_vm5, %v5085_v1  ;;  %5616 = vmatmul.f32.gmra.mxu1 %v5084_v29 }
0x1559   :  { %5467 = vmatmul.f32.gmra.mxu2 %v5101_v21 }
0x155b   :  { %v5736_v36 = vpop.f32.mrf.mxu3 }
0x155c   :  { %v12643_v6 = vadd.f32 %v5736_v36, %v5570_v47  ;;  %v5420_v33 = vpop.f32.mrf.mxu2  ;;  %v5113_v36 = vld [vmem:[%s14790_s3 + $0x270] sm:$0xff] }
0x155d   :  { %v5572_v45 = vpop.f32.mrf.mxu1  ;;  %v5421_v47 = vadd.f32 %v5420_v33, %v5191_v50  ;;  %v5105_v33 = vld [vmem:[%s14790_s3 + $0x230] sm:$0xff] }
0x155e   :  { %v5573_v53 = vadd.f32 %v5572_v45, %v5406_v25  ;;  %v5103_v25 = vld [vmem:[%s14790_s3 + $0x220] sm:$0xff]  ;;  %v12744_v45 = vld [vmem:[%s14793_s6 + $0x50] sm:$0xff] }
0x155f   :  { %6196 = vrot.lane.b32.xlu2 %v12744_v45, %s9080_s28 }
0x1560   :  { %8282 = vmatmul.msk.f32.gmra.mxu3 %vm1251_vm5, %v5088_v31  ;;  %5619 = vmatmul.f32.gmra.mxu1 %v5087_v57  ;;  %v5102_v31 = vld [vmem:[%s14790_s3 + $0x218] sm:$0xff] }
0x1561   :  { %5470 = vmatmul.f32.gmra.mxu2 %v5104_v19 }
0x1563   :  { %v5739_v59 = vpop.f32.mrf.mxu3 }
0x1564   :  { %v12661_v60 = vadd.f32 %v5739_v59, %v5573_v53  ;;  %v5423_v56 = vpop.f32.mrf.mxu2  ;;  %v5192_v53 = vld [vmem:[%s14793_s6 + $0x38] sm:$0xff] }
0x1565   :  { %v5575_v51 = vpop.f32.mrf.mxu1  ;;  %v5424_v21 = vadd.f32 %v5423_v56, %v5192_v53  ;;  %v5119_v56 = vld [vmem:[%s14790_s3 + $0x2a0] sm:$0xff]  ;;  %v5117_v53 = vld [vmem:[%s14790_s3 + $0x290] sm:$0xff] }
0x1566   :  { %v5576_v22 = vadd.f32 %v5575_v51, %v5409_v2  ;;  %v5106_v51 = vld [vmem:[%s14790_s3 + $0x238] sm:$0xff] }
0x1568   :  { %8283 = vmatmul.msk.f32.gmra.mxu3 %vm1251_vm5, %v5091_v35  ;;  %5622 = vmatmul.f32.gmra.mxu1 %v5090_v13  ;;  %v5116_v35 = vld [vmem:[%s14790_s3 + $0x288] sm:$0xff] }
0x1569   :  { %5473 = vmatmul.f32.gmra.mxu2 %v5107_v37 }
0x156b   :  { %v5742_v12 = vpop.f32.mrf.mxu3 }
0x156c   :  { %v12679_v18 = vadd.f32 %v5742_v12, %v5576_v22  ;;  %v5426_v40 = vpop.f32.mrf.mxu2  ;;  %v12768_v22 = vld [vmem:[%s14793_s6 + $0x58] sm:$0xff]  ;;  %v5193_v12 = vld [vmem:[%s14793_s6 + $0x40] sm:$0xff] }
0x156d   :  { %v5578_v17 = vpop.f32.mrf.mxu1  ;;  %6198 = vrot.lane.b32.xlu2 %v12768_v22, %s9080_s28 }
0x156e   :  { %v5579_v15 = vadd.f32 %v5578_v17, %v5412_v58 }
0x1570   :  { %8284 = vmatmul.msk.f32.gmra.mxu3 %vm1251_vm5, %v5094_v41  ;;  %5625 = vmatmul.f32.gmra.mxu1 %v5093_v46  ;;  %v5427_v41 = vadd.f32 %v5426_v40, %v5193_v12 }
0x1571   :  { %5476 = vmatmul.f32.gmra.mxu2 %v5110_v20  ;;  %v12815_v20 = vld [vmem:[%s14793_s6 + $0x68] sm:$0xff] }
0x1573   :  { %v5745_v10 = vpop.f32.mrf.mxu3 }
0x1574   :  { %v12697_v39 = vadd.f32 %v5745_v10, %v5579_v15  ;;  %v12724_v43 = vpop.f32.mrf.mxu2  ;;  %v5109_v15 = vld [vmem:[%s14790_s3 + $0x250] sm:$0xff] }
0x1575   :  { %v5581_v42 = vpop.f32.mrf.mxu1 }
0x1576   :  { %v5582_v28 = vadd.f32 %v5581_v42, %v5415_v27  ;;  %v5108_v27 = vld [vmem:[%s14790_s3 + $0x248] sm:$0xff] }
0x1578   :  { %8285 = vmatmul.msk.f32.gmra.mxu3 %vm1251_vm5, %v5097_v4  ;;  %5628 = vmatmul.f32.gmra.mxu1 %v5096_v34  ;;  %v12792_v4 = vld [vmem:[%s14793_s6 + $0x60] sm:$0xff] }
0x1579   :  { %5479 = vmatmul.f32.gmra.mxu2 %v5113_v36  ;;  %6200 = vrot.lane.b32.xlu2 %v12792_v4, %s9080_s28 }
0x157b   :  { %v5748_v62 = vpop.f32.mrf.mxu3 }
0x157c   :  { %v12713_v26 = vadd.f32 %v5748_v62, %v5582_v28  ;;  %v12746_v57 = vpop.f32.mrf.mxu2  ;;  %v5122_v28 = vld [vmem:[%s14790_s3 + $0x2b8] sm:$0xff] }
0x157d   :  { %v5584_v48 = vpop.f32.mrf.mxu1 }
0x157e   :  { %v5585_v1 = vadd.f32 %v5584_v48, %v5418_v16  ;;  %v5111_v16 = vld [vmem:[%s14790_s3 + $0x260] sm:$0xff] }
0x1580   :  { %8286 = vmatmul.msk.f32.gmra.mxu3 %vm1251_vm5, %v5100_v49  ;;  %5631 = vmatmul.f32.gmra.mxu1 %v5099_v55  ;;  %v5125_v55 = vld [vmem:[%s14790_s3 + $0x2d0] sm:$0xff] }
0x1581   :  { %5482 = vmatmul.f32.gmra.mxu2 %v5116_v35  ;;  %6202 = vrot.lane.b32.xlu2 %v12815_v20, %s9080_s28  ;;  %v5131_v35 = vld [vmem:[%s14790_s3 + $0x300] sm:$0xff] }
0x1583   :  { %v5751_v29 = vpop.f32.mrf.mxu3 }
0x1584   :  { %v12730_v8 = vadd.f32 %v5751_v29, %v5585_v1  ;;  %v12773_v58 = vpop.f32.mrf.mxu2  ;;  %v5115_v1 = vld [vmem:[%s14790_s3 + $0x280] sm:$0xff]  ;;  %v5114_v29 = vld [vmem:[%s14790_s3 + $0x278] sm:$0xff] }
0x1585   :  { %v5587_v14 = vpop.f32.mrf.mxu1  ;;  %v5436_v3 = vadd.f32 %v12773_v58, %v12768_v22  ;;  %v5433_v22 = vadd.f32 %v12746_v57, %v12744_v45  ;;  %v5132_v45 = vld [vmem:[%s14790_s3 + $0x308] sm:$0xff] }
0x1586   :  { %v5588_v44 = vadd.f32 %v5587_v14, %v5421_v47  ;;  %v5199_v47 = vld [vmem:[%s14793_s6 + $0x70] sm:$0xff]  ;;  %v5128_v14 = vld [vmem:[%s14790_s3 + $0x2e8] sm:$0xff] }
0x1588   :  { %8287 = vmatmul.msk.f32.gmra.mxu3 %vm1251_vm5, %v5103_v25  ;;  %5634 = vmatmul.f32.gmra.mxu1 %v5102_v31  ;;  %v5118_v31 = vld [vmem:[%s14790_s3 + $0x298] sm:$0xff] }
0x1589   :  { %5485 = vmatmul.f32.gmra.mxu2 %v5119_v56  ;;  %6204 = vrot.lane.b32.xlu2 %v5199_v47, %s9080_s28  ;;  %v5134_v56 = vld [vmem:[%s14790_s3 + $0x318] sm:$0xff] }
0x158b   :  { %v5754_v59 = vpop.f32.mrf.mxu3 }
0x158c   :  { %v12754_v2 = vadd.f32 %v5754_v59, %v5588_v44  ;;  %v12794_v42 = vpop.f32.mrf.mxu2 }
0x158d   :  { %v5590_v13 = vpop.f32.mrf.mxu1 }
0x158e   :  { %v5591_v19 = vadd.f32 %v5590_v13, %v5424_v21 }
0x1590   :  { %8288 = vmatmul.msk.f32.gmra.mxu3 %vm1251_vm5, %v5106_v51  ;;  %5637 = vmatmul.f32.gmra.mxu1 %v5105_v33  ;;  %v5121_v51 = vld [vmem:[%s14790_s3 + $0x2b0] sm:$0xff]  ;;  %v5120_v33 = vld [vmem:[%s14790_s3 + $0x2a8] sm:$0xff] }
0x1591   :  { %5488 = vmatmul.f32.gmra.mxu2 %v5122_v28  ;;  %6176 = vrot.lane.b32.xlu2 %v12625_v61, %s9080_s28  ;;  %v12870_v61 = vld [vmem:[%s14793_s6 + $0x80] sm:$0xff]  ;;  %v12905_v28 = vld [vmem:[%s14793_s6 + $0xf0] sm:$0xff] }
0x1592   :  { %6236 = vrot.lane.b32.xlu1 %v12905_v28, %s9080_s28 }
0x1593   :  { %v5757_v17 = vpop.f32.mrf.mxu3 }
0x1594   :  { %v12778_v46 = vadd.f32 %v5757_v17, %v5591_v19  ;;  %v12817_v49 = vpop.f32.mrf.mxu2 }
0x1595   :  { %v5593_v10 = vpop.f32.mrf.mxu1 }
0x1596   :  { %v5594_v37 = vadd.f32 %v5593_v10, %v5427_v41  ;;  %v12879_v41 = vld [vmem:[%s14793_s6 + $0xa0] sm:$0xff] }
0x1597   :  { %6216 = vrot.lane.b32.xlu0 %v12879_v41, %s9080_s28 }
0x1598   :  { %8289 = vmatmul.msk.f32.gmra.mxu3 %vm1251_vm5, %v5109_v15  ;;  %5640 = vmatmul.f32.gmra.mxu1 %v5108_v27  ;;  %v5124_v15 = vld [vmem:[%s14790_s3 + $0x2c8] sm:$0xff]  ;;  %v5123_v27 = vld [vmem:[%s14790_s3 + $0x2c0] sm:$0xff] }
0x1599   :  { %5491 = vmatmul.f32.gmra.mxu2 %v5125_v55  ;;  %v5127_v55 = vld [vmem:[%s14790_s3 + $0x2e0] sm:$0xff] }
0x159b   :  { %v5760_v34 = vpop.f32.mrf.mxu3 }
0x159c   :  { %v12799_v40 = vadd.f32 %v5760_v34, %v5594_v37  ;;  %v5444_v36 = vpop.f32.mrf.mxu2  ;;  %v12900_v34 = vld [vmem:[%s14793_s6 + $0xa8] sm:$0xff] }
0x159d   :  { %v12807_v62 = vpop.f32.mrf.mxu1 }
0x159f   :  { %6218 = vrot.lane.b32.xlu0 %v12900_v34, %s9080_s28 }
0x15a0   :  { %8290 = vmatmul.msk.f32.gmra.mxu3 %vm1251_vm5, %v5112_v38  ;;  %5643 = vmatmul.f32.gmra.mxu1 %v5111_v16  ;;  %v5137_v16 = vld [vmem:[%s14790_s3 + $0x330] sm:$0xff] }
0x15a1   :  { %5494 = vmatmul.f32.gmra.mxu2 %v5128_v14 }
0x15a3   :  { %v12822_v48 = vpop.f32.mrf.mxu3 }
0x15a4   :  { %v5447_v59 = vpop.f32.mrf.mxu2 }
0x15a5   :  { %v12830_v50 = vpop.f32.mrf.mxu1 }
0x15a6   :  { %v5600_v57 = vadd.f32 %v12830_v50, %v5433_v22 }
0x15a8   :  { %8291 = vmatmul.msk.f32.gmra.mxu3 %vm1251_vm5, %v5115_v1  ;;  %5646 = vmatmul.f32.gmra.mxu1 %v5114_v29  ;;  %v5126_v29 = vld [vmem:[%s14790_s3 + $0x2d8] sm:$0xff] }
0x15a9   :  { %5497 = vmatmul.f32.gmra.mxu2 %v5131_v35  ;;  %v12936_v35 = vld [vmem:[%s14793_s6 + $0xf8] sm:$0xff] }
0x15aa   :  { %6238 = vrot.lane.b32.xlu1 %v12936_v35, %s9080_s28 }
0x15ab   :  { %v12840_v25 = vpop.f32.mrf.mxu3 }
0x15ac   :  { %v5450_v12 = vpop.f32.mrf.mxu2 }
0x15ad   :  { %v12848_v44 = vpop.f32.mrf.mxu1  ;;  %v12874_v19 = vadd.f32 %v5450_v12, %v12870_v61 }
0x15b0   :  { %8292 = vmatmul.msk.f32.gmra.mxu3 %vm1251_vm5, %v5118_v31  ;;  %5649 = vmatmul.f32.gmra.mxu1 %v5117_v53  ;;  %v12926_v31 = vld [vmem:[%s14793_s6 + $0x78] sm:$0xff]  ;;  %v12931_v53 = vld [vmem:[%s14793_s6 + $0xb0] sm:$0xff] }
0x15b1   :  { %5500 = vmatmul.f32.gmra.mxu2 %v5134_v56  ;;  %6220 = vrot.lane.b32.xlu0 %v12931_v53, %s9080_s28  ;;  %v5448_v12 = vadd.f32 %v5447_v59, %v12926_v31  ;;  %v5140_v56 = vld [vmem:[%s14790_s3 + $0x348] sm:$0xff] }
0x15b3   :  { %v12856_v21 = vpop.f32.mrf.mxu3 }
0x15b4   :  { %v12895_v37 = vpop.f32.mrf.mxu2 }
0x15b5   :  { %v5605_v13 = vpop.f32.mrf.mxu1 }
0x15b8   :  { %8293 = vmatmul.msk.f32.gmra.mxu3 %vm1251_vm5, %v5121_v51  ;;  %5652 = vmatmul.f32.gmra.mxu1 %v5120_v33  ;;  %v5445_v33 = vadd.f32 %v5444_v36, %v5199_v47  ;;  %v5439_v47 = vadd.f32 %v12794_v42, %v12792_v4  ;;  %v12969_v4 = vld [vmem:[%s14793_s6 + $0x100] sm:$0xff]  ;;  %v5194_v42 = vld [vmem:[%s14793_s6 + $0x48] sm:$0xff] }
0x15b9   :  { %5503 = vmatmul.f32.gmra.mxu2 %v5137_v16  ;;  %v5129_v16 = vld [vmem:[%s14790_s3 + $0x2f0] sm:$0xff]  ;;  %6240 = vrot.lane.b32.xlu1 %v12969_v4, %s9080_s28 }
0x15ba   :  { %v5606_v58 = vadd.f32 %v5605_v13, %v5439_v47 }
0x15bb   :  { %v12881_v17 = vpop.f32.mrf.mxu3 }
0x15bc   :  { %v12921_v14 = vpop.f32.mrf.mxu2  ;;  %v5773_v13 = vadd.f32 %v12881_v17, %v5606_v58  ;;  %v13013_v17 = vld [vmem:[%s14793_s6 + $0x108] sm:$0xff] }
0x15bd   :  { %v5608_v10 = vpop.f32.mrf.mxu1 }
0x15c0   :  { %8294 = vmatmul.msk.f32.gmra.mxu3 %vm1251_vm5, %v5124_v15  ;;  %5655 = vmatmul.f32.gmra.mxu1 %v5123_v27  ;;  %v5130_v15 = vld [vmem:[%s14790_s3 + $0x2f8] sm:$0xff] }
0x15c1   :  { %5506 = vmatmul.f32.gmra.mxu2 %v5140_v56  ;;  %v12964_v56 = vld [vmem:[%s14793_s6 + $0xb8] sm:$0xff]  ;;  %6242 = vrot.lane.b32.xlu1 %v13013_v17, %s9080_s28 }
0x15c2   :  { %6222 = vrot.lane.b32.xlu0 %v12964_v56, %s9080_s28 }
0x15c3   :  { %v5775_v38 = vpop.f32.mrf.mxu3 }
0x15c5   :  { %v5611_v1 = vpop.f32.mrf.mxu1 }
0x15c6   :  { %v5612_v36 = vadd.f32 %v5611_v1, %v5445_v33  ;;  %v5143_v1 = vld [vmem:[%s14790_s3 + $0x360] sm:$0xff]  ;;  %v5133_v33 = vld [vmem:[%s14790_s3 + $0x310] sm:$0xff] }
0x15c8   :  { %8295 = vmatmul.msk.f32.gmra.mxu3 %vm1251_vm5, %v5127_v55  ;;  %5658 = vmatmul.f32.gmra.mxu1 %v5126_v29  ;;  %v5442_v55 = vadd.f32 %v12817_v49, %v12815_v20  ;;  %v12957_v29 = vpop.f32.mrf.mxu2 }
0x15c9   :  { %5509 = vmatmul.f32.gmra.mxu2 %v5143_v1 }
0x15ca   :  { %v5609_v32 = vadd.f32 %v5608_v10, %v5442_v55 }
0x15cb   :  { %v5778_v51 = vpop.f32.mrf.mxu3 }
0x15cc   :  { %v5779_v49 = vadd.f32 %v5778_v51, %v5612_v36 }
0x15cd   :  { %v5614_v27 = vpop.f32.mrf.mxu1 }
0x15ce   :  { %v5615_v59 = vadd.f32 %v5614_v27, %v5448_v12  ;;  %v5603_v27 = vadd.f32 %v12848_v44, %v5436_v3  ;;  %v5900_v51 = vmax.f32 %v5779_v49, 0.0  ;;  %v12998_v3 = vld [vmem:[%s14793_s6 + $0x88] sm:$0xff]  ;;  %v5135_v49 = vld [vmem:[%s14790_s3 + $0x320] sm:$0xff] }
0x15d0   :  { %8296 = vmatmul.msk.f32.gmra.mxu3 %vm1251_vm5, %v5130_v15  ;;  %5661 = vmatmul.f32.gmra.mxu1 %v5129_v16  ;;  %v5430_v15 = vadd.f32 %v12724_v43, %v5194_v42  ;;  %v5776_v16 = vadd.f32 %v5775_v38, %v5609_v32  ;;  %v5462_v36 = vpop.f32.mrf.mxu2  ;;  %v5770_v50 = vadd.f32 %v12856_v21, %v5603_v27  ;;  %v5898_v21 = vmax.f32 %v5773_v13, 0.0  ;;  %v5146_v42 = vld [vmem:[%s14790_s3 + $0x378] sm:$0xff] }
0x15d1   :  { %v13001_v32 = vadd.f32 %v12879_v41, %v5462_v36  ;;  %5512 = vmatmul.f32.gmra.mxu2 %v5146_v42  ;;  %v5204_v36 = vld [vmem:[%s14793_s6 + $0x98] sm:$0xff] }
0x15d2   :  { %v5597_v43 = vadd.f32 %v12807_v62, %v5430_v15  ;;  %v5899_v44 = vmax.f32 %v5776_v16, 0.0  ;;  %v5767_v62 = vadd.f32 %v12840_v25, %v5600_v57  ;;  %v5897_v25 = vmax.f32 %v5770_v50, 0.0  ;;  %v13044_v15 = vld [vmem:[%s14793_s6 + $0x110] sm:$0xff]  ;;  %v5139_v57 = vld [vmem:[%s14790_s3 + $0x340] sm:$0xff] }
0x15d3   :  { %v5781_v20 = vpop.f32.mrf.mxu3  ;;  %6244 = vrot.lane.b32.xlu1 %v13044_v15, %s9080_s28  ;;  %v5894_v16 = vmax.f32 %v12799_v40, 0.0  ;;  %v5138_v40 = vld [vmem:[%s14790_s3 + $0x338] sm:$0xff] }
0x15d4   :  { %v5782_v10 = vadd.f32 %v5781_v20, %v5615_v59  ;;  %v5454_v59 = vadd.f32 %v12895_v37, %v12998_v3  ;;  %v5136_v20 = vld [vmem:[%s14790_s3 + $0x328] sm:$0xff]  ;;  %v5764_v58 = vadd.f32 %v12822_v48, %v5597_v43 }
0x15d5   :  { %v5617_v12 = vpop.f32.mrf.mxu1 }
0x15d6   :  { %v5901_v55 = vmax.f32 %v5782_v10, 0.0  ;;  %v5618_v47 = vadd.f32 %v5617_v12, %v12874_v19  ;;  %v13008_v19 = vld [vmem:[%s14793_s6 + $0xc0] sm:$0xff]  ;;  %v5896_v10 = vmax.f32 %v5767_v62, 0.0  ;;  %v5895_v48 = vmax.f32 %v5764_v58, 0.0  ;;  %v5142_v62 = vld [vmem:[%s14790_s3 + $0x358] sm:$0xff] }
0x15d7   :  { %6224 = vrot.lane.b32.xlu0 %v13008_v19, %s9080_s28 }
0x15d8   :  { %8297 = vmatmul.msk.f32.gmra.mxu3 %vm1251_vm5, %v5133_v33  ;;  %6416 = vmatpush.msra.mxu0 %v5901_v55  ;;  %v5465_v1 = vpop.f32.mrf.mxu2  ;;  %v5203_v33 = vld [vmem:[%s14793_s6 + $0x90] sm:$0xff] }
0x15d9   :  { %5664 = vmatmul.f32.gmra.mxu1 %v5132_v45  ;;  %v13039_v12 = vadd.f32 %v12900_v34, %v5465_v1  ;;  %v5457_v34 = vadd.f32 %v12921_v14, %v5203_v33  ;;  %v5149_v45 = vld [vmem:[%s14790_s3 + $0x390] sm:$0xff]  ;;  %v5940_v33 = vld [vmem:[%s14791_s4 + $0x20] sm:$0xff] }
0x15da   :  { %6417 = vmatpush.msra.mxu0 %v5900_v51  ;;  %5515 = vmatmul.f32.gmra.mxu2 %v5149_v45  ;;  %v5892_v51 = vmax.f32 %v12754_v2, 0.0  ;;  %v13076_v2 = vld [vmem:[%s14793_s6 + $0xc8] sm:$0xff] }
0x15db   :  { %v5784_v38 = vpop.f32.mrf.mxu3  ;;  %6226 = vrot.lane.b32.xlu1 %v13076_v2, %s9080_s28 }
0x15dc   :  { %v13020_v41 = vadd.f32 %v5784_v38, %v5618_v47  ;;  %6418 = vmatpush.msra.mxu0 %v5899_v44  ;;  %v5890_v44 = vmax.f32 %v12713_v26, 0.0  ;;  %v5141_v26 = vld [vmem:[%s14790_s3 + $0x350] sm:$0xff] }
0x15dd   :  { %v5620_v22 = vpop.f32.mrf.mxu1 }
0x15de   :  { %6419 = vmatpush.msra.mxu0 %v5898_v21  ;;  %v5621_v37 = vadd.f32 %v5620_v22, %v5454_v59  ;;  %v5888_v59 = vmax.f32 %v12679_v18, 0.0  ;;  %v5887_v22 = vmax.f32 %v12661_v60, 0.0  ;;  %v5886_v18 = vmax.f32 %v12643_v6, 0.0  ;;  %v5155_v60 = vld [vmem:[%s14790_s3 + $0x3c0] sm:$0xff]  ;;  %v5144_v6 = vld [vmem:[%s14790_s3 + $0x368] sm:$0xff] }
0x15df   :  { %6206 = vrot.lane.b32.xlu0 %v12926_v31, %s9080_s28  ;;  %v5893_v31 = vmax.f32 %v12778_v46, 0.0  ;;  %v5891_v46 = vmax.f32 %v12730_v8, 0.0  ;;  %v5460_v8 = vadd.f32 %v12957_v29, %v5204_v36  ;;  %v13172_v36 = vld [vmem:[%s14793_s6 + $0x118] sm:$0xff] }
0x15e0   :  { %8298 = vmatmul.msk.f32.gmra.mxu3 %vm1251_vm5, %v5136_v20  ;;  %6420 = vmatpush.msra.mxu0 %v5897_v25  ;;  %v5468_v47 = vpop.f32.mrf.mxu2 }
0x15e1   :  { %5667 = vmatmul.f32.gmra.mxu1 %v5135_v49  ;;  %v13070_v43 = vadd.f32 %v12931_v53, %v5468_v47  ;;  %v5152_v53 = vld [vmem:[%s14790_s3 + $0x3a8] sm:$0xff]  ;;  %6246 = vrot.lane.b32.xlu2 %v13172_v36, %s9080_s28 }
0x15e2   :  { %6421 = vmatpush.msra.mxu0 %v5896_v10  ;;  %5518 = vmatmul.f32.gmra.mxu2 %v5152_v53 }
0x15e3   :  { %v5787_v27 = vpop.f32.mrf.mxu3  ;;  %6180 = vrot.lane.b32.xlu1 %v12659_v52, %s9080_s28  ;;  %v5145_v52 = vld [vmem:[%s14790_s3 + $0x370] sm:$0xff] }
0x15e4   :  { %v13051_v55 = vadd.f32 %v5787_v27, %v5621_v37  ;;  %6422 = vmatpush.msra.mxu0 %v5895_v48  ;;  %v5158_v48 = vld [vmem:[%s14790_s3 + $0x3d8] sm:$0xff] }
0x15e5   :  { %v5623_v13 = vpop.f32.mrf.mxu1 }
0x15e6   :  { %6423 = vmatpush.msra.mxu0 %v5894_v16  ;;  %v5624_v14 = vadd.f32 %v5623_v13, %v5457_v34  ;;  %v5161_v13 = vld [vmem:[%s14790_s3 + $0x3f0] sm:$0xff] }
0x15e7   :  { %6178 = vrot.lane.b32.xlu0 %v12641_v54, %s9080_s28  ;;  %v5889_v54 = vmax.f32 %v12697_v39, 0.0 }
0x15e8   :  { %8299 = vmatmul.msk.f32.gmra.mxu3 %vm1251_vm5, %v5139_v57  ;;  %6424 = vmatpush.msra.mxu0 %v5893_v31  ;;  %v5471_v42 = vpop.f32.mrf.mxu2  ;;  %v5944_v57 = vld [vmem:[%s14791_s4 + $0x40] sm:$0xff] }
0x15e9   :  { %5670 = vmatmul.f32.gmra.mxu1 %v5138_v40  ;;  %v13099_v20 = vadd.f32 %v12964_v56, %v5471_v42  ;;  %v5936_v56 = vld [vmem:[%s14791_s4] sm:$0xff]  ;;  %6182 = vrot.lane.b32.xlu2 %v12677_v63, %s9080_s28  ;;  %v5157_v42 = vld [vmem:[%s14790_s3 + $0x3d0] sm:$0xff]  ;;  %v5156_v63 = vld [vmem:[%s14790_s3 + $0x3c8] sm:$0xff] }
0x15ea   :  { %6425 = vmatpush.msra.mxu0 %v5892_v51  ;;  %5521 = vmatmul.f32.gmra.mxu2 %v5155_v60  ;;  %v5151_v31 = vld [vmem:[%s14790_s3 + $0x3a0] sm:$0xff]  ;;  %v13161_v51 = vld [vmem:[%s14793_s6 + $0xd0] sm:$0xff] }
0x15eb   :  { %v5790_v50 = vpop.f32.mrf.mxu3  ;;  %6228 = vrot.lane.b32.xlu1 %v13161_v51, %s9080_s28  ;;  %v5956_v60 = vld [vmem:[%s14791_s4 + $0xa0] sm:$0xff] }
0x15ec   :  { %v13083_v38 = vadd.f32 %v5790_v50, %v5624_v14  ;;  %6426 = vmatpush.msra.mxu0 %v5891_v46 }
0x15ed   :  { %v5626_v21 = vpop.f32.mrf.mxu1 }
0x15ee   :  { %6427 = vmatpush.msra.mxu0 %v5890_v44  ;;  %v5627_v29 = vadd.f32 %v5626_v21, %v5460_v8  ;;  %v5948_v44 = vld [vmem:[%s14791_s4 + $0x60] sm:$0xff]  ;;  %v5154_v8 = vld [vmem:[%s14790_s3 + $0x3b8] sm:$0xff] }
0x15ef   :  { %6208 = vrot.lane.b32.xlu0 %v12870_v61, %s9080_s28 }
0x15f0   :  { %8300 = vmatmul.msk.f32.gmra.mxu3 %vm1251_vm5, %v5142_v62  ;;  %6428 = vmatpush.msra.mxu0 %v5889_v54  ;;  %v5474_v49 = vpop.f32.mrf.mxu2  ;;  %v5153_v62 = vld [vmem:[%s14790_s3 + $0x3b0] sm:$0xff] }
0x15f1   :  { %5673 = vmatmul.f32.gmra.mxu1 %v5141_v26  ;;  %v5475_v10 = vadd.f32 %v13008_v19, %v5474_v49 }
0x15f2   :  { %6429 = vmatpush.msra.mxu0 %v5888_v59  ;;  %5524 = vmatmul.f32.gmra.mxu2 %v5158_v48  ;;  %v5163_v48 = vld [vmem:[%s14790_s3 + $0x400] sm:$0xff] }
0x15f3   :  { %v5793_v39 = vpop.f32.mrf.mxu3  ;;  %6210 = vrot.lane.b32.xlu1 %v12998_v3, %s9080_s28  ;;  %v5167_v3 = vld [vmem:[%s14790_s3 + $0x420] sm:$0xff] }
0x15f4   :  { %v13107_v58 = vadd.f32 %v5793_v39, %v5627_v29  ;;  %6430 = vmatpush.msra.mxu0 %v5887_v22  ;;  %v5952_v29 = vld [vmem:[%s14791_s4 + $0x80] sm:$0xff] }
0x15f5   :  { %v5629_v25 = vpop.f32.mrf.mxu1 }
0x15f6   :  { %6431 = vmatpush.msra.mxu0 %v5886_v18  ;;  %v5630_v61 = vadd.f32 %v5629_v25, %v13001_v32  ;;  %v5148_v32 = vld [vmem:[%s14790_s3 + $0x388] sm:$0xff] }
0x15f7   :  { %6432 = vmatmul.f32.vlgmr.msra.gmra.mxu0 %v5936_v56  ;;  %6184 = vrot.lane.b32.xlu0 %v12695_v0, %s9080_s28  ;;  %v5147_v0 = vld [vmem:[%s14790_s3 + $0x380] sm:$0xff]  ;;  %v5160_v25 = vld [vmem:[%s14790_s3 + $0x3e8] sm:$0xff] }
0x15f8   :  { %8301 = vmatmul.msk.f32.gmra.mxu3 %vm1251_vm5, %v5145_v52  ;;  %v13142_v16 = vpop.f32.mrf.mxu2  ;;  %v5170_v52 = vld [vmem:[%s14790_s3 + $0x438] sm:$0xff] }
0x15f9   :  { %5676 = vmatmul.f32.gmra.mxu1 %v5144_v6 }
0x15fa   :  { %5527 = vmatmul.f32.gmra.mxu2 %v5161_v13  ;;  %v5166_v13 = vld [vmem:[%s14790_s3 + $0x418] sm:$0xff] }
0x15fb   :  { %v5796_v37 = vpop.f32.mrf.mxu3 }
0x15fc   :  { %v13126_v1 = vadd.f32 %v5796_v37, %v5630_v61  ;;  %v5159_v61 = vld [vmem:[%s14790_s3 + $0x3e0] sm:$0xff] }
0x15fd   :  { %v5632_v27 = vpop.f32.mrf.mxu1  ;;  %v5960_v37 = vld [vmem:[%s14791_s4 + $0xc0] sm:$0xff] }
0x15fe   :  { %v5633_v19 = vadd.f32 %v5632_v27, %v13039_v12  ;;  %v5150_v12 = vld [vmem:[%s14790_s3 + $0x398] sm:$0xff] }
0x15ff   :  { %6435 = vmatmul.f32.gmra.mxu0 %v5940_v33  ;;  %v5173_v33 = vld [vmem:[%s14790_s3 + $0x450] sm:$0xff]  ;;  %v5162_v27 = vld [vmem:[%s14790_s3 + $0x3f8] sm:$0xff] }
0x1600   :  { %8302 = vmatmul.msk.f32.gmra.mxu3 %vm1251_vm5, %v5148_v32  ;;  %v13167_v47 = vpop.f32.mrf.mxu2 }
0x1601   :  { %5679 = vmatmul.f32.gmra.mxu1 %v5147_v0 }
0x1603   :  { %v5799_v34 = vpop.f32.mrf.mxu3 }
0x1604   :  { %v13144_v45 = vadd.f32 %v5799_v34, %v5633_v19  ;;  %v5964_v34 = vld [vmem:[%s14791_s4 + $0xe0] sm:$0xff] }
0x1605   :  { %v5635_v40 = vpop.f32.mrf.mxu1 }
0x1606   :  { %v5636_v14 = vadd.f32 %v5635_v40, %v13070_v43  ;;  %v5164_v43 = vld [vmem:[%s14790_s3 + $0x408] sm:$0xff]  ;;  %v5165_v40 = vld [vmem:[%s14790_s3 + $0x410] sm:$0xff] }
0x1607   :  { %6438 = vmatmul.f32.gmra.mxu0 %v5944_v57  ;;  %5530 = vmatmul.f32.gmra.mxu2 %v5164_v43  ;;  %v5176_v57 = vld [vmem:[%s14790_s3 + $0x468] sm:$0xff] }
0x1608   :  { %8303 = vmatmul.msk.f32.gmra.mxu3 %vm1251_vm5, %v5151_v31  ;;  %v13194_v54 = vpop.f32.mrf.mxu2 }
0x1609   :  { %5682 = vmatmul.f32.gmra.mxu1 %v5150_v12 }
0x160b   :  { %v5802_v46 = vpop.f32.mrf.mxu3 }
0x160c   :  { %v13176_v50 = vadd.f32 %v5802_v46, %v5636_v14  ;;  %v5968_v46 = vld [vmem:[%s14791_s4 + $0x100] sm:$0xff] }
0x160d   :  { %v5638_v53 = vpop.f32.mrf.mxu1 }
0x160e   :  { %v5639_v21 = vadd.f32 %v5638_v53, %v13099_v20  ;;  %v5179_v53 = vld [vmem:[%s14790_s3 + $0x480] sm:$0xff] }
0x160f   :  { %6441 = vmatmul.f32.gmra.mxu0 %v5948_v44  ;;  %5533 = vmatmul.f32.gmra.mxu2 %v5167_v3  ;;  %v5169_v44 = vld [vmem:[%s14790_s3 + $0x430] sm:$0xff] }
0x1610   :  { %8304 = vmatmul.msk.f32.gmra.mxu3 %vm1251_vm5, %v5154_v8  ;;  %v13213_v39 = vpop.f32.mrf.mxu2  ;;  %v5168_v8 = vld [vmem:[%s14790_s3 + $0x428] sm:$0xff] }
0x1611   :  { %5685 = vmatmul.f32.gmra.mxu1 %v5153_v62 }
0x1613   :  { %v5805_v26 = vpop.f32.mrf.mxu3 }
0x1614   :  { %v13198_v59 = vadd.f32 %v5805_v26, %v5639_v21  ;;  %v5972_v26 = vld [vmem:[%s14791_s4 + $0x120] sm:$0xff] }
0x1615   :  { %v5641_v20 = vpop.f32.mrf.mxu1 }
0x1616   :  { %v5642_v22 = vadd.f32 %v5641_v20, %v5475_v10  ;;  %v5182_v20 = vld [vmem:[%s14790_s3 + $0x498] sm:$0xff] }
0x1617   :  { %6444 = vmatmul.f32.gmra.mxu0 %v5952_v29  ;;  %5536 = vmatmul.f32.gmra.mxu2 %v5170_v52  ;;  %v5172_v29 = vld [vmem:[%s14790_s3 + $0x448] sm:$0xff] }
0x1618   :  { %8305 = vmatmul.msk.f32.gmra.mxu3 %vm1251_vm5, %v5157_v42  ;;  %v5489_v49 = vpop.f32.mrf.mxu2  ;;  %v5171_v42 = vld [vmem:[%s14790_s3 + $0x440] sm:$0xff] }
0x1619   :  { %5688 = vmatmul.f32.gmra.mxu1 %v5156_v63 }
0x161b   :  { %v5808_v18 = vpop.f32.mrf.mxu3 }
0x161c   :  { %v13215_v56 = vadd.f32 %v5808_v18, %v5642_v22  ;;  %v5976_v18 = vld [vmem:[%s14791_s4 + $0x140] sm:$0xff] }
0x161d   :  { %v13226_v6 = vpop.f32.mrf.mxu1 }
0x161f   :  { %6447 = vmatmul.f32.gmra.mxu0 %v5956_v60  ;;  %5539 = vmatmul.f32.gmra.mxu2 %v5173_v33  ;;  %v5175_v60 = vld [vmem:[%s14790_s3 + $0x460] sm:$0xff] }
0x1620   :  { %8306 = vmatmul.msk.f32.gmra.mxu3 %vm1251_vm5, %v5160_v25  ;;  %v5492_v0 = vpop.f32.mrf.mxu2  ;;  %v5174_v25 = vld [vmem:[%s14790_s3 + $0x458] sm:$0xff] }
0x1621   :  { %5691 = vmatmul.f32.gmra.mxu1 %v5159_v61  ;;  %v5493_v33 = vadd.f32 %v12905_v28, %v5492_v0  ;;  %v5178_v28 = vld [vmem:[%s14790_s3 + $0x478] sm:$0xff] }
0x1623   :  { %v13232_v10 = vpop.f32.mrf.mxu3 }
0x1625   :  { %v13243_v32 = vpop.f32.mrf.mxu1 }
0x1627   :  { %6450 = vmatmul.f32.gmra.mxu0 %v5960_v37  ;;  %5542 = vmatmul.f32.gmra.mxu2 %v5176_v57  ;;  %v5214_v37 = vld [vmem:[%s14793_s6 + $0xe8] sm:$0xff] }
0x1628   :  { %8307 = vmatmul.msk.f32.gmra.mxu3 %vm1251_vm5, %v5163_v48  ;;  %v5495_v12 = vpop.f32.mrf.mxu2  ;;  %v5213_v48 = vld [vmem:[%s14793_s6 + $0xe0] sm:$0xff] }
0x1629   :  { %5694 = vmatmul.f32.gmra.mxu1 %v5162_v27  ;;  %v5496_v57 = vadd.f32 %v12936_v35, %v5495_v12  ;;  %v5177_v35 = vld [vmem:[%s14790_s3 + $0x470] sm:$0xff] }
0x162b   :  { %v13249_v19 = vpop.f32.mrf.mxu3 }
0x162d   :  { %v13260_v31 = vpop.f32.mrf.mxu1 }
0x162f   :  { %6453 = vmatmul.f32.gmra.mxu0 %v5964_v34  ;;  %5545 = vmatmul.f32.gmra.mxu2 %v5179_v53  ;;  %v5490_v34 = vadd.f32 %v5489_v49, %v5214_v37 }
0x1630   :  { %8308 = vmatmul.msk.f32.gmra.mxu3 %vm1251_vm5, %v5166_v13  ;;  %v13281_v62 = vpop.f32.mrf.mxu2  ;;  %v5980_v13 = vld [vmem:[%s14791_s4 + $0x160] sm:$0xff] }
0x1631   :  { %5697 = vmatmul.f32.gmra.mxu1 %v5165_v40  ;;  %v5212_v40 = vld [vmem:[%s14793_s6 + $0xd8] sm:$0xff] }
0x1632   :  { %v5484_v49 = vadd.f32 %v13194_v54, %v5212_v40 }
0x1633   :  { %v13266_v14 = vpop.f32.mrf.mxu3 }
0x1635   :  { %v5653_v43 = vpop.f32.mrf.mxu1 }
0x1637   :  { %6456 = vmatmul.f32.gmra.mxu0 %v5968_v46  ;;  %5548 = vmatmul.f32.gmra.mxu2 %v5182_v20  ;;  %v5487_v46 = vadd.f32 %v13213_v39, %v5213_v48  ;;  %v5478_v20 = vadd.f32 %v13076_v2, %v13142_v16  ;;  %v5180_v2 = vld [vmem:[%s14790_s3 + $0x488] sm:$0xff]  ;;  %v13355_v16 = vld [vmem:[%s14793_s6 + $0x120] sm:$0xff] }
0x1638   :  { %8309 = vmatmul.msk.f32.gmra.mxu3 %vm1251_vm5, %v5169_v44  ;;  %v13296_v22 = vpop.f32.mrf.mxu2  ;;  %6248 = vrot.lane.b32.xlu2 %v13355_v16, %s9080_s28 }
0x1639   :  { %5700 = vmatmul.f32.gmra.mxu1 %v5168_v8 }
0x163b   :  { %v5820_v21 = vpop.f32.mrf.mxu3 }
0x163d   :  { %v5656_v3 = vpop.f32.mrf.mxu1 }
0x163e   :  { %v5657_v12 = vadd.f32 %v5656_v3, %v5490_v34  ;;  %v5984_v3 = vld [vmem:[%s14791_s4 + $0x180] sm:$0xff] }
0x163f   :  { %6459 = vmatmul.f32.gmra.mxu0 %v5972_v26  ;;  %v5481_v26 = vadd.f32 %v13167_v47, %v13161_v51 }
0x1640   :  { %8310 = vmatmul.msk.f32.gmra.mxu3 %vm1251_vm5, %v5172_v29  ;;  %v13308_v61 = vpop.f32.mrf.mxu2  ;;  %v5654_v29 = vadd.f32 %v5653_v43, %v5487_v46  ;;  %6230 = vrot.lane.b32.xlu2 %v5212_v40, %s9080_s28 }
0x1641   :  { %5703 = vmatmul.f32.gmra.mxu1 %v5171_v42  ;;  %v5648_v51 = vadd.f32 %v13243_v32, %v5481_v26  ;;  %v5645_v32 = vadd.f32 %v13226_v6, %v5478_v20  ;;  %v5988_v6 = vld [vmem:[%s14791_s4 + $0x1a0] sm:$0xff]  ;;  %v5902_v20 = vmax.f32 %v13020_v41, 0.0 }
0x1642   :  { %v5821_v47 = vadd.f32 %v5820_v21, %v5654_v29  ;;  %v5996_v29 = vld [vmem:[%s14791_s4 + $0x1e0] sm:$0xff] }
0x1643   :  { %v5823_v63 = vpop.f32.mrf.mxu3  ;;  %v5812_v34 = vadd.f32 %v13232_v10, %v5645_v32  ;;  %v6004_v41 = vld [vmem:[%s14791_s4 + $0x220] sm:$0xff] }
0x1644   :  { %v5914_v48 = vmax.f32 %v5821_v47, 0.0 }
0x1645   :  { %v5659_v52 = vpop.f32.mrf.mxu1  ;;  %v5911_v10 = vmax.f32 %v5812_v34, 0.0 }
0x1646   :  { %v5660_v44 = vadd.f32 %v5659_v52, %v5493_v33  ;;  %v5181_v52 = vld [vmem:[%s14790_s3 + $0x490] sm:$0xff]  ;;  %v5815_v33 = vadd.f32 %v13249_v19, %v5648_v51  ;;  %v5183_v19 = vld [vmem:[%s14790_s3 + $0x4a0] sm:$0xff] }
0x1647   :  { %6462 = vmatmul.f32.gmra.mxu0 %v5976_v18  ;;  %v5651_v18 = vadd.f32 %v13260_v31, %v5484_v49  ;;  %v5909_v49 = vmax.f32 %v13198_v59, 0.0 }
0x1648   :  { %8311 = vmatmul.msk.f32.gmra.mxu3 %vm1251_vm5, %v5175_v60  ;;  %v13333_v53 = vpop.f32.mrf.mxu2  ;;  %v5824_v60 = vadd.f32 %v5823_v63, %v5657_v12  ;;  %v5908_v12 = vmax.f32 %v13176_v50, 0.0  ;;  %v5903_v50 = vmax.f32 %v13051_v55, 0.0 }
0x1649   :  { %5706 = vmatmul.f32.gmra.mxu1 %v5174_v25  ;;  %v5818_v31 = vadd.f32 %v13266_v14, %v5651_v18  ;;  %v5184_v14 = vld [vmem:[%s14790_s3 + $0x4a8] sm:$0xff] }
0x164a   :  { %v5915_v21 = vmax.f32 %v5824_v60, 0.0 }
0x164b   :  { %v5826_v27 = vpop.f32.mrf.mxu3 }
0x164c   :  { %v5827_v39 = vadd.f32 %v5826_v27, %v5660_v44  ;;  %v5910_v44 = vmax.f32 %v13215_v56, 0.0  ;;  %v5906_v56 = vmax.f32 %v13126_v1, 0.0 }
0x164d   :  { %v5662_v0 = vpop.f32.mrf.mxu1 }
0x164e   :  { %v5663_v8 = vadd.f32 %v5662_v0, %v5496_v57  ;;  %v5916_v43 = vmax.f32 %v5827_v39, 0.0  ;;  %v5913_v57 = vmax.f32 %v5818_v31, 0.0  ;;  %v5905_v39 = vmax.f32 %v13107_v58, 0.0  ;;  %v6000_v58 = vld [vmem:[%s14791_s4 + $0x200] sm:$0xff] }
0x164f   :  { %6465 = vmatmul.f32.gmra.mxu0 %v5980_v13  ;;  %v5912_v13 = vmax.f32 %v5815_v33, 0.0 }
0x1650   :  { %8312 = vmatmul.msk.f32.gmra.mxu3 %vm1251_vm5, %v5178_v28  ;;  %v13362_v63 = vpop.f32.mrf.mxu2 }
0x1651   :  { %5709 = vmatmul.f32.gmra.mxu1 %v5177_v35  ;;  %v5992_v35 = vld [vmem:[%s14791_s4 + $0x1c0] sm:$0xff] }
0x1653   :  { %v5829_v42 = vpop.f32.mrf.mxu3 }
0x1654   :  { %v5830_v54 = vadd.f32 %v5829_v42, %v5663_v8  ;;  %v5907_v8 = vmax.f32 %v13144_v45, 0.0  ;;  %v5904_v45 = vmax.f32 %v13083_v38, 0.0 }
0x1656   :  { %v5917_v25 = vmax.f32 %v5830_v54, 0.0  ;;  %v13347_v37 = vpop.f32.mrf.mxu1 }
0x1657   :  { %14934 = vst [vmem:[#allocation14_spill] sm:$0xff] %v13347_v37  ;;  %6468 = vmatmul.f32.gmra.mxu0 %v5984_v3 }
0x1658   :  { %8313 = vmatmul.msk.f32.gmra.mxu3 %vm1251_vm5, %v5181_v52  ;;  %6553 = vmatpush.msrb.mxu0 %v5917_v25  ;;  %v13383_v46 = vpop.f32.mrf.mxu2 }
0x1659   :  { %5712 = vmatmul.f32.gmra.mxu1 %v5180_v2 }
0x165a   :  { %6554 = vmatpush.msrb.mxu0 %v5916_v43  ;;  %v6008_v43 = vld [vmem:[%s14791_s4 + $0x240] sm:$0xff] }
0x165b   :  { %v13365_v27 = vpop.f32.mrf.mxu3 }
0x165c   :  { %14935 = vst [vmem:[#allocation31_spill] sm:$0xff] %v13365_v27  ;;  %6555 = vmatpush.msrb.mxu0 %v5915_v21  ;;  %v6012_v21 = vld [vmem:[%s14791_s4 + $0x260] sm:$0xff] }
0x165e   :  { %6556 = vmatpush.msrb.mxu0 %v5914_v48  ;;  %v13374_v28 = vpop.f32.mrf.mxu1 }
0x165f   :  { %6471 = vmatmul.f32.gmra.mxu0 %v5988_v6 }
0x1660   :  { %8314 = vmatmul.msk.f32.gmra.mxu3 %vm1251_vm5, %v5184_v14  ;;  %6557 = vmatpush.msrb.mxu0 %v5913_v57  ;;  %v13400_v59 = vpop.f32.mrf.mxu2  ;;  %v6016_v57 = vld [vmem:[%s14791_s4 + $0x280] sm:$0xff] }
0x1661   :  { %5715 = vmatmul.f32.gmra.mxu1 %v5183_v19 }
0x1662   :  { %6558 = vmatpush.msrb.mxu0 %v5912_v13 }
0x1663   :  { %v13381_v0 = vpop.f32.mrf.mxu3 }
0x1664   :  { %14936 = vst [vmem:[#allocation33_spill] sm:$0xff] %v13381_v0  ;;  %6559 = vmatpush.msrb.mxu0 %v5911_v10  ;;  %v6020_v10 = vld [vmem:[%s14791_s4 + $0x2a0] sm:$0xff] }
0x1666   :  { %6560 = vmatpush.msrb.mxu0 %v5910_v44  ;;  %v13390_v40 = vpop.f32.mrf.mxu1 }
0x1667   :  { %6474 = vmatmul.f32.gmra.mxu0 %v5992_v35 }
0x1668   :  { %6561 = vmatpush.msrb.mxu0 %v5909_v49  ;;  %v13417_v38 = vpop.f32.mrf.mxu2 }
0x166a   :  { %6562 = vmatpush.msrb.mxu0 %v5908_v12 }
0x166b   :  { %v13394_v26 = vpop.f32.mrf.mxu3 }
0x166c   :  { %14937 = vst [vmem:[#allocation7_spill] sm:$0xff] %v13394_v26  ;;  %6563 = vmatpush.msrb.mxu0 %v5907_v8  ;;  %v6024_v8 = vld [vmem:[%s14791_s4 + $0x2c0] sm:$0xff] }
0x166e   :  { %6564 = vmatpush.msrb.mxu0 %v5906_v56  ;;  %v13403_v42 = vpop.f32.mrf.mxu1 }
0x166f   :  { %6477 = vmatmul.f32.gmra.mxu0 %v5996_v29 }
0x1670   :  { %6565 = vmatpush.msrb.mxu0 %v5905_v39  ;;  %v13428_v52 = vpop.f32.mrf.mxu2 }
0x1672   :  { %6566 = vmatpush.msrb.mxu0 %v5904_v45 }
0x1673   :  { %v13407_v1 = vpop.f32.mrf.mxu3 }
0x1674   :  { %v13410_v18 = vpop.f32.mrf.mxu0  ;;  %6567 = vmatpush.msrb.mxu0 %v5903_v50  ;;  %v6028_v50 = vld [vmem:[%s14791_s4 + $0x2e0] sm:$0xff] }
0x1675   :  { %14938 = vst [vmem:[#allocation5_spill] sm:$0xff] %v13410_v18 }
0x1676   :  { %6568 = vmatpush.msrb.mxu0 %v5902_v20  ;;  %v13415_v60 = vpop.f32.mrf.mxu1 }
0x1677   :  { %6480 = vmatmul.f32.gmra.mxu0 %v6000_v58 }
0x1678   :  { %v13441_v32 = vpop.f32.mrf.mxu2 }
0x167b   :  { %v13419_v54 = vpop.f32.mrf.mxu3 }
0x167c   :  { %v13421_v55 = vpop.f32.mrf.mxu0 }
0x167d   :  { %14939 = vst [vmem:[#allocation10_spill] sm:$0xff] %v13421_v55 }
0x167e   :  { %v13426_v3 = vpop.f32.mrf.mxu1 }
0x167f   :  { %6483 = vmatmul.f32.gmra.mxu0 %v6004_v41 }
0x1680   :  { %v5528_v6 = vpop.f32.mrf.mxu2 }
0x1683   :  { %v13430_v51 = vpop.f32.mrf.mxu3 }
0x1684   :  { %v13432_v47 = vpop.f32.mrf.mxu0 }
0x1685   :  { %14940 = vst [vmem:[#allocation48_spill] sm:$0xff] %v13432_v47 }
0x1686   :  { %v13437_v25 = vpop.f32.mrf.mxu1 }
0x1687   :  { %6486 = vmatmul.f32.gmra.mxu0 %v6008_v43 }
0x168a   :  { %v5531_v35 = vpop.f32.mrf.mxu2 }
0x168b   :  { %v13439_v2 = vpop.f32.mrf.mxu3 }
0x168c   :  { %v13443_v31 = vpop.f32.mrf.mxu0 }
0x168d   :  { %14941 = vst [vmem:[#allocation42_spill] sm:$0xff] %v13443_v31  ;;  %v5228_v31 = vld [vmem:[%s14793_s6 + $0x158] sm:$0xff] }
0x168e   :  { %v13448_v33 = vpop.f32.mrf.mxu1 }
0x168f   :  { %6489 = vmatmul.f32.gmra.mxu0 %v6012_v21  ;;  %v6032_v21 = vld [vmem:[%s14791_s4 + $0x300] sm:$0xff] }
0x1692   :  { %v5534_v29 = vpop.f32.mrf.mxu2 }
0x1693   :  { %v13450_v48 = vpop.f32.mrf.mxu3 }
0x1694   :  { %v13452_v34 = vpop.f32.mrf.mxu0 }
0x1695   :  { %14942 = vst [vmem:[#allocation44_spill] sm:$0xff] %v13452_v34 }
0x1696   :  { %v13457_v14 = vpop.f32.mrf.mxu1 }
0x1697   :  { %6492 = vmatmul.f32.gmra.mxu0 %v6016_v57 }
0x169a   :  { %v5537_v41 = vpop.f32.mrf.mxu2 }
0x169b   :  { %v13459_v13 = vpop.f32.mrf.mxu3 }
0x169c   :  { %v13461_v19 = vpop.f32.mrf.mxu0 }
0x169d   :  { %14943 = vst [vmem:[#allocation20_spill] sm:$0xff] %v13461_v19 }
0x169e   :  { %v13466_v44 = vpop.f32.mrf.mxu1 }
0x169f   :  { %6495 = vmatmul.f32.gmra.mxu0 %v6020_v10 }
0x16a2   :  { %v5540_v24 = vpop.f32.mrf.mxu2 }
0x16a3   :  { %v13468_v49 = vpop.f32.mrf.mxu3 }
0x16a4   :  { %v13470_v12 = vpop.f32.mrf.mxu0 }
0x16a5   :  { %14944 = vst [vmem:[#allocation26_spill] sm:$0xff] %v13470_v12 }
0x16a6   :  { %v5695_v56 = vpop.f32.mrf.mxu1 }
0x16a7   :  { %6498 = vmatmul.f32.gmra.mxu0 %v6024_v8 }
0x16aa   :  { %v5543_v5 = vpop.f32.mrf.mxu2 }
0x16ab   :  { %v13475_v39 = vpop.f32.mrf.mxu3 }
0x16ac   :  { %v13477_v45 = vpop.f32.mrf.mxu0 }
0x16ad   :  { %14945 = vst [vmem:[#allocation21_spill] sm:$0xff] %v13477_v45  ;;  %v5229_v45 = vld [vmem:[%s14793_s6 + $0x160] sm:$0xff] }
0x16ae   :  { %v5698_v20 = vpop.f32.mrf.mxu1  ;;  %v5535_v47 = vadd.f32 %v5534_v29, %v5229_v45 }
0x16af   :  { %6501 = vmatmul.f32.gmra.mxu0 %v6028_v50 }
0x16b3   :  { %v5865_v58 = vpop.f32.mrf.mxu3 }
0x16b4   :  { %v13482_v43 = vpop.f32.mrf.mxu0 }
0x16b5   :  { %14946 = vst [vmem:[#allocation45_spill] sm:$0xff] %v13482_v43 }
0x16b6   :  { %v5701_v57 = vpop.f32.mrf.mxu1 }
0x16b7   :  { %6504 = vmatmul.f32.gmra.mxu0 %v6032_v21  ;;  %v5231_v21 = vld [vmem:[%s14793_s6 + $0x170] sm:$0xff]  ;;  %v5702_v27 = vadd.f32 %v5701_v57, %v5535_v47 }
0x16b8   :  { %v5541_v43 = vadd.f32 %v5540_v24, %v5231_v21  ;;  %v5227_v21 = vld [vmem:[%s14793_s6 + $0x150] sm:$0xff] }
0x16b9   :  { %v5529_v18 = vadd.f32 %v5528_v6, %v5227_v21 }
0x16bb   :  { %v5868_v10 = vpop.f32.mrf.mxu3 }
0x16bc   :  { %v13487_v8 = vpop.f32.mrf.mxu0  ;;  %v5869_v6 = vadd.f32 %v5868_v10, %v5702_v27 }
0x16bd   :  { %14947 = vst [vmem:[#allocation6_spill] sm:$0xff] %v13487_v8  ;;  %v5230_v8 = vld [vmem:[%s14793_s6 + $0x168] sm:$0xff] }
0x16be   :  { %v5704_v30 = vpop.f32.mrf.mxu1  ;;  %v5538_v19 = vadd.f32 %v5537_v41, %v5230_v8  ;;  %v5546_v41 = vpop.f32.mrf.mxu2  ;;  %v5532_v8 = vadd.f32 %v5531_v35, %v5228_v31  ;;  %v5225_v31 = vld [vmem:[%s14793_s6 + $0x140] sm:$0xff]  ;;  %v5930_v10 = vmax.f32 %v5869_v6, 0.0 }
0x16bf   :  { %6507 = vmatmul.f32.gmra.mxu0 %v6036_v9  ;;  %v5232_v9 = vld [vmem:[%s14793_s6 + $0x178] sm:$0xff]  ;;  %v5523_v35 = vadd.f32 %v13428_v52, %v5225_v31  ;;  %v5222_v52 = vld [vmem:[%s14793_s6 + $0x128] sm:$0xff] }
0x16c0   :  { %v5544_v34 = vadd.f32 %v5543_v5, %v5232_v9  ;;  %v5226_v9 = vld [vmem:[%s14793_s6 + $0x148] sm:$0xff]  ;;  %v5699_v29 = vadd.f32 %v5698_v20, %v5532_v8 }
0x16c3   :  { %v5871_v50 = vpop.f32.mrf.mxu3 }
0x16c4   :  { %v13492_v11 = vpop.f32.mrf.mxu0 }
0x16c5   :  { %14948 = vst [vmem:[#allocation8_spill] sm:$0xff] %v13492_v11 }
0x16c6   :  { %v5707_v23 = vpop.f32.mrf.mxu1 }
0x16c7   :  { %6510 = vmatmul.f32.gmra.mxu0 %v6040_v7  ;;  %v6044_v7 = vld [vmem:[%s14791_s4 + $0x360] sm:$0xff]  ;;  %v5708_v55 = vadd.f32 %v5707_v23, %v5541_v43  ;;  %v5526_v23 = vadd.f32 %v13441_v32, %v5226_v9  ;;  %v5223_v32 = vld [vmem:[%s14793_s6 + $0x130] sm:$0xff] }
0x16c9   :  { %v5693_v27 = vadd.f32 %v13466_v44, %v5526_v23  ;;  %v5517_v44 = vadd.f32 %v13400_v59, %v5223_v32  ;;  %v14951_v32 = vld [vmem:[#allocation7_spill] sm:$0xff] }
0x16cb   :  { %v5874_v12 = vpop.f32.mrf.mxu3 }
0x16cc   :  { %v13509_v11 = vpop.f32.mrf.mxu0  ;;  %v5875_v0 = vadd.f32 %v5874_v12, %v5708_v55  ;;  %v5234_v12 = vld [vmem:[%s14793_s6 + $0x188] sm:$0xff] }
0x16cd   :  { %14949 = vst [vmem:[#allocation49_spill] sm:$0xff] %v13509_v11  ;;  %v5705_v11 = vadd.f32 %v5704_v30, %v5538_v19  ;;  %v6048_v30 = vld [vmem:[%s14791_s4 + $0x380] sm:$0xff] }
0x16ce   :  { %v5710_v24 = vpop.f32.mrf.mxu1  ;;  %v5932_v47 = vmax.f32 %v5875_v0, 0.0  ;;  %v5866_v0 = vadd.f32 %v5865_v58, %v5699_v29 }
0x16cf   :  { %6513 = vmatmul.f32.gmra.mxu0 %v6044_v7  ;;  %v5711_v5 = vadd.f32 %v5710_v24, %v5544_v34  ;;  %v5872_v45 = vadd.f32 %v5871_v50, %v5705_v11  ;;  %v5696_v34 = vadd.f32 %v5695_v56, %v5529_v18  ;;  %v5224_v11 = vld [vmem:[%s14793_s6 + $0x138] sm:$0xff]  ;;  %v5549_v56 = vpop.f32.mrf.mxu2  ;;  %v5690_v7 = vadd.f32 %v13457_v14, %v5523_v35 }
0x16d0   :  { %v5520_v20 = vadd.f32 %v13417_v38, %v5224_v11  ;;  %v5860_v24 = vadd.f32 %v13468_v49, %v5693_v27  ;;  %v5929_v21 = vmax.f32 %v5866_v0, 0.0  ;;  %v5550_v38 = vadd.f32 %v5549_v56, %v5234_v12 }
0x16d1   :  { %v5931_v18 = vmax.f32 %v5872_v45, 0.0  ;;  %v5863_v57 = vadd.f32 %v13475_v39, %v5696_v34  ;;  %v6052_v39 = vld [vmem:[%s14791_s4 + $0x3a0] sm:$0xff]  ;;  %v5511_v14 = vadd.f32 %v13362_v63, %v13355_v16  ;;  %v5684_v49 = vadd.f32 %v13437_v25, %v5517_v44 }
0x16d2   :  { %v5857_v29 = vadd.f32 %v13459_v13, %v5690_v7  ;;  %v5927_v45 = vmax.f32 %v5860_v24, 0.0  ;;  %v5505_v16 = vadd.f32 %v13044_v15, %v13308_v61  ;;  %v6072_v44 = vld [vmem:[%s14791_s4 + $0x440] sm:$0xff]  ;;  %v5938_v24 = vld [vmem:[%s14791_s4 + $0x10] sm:$0xff] }
0x16d3   :  { %v5877_v26 = vpop.f32.mrf.mxu3  ;;  %v5928_v9 = vmax.f32 %v5863_v57, 0.0  ;;  %v5678_v25 = vadd.f32 %v13415_v60, %v5511_v14  ;;  %v5851_v13 = vadd.f32 %v13439_v2, %v5684_v49  ;;  %v5499_v2 = vadd.f32 %v12969_v4, %v13281_v62  ;;  %v6060_v62 = vld [vmem:[%s14791_s4 + $0x3e0] sm:$0xff] }
0x16d4   :  { %v5878_v43 = vadd.f32 %v5877_v26, %v5711_v5  ;;  %v13524_v37 = vpop.f32.mrf.mxu0  ;;  %v5233_v26 = vld [vmem:[%s14793_s6 + $0x180] sm:$0xff]  ;;  %v5687_v5 = vadd.f32 %v13448_v33, %v5520_v20  ;;  %v5926_v34 = vmax.f32 %v5857_v29, 0.0  ;;  %v5950_v29 = vld [vmem:[%s14791_s4 + $0x70] sm:$0xff] }
0x16d5   :  { %v5547_v50 = vadd.f32 %v5546_v41, %v5233_v26  ;;  %v5514_v41 = vadd.f32 %v13383_v46, %v5222_v52  ;;  %v5508_v46 = vadd.f32 %v13172_v36, %v13333_v53  ;;  %v6056_v36 = vld [vmem:[%s14791_s4 + $0x3c0] sm:$0xff]  ;;  %v5502_v53 = vadd.f32 %v13013_v17, %v13296_v22 }
0x16d6   :  { %v5933_v55 = vmax.f32 %v5878_v43, 0.0  ;;  %v5713_v19 = vpop.f32.mrf.mxu1  ;;  %v5924_v11 = vmax.f32 %v5851_v13, 0.0  ;;  %v6064_v57 = vld [vmem:[%s14791_s4 + $0x400] sm:$0xff] }
0x16d7   :  { %6516 = vmatmul.f32.gmra.mxu0 %v6048_v30  ;;  %v5714_v59 = vadd.f32 %v5713_v19, %v5547_v50  ;;  %v5681_v33 = vadd.f32 %v13426_v3, %v5514_v41  ;;  %v5854_v30 = vadd.f32 %v13450_v48, %v5687_v5  ;;  %v5675_v3 = vadd.f32 %v13403_v42, %v5508_v46  ;;  %v6068_v50 = vld [vmem:[%s14791_s4 + $0x420] sm:$0xff]  ;;  %v5939_v41 = vld [vmem:[%s14791_s4 + $0x18] sm:$0xff] }
0x16d8   :  { %6690 = vmatpush.msra.mxu2 %v5933_v55  ;;  %v5672_v55 = vadd.f32 %v13390_v40, %v5505_v16  ;;  %v5845_v19 = vadd.f32 %v13419_v54, %v5678_v25  ;;  %v5669_v17 = vadd.f32 %v13374_v28, %v5502_v53  ;;  %v14952_v40 = vld [vmem:[#allocation33_spill] sm:$0xff]  ;;  %v5937_v16 = vld [vmem:[%s14791_s4 + $0x8] sm:$0xff]  ;;  %v5955_v25 = vld [vmem:[%s14791_s4 + $0x98] sm:$0xff] }
0x16d9   :  { %v5848_v15 = vadd.f32 %v13430_v51, %v5681_v33  ;;  %v5925_v61 = vmax.f32 %v5854_v30, 0.0  ;;  %v5842_v22 = vadd.f32 %v13407_v1, %v5675_v3  ;;  %v14950_v51 = vld [vmem:[#allocation14_spill] sm:$0xff]  ;;  %v14953_v1 = vld [vmem:[#allocation31_spill] sm:$0xff]  ;;  %v6076_v7 = vld [vmem:[%s14791_s4 + $0x460] sm:$0xff] }
0x16da   :  { %6691 = vmatpush.msra.mxu2 %v5932_v47  ;;  %v5666_v26 = vadd.f32 %v14950_v51, %v5499_v2  ;;  %v5839_v35 = vadd.f32 %v14951_v32, %v5672_v55  ;;  %v5922_v27 = vmax.f32 %v5845_v19, 0.0  ;;  %v5836_v54 = vadd.f32 %v14952_v40, %v5669_v17  ;;  %v6088_v49 = vld [vmem:[%s14791_s4 + $0x4c0] sm:$0xff]  ;;  %v5954_v33 = vld [vmem:[%s14791_s4 + $0x90] sm:$0xff]  ;;  %v5951_v30 = vld [vmem:[%s14791_s4 + $0x78] sm:$0xff] }
0x16db   :  { %v5880_v58 = vpop.f32.mrf.mxu3  ;;  %v5923_v42 = vmax.f32 %v5848_v15, 0.0  ;;  %v5921_v28 = vmax.f32 %v5842_v22, 0.0  ;;  %v6092_v46 = vld [vmem:[%s14791_s4 + $0x4e0] sm:$0xff]  ;;  %v5945_v3 = vld [vmem:[%s14791_s4 + $0x48] sm:$0xff]  ;;  %v5966_v15 = vld [vmem:[%s14791_s4 + $0xf0] sm:$0xff] }
0x16dc   :  { %v13554_v8 = vpop.f32.mrf.mxu0  ;;  %6692 = vmatpush.msra.mxu2 %v5931_v18  ;;  %v5881_v31 = vadd.f32 %v5880_v58, %v5714_v59  ;;  %v5833_v0 = vadd.f32 %v14953_v1, %v5666_v26  ;;  %v5920_v18 = vmax.f32 %v5839_v35, 0.0  ;;  %v5919_v12 = vmax.f32 %v5836_v54, 0.0  ;;  %v5946_v59 = vld [vmem:[%s14791_s4 + $0x50] sm:$0xff]  ;;  %v5967_v55 = vld [vmem:[%s14791_s4 + $0xf8] sm:$0xff]  ;;  %v5957_v51 = vld [vmem:[%s14791_s4 + $0xa8] sm:$0xff] }
0x16dd   :  { %v5970_v2 = vld [vmem:[%s14791_s4 + $0x110] sm:$0xff]  ;;  %v5971_v22 = vld [vmem:[%s14791_s4 + $0x118] sm:$0xff] }
0x16de   :  { %6693 = vmatpush.msra.mxu2 %v5930_v10  ;;  %v5716_v23 = vpop.f32.mrf.mxu1  ;;  %v5934_v60 = vmax.f32 %v5881_v31, 0.0  ;;  %v5918_v56 = vmax.f32 %v5833_v0, 0.0  ;;  %v5974_v17 = vld [vmem:[%s14791_s4 + $0x130] sm:$0xff]  ;;  %v5975_v32 = vld [vmem:[%s14791_s4 + $0x138] sm:$0xff] }
0x16df   :  { %6519 = vmatmul.f32.gmra.mxu0 %v6052_v39  ;;  %v5717_v43 = vadd.f32 %v5716_v23, %v5550_v38  ;;  %v6080_v38 = vld [vmem:[%s14791_s4 + $0x480] sm:$0xff]  ;;  %v5942_v39 = vld [vmem:[%s14791_s4 + $0x30] sm:$0xff]  ;;  %v5943_v23 = vld [vmem:[%s14791_s4 + $0x38] sm:$0xff] }
0x16e0   :  { %6694 = vmatpush.msra.mxu2 %v5929_v21  ;;  %v5978_v26 = vld [vmem:[%s14791_s4 + $0x150] sm:$0xff]  ;;  %v5979_v40 = vld [vmem:[%s14791_s4 + $0x158] sm:$0xff] }
0x16e1   :  { %v5986_v1 = vld [vmem:[%s14791_s4 + $0x190] sm:$0xff]  ;;  %v5983_v0 = vld [vmem:[%s14791_s4 + $0x178] sm:$0xff] }
0x16e2   :  { %6695 = vmatpush.msra.mxu2 %v5928_v9  ;;  %v6084_v9 = vld [vmem:[%s14791_s4 + $0x4a0] sm:$0xff] }
0x16e3   :  { %v5883_v63 = vpop.f32.mrf.mxu3 }
0x16e4   :  { %v5884_v6 = vadd.f32 %v5883_v63, %v5717_v43  ;;  %v13573_v47 = vpop.f32.mrf.mxu0  ;;  %6696 = vmatpush.msra.mxu2 %v5927_v45  ;;  %v5947_v45 = vld [vmem:[%s14791_s4 + $0x58] sm:$0xff]  ;;  %v5958_v63 = vld [vmem:[%s14791_s4 + $0xb0] sm:$0xff] }
0x16e6   :  { %v5935_v48 = vmax.f32 %v5884_v6, 0.0  ;;  %6697 = vmatpush.msra.mxu2 %v5926_v34  ;;  %v5941_v34 = vld [vmem:[%s14791_s4 + $0x28] sm:$0xff]  ;;  %v5962_v6 = vld [vmem:[%s14791_s4 + $0xd0] sm:$0xff] }
0x16e7   :  { %6522 = vmatmul.f32.gmra.mxu0 %v6056_v36  ;;  %v5959_v36 = vld [vmem:[%s14791_s4 + $0xb8] sm:$0xff] }
0x16e8   :  { %6698 = vmatpush.msra.mxu2 %v5925_v61  ;;  %6841 = vmatpush.msrb.mxu1 %v5935_v48  ;;  %v5963_v61 = vld [vmem:[%s14791_s4 + $0xd8] sm:$0xff]  ;;  %v5949_v48 = vld [vmem:[%s14791_s4 + $0x68] sm:$0xff] }
0x16ea   :  { %6699 = vmatpush.msra.mxu2 %v5924_v11  ;;  %6842 = vmatpush.msrb.mxu1 %v5934_v60  ;;  %v5953_v11 = vld [vmem:[%s14791_s4 + $0x88] sm:$0xff] }
0x16eb   :  { %8315 = vmatmul.msk.f32.vlgmr.msrb.gmra.mxu1 %vm265_vm2, %v5939_v41  ;;  %v13792_v41 = vpop.permute.xlu1 %6236 }
0x16ec   :  { %v13590_v4 = vpop.f32.mrf.mxu0  ;;  %6700 = vmatpush.msra.mxu2 %v5923_v42 }
0x16ee   :  { %6701 = vmatpush.msra.mxu2 %v5922_v27  ;;  %v5961_v27 = vld [vmem:[%s14791_s4 + $0xc8] sm:$0xff] }
0x16ef   :  { %6525 = vmatmul.f32.gmra.mxu0 %v6060_v62  ;;  %v5982_v62 = vld [vmem:[%s14791_s4 + $0x170] sm:$0xff] }
0x16f0   :  { %6702 = vmatpush.msra.mxu2 %v5921_v28  ;;  %v5965_v28 = vld [vmem:[%s14791_s4 + $0xe8] sm:$0xff] }
0x16f2   :  { %6703 = vmatpush.msra.mxu2 %v5920_v18 }
0x16f3   :  { %8316 = vmatmul.msk.f32.gmra.mxu1 %vm265_vm2, %v5943_v23 }
0x16f4   :  { %v13597_v20 = vpop.f32.mrf.mxu0  ;;  %6704 = vmatpush.msra.mxu2 %v5919_v12  ;;  %v5969_v12 = vld [vmem:[%s14791_s4 + $0x108] sm:$0xff] }
0x16f6   :  { %6705 = vmatpush.msra.mxu2 %v5918_v56  ;;  %v5990_v56 = vld [vmem:[%s14791_s4 + $0x1b0] sm:$0xff] }
0x16f7   :  { %6528 = vmatmul.f32.gmra.mxu0 %v6064_v57  ;;  %6706 = vmatmul.f32.vlgmr.msra.gmra.mxu2 %v5938_v24  ;;  %v5987_v57 = vld [vmem:[%s14791_s4 + $0x198] sm:$0xff]  ;;  %v13783_v24 = vpop.permute.xlu2 %6196 }
0x16fb   :  { %8317 = vmatmul.msk.f32.gmra.mxu1 %vm265_vm2, %v5947_v45 }
0x16fc   :  { %v13602_v10 = vpop.f32.mrf.mxu0 }
0x16ff   :  { %6531 = vmatmul.f32.gmra.mxu0 %v6068_v50  ;;  %6709 = vmatmul.f32.gmra.mxu2 %v5942_v39  ;;  %v13776_v50 = vpop.permute.xlu0 %6216  ;;  %v5991_v39 = vld [vmem:[%s14791_s4 + $0x1b8] sm:$0xff]  ;;  %v13807_v45 = vpop.permute.xlu2 %6198 }
0x1703   :  { %8318 = vmatmul.msk.f32.gmra.mxu1 %vm265_vm2, %v5951_v30  ;;  %v13815_v30 = vpop.permute.xlu1 %6238 }
0x1704   :  { %v13607_v52 = vpop.f32.mrf.mxu0 }
0x1705   :  { %14954 = vst [vmem:[#allocation43_spill] sm:$0xff] %v13607_v52 }
0x1707   :  { %6534 = vmatmul.f32.gmra.mxu0 %v6072_v44  ;;  %6712 = vmatmul.f32.gmra.mxu2 %v5946_v59  ;;  %v5977_v59 = vld [vmem:[%s14791_s4 + $0x148] sm:$0xff]  ;;  %v13799_v23 = vpop.permute.xlu0 %6218 }
0x170b   :  { %8319 = vmatmul.msk.f32.gmra.mxu1 %vm265_vm2, %v5955_v25 }
0x170c   :  { %v13612_v58 = vpop.f32.mrf.mxu0 }
0x170d   :  { %14955 = vst [vmem:[#allocation46_spill] sm:$0xff] %v13612_v58 }
0x170f   :  { %6537 = vmatmul.f32.gmra.mxu0 %v6076_v7  ;;  %6715 = vmatmul.f32.gmra.mxu2 %v5950_v29  ;;  %v5973_v7 = vld [vmem:[%s14791_s4 + $0x128] sm:$0xff]  ;;  %v5995_v29 = vld [vmem:[%s14791_s4 + $0x1d8] sm:$0xff]  ;;  %v13823_v25 = vpop.permute.xlu0 %6220 }
0x1713   :  { %8320 = vmatmul.msk.f32.gmra.mxu1 %vm265_vm2, %v5959_v36  ;;  %v5985_v36 = vld [vmem:[%s14791_s4 + $0x188] sm:$0xff] }
0x1714   :  { %v13620_v21 = vpop.f32.mrf.mxu0 }
0x1717   :  { %6540 = vmatmul.f32.gmra.mxu0 %v6080_v38  ;;  %6718 = vmatmul.f32.gmra.mxu2 %v5954_v33  ;;  %v5994_v38 = vld [vmem:[%s14791_s4 + $0x1d0] sm:$0xff]  ;;  %v5981_v33 = vld [vmem:[%s14791_s4 + $0x168] sm:$0xff] }
0x171b   :  { %8321 = vmatmul.msk.f32.gmra.mxu1 %vm265_vm2, %v5963_v61  ;;  %v13833_v61 = vpop.permute.xlu1 %6240 }
0x171c   :  { %v13632_v5 = vpop.f32.mrf.mxu0 }
0x171f   :  { %6543 = vmatmul.f32.gmra.mxu0 %v6084_v9  ;;  %6721 = vmatmul.f32.gmra.mxu2 %v5958_v63  ;;  %v5999_v63 = vld [vmem:[%s14791_s4 + $0x1f8] sm:$0xff] }
0x1723   :  { %8322 = vmatmul.msk.f32.gmra.mxu1 %vm265_vm2, %v5967_v55  ;;  %v13841_v55 = vpop.permute.xlu0 %6222 }
0x1724   :  { %v13644_v14 = vpop.f32.mrf.mxu0 }
0x1727   :  { %6546 = vmatmul.f32.gmra.mxu0 %v6088_v49  ;;  %6724 = vmatmul.f32.gmra.mxu2 %v5962_v6  ;;  %v5998_v49 = vld [vmem:[%s14791_s4 + $0x1f0] sm:$0xff] }
0x172b   :  { %8323 = vmatmul.msk.f32.gmra.mxu1 %vm265_vm2, %v5971_v22  ;;  %v5989_v22 = vld [vmem:[%s14791_s4 + $0x1a8] sm:$0xff] }
0x172c   :  { %v13656_v43 = vpop.f32.mrf.mxu0 }
0x172f   :  { %6549 = vmatmul.f32.gmra.mxu0 %v6092_v46  ;;  %6727 = vmatmul.f32.gmra.mxu2 %v5966_v15 }
0x1733   :  { %8324 = vmatmul.msk.f32.gmra.mxu1 %vm265_vm2, %v5975_v32  ;;  %v6010_v32 = vld [vmem:[%s14791_s4 + $0x250] sm:$0xff] }
0x1734   :  { %v13668_v31 = vpop.f32.mrf.mxu0 }
0x1737   :  { %6569 = vmatmul.f32.vlgmr.msrb.gmra.mxu0 %v5937_v16  ;;  %6730 = vmatmul.f32.gmra.mxu2 %v5970_v2  ;;  %v6002_v16 = vld [vmem:[%s14791_s4 + $0x210] sm:$0xff]  ;;  %v6003_v2 = vld [vmem:[%s14791_s4 + $0x218] sm:$0xff] }
0x173b   :  { %8325 = vmatmul.msk.f32.gmra.mxu1 %vm265_vm2, %v5979_v40  ;;  %v13860_v40 = vpop.permute.xlu0 %6224 }
0x173c   :  { %v13680_v13 = vpop.f32.mrf.mxu0 }
0x173f   :  { %6572 = vmatmul.f32.gmra.mxu0 %v5941_v34  ;;  %6733 = vmatmul.f32.gmra.mxu2 %v5974_v17  ;;  %v13826_v34 = vpop.permute.xlu2 %6200 }
0x1743   :  { %8326 = vmatmul.msk.f32.gmra.mxu1 %vm265_vm2, %v5983_v0 }
0x1744   :  { %v13692_v53 = vpop.f32.mrf.mxu0 }
0x1747   :  { %6575 = vmatmul.f32.gmra.mxu0 %v5945_v3  ;;  %6736 = vmatmul.f32.gmra.mxu2 %v5978_v26 }
0x174b   :  { %8327 = vmatmul.msk.f32.gmra.mxu1 %vm265_vm2, %v5987_v57  ;;  %v6014_v57 = vld [vmem:[%s14791_s4 + $0x270] sm:$0xff] }
0x174c   :  { %v13704_v60 = vpop.f32.mrf.mxu0 }
0x174f   :  { %6578 = vmatmul.f32.gmra.mxu0 %v5949_v48  ;;  %6739 = vmatmul.f32.gmra.mxu2 %v5982_v62  ;;  %v6006_v48 = vld [vmem:[%s14791_s4 + $0x230] sm:$0xff]  ;;  %v13857_v62 = vpop.permute.xlu1 %6242 }
0x1753   :  { %8328 = vmatmul.msk.f32.gmra.mxu1 %vm265_vm2, %v5991_v39 }
0x1754   :  { %v13716_v19 = vpop.f32.mrf.mxu0 }
0x1755   :  { %14956 = vst [vmem:[#allocation40_spill] sm:$0xff] %v13716_v19 }
0x1757   :  { %6581 = vmatmul.f32.gmra.mxu0 %v5953_v11  ;;  %6742 = vmatmul.f32.gmra.mxu2 %v5986_v1  ;;  %v13844_v11 = vpop.permute.xlu2 %6202  ;;  %v5993_v1 = vld [vmem:[%s14791_s4 + $0x1c8] sm:$0xff] }
0x175b   :  { %8329 = vmatmul.msk.f32.gmra.mxu1 %vm265_vm2, %v5995_v29  ;;  %v13883_v29 = vpop.permute.xlu0 %6206 }
0x175c   :  { %v13728_v42 = vpop.f32.mrf.mxu0 }
0x175d   :  { %14957 = vst [vmem:[#allocation41_spill] sm:$0xff] %v13728_v42 }
0x175f   :  { %6584 = vmatmul.f32.gmra.mxu0 %v5957_v51  ;;  %6745 = vmatmul.f32.gmra.mxu2 %v5990_v56 }
0x1763   :  { %8330 = vmatmul.msk.f32.gmra.mxu1 %vm265_vm2, %v5999_v63  ;;  %v6018_v63 = vld [vmem:[%s14791_s4 + $0x290] sm:$0xff] }
0x1764   :  { %v13740_v35 = vpop.f32.mrf.mxu0 }
0x1767   :  { %6587 = vmatmul.f32.gmra.mxu0 %v5961_v27  ;;  %6748 = vmatmul.f32.gmra.mxu2 %v5994_v38  ;;  %v6007_v27 = vld [vmem:[%s14791_s4 + $0x238] sm:$0xff]  ;;  %v13876_v38 = vpop.permute.xlu1 %6244 }
0x1768   :  { %v6844_v15 = vpop.f32.mrf.mxu1 }
0x176b   :  { %8331 = vmatmul.msk.f32.gmra.mxu1 %vm265_vm2, %v6003_v2 }
0x176c   :  { %v13752_v54 = vpop.f32.mrf.mxu0 }
0x176f   :  { %6590 = vmatmul.f32.gmra.mxu0 %v5965_v28  ;;  %6751 = vmatmul.f32.gmra.mxu2 %v5998_v49 }
0x1770   :  { %v6847_v26 = vpop.f32.mrf.mxu1 }
0x1773   :  { %8332 = vmatmul.msk.f32.gmra.mxu1 %vm265_vm2, %v6007_v27 }
0x1774   :  { %v13764_v18 = vpop.f32.mrf.mxu0 }
0x1777   :  { %6593 = vmatmul.f32.gmra.mxu0 %v5969_v12  ;;  %6754 = vmatmul.f32.gmra.mxu2 %v6002_v16  ;;  %v13867_v12 = vpop.permute.xlu2 %6204 }
0x1778   :  { %v6850_v56 = vpop.f32.mrf.mxu1 }
0x177a   :  { %v6707_v3 = vpop.f32.mrf.mxu2 }
0x177c   :  { %v13778_v44 = vpop.f32.mrf.mxu0 }
0x177f   :  { %6596 = vmatmul.f32.gmra.mxu0 %v5973_v7  ;;  %6757 = vmatmul.f32.gmra.mxu2 %v6006_v48  ;;  %v6011_v7 = vld [vmem:[%s14791_s4 + $0x258] sm:$0xff]  ;;  %v6177_v16 = vpop.permute.xlu2 %6176  ;;  %v14961_v48 = vld [vmem:[#allocation5_spill] sm:$0xff] }
0x1780   :  { %8333 = vmatmul.msk.f32.gmra.mxu1 %vm265_vm2, %v6011_v7  ;;  %v6434_v2 = vadd.f32 %v14961_v48, %v6177_v16  ;;  %v6019_v16 = vld [vmem:[%s14791_s4 + $0x298] sm:$0xff] }
0x1782   :  { %v6710_v51 = vpop.f32.mrf.mxu2 }
0x1784   :  { %v13794_v9 = vpop.f32.mrf.mxu0 }
0x1787   :  { %6599 = vmatmul.f32.gmra.mxu0 %v5977_v59  ;;  %6760 = vmatmul.f32.gmra.mxu2 %v6010_v32  ;;  %v5997_v59 = vld [vmem:[%s14791_s4 + $0x1e8] sm:$0xff] }
0x1788   :  { %v6001_v32 = vld [vmem:[%s14791_s4 + $0x208] sm:$0xff] }
0x178a   :  { %v6713_v0 = vpop.f32.mrf.mxu2 }
0x178c   :  { %v13810_v46 = vpop.f32.mrf.mxu0 }
0x178f   :  { %6602 = vmatmul.f32.gmra.mxu0 %v5981_v33  ;;  %6763 = vmatmul.f32.gmra.mxu2 %v6014_v57  ;;  %v6853_v33 = vpop.f32.mrf.mxu1  ;;  %v13896_v57 = vpop.permute.xlu1 %6226 }
0x1792   :  { %v6716_v49 = vpop.f32.mrf.mxu2 }
0x1794   :  { %v13828_v6 = vpop.f32.mrf.mxu0 }
0x1797   :  { %6605 = vmatmul.f32.gmra.mxu0 %v5985_v36  ;;  %v6015_v36 = vld [vmem:[%s14791_s4 + $0x278] sm:$0xff]  ;;  %6766 = vmatmul.f32.gmra.mxu2 %v6018_v63  ;;  %v6022_v63 = vld [vmem:[%s14791_s4 + $0x2b0] sm:$0xff] }
0x1798   :  { %8334 = vmatmul.msk.f32.gmra.mxu1 %vm265_vm2, %v6015_v36  ;;  %v14963_v36 = vld [vmem:[#allocation10_spill] sm:$0xff] }
0x179c   :  { %v13846_v17 = vpop.f32.mrf.mxu0 }
0x179d   :  { %14958 = vst [vmem:[#allocation47_spill] sm:$0xff] %v13846_v17  ;;  %v6497_v17 = vadd.f32 %v13632_v5, %v13799_v23 }
0x179f   :  { %6608 = vmatmul.f32.gmra.mxu0 %v5989_v22  ;;  %6769 = vmatmul.f32.gmra.mxu2 %v6022_v63  ;;  %v6026_v63 = vld [vmem:[%s14791_s4 + $0x2d0] sm:$0xff] }
0x17a0   :  { %8335 = vmatmul.msk.f32.gmra.mxu1 %vm265_vm2, %v6019_v16  ;;  %v6181_v16 = vpop.permute.xlu1 %6180 }
0x17a4   :  { %v13862_v28 = vpop.f32.mrf.mxu0 }
0x17a5   :  { %14959 = vst [vmem:[#allocation15_spill] sm:$0xff] %v13862_v28 }
0x17a7   :  { %6611 = vmatmul.f32.gmra.mxu0 %v5993_v1  ;;  %v6719_v1 = vpop.f32.mrf.mxu2  ;;  %6772 = vmatmul.f32.gmra.mxu2 %v6026_v63 }
0x17ac   :  { %v13878_v39 = vpop.f32.mrf.mxu0 }
0x17ad   :  { %14960 = vst [vmem:[#allocation36_spill] sm:$0xff] %v13878_v39  ;;  %v6179_v39 = vpop.permute.xlu0 %6178 }
0x17ae   :  { %v6437_v48 = vadd.f32 %v14963_v36, %v6179_v39  ;;  %v6023_v39 = vld [vmem:[%s14791_s4 + $0x2b8] sm:$0xff] }
0x17af   :  { %6614 = vmatmul.f32.gmra.mxu0 %v5997_v59  ;;  %v6856_v59 = vpop.f32.mrf.mxu1  ;;  %8336 = vmatmul.msk.f32.gmra.mxu1 %vm265_vm2, %v6023_v39 }
0x17b4   :  { %v6570_v22 = vpop.f32.mrf.mxu0 }
0x17b5   :  { %v6571_v27 = vadd.f32 %v6570_v22, %v6434_v2  ;;  %v13911_v22 = vpop.f32.mrf.mxu2  ;;  %v13932_v19 = vpop.permute.xlu0 %6208 }
0x17b6   :  { %14964 = vst [vmem:[#allocation28_spill] sm:$0xff] %v13911_v22 }
0x17b7   :  { %v6708_v7 = vadd.f32 %v6707_v3, %v6571_v27  ;;  %6617 = vmatmul.f32.gmra.mxu0 %v6001_v32  ;;  %v6005_v3 = vld [vmem:[%s14791_s4 + $0x228] sm:$0xff]  ;;  %v13913_v32 = vpop.permute.xlu2 %6246 }
0x17b9   :  { %v13898_v42 = vadd.f32 %v6844_v15, %v6708_v7  ;;  %v13915_v7 = vpop.f32.mrf.mxu1 }
0x17ba   :  { %14965 = vst [vmem:[#allocation16_spill] sm:$0xff] %v13915_v7 }
0x17bb   :  { %14962 = vst [vmem:[#allocation11_spill] sm:$0xff] %v13898_v42 }
0x17bc   :  { %v6573_v2 = vpop.f32.mrf.mxu0 }
0x17bd   :  { %v6574_v15 = vadd.f32 %v6573_v2, %v6437_v48  ;;  %v14967_v48 = vld [vmem:[#allocation48_spill] sm:$0xff]  ;;  %v13930_v7 = vpop.f32.mrf.mxu2 }
0x17be   :  { %v6440_v2 = vadd.f32 %v14967_v48, %v6181_v16  ;;  %14968 = vst [vmem:[#allocation12_spill] sm:$0xff] %v13930_v7  ;;  %v14971_v16 = vld [vmem:[#allocation42_spill] sm:$0xff]  ;;  %v6055_v7 = vld [vmem:[%s14791_s4 + $0x3b8] sm:$0xff] }
0x17bf   :  { %v6711_v27 = vadd.f32 %v6710_v51, %v6574_v15  ;;  %6620 = vmatmul.f32.gmra.mxu0 %v6005_v3  ;;  %v6009_v3 = vld [vmem:[%s14791_s4 + $0x248] sm:$0xff]  ;;  %v6183_v63 = vpop.permute.xlu2 %6182 }
0x17c0   :  { %v6443_v48 = vadd.f32 %v14971_v16, %v6183_v63  ;;  %v14975_v63 = vld [vmem:[#allocation44_spill] sm:$0xff] }
0x17c1   :  { %v13923_v36 = vadd.f32 %v6847_v26, %v6711_v27  ;;  %v13934_v28 = vpop.f32.mrf.mxu1  ;;  %v6030_v26 = vld [vmem:[%s14791_s4 + $0x2f0] sm:$0xff]  ;;  %v6027_v27 = vld [vmem:[%s14791_s4 + $0x2d8] sm:$0xff] }
0x17c2   :  { %14969 = vst [vmem:[#allocation30_spill] sm:$0xff] %v13934_v28  ;;  %6775 = vmatmul.f32.gmra.mxu2 %v6030_v26  ;;  %8337 = vmatmul.msk.f32.gmra.mxu1 %vm265_vm2, %v6027_v27  ;;  %v6185_v26 = vpop.permute.xlu0 %6184 }
0x17c3   :  { %14966 = vst [vmem:[#allocation37_spill] sm:$0xff] %v13923_v36  ;;  %v6446_v16 = vadd.f32 %v14975_v63, %v6185_v26 }
0x17c4   :  { %v6576_v51 = vpop.f32.mrf.mxu0 }
0x17c5   :  { %v6577_v15 = vadd.f32 %v6576_v51, %v6440_v2  ;;  %v6013_v2 = vld [vmem:[%s14791_s4 + $0x268] sm:$0xff] }
0x17c7   :  { %v6714_v22 = vadd.f32 %v6713_v0, %v6577_v15  ;;  %6623 = vmatmul.f32.gmra.mxu0 %v6009_v3  ;;  %v13949_v3 = vpop.f32.mrf.mxu2 }
0x17c8   :  { %14972 = vst [vmem:[#allocation38_spill] sm:$0xff] %v13949_v3  ;;  %v6051_v3 = vld [vmem:[%s14791_s4 + $0x398] sm:$0xff] }
0x17c9   :  { %v13942_v39 = vadd.f32 %v6850_v56, %v6714_v22  ;;  %v13951_v28 = vpop.f32.mrf.mxu1  ;;  %v6034_v56 = vld [vmem:[%s14791_s4 + $0x310] sm:$0xff]  ;;  %v6031_v22 = vld [vmem:[%s14791_s4 + $0x2f8] sm:$0xff] }
0x17ca   :  { %14973 = vst [vmem:[#allocation13_spill] sm:$0xff] %v13951_v28  ;;  %6778 = vmatmul.f32.gmra.mxu2 %v6034_v56  ;;  %8338 = vmatmul.msk.f32.gmra.mxu1 %vm265_vm2, %v6031_v22 }
0x17cb   :  { %14970 = vst [vmem:[#allocation17_spill] sm:$0xff] %v13942_v39 }
0x17cc   :  { %v6579_v0 = vpop.f32.mrf.mxu0 }
0x17cd   :  { %v6580_v51 = vadd.f32 %v6579_v0, %v6443_v48  ;;  %v6017_v48 = vld [vmem:[%s14791_s4 + $0x288] sm:$0xff] }
0x17cf   :  { %v6717_v15 = vadd.f32 %v6716_v49, %v6580_v51  ;;  %6626 = vmatmul.f32.gmra.mxu0 %v6013_v2  ;;  %v13966_v2 = vpop.f32.mrf.mxu2 }
0x17d0   :  { %14976 = vst [vmem:[#allocation18_spill] sm:$0xff] %v13966_v2  ;;  %v6054_v2 = vld [vmem:[%s14791_s4 + $0x3b0] sm:$0xff] }
0x17d1   :  { %v13959_v27 = vadd.f32 %v6853_v33, %v6717_v15  ;;  %v13968_v28 = vpop.f32.mrf.mxu1  ;;  %v6038_v33 = vld [vmem:[%s14791_s4 + $0x330] sm:$0xff]  ;;  %v6035_v15 = vld [vmem:[%s14791_s4 + $0x318] sm:$0xff] }
0x17d2   :  { %14977 = vst [vmem:[#allocation39_spill] sm:$0xff] %v13968_v28  ;;  %6781 = vmatmul.f32.gmra.mxu2 %v6038_v33  ;;  %8339 = vmatmul.msk.f32.gmra.mxu1 %vm265_vm2, %v6035_v15  ;;  %v6046_v33 = vld [vmem:[%s14791_s4 + $0x370] sm:$0xff]  ;;  %v6043_v15 = vld [vmem:[%s14791_s4 + $0x358] sm:$0xff] }
0x17d3   :  { %14974 = vst [vmem:[#allocation32_spill] sm:$0xff] %v13959_v27 }
0x17d4   :  { %v6582_v49 = vpop.f32.mrf.mxu0 }
0x17d5   :  { %v6583_v0 = vadd.f32 %v6582_v49, %v6446_v16  ;;  %v6042_v16 = vld [vmem:[%s14791_s4 + $0x350] sm:$0xff] }
0x17d7   :  { %v6720_v51 = vadd.f32 %v6719_v1, %v6583_v0  ;;  %6629 = vmatmul.f32.gmra.mxu0 %v6017_v48  ;;  %v6021_v1 = vld [vmem:[%s14791_s4 + $0x2a8] sm:$0xff]  ;;  %v13984_v26 = vpop.f32.mrf.mxu2 }
0x17d8   :  { %14980 = vst [vmem:[#allocation14_spill] sm:$0xff] %v13984_v26  ;;  %v6025_v48 = vld [vmem:[%s14791_s4 + $0x2c8] sm:$0xff]  ;;  %v6047_v26 = vld [vmem:[%s14791_s4 + $0x378] sm:$0xff] }
0x17d9   :  { %v13976_v56 = vadd.f32 %v6856_v59, %v6720_v51  ;;  %v13986_v63 = vpop.f32.mrf.mxu1  ;;  %v6039_v59 = vld [vmem:[%s14791_s4 + $0x338] sm:$0xff] }
0x17da   :  { %14981 = vst [vmem:[#allocation7_spill] sm:$0xff] %v13986_v63  ;;  %6784 = vmatmul.f32.gmra.mxu2 %v6042_v16  ;;  %8340 = vmatmul.msk.f32.gmra.mxu1 %vm265_vm2, %v6039_v59  ;;  %v6029_v16 = vld [vmem:[%s14791_s4 + $0x2e8] sm:$0xff]  ;;  %v6050_v63 = vld [vmem:[%s14791_s4 + $0x390] sm:$0xff] }
0x17db   :  { %14978 = vst [vmem:[#allocation34_spill] sm:$0xff] %v13976_v56 }
0x17dc   :  { %v13979_v22 = vpop.f32.mrf.mxu0 }
0x17dd   :  { %14979 = vst [vmem:[#allocation35_spill] sm:$0xff] %v13979_v22 }
0x17df   :  { %6632 = vmatmul.f32.gmra.mxu0 %v6021_v1  ;;  %v6737_v0 = vpop.f32.mrf.mxu2 }
0x17e1   :  { %v6874_v51 = vpop.f32.mrf.mxu1 }
0x17e2   :  { %6787 = vmatmul.f32.gmra.mxu2 %v6046_v33  ;;  %8341 = vmatmul.msk.f32.gmra.mxu1 %vm265_vm2, %v6043_v15  ;;  %v6033_v15 = vld [vmem:[%s14791_s4 + $0x308] sm:$0xff] }
0x17e4   :  { %v13995_v49 = vpop.f32.mrf.mxu0 }
0x17e5   :  { %14982 = vst [vmem:[#allocation33_spill] sm:$0xff] %v13995_v49 }
0x17e7   :  { %6635 = vmatmul.f32.gmra.mxu0 %v6025_v48  ;;  %v6740_v59 = vpop.f32.mrf.mxu2 }
0x17e9   :  { %v6877_v48 = vpop.f32.mrf.mxu1 }
0x17ea   :  { %6790 = vmatmul.f32.gmra.mxu2 %v6050_v63  ;;  %8342 = vmatmul.msk.f32.gmra.mxu1 %vm265_vm2, %v6047_v26  ;;  %v6037_v63 = vld [vmem:[%s14791_s4 + $0x328] sm:$0xff] }
0x17ec   :  { %v14007_v1 = vpop.f32.mrf.mxu0 }
0x17ed   :  { %14983 = vst [vmem:[#allocation31_spill] sm:$0xff] %v14007_v1  ;;  %v6058_v1 = vld [vmem:[%s14791_s4 + $0x3d0] sm:$0xff] }
0x17ef   :  { %6638 = vmatmul.f32.gmra.mxu0 %v6029_v16  ;;  %v6743_v28 = vpop.f32.mrf.mxu2 }
0x17f1   :  { %v6880_v16 = vpop.f32.mrf.mxu1 }
0x17f2   :  { %6793 = vmatmul.f32.gmra.mxu2 %v6054_v2  ;;  %8343 = vmatmul.msk.f32.gmra.mxu1 %vm265_vm2, %v6051_v3  ;;  %v14986_v3 = vld [vmem:[#allocation8_spill] sm:$0xff] }
0x17f3   :  { %v6464_v2 = vadd.f32 %v14986_v3, %v13783_v24  ;;  %v6059_v24 = vld [vmem:[%s14791_s4 + $0x3d8] sm:$0xff] }
0x17f4   :  { %v14019_v33 = vpop.f32.mrf.mxu0 }
0x17f5   :  { %14984 = vst [vmem:[#allocation5_spill] sm:$0xff] %v14019_v33 }
0x17f7   :  { %6641 = vmatmul.f32.gmra.mxu0 %v6033_v15  ;;  %v6746_v33 = vpop.f32.mrf.mxu2 }
0x17f9   :  { %v6883_v15 = vpop.f32.mrf.mxu1 }
0x17fa   :  { %6796 = vmatmul.f32.gmra.mxu2 %v6058_v1  ;;  %8344 = vmatmul.msk.f32.gmra.mxu1 %vm265_vm2, %v6055_v7  ;;  %v6062_v7 = vld [vmem:[%s14791_s4 + $0x3f0] sm:$0xff]  ;;  %v14987_v1 = vld [vmem:[#allocation49_spill] sm:$0xff] }
0x17fc   :  { %v14031_v26 = vpop.f32.mrf.mxu0 }
0x17fd   :  { %14985 = vst [vmem:[#allocation10_spill] sm:$0xff] %v14031_v26 }
0x17ff   :  { %6644 = vmatmul.f32.gmra.mxu0 %v6037_v63  ;;  %v6041_v63 = vld [vmem:[%s14791_s4 + $0x348] sm:$0xff]  ;;  %v14048_v56 = vpop.f32.mrf.mxu2 }
0x1801   :  { %v14050_v58 = vpop.f32.mrf.mxu1 }
0x1802   :  { %6799 = vmatmul.f32.gmra.mxu2 %v6062_v7  ;;  %8345 = vmatmul.msk.f32.gmra.mxu1 %vm265_vm2, %v6059_v24  ;;  %v6066_v7 = vld [vmem:[%s14791_s4 + $0x410] sm:$0xff] }
0x1804   :  { %v6600_v26 = vpop.f32.mrf.mxu0 }
0x1805   :  { %v6601_v49 = vadd.f32 %v6600_v26, %v6464_v2  ;;  %v6467_v26 = vadd.f32 %v14987_v1, %v13807_v45  ;;  %v6063_v45 = vld [vmem:[%s14791_s4 + $0x3f8] sm:$0xff] }
0x1807   :  { %v6738_v22 = vadd.f32 %v6737_v0, %v6601_v49  ;;  %6647 = vmatmul.f32.gmra.mxu0 %v6041_v63 }
0x1809   :  { %v6875_v27 = vadd.f32 %v6874_v51, %v6738_v22  ;;  %v6045_v22 = vld [vmem:[%s14791_s4 + $0x368] sm:$0xff]  ;;  %v14065_v51 = vpop.f32.mrf.mxu2  ;;  %v14067_v2 = vpop.f32.mrf.mxu1 }
0x180a   :  { %6802 = vmatmul.f32.gmra.mxu2 %v6066_v7  ;;  %8346 = vmatmul.msk.f32.gmra.mxu1 %vm265_vm2, %v6063_v45 }
0x180b   :  { %6974 = vrot.lane.b32.xlu1 %v6875_v27, %s9082_s11  ;;  %v6470_v27 = vadd.f32 %v13524_v37, %v13826_v34  ;;  %v6067_v37 = vld [vmem:[%s14791_s4 + $0x418] sm:$0xff]  ;;  %v6473_v34 = vadd.f32 %v13554_v8, %v13844_v11 }
0x180c   :  { %v6603_v49 = vpop.f32.mrf.mxu0  ;;  %v6071_v8 = vld [vmem:[%s14791_s4 + $0x438] sm:$0xff] }
0x180d   :  { %v6604_v0 = vadd.f32 %v6603_v49, %v6467_v26 }
0x180f   :  { %v6741_v3 = vadd.f32 %v6740_v59, %v6604_v0  ;;  %6650 = vmatmul.f32.gmra.mxu0 %v6045_v22  ;;  %v6070_v0 = vld [vmem:[%s14791_s4 + $0x430] sm:$0xff] }
0x1811   :  { %v6878_v63 = vadd.f32 %v6877_v48, %v6741_v3  ;;  %v6049_v48 = vld [vmem:[%s14791_s4 + $0x388] sm:$0xff]  ;;  %v14082_v1 = vpop.f32.mrf.mxu2  ;;  %v14084_v49 = vpop.f32.mrf.mxu1 }
0x1812   :  { %6805 = vmatmul.f32.gmra.mxu2 %v6070_v0  ;;  %8347 = vmatmul.msk.f32.gmra.mxu1 %vm265_vm2, %v6067_v37  ;;  %v6061_v0 = vld [vmem:[%s14791_s4 + $0x3e8] sm:$0xff] }
0x1813   :  { %6976 = vrot.lane.b32.xlu2 %v6878_v63, %s9082_s11 }
0x1814   :  { %v6606_v59 = vpop.f32.mrf.mxu0 }
0x1815   :  { %v6607_v24 = vadd.f32 %v6606_v59, %v6470_v27  ;;  %v6074_v59 = vld [vmem:[%s14791_s4 + $0x450] sm:$0xff] }
0x1817   :  { %v6744_v26 = vadd.f32 %v6743_v28, %v6607_v24  ;;  %6653 = vmatmul.f32.gmra.mxu0 %v6049_v48  ;;  %v6078_v24 = vld [vmem:[%s14791_s4 + $0x470] sm:$0xff] }
0x1819   :  { %v6881_v22 = vadd.f32 %v6880_v16, %v6744_v26  ;;  %v6053_v16 = vld [vmem:[%s14791_s4 + $0x3a8] sm:$0xff]  ;;  %v14099_v63 = vpop.f32.mrf.mxu2  ;;  %v14101_v45 = vpop.f32.mrf.mxu1  ;;  %v6075_v26 = vld [vmem:[%s14791_s4 + $0x458] sm:$0xff] }
0x181a   :  { %14988 = vst [vmem:[#allocation48_spill] sm:$0xff] %v14101_v45  ;;  %6808 = vmatmul.f32.gmra.mxu2 %v6074_v59  ;;  %8348 = vmatmul.msk.f32.gmra.mxu1 %vm265_vm2, %v6071_v8  ;;  %v6083_v8 = vld [vmem:[%s14791_s4 + $0x498] sm:$0xff] }
0x181b   :  { %6978 = vrot.lane.b32.xlu0 %v6881_v22, %s9082_s11 }
0x181c   :  { %v6609_v28 = vpop.f32.mrf.mxu0 }
0x181d   :  { %v6610_v3 = vadd.f32 %v6609_v28, %v6473_v34  ;;  %v6082_v28 = vld [vmem:[%s14791_s4 + $0x490] sm:$0xff] }
0x181f   :  { %v6747_v7 = vadd.f32 %v6746_v33, %v6610_v3  ;;  %6656 = vmatmul.f32.gmra.mxu0 %v6053_v16  ;;  %v6057_v33 = vld [vmem:[%s14791_s4 + $0x3c8] sm:$0xff]  ;;  %v6079_v16 = vld [vmem:[%s14791_s4 + $0x478] sm:$0xff] }
0x1821   :  { %v6884_v27 = vadd.f32 %v6883_v15, %v6747_v7  ;;  %v14116_v15 = vpop.f32.mrf.mxu2  ;;  %v14118_v48 = vpop.f32.mrf.mxu1  ;;  %v6065_v7 = vld [vmem:[%s14791_s4 + $0x408] sm:$0xff] }
0x1822   :  { %14989 = vst [vmem:[#allocation42_spill] sm:$0xff] %v14116_v15  ;;  %6811 = vmatmul.f32.gmra.mxu2 %v6078_v24  ;;  %8349 = vmatmul.msk.f32.gmra.mxu1 %vm265_vm2, %v6075_v26  ;;  %v6069_v24 = vld [vmem:[%s14791_s4 + $0x428] sm:$0xff] }
0x1823   :  { %6980 = vrot.lane.b32.xlu1 %v6884_v27, %s9082_s11  ;;  %14990 = vst [vmem:[#allocation44_spill] sm:$0xff] %v14118_v48  ;;  %v6081_v48 = vld [vmem:[%s14791_s4 + $0x488] sm:$0xff] }
0x1824   :  { %v14111_v11 = vpop.f32.mrf.mxu0 }
0x1827   :  { %6659 = vmatmul.f32.gmra.mxu0 %v6057_v33 }
0x1829   :  { %v14132_v37 = vpop.f32.mrf.mxu2  ;;  %v14134_v34 = vpop.f32.mrf.mxu1 }
0x182a   :  { %14991 = vst [vmem:[#allocation8_spill] sm:$0xff] %v14132_v37  ;;  %6814 = vmatmul.f32.gmra.mxu2 %v6082_v28  ;;  %8350 = vmatmul.msk.f32.gmra.mxu1 %vm265_vm2, %v6079_v16  ;;  %v6073_v16 = vld [vmem:[%s14791_s4 + $0x448] sm:$0xff] }
0x182b   :  { %14992 = vst [vmem:[#allocation49_spill] sm:$0xff] %v14134_v34 }
0x182c   :  { %v14127_v22 = vpop.f32.mrf.mxu0 }
0x182f   :  { %6662 = vmatmul.f32.gmra.mxu0 %v6061_v0 }
0x1831   :  { %v6767_v27 = vpop.f32.mrf.mxu2  ;;  %v6904_v59 = vpop.f32.mrf.mxu1 }
0x1832   :  { %8351 = vmatmul.msk.f32.gmra.mxu1 %vm265_vm2, %v6083_v8  ;;  %v6077_v8 = vld [vmem:[%s14791_s4 + $0x468] sm:$0xff] }
0x1834   :  { %v14143_v3 = vpop.f32.mrf.mxu0 }
0x1837   :  { %6665 = vmatmul.f32.gmra.mxu0 %v6065_v7 }
0x1839   :  { %v6770_v26 = vpop.f32.mrf.mxu2  ;;  %v6907_v0 = vpop.f32.mrf.mxu1 }
0x183c   :  { %v14152_v33 = vpop.f32.mrf.mxu0 }
0x183f   :  { %6668 = vmatmul.f32.gmra.mxu0 %v6069_v24  ;;  %v6494_v24 = vadd.f32 %v13620_v21, %v13776_v50 }
0x1841   :  { %v6773_v7 = vpop.f32.mrf.mxu2  ;;  %v6910_v37 = vpop.f32.mrf.mxu1 }
0x1844   :  { %v14157_v28 = vpop.f32.mrf.mxu0 }
0x1845   :  { %14993 = vst [vmem:[#allocation50_spill] sm:$0xff] %v14157_v28 }
0x1847   :  { %6671 = vmatmul.f32.gmra.mxu0 %v6073_v16 }
0x1849   :  { %v6776_v15 = vpop.f32.mrf.mxu2  ;;  %v6913_v16 = vpop.f32.mrf.mxu1 }
0x184c   :  { %v14162_v34 = vpop.f32.mrf.mxu0 }
0x184d   :  { %14994 = vst [vmem:[#allocation51_spill] sm:$0xff] %v14162_v34 }
0x184f   :  { %6674 = vmatmul.f32.gmra.mxu0 %v6077_v8 }
0x1851   :  { %v14175_v42 = vpop.f32.mrf.mxu2  ;;  %v14177_v50 = vpop.f32.mrf.mxu1 }
0x1854   :  { %v6630_v39 = vpop.f32.mrf.mxu0 }
0x1855   :  { %v6631_v28 = vadd.f32 %v6630_v39, %v6494_v24  ;;  %v6500_v39 = vadd.f32 %v13644_v14, %v13823_v25 }
0x1857   :  { %v6768_v52 = vadd.f32 %v6767_v27, %v6631_v28  ;;  %6677 = vmatmul.f32.gmra.mxu0 %v6081_v48 }
0x1859   :  { %v6905_v34 = vadd.f32 %v6904_v59, %v6768_v52  ;;  %v14182_v59 = vpop.f32.mrf.mxu2  ;;  %v14184_v23 = vpop.f32.mrf.mxu1 }
0x185b   :  { %7014 = vrot.lane.b32.xlu2 %v6905_v34, %s9083_s8 }
0x185c   :  { %v6633_v8 = vpop.f32.mrf.mxu0 }
0x185d   :  { %v6634_v36 = vadd.f32 %v6633_v8, %v6497_v17  ;;  %v6503_v17 = vadd.f32 %v13656_v43, %v13841_v55  ;;  %v6229_v8 = vpop.permute.xlu1 %6228 }
0x185e   :  { %v6512_v43 = vadd.f32 %v13692_v53, %v6229_v8 }
0x185f   :  { %v6771_v21 = vadd.f32 %v6770_v26, %v6634_v36 }
0x1861   :  { %v6908_v45 = vadd.f32 %v6907_v0, %v6771_v21  ;;  %v6785_v14 = vpop.f32.mrf.mxu2 }
0x1863   :  { %7016 = vrot.lane.b32.xlu0 %v6908_v45, %s9083_s8  ;;  %v6922_v45 = vpop.f32.mrf.mxu1 }
0x1864   :  { %v6636_v48 = vpop.f32.mrf.mxu0 }
0x1865   :  { %v6637_v52 = vadd.f32 %v6636_v48, %v6500_v39 }
0x1867   :  { %v6774_v27 = vadd.f32 %v6773_v7, %v6637_v52 }
0x1869   :  { %v6911_v5 = vadd.f32 %v6910_v37, %v6774_v27  ;;  %v6788_v7 = vpop.f32.mrf.mxu2  ;;  %v14192_v37 = vpop.permute.xlu2 %6248 }
0x186b   :  { %7018 = vrot.lane.b32.xlu1 %v6911_v5, %s9083_s8  ;;  %v6925_v24 = vpop.f32.mrf.mxu1  ;;  %v6085_v5 = vld [vmem:[%s14791_s4 + $0x4a8] sm:$0xff] }
0x186c   :  { %v6639_v36 = vpop.f32.mrf.mxu0  ;;  %6680 = vmatmul.f32.gmra.mxu0 %v6085_v5 }
0x186d   :  { %v6640_v34 = vadd.f32 %v6639_v36, %v6503_v17 }
0x186f   :  { %v6777_v26 = vadd.f32 %v6776_v15, %v6640_v34  ;;  %v6086_v15 = vld [vmem:[%s14791_s4 + $0x4b0] sm:$0xff]  ;;  %v6087_v34 = vld [vmem:[%s14791_s4 + $0x4b8] sm:$0xff] }
0x1870   :  { %6817 = vmatmul.f32.gmra.mxu2 %v6086_v15  ;;  %8352 = vmatmul.msk.f32.gmra.mxu1 %vm265_vm2, %v6087_v34  ;;  %v6524_v15 = vadd.f32 %v13740_v35, %v13792_v41  ;;  %v6527_v34 = vadd.f32 %v13752_v54, %v13815_v30  ;;  %v6506_v35 = vadd.f32 %v13668_v31, %v13860_v40 }
0x1871   :  { %v6914_v0 = vadd.f32 %v6913_v16, %v6777_v26  ;;  %v14195_v39 = vpop.f32.mrf.mxu2  ;;  %v6231_v48 = vpop.permute.xlu2 %6230 }
0x1872   :  { %v6515_v53 = vadd.f32 %v13704_v60, %v6231_v48  ;;  %v6090_v60 = vld [vmem:[%s14791_s4 + $0x4d0] sm:$0xff] }
0x1873   :  { %7020 = vrot.lane.b32.xlu2 %v6914_v0, %s9083_s8  ;;  %v14200_v52 = vpop.f32.mrf.mxu1 }
0x1874   :  { %v6642_v25 = vpop.f32.mrf.mxu0 }
0x1875   :  { %v6643_v54 = vadd.f32 %v6642_v25, %v6506_v35  ;;  %v6095_v25 = vld [vmem:[%s14791_s4 + $0x4f8] sm:$0xff] }
0x1877   :  { %v6780_v40 = vadd.f32 %v14175_v42, %v6643_v54  ;;  %v6101_v42 = vld [vmem:[%s14793_s6 + $0x28] sm:$0xff]  ;;  %v6114_v54 = vld [vmem:[%s14793_s6 + $0x90] sm:$0xff] }
0x1878   :  { %6820 = vmatmul.f32.gmra.mxu2 %v6090_v60 }
0x1879   :  { %v14212_v0 = vpop.f32.mrf.mxu2 }
0x187c   :  { %v14190_v28 = vpop.f32.mrf.mxu0 }
0x1884   :  { %v6648_v55 = vpop.f32.mrf.mxu0 }
0x1885   :  { %v6649_v21 = vadd.f32 %v6648_v55, %v6512_v43  ;;  %v6089_v43 = vld [vmem:[%s14791_s4 + $0x4c8] sm:$0xff] }
0x1886   :  { %6683 = vmatmul.f32.gmra.mxu0 %v6089_v43 }
0x1887   :  { %v6786_v16 = vadd.f32 %v6785_v14, %v6649_v21 }
0x1889   :  { %v14202_v27 = vadd.f32 %v6922_v45, %v6786_v16  ;;  %v14216_v45 = vpop.f32.mrf.mxu1 }
0x188c   :  { %v6651_v17 = vpop.f32.mrf.mxu0 }
0x188d   :  { %v6652_v36 = vadd.f32 %v6651_v17, %v6515_v53 }
0x188f   :  { %v6789_v26 = vadd.f32 %v6788_v7, %v6652_v36  ;;  %v6797_v7 = vpop.f32.mrf.mxu2 }
0x1891   :  { %v14214_v14 = vadd.f32 %v6925_v24, %v6789_v26  ;;  %v6934_v21 = vpop.f32.mrf.mxu1  ;;  %v6091_v24 = vld [vmem:[%s14791_s4 + $0x4d8] sm:$0xff] }
0x1892   :  { %8353 = vmatmul.msk.f32.gmra.mxu1 %vm265_vm2, %v6091_v24  ;;  %v6094_v24 = vld [vmem:[%s14791_s4 + $0x4f0] sm:$0xff] }
0x1893   :  { %6823 = vmatmul.f32.gmra.mxu2 %v6094_v24  ;;  %v6134_v24 = vld [vmem:[%s14793_s6 + $0x130] sm:$0xff] }
0x1894   :  { %v14218_v8 = vpop.f32.mrf.mxu0 }
0x1897   :  { %v6800_v48 = vpop.f32.mrf.mxu2 }
0x1899   :  { %v6937_v53 = vpop.f32.mrf.mxu1 }
0x189a   :  { %8354 = vmatmul.msk.f32.gmra.mxu1 %vm265_vm2, %v6095_v25 }
0x189c   :  { %v14226_v55 = vpop.f32.mrf.mxu0 }
0x189f   :  { %v6803_v43 = vpop.f32.mrf.mxu2 }
0x18a4   :  { %v6660_v16 = vpop.f32.mrf.mxu0 }
0x18a5   :  { %v6661_v5 = vadd.f32 %v6660_v16, %v6524_v15  ;;  %v6093_v15 = vld [vmem:[%s14791_s4 + $0x4e8] sm:$0xff]  ;;  %v6530_v16 = vadd.f32 %v13764_v18, %v13833_v61  ;;  %v6917_v61 = vadd.f32 %v14177_v50, %v6780_v40 }
0x18a6   :  { %6686 = vmatmul.f32.gmra.mxu0 %v6093_v15 }
0x18a7   :  { %v6798_v17 = vadd.f32 %v6797_v7, %v6661_v5  ;;  %v6133_v7 = vld [vmem:[%s14793_s6 + $0x128] sm:$0xff]  ;;  %v6476_v5 = vadd.f32 %v13573_v47, %v13867_v12 }
0x18a9   :  { %v6935_v36 = vadd.f32 %v6934_v21, %v6798_v17  ;;  %v6940_v21 = vpop.f32.mrf.mxu1  ;;  %v6806_v17 = vpop.f32.mrf.mxu2  ;;  %v6613_v18 = vadd.f32 %v14111_v11, %v6476_v5  ;;  %v6542_v5 = vadd.f32 %v13828_v6, %v14192_v37 }
0x18ab   :  { %7054 = vrot.lane.b32.xlu0 %v6935_v36, %s9084_s14  ;;  %v6750_v12 = vadd.f32 %v14048_v56, %v6613_v18 }
0x18ac   :  { %v6663_v26 = vpop.f32.mrf.mxu0 }
0x18ad   :  { %v6664_v60 = vadd.f32 %v6663_v26, %v6527_v34  ;;  %v6533_v26 = vadd.f32 %v13778_v44, %v13857_v62  ;;  %v6536_v44 = vadd.f32 %v13794_v9, %v13876_v38  ;;  %v6509_v9 = vadd.f32 %v13680_v13, %v13896_v57 }
0x18af   :  { %v6801_v41 = vadd.f32 %v6800_v48, %v6664_v60  ;;  %v6887_v60 = vadd.f32 %v14050_v58, %v6750_v12  ;;  %v7114_v58 = vld [vmem:[%s14788_s1 + $0x38] sm:$0xf]  ;;  %v6646_v15 = vadd.f32 %v14190_v28, %v6509_v9  ;;  %v14997_v9 = vld [vmem:[#allocation37_spill] sm:$0xff] }
0x18b0   :  { %8355 = vmatpush.msk.msra.mxu3 %vm3166_vm6, %v7114_v58 }
0x18b1   :  { %v6938_v30 = vadd.f32 %v6937_v53, %v6801_v41  ;;  %v6943_v34 = vpop.f32.mrf.mxu1  ;;  %v6809_v35 = vpop.f32.mrf.mxu2 }
0x18b3   :  { %6250 = vrot.lane.b32.xlu0 %v6133_v7, %s9080_s28  ;;  %7056 = vrot.lane.b32.xlu1 %v6938_v30, %s9084_s14  ;;  %v6479_v7 = vadd.f32 %v13590_v4, %v13883_v29  ;;  %v6539_v4 = vadd.f32 %v13810_v46, %v13913_v32  ;;  %v6482_v32 = vadd.f32 %v13597_v20, %v13932_v19 }
0x18b4   :  { %v6666_v31 = vpop.f32.mrf.mxu0 }
0x18b5   :  { %v6667_v48 = vadd.f32 %v6666_v31, %v6530_v16  ;;  %v6616_v30 = vadd.f32 %v14127_v22, %v6479_v7  ;;  %v6783_v31 = vadd.f32 %v14182_v59, %v6646_v15  ;;  %v6135_v59 = vld [vmem:[%s14793_s6 + $0x138] sm:$0xff]  ;;  %v14998_v15 = vld [vmem:[#allocation47_spill] sm:$0xff] }
0x18b7   :  { %v6804_v53 = vadd.f32 %v6803_v43, %v6667_v48  ;;  %v6753_v57 = vadd.f32 %v14065_v51, %v6616_v30  ;;  %v6920_v25 = vadd.f32 %v14184_v23, %v6783_v31  ;;  %v6125_v51 = vld [vmem:[%s14793_s6 + $0xe8] sm:$0xff]  ;;  %v6619_v23 = vadd.f32 %v14143_v3, %v6482_v32  ;;  %v6102_v3 = vld [vmem:[%s14793_s6 + $0x30] sm:$0xff] }
0x18b9   :  { %v6941_v36 = vadd.f32 %v6940_v21, %v6804_v53  ;;  %v6946_v56 = vpop.f32.mrf.mxu1  ;;  %v6124_v21 = vld [vmem:[%s14793_s6 + $0xe0] sm:$0xff]  ;;  %v6812_v29 = vpop.f32.mrf.mxu2  ;;  %v6890_v28 = vadd.f32 %v14067_v2, %v6753_v57  ;;  %v6115_v2 = vld [vmem:[%s14793_s6 + $0x98] sm:$0xff]  ;;  %v6756_v20 = vadd.f32 %v14082_v1, %v6619_v23 }
0x18ba   :  { %v6103_v53 = vld [vmem:[%s14793_s6 + $0x38] sm:$0xff]  ;;  %v6211_v1 = vpop.permute.xlu1 %6210  ;;  %v15003_v23 = vld [vmem:[#allocation17_spill] sm:$0xff] }
0x18bb   :  { %7022 = vrot.lane.b32.xlu0 %v6917_v61, %s9083_s8  ;;  %7058 = vrot.lane.b32.xlu2 %v6941_v36, %s9084_s14  ;;  %v6893_v18 = vadd.f32 %v14084_v49, %v6756_v20  ;;  %v6485_v36 = vadd.f32 %v13602_v10, %v6211_v1  ;;  %v6105_v10 = vld [vmem:[%s14793_s6 + $0x48] sm:$0xff] }
0x18bc   :  { %6186 = vrot.lane.b32.xlu1 %v6101_v42, %s9080_s28  ;;  %v6669_v47 = vpop.f32.mrf.mxu0 }
0x18bd   :  { %v6670_v11 = vadd.f32 %v6669_v47, %v6533_v26  ;;  %v6622_v42 = vadd.f32 %v14152_v33, %v6485_v36  ;;  %v6104_v26 = vld [vmem:[%s14793_s6 + $0x40] sm:$0xff]  ;;  %v14995_v47 = vld [vmem:[#allocation48_spill] sm:$0xff]  ;;  %v6977_v33 = vpop.permute.xlu2 %6976 }
0x18bf   :  { %v6807_v50 = vadd.f32 %v6806_v17, %v6670_v11  ;;  %v6759_v49 = vadd.f32 %v14099_v63, %v6622_v42 }
0x18c1   :  { %v6944_v43 = vadd.f32 %v6943_v34, %v6807_v50  ;;  %v6949_v22 = vpop.f32.mrf.mxu1  ;;  %v6815_v61 = vpop.f32.mrf.mxu2  ;;  %v6896_v12 = vadd.f32 %v14995_v47, %v6759_v49 }
0x18c3   :  { %7060 = vrot.lane.b32.xlu0 %v6944_v43, %s9084_s14  ;;  %6982 = vrot.lane.b32.xlu2 %v6887_v60, %s9082_s11  ;;  %v6975_v60 = vpop.permute.xlu1 %6974 }
0x18c4   :  { %6252 = vrot.lane.b32.xlu1 %v6134_v24, %s9080_s28  ;;  %v6672_v62 = vpop.f32.mrf.mxu0 }
0x18c5   :  { %v6673_v41 = vadd.f32 %v6672_v62, %v6536_v44  ;;  %v7015_v11 = vpop.permute.xlu2 %7014 }
0x18c7   :  { %v6810_v38 = vadd.f32 %v6809_v35, %v6673_v41  ;;  %v14996_v35 = vld [vmem:[#allocation11_spill] sm:$0xff] }
0x18c8   :  { %v7084_v44 = vsel %vm3101_vm7, %v14996_v35, %v6975_v60 }
0x18c9   :  { %v6947_v16 = vadd.f32 %v6946_v56, %v6810_v38  ;;  %v6952_v37 = vpop.f32.mrf.mxu1  ;;  %v7085_v38 = vsel %vm3101_vm7, %v14997_v9, %v6977_v33  ;;  %v15013_v9 = vld [vmem:[#allocation28_spill] sm:$0xff] }
0x18cb   :  { %6232 = vrot.lane.b32.xlu0 %v6124_v21, %s9080_s28  ;;  %6212 = vrot.lane.b32.xlu2 %v6114_v54, %s9080_s28  ;;  %v6981_v24 = vpop.permute.xlu1 %6980 }
0x18cc   :  { %7062 = vrot.lane.b32.xlu1 %v6947_v16, %s9084_s14  ;;  %v6675_v13 = vpop.f32.mrf.mxu0 }
0x18cd   :  { %v6676_v40 = vadd.f32 %v6675_v13, %v6539_v4  ;;  %v7021_v50 = vpop.permute.xlu2 %7020  ;;  %v14999_v4 = vld [vmem:[#allocation43_spill] sm:$0xff] }
0x18cf   :  { %v6813_v48 = vadd.f32 %v6812_v29, %v6676_v40  ;;  %v15000_v40 = vld [vmem:[#allocation50_spill] sm:$0xff] }
0x18d1   :  { %v6950_v46 = vadd.f32 %v6949_v22, %v6813_v48 }
0x18d3   :  { %7024 = vrot.lane.b32.xlu0 %v6920_v25, %s9083_s8  ;;  %6984 = vrot.lane.b32.xlu2 %v6890_v28, %s9082_s11  ;;  %v15001_v25 = vld [vmem:[#allocation42_spill] sm:$0xff] }
0x18d4   :  { %7064 = vrot.lane.b32.xlu1 %v6950_v46, %s9084_s14  ;;  %v6678_v19 = vpop.f32.mrf.mxu0 }
0x18d5   :  { %v6679_v17 = vadd.f32 %v6678_v19, %v6542_v5 }
0x18d7   :  { %v6816_v6 = vadd.f32 %v6815_v61, %v6679_v17 }
0x18d9   :  { %v6953_v34 = vadd.f32 %v6952_v37, %v6816_v6  ;;  %v15005_v6 = vld [vmem:[#allocation20_spill] sm:$0xff] }
0x18db   :  { %6234 = vrot.lane.b32.xlu0 %v6125_v51, %s9080_s28  ;;  %6214 = vrot.lane.b32.xlu2 %v6115_v2, %s9080_s28  ;;  %v15002_v51 = vld [vmem:[#allocation44_spill] sm:$0xff] }
0x18dc   :  { %6254 = vrot.lane.b32.xlu1 %v6135_v59, %s9080_s28 }
0x18dd   :  { %v7019_v58 = vpop.permute.xlu1 %7018 }
0x18e3   :  { %6190 = vrot.lane.b32.xlu0 %v6103_v53, %s9080_s28  ;;  %6188 = vrot.lane.b32.xlu2 %v6102_v3, %s9080_s28 }
0x18e4   :  { %6986 = vrot.lane.b32.xlu1 %v6893_v18, %s9082_s11  ;;  %v15004_v18 = vld [vmem:[#allocation32_spill] sm:$0xff] }
0x18e5   :  { %v7087_v61 = vsel %vm3101_vm7, %v15004_v18, %v6981_v24  ;;  %v15010_v24 = vld [vmem:[#allocation8_spill] sm:$0xff] }
0x18e6   :  { %v7097_v1 = vsel %vm3112_vm8, %v7087_v61, %v7021_v50 }
0x18e9   :  { %v6681_v7 = vpop.f32.mrf.mxu0 }
0x18eb   :  { %7066 = vrot.lane.b32.xlu0 %v6953_v34, %s9084_s14  ;;  %7026 = vrot.lane.b32.xlu2 %v14202_v27, %s9083_s8  ;;  %v6979_v27 = vpop.permute.xlu0 %6978 }
0x18ec   :  { %6192 = vrot.lane.b32.xlu1 %v6104_v26, %s9080_s28  ;;  %v7086_v20 = vsel %vm3101_vm7, %v15003_v23, %v6979_v27  ;;  %v15006_v26 = vld [vmem:[#allocation46_spill] sm:$0xff] }
0x18ed   :  { %v6955_v28 = vpop.f32.mrf.mxu1  ;;  %v7096_v53 = vsel %vm3112_vm8, %v7086_v20, %v7019_v58  ;;  %v15018_v20 = vld [vmem:[#allocation36_spill] sm:$0xff] }
0x18f3   :  { %7028 = vrot.lane.b32.xlu0 %v14214_v14, %s9083_s8  ;;  %6988 = vrot.lane.b32.xlu2 %v6896_v12, %s9082_s11  ;;  %v7017_v43 = vpop.permute.xlu0 %7016  ;;  %v7094_v14 = vsel %vm3112_vm8, %v7084_v44, %v7015_v11  ;;  %v6818_v31 = vpop.f32.mrf.mxu2  ;;  %v15008_v11 = vld [vmem:[#allocation51_spill] sm:$0xff] }
0x18f4   :  { %v7095_v30 = vsel %vm3112_vm8, %v7085_v38, %v7017_v43  ;;  %v15009_v43 = vld [vmem:[#allocation35_spill] sm:$0xff] }
0x18fb   :  { %6194 = vrot.lane.b32.xlu2 %v6105_v10, %s9080_s28  ;;  %v15007_v10 = vld [vmem:[#allocation15_spill] sm:$0xff]  ;;  %v6821_v60 = vpop.f32.mrf.mxu2 }
0x1903   :  { %v6684_v12 = vpop.f32.mrf.mxu0 }
0x190f   :  { %v6958_v44 = vpop.f32.mrf.mxu1 }
0x1915   :  { %v7059_v63 = vpop.permute.xlu2 %7058 }
0x1916   :  { %v7106_v17 = vsel %vm3123_vm10, %v7096_v53, %v7059_v63 }
0x191d   :  { %v7055_v62 = vpop.permute.xlu0 %7054  ;;  %v6983_v56 = vpop.permute.xlu2 %6982 }
0x191e   :  { %v7104_v41 = vsel %vm3123_vm10, %v7094_v14, %v7055_v62  ;;  %v15011_v62 = vld [vmem:[#allocation49_spill] sm:$0xff] }
0x191f   :  { %8356 = vmatmul.msk.f32.vlgmr.msra.gmra.mxu3 %vm3135_vm9, %v7104_v41  ;;  %v15012_v41 = vld [vmem:[#allocation34_spill] sm:$0xff] }
0x1925   :  { %v6251_v21 = vpop.permute.xlu0 %6250  ;;  %v6213_v54 = vpop.permute.xlu2 %6212 }
0x1926   :  { %v6545_v16 = vadd.f32 %v14998_v15, %v6251_v21  ;;  %v6488_v13 = vadd.f32 %v14999_v4, %v6213_v54  ;;  %v7057_v29 = vpop.permute.xlu1 %7056  ;;  %v15014_v15 = vld [vmem:[#allocation40_spill] sm:$0xff] }
0x1927   :  { %v7105_v57 = vsel %vm3123_vm10, %v7095_v30, %v7057_v29 }
0x1928   :  { %v6625_v22 = vadd.f32 %v15000_v40, %v6488_v13  ;;  %v6682_v48 = vadd.f32 %v6681_v7, %v6545_v16  ;;  %8357 = vmatmul.msk.f32.gmra.mxu3 %vm3135_vm9, %v7105_v57  ;;  %v7088_v7 = vsel %vm3101_vm7, %v15012_v41, %v6983_v56  ;;  %v15015_v56 = vld [vmem:[#allocation16_spill] sm:$0xff] }
0x192a   :  { %v6762_v46 = vadd.f32 %v15001_v25, %v6625_v22  ;;  %v6819_v32 = vadd.f32 %v6818_v31, %v6682_v48 }
0x192c   :  { %v6899_v2 = vadd.f32 %v15002_v51, %v6762_v46  ;;  %v6956_v59 = vadd.f32 %v6955_v28, %v6819_v32  ;;  %v15016_v32 = vld [vmem:[#allocation26_spill] sm:$0xff] }
0x192d   :  { %v7023_v19 = vpop.permute.xlu0 %7022  ;;  %v6985_v5 = vpop.permute.xlu2 %6984 }
0x192e   :  { %v6187_v3 = vpop.permute.xlu1 %6186  ;;  %6990 = vrot.lane.b32.xlu0 %v6899_v2, %s9082_s11  ;;  %7068 = vrot.lane.b32.xlu1 %v6956_v59, %s9084_s14  ;;  %v7098_v30 = vsel %vm3112_vm8, %v7088_v7, %v7023_v19  ;;  %v15017_v59 = vld [vmem:[#allocation41_spill] sm:$0xff] }
0x192f   :  { %v6449_v37 = vadd.f32 %v15005_v6, %v6187_v3 }
0x1930   :  { %8358 = vmatmul.msk.f32.gmra.mxu3 %vm3135_vm9, %v7106_v17  ;;  %v6824_v17 = vpop.f32.mrf.mxu2 }
0x1931   :  { %v6586_v63 = vadd.f32 %v15009_v43, %v6449_v37  ;;  %v15020_v37 = vld [vmem:[#allocation12_spill] sm:$0xff] }
0x1933   :  { %v6723_v38 = vadd.f32 %v15013_v9, %v6586_v63  ;;  %v15024_v63 = vld [vmem:[#allocation38_spill] sm:$0xff] }
0x1935   :  { %v7061_v36 = vpop.permute.xlu0 %7060  ;;  %v6215_v42 = vpop.permute.xlu2 %6214  ;;  %v6860_v57 = vadd.f32 %v15015_v56, %v6723_v38 }
0x1936   :  { %v7107_v34 = vsel %vm3123_vm10, %v7097_v1, %v7061_v36  ;;  %v6491_v49 = vadd.f32 %v15006_v26, %v6215_v42  ;;  %v6253_v47 = vpop.permute.xlu1 %6252  ;;  %v6961_v1 = vpop.f32.mrf.mxu1 }
0x1937   :  { %v6548_v33 = vadd.f32 %v15007_v10, %v6253_v47  ;;  %v7089_v48 = vsel %vm3101_vm7, %v6860_v57, %v6985_v5  ;;  %v15019_v5 = vld [vmem:[#allocation33_spill] sm:$0xff]  ;;  %v15021_v47 = vld [vmem:[#allocation30_spill] sm:$0xff] }
0x1938   :  { %v6628_v27 = vadd.f32 %v15008_v11, %v6491_v49  ;;  %8359 = vmatmul.msk.f32.gmra.mxu3 %vm3135_vm9, %v7107_v34 }
0x1939   :  { %v6685_v50 = vadd.f32 %v6684_v12, %v6548_v33 }
0x193a   :  { %v6765_v35 = vadd.f32 %v15010_v24, %v6628_v27 }
0x193b   :  { %v6822_v14 = vadd.f32 %v6821_v60, %v6685_v50  ;;  %v15023_v60 = vld [vmem:[#allocation31_spill] sm:$0xff] }
0x193c   :  { %v6902_v58 = vadd.f32 %v15011_v62, %v6765_v35  ;;  %v15025_v35 = vld [vmem:[#allocation13_spill] sm:$0xff] }
0x193d   :  { %v6959_v21 = vadd.f32 %v6958_v44, %v6822_v14  ;;  %v6233_v54 = vpop.permute.xlu0 %6232 }
0x193e   :  { %v6518_v16 = vadd.f32 %v15014_v15, %v6233_v54  ;;  %v7063_v4 = vpop.permute.xlu1 %7062  ;;  %6992 = vrot.lane.b32.xlu0 %v6902_v58, %s9082_s11  ;;  %s8000_s11 = sshll.u32 %s14794_s7, 4  ;;  %s8001_s11 = int_to_ptr.hbm [resolvable:$true] %s8000_s11 }
0x193f   :  { %v7108_v13 = vsel %vm3123_vm10, %v7098_v30, %v7063_v4  ;;  %7070 = vrot.lane.b32.xlu2 %v6959_v21, %s9084_s14  ;;  %v15026_v21 = vld [vmem:[#allocation45_spill] sm:$0xff] }
0x1940   :  { %v6655_v29 = vadd.f32 %v14218_v8, %v6518_v16  ;;  %8360 = vmatmul.msk.f32.gmra.mxu3 %vm3135_vm9, %v7108_v13  ;;  %v6189_v8 = vpop.permute.xlu2 %6188  ;;  %v15027_v16 = vld [vmem:[#allocation5_spill] sm:$0xff] }
0x1941   :  { %v6452_v51 = vadd.f32 %v15016_v32, %v6189_v8  ;;  %v15030_v32 = vld [vmem:[#allocation6_spill] sm:$0xff] }
0x1942   :  { %v6792_v31 = vadd.f32 %v14195_v39, %v6655_v29  ;;  %v15028_v29 = vld [vmem:[#allocation18_spill] sm:$0xff] }
0x1943   :  { %v6589_v53 = vadd.f32 %v15019_v5, %v6452_v51 }
0x1944   :  { %v6929_v40 = vadd.f32 %v14200_v52, %v6792_v31  ;;  %v6687_v52 = vpop.f32.mrf.mxu0 }
0x1945   :  { %v7025_v22 = vpop.permute.xlu0 %7024  ;;  %v6726_v36 = vadd.f32 %v15020_v37, %v6589_v53 }
0x1946   :  { %v7099_v28 = vsel %vm3112_vm8, %v7089_v48, %v7025_v22  ;;  %v7065_v25 = vpop.permute.xlu1 %7064  ;;  %7030 = vrot.lane.b32.xlu1 %v6929_v40, %s9083_s8  ;;  %v15029_v40 = vld [vmem:[#allocation39_spill] sm:$0xff]  ;;  %v14444_v48 = vld [vmem:[%s14792_s5] sm:$0xff] }
0x1947   :  { %v7109_v46 = vsel %vm3123_vm10, %v7099_v28, %v7065_v25  ;;  %v6863_v12 = vadd.f32 %v15021_v47, %v6726_v36  ;;  %v15034_v47 = vmov 4  }
0x1948   :  { %8361 = vmatmul.msk.f32.gmra.mxu3 %vm3135_vm9, %v7109_v46  ;;  %v7027_v10 = vpop.permute.xlu2 %7026 }
0x194d   :  { %v6235_v2 = vpop.permute.xlu0 %6234 }
0x194e   :  { %v6521_v39 = vadd.f32 %v15017_v59, %v6235_v2  ;;  %v6255_v23 = vpop.permute.xlu1 %6254 }
0x194f   :  { %v6551_v19 = vadd.f32 %v15018_v20, %v6255_v23  ;;  %v15031_v23 = vld [vmem:[#allocation10_spill] sm:$0xff]  ;;  %v14458_v20 = vld [vmem:[%s14792_s5 + $0x18] sm:$0xff] }
0x1950   :  { %v6658_v3 = vadd.f32 %v14226_v55, %v6521_v39  ;;  %v6989_v62 = vpop.permute.xlu2 %6988 }
0x1951   :  { %v6688_v18 = vadd.f32 %v6687_v52, %v6551_v19  ;;  %v15032_v19 = vld [vmem:[#allocation14_spill] sm:$0xff] }
0x1952   :  { %v6795_v61 = vadd.f32 %v14212_v0, %v6658_v3 }
0x1953   :  { %v6825_v6 = vadd.f32 %v6824_v17, %v6688_v18  ;;  %v15033_v17 = vld [vmem:[#allocation7_spill] sm:$0xff] }
0x1954   :  { %v6932_v42 = vadd.f32 %v14216_v45, %v6795_v61  ;;  %v15022_v45 = vld [vmem:[#allocation21_spill] sm:$0xff]  ;;  %v14466_v61 = vld [vmem:[%s14792_s5 + $0x28] sm:$0xff] }
0x1955   :  { %v6962_v34 = vadd.f32 %v6961_v1, %v6825_v6  ;;  %v6191_v26 = vpop.permute.xlu0 %6190 }
0x1956   :  { %7032 = vrot.lane.b32.xlu1 %v6932_v42, %s9083_s8  ;;  %v6987_v49 = vpop.permute.xlu1 %6986  ;;  %v6455_v27 = vadd.f32 %v15022_v45, %v6191_v26  ;;  %v14497_v45 = vld [vmem:[%s14792_s5 + $0x38] sm:$0xff]  ;;  %s9089_s8 = smov 128  }
0x1957   :  { %7072 = vrot.lane.b32.xlu2 %v6962_v34, %s9084_s14  ;;  %v7090_v55 = vsel %vm3101_vm7, %v6863_v12, %v6987_v49  ;;  %v14477_v49 = vld [vmem:[%s14792_s5 + $0x40] sm:$0xff] }
0x1958   :  { %v7100_v0 = vsel %vm3112_vm8, %v7090_v55, %v7027_v10  ;;  %v6592_v43 = vadd.f32 %v15023_v60, %v6455_v27  ;;  %v6195_v13 = vpop.permute.xlu2 %6194 }
0x1959   :  { %v6461_v51 = vadd.f32 %v15030_v32, %v6195_v13  ;;  %v7249_v13 = vld [vmem:[%s14789_s2 + $0x290] sm:$0xff]  ;;  %v7240_v32 = vld [vmem:[%s14789_s2 + $0xe0] sm:$0xff] }
0x195a   :  { %v6729_v50 = vadd.f32 %v15024_v63, %v6592_v43 }
0x195b   :  { %v6598_v52 = vadd.f32 %v15031_v23, %v6461_v51  ;;  %v7242_v51 = vld [vmem:[%s14789_s2 + $0x138] sm:$0xff] }
0x195c   :  { %v6866_v44 = vadd.f32 %v15025_v35, %v6729_v50 }
0x195d   :  { %v7067_v33 = vpop.permute.xlu0 %7066  ;;  %v6735_v5 = vadd.f32 %v15032_v19, %v6598_v52  ;;  %v7248_v52 = vld [vmem:[%s14789_s2 + $0x240] sm:$0xff] }
0x195e   :  { %v7110_v11 = vsel %vm3123_vm10, %v7100_v0, %v7067_v33  ;;  %v6193_v24 = vpop.permute.xlu1 %6192  ;;  %v7091_v58 = vsel %vm3101_vm7, %v6866_v44, %v6989_v62  ;;  %v14485_v33 = vld [vmem:[%s14792_s5 + $0x10] sm:$0xff]  ;;  %v14491_v0 = vld [vmem:[%s14792_s5 + $0x20] sm:$0xff] }
0x195f   :  { %8362 = vmatmul.msk.f32.gmra.mxu3 %vm3135_vm9, %v7110_v11  ;;  %v6458_v54 = vadd.f32 %v15026_v21, %v6193_v24  ;;  %v6872_v18 = vadd.f32 %v15033_v17, %v6735_v5  ;;  %v7237_v21 = vld [vmem:[%s14789_s2 + $0x80] sm:$0xff]  ;;  %v7250_v5 = vld [vmem:[%s14789_s2 + $0x298] sm:$0xff]  ;;  %v7254_v17 = vld [vmem:[%s14789_s2 + $0x348] sm:$0xff] }
0x1961   :  { %v6595_v4 = vadd.f32 %v15027_v16, %v6458_v54  ;;  %v14526_v54 = vld [vmem:[%s14792_s5 + $0x48] sm:$0xff]  ;;  %v7245_v16 = vld [vmem:[%s14789_s2 + $0x1e0] sm:$0xff] }
0x1963   :  { %v6732_v56 = vadd.f32 %v15028_v29, %v6595_v4  ;;  %v7247_v4 = vld [vmem:[%s14789_s2 + $0x238] sm:$0xff]  ;;  %v7251_v29 = vld [vmem:[%s14789_s2 + $0x2e8] sm:$0xff] }
0x1965   :  { %v7029_v14 = vpop.permute.xlu0 %7028  ;;  %v6869_v22 = vadd.f32 %v15029_v40, %v6732_v56  ;;  %v7253_v56 = vld [vmem:[%s14789_s2 + $0x340] sm:$0xff] }
0x1966   :  { %v7101_v41 = vsel %vm3112_vm8, %v7091_v58, %v7029_v14 }
0x1999   :  { %v7071_v46 = vpop.permute.xlu2 %7070 }
0x19a0   :  { %v7069_v7 = vpop.permute.xlu1 %7068  ;;  %v6991_v31 = vpop.permute.xlu0 %6990 }
0x19a1   :  { %v7111_v9 = vsel %vm3123_vm10, %v7101_v41, %v7069_v7  ;;  %v7092_v28 = vsel %vm3101_vm7, %v6869_v22, %v6991_v31  ;;  %v14505_v41 = vld [vmem:[%s14792_s5 + $0x8] sm:$0xff] }
0x19a2   :  { %v14427_v38 = vpop.f32.mrf.mxu3  ;;  %8363 = vmatmul.msk.f32.gmra.mxu3 %vm3135_vm9, %v7111_v9  ;;  %v7235_v7 = vld [vmem:[%s14789_s2 + $0x28] sm:$0xff]  ;;  %v14517_v9 = vld [vmem:[%s14792_s5 + $0x30] sm:$0xff] }
0x19ab   :  { %v14431_v30 = vpop.f32.mrf.mxu3 }
0x19ac   :  { %v8952_v15 = vpack.i.bf16 %v14427_v38, %v14431_v30 }
0x19ae   :  { %8953 = vrot.lane.b32.xlu2 %v8952_v15, %s9075_s21  ;;  %v7243_v15 = vld [vmem:[%s14789_s2 + $0x188] sm:$0xff] }
0x19b0   :  { %v6993_v3 = vpop.permute.xlu0 %6992 }
0x19b1   :  { %v7093_v1 = vsel %vm3101_vm7, %v6872_v18, %v6993_v3  ;;  %v7073_v37 = vpop.permute.xlu2 %7072 }
0x19b3   :  { %v14438_v57 = vpop.f32.mrf.mxu3 }
0x19b6   :  { %7256 = vperm.xlu2 %8967, %v14444_v48  }
0x19b8   :  { %v7031_v25 = vpop.permute.xlu1 %7030 }
0x19b9   :  { %v7102_v8 = vsel %vm3112_vm8, %v7092_v28, %v7031_v25 }
0x19ba   :  { %v7112_v2 = vsel %vm3123_vm10, %v7102_v8, %v7071_v46  ;;  %v7236_v46 = vld [vmem:[%s14789_s2 + $0x30] sm:$0xff]  ;;  %v7238_v8 = vld [vmem:[%s14789_s2 + $0x88] sm:$0xff] }
0x19bb   :  { %v7174_v59 = vpop.f32.mrf.mxu3  ;;  %8364 = vmatmul.msk.f32.gmra.mxu3 %vm3135_vm9, %v7112_v2  ;;  %v7244_v2 = vld [vmem:[%s14789_s2 + $0x190] sm:$0xff] }
0x19bc   :  { %v8947_v39 = vpack.i.bf16 %v14438_v57, %v7174_v59 }
0x19be   :  { %8948 = vrot.lane.b32.xlu1 %v8947_v39, %s9075_s21  ;;  %7268 = vperm.xlu2 %8967, %v14458_v20   ;;  %v7246_v39 = vld [vmem:[%s14789_s2 + $0x1e8] sm:$0xff] }
0x19c3   :  { %v7177_v53 = vpop.f32.mrf.mxu3 }
0x19c6   :  { %7276 = vperm.xlu2 %8967, %v14466_v61  }
0x19c8   :  { %v7033_v6 = vpop.permute.xlu1 %7032 }
0x19c9   :  { %v7103_v36 = vsel %vm3112_vm8, %v7093_v1, %v7033_v6 }
0x19ca   :  { %v7113_v42 = vsel %vm3123_vm10, %v7103_v36, %v7073_v37  ;;  %v7439_v36 = vld [vmem:[%s14788_s1 + $0x40] sm:$0xff] }
0x19cb   :  { %v7180_v34 = vpop.f32.mrf.mxu3  ;;  %8365 = vmatmul.msk.f32.gmra.mxu3 %vm3135_vm9, %v7113_v42 }
0x19cc   :  { %v8942_v26 = vpack.i.bf16 %v7177_v53, %v7180_v34 }
0x19ce   :  { %8943 = vrot.lane.b32.xlu0 %v8942_v26, %s9075_s21  ;;  %7288 = vperm.xlu2 %8967, %v14477_v49  }
0x19d6   :  { %8997 = vset.pattern.permute.xlu2 %v15034_v47 }
0x19e2   :  { %v7183_v12 = vpop.f32.mrf.mxu3 }
0x1a08   :  { %v8954_v50 = vpop.permute.xlu2 %8953 }
0x1a09   :  { %v8955_v44 = vunpack.i.l.bf16 %v8954_v50  ;;  %v8956_v14 = vunpack.i.h.bf16 %v8954_v50 }
0x1a10   :  { %v7257_v26 = vpop.permute.xlu2 %7256 }
0x1a25   :  { %v7186_v55 = vpop.f32.mrf.mxu3 }
0x1a26   :  { %v8962_v10 = vpack.i.bf16 %v7183_v12, %v7186_v55 }
0x1a28   :  { %8963 = vrot.lane.b32.xlu1 %v8962_v10, %s9075_s21 }
0x1a30   :  { %7264 = vperm.xlu1 %8969, %v14485_v33   ;;  %v8949_v60 = vpop.permute.xlu1 %8948 }
0x1a31   :  { %v8950_v63 = vunpack.i.l.bf16 %v8949_v60  ;;  %v8951_v35 = vunpack.i.h.bf16 %v8949_v60 }
0x1a38   :  { %7272 = vperm.xlu1 %8969, %v14491_v0  }
0x1a3e   :  { %v7189_v24 = vpop.f32.mrf.mxu3 }
0x1a40   :  { %v8944_v11 = vpop.permute.xlu0 %8943  ;;  %7284 = vperm.xlu1 %8969, %v14497_v45  }
0x1a41   :  { %v8945_v27 = vunpack.i.l.bf16 %v8944_v11  ;;  %v8946_v43 = vunpack.i.h.bf16 %v8944_v11 }
0x1a43   :  { %7325 = vmatpush.msrb.mxu3 %v8945_v27 }
0x1a45   :  { %7326 = vmatpush.msrb.mxu3 %v8946_v43 }
0x1a47   :  { %7327 = vmatpush.msrb.mxu3 %v8950_v63 }
0x1a48   :  { %8996 = vset.pattern.permute.xlu1 %v15034_v47 }
0x1a49   :  { %7328 = vmatpush.msrb.mxu3 %v8951_v35 }
0x1a4b   :  { %7329 = vmatpush.msrb.mxu3 %v8955_v44 }
0x1a4d   :  { %7330 = vmatpush.msrb.mxu3 %v8956_v14 }
0x1a4e   :  { %v7192_v62 = vpop.f32.mrf.mxu3 }
0x1a4f   :  { %v8957_v58 = vpack.i.bf16 %v7189_v24, %v7192_v62  ;;  %7331 = vmatpush.msrb.mxu3 %v7192_v62 }
0x1a51   :  { %8958 = vrot.lane.b32.xlu0 %v8957_v58, %s9075_s21  ;;  %7332 = vmatpush.msrb.mxu3 %v7189_v24 }
0x1a53   :  { %7333 = vmatpush.msrb.mxu3 %v7186_v55 }
0x1a55   :  { %7334 = vmatpush.msrb.mxu3 %v7183_v12 }
0x1a57   :  { %7335 = vmatpush.msrb.mxu3 %v7180_v34 }
0x1a59   :  { %7336 = vmatpush.msrb.mxu3 %v7177_v53  ;;  %7260 = vperm.xlu0 %8968, %v14505_v41   ;;  %v7252_v53 = vld [vmem:[%s14789_s2 + $0x2f0] sm:$0xff] }
0x1a5b   :  { %7337 = vmatpush.msrb.mxu3 %v7174_v59 }
0x1a5d   :  { %7338 = vmatpush.msrb.mxu3 %v14438_v57 }
0x1a5f   :  { %7339 = vmatpush.msrb.mxu3 %v14431_v30  ;;  %v7241_v30 = vld [vmem:[%s14789_s2 + $0x130] sm:$0xff] }
0x1a61   :  { %7340 = vmatpush.msrb.mxu3 %v14427_v38  ;;  %7280 = vperm.xlu0 %8968, %v14517_v9   ;;  %v7239_v38 = vld [vmem:[%s14789_s2 + $0xd8] sm:$0xff] }
0x1a62   :  { %7341 = vmatmul.f32.vlgmr.msrb.gmra.mxu3 %v7235_v7  ;;  %v7269_v7 = vpop.permute.xlu2 %7268 }
0x1a69   :  { %7292 = vperm.xlu0 %8968, %v14526_v54  }
0x1a6a   :  { %7344 = vmatmul.f32.gmra.mxu3 %v7237_v21 }
0x1a71   :  { %8995 = vset.pattern.permute.xlu0 %v15034_v47 }
0x1a72   :  { %7347 = vmatmul.f32.gmra.mxu3 %v7239_v38 }
0x1a7a   :  { %7350 = vmatmul.f32.gmra.mxu3 %v7241_v30 }
0x1a82   :  { %7353 = vmatmul.f32.gmra.mxu3 %v7243_v15 }
0x1a8a   :  { %7356 = vmatmul.f32.gmra.mxu3 %v7245_v16 }
0x1a92   :  { %7359 = vmatmul.f32.gmra.mxu3 %v7247_v4 }
0x1a9a   :  { %7362 = vmatmul.f32.gmra.mxu3 %v7249_v13  ;;  %v8964_v40 = vpop.permute.xlu1 %8963 }
0x1a9b   :  { %v8965_v28 = vunpack.i.l.bf16 %v8964_v40  ;;  %v8966_v25 = vunpack.i.h.bf16 %v8964_v40  ;;  %v7277_v40 = vpop.permute.xlu2 %7276 }
0x1aa2   :  { %7365 = vmatmul.f32.gmra.mxu3 %v7251_v29  ;;  %v7265_v24 = vpop.permute.xlu1 %7264 }
0x1aaa   :  { %7368 = vmatmul.f32.gmra.mxu3 %v7253_v56  ;;  %v7273_v4 = vpop.permute.xlu1 %7272 }
0x1ac3   :  { %v8959_v57 = vpop.permute.xlu0 %8958 }
0x1ac4   :  { %v8960_v31 = vunpack.i.l.bf16 %v8959_v57  ;;  %v8961_v22 = vunpack.i.h.bf16 %v8959_v57 }
0x1ac6   :  { %7384 = vmatpush.msra.mxu3 %v8960_v31 }
0x1ac8   :  { %7385 = vmatpush.msra.mxu3 %v8961_v22 }
0x1aca   :  { %7386 = vmatpush.msra.mxu3 %v8965_v28 }
0x1acb   :  { %v7261_v11 = vpop.permute.xlu0 %7260 }
0x1acc   :  { %7387 = vmatpush.msra.mxu3 %v8966_v25 }
0x1acd   :  { %8366 = vmatmul.msk.f32.vlgmr.msra.gmra.mxu3 %vm35_vm0, %v7236_v46 }
0x1ace   :  { %7485 = vmatpush.msrb.mxu3 %v7439_v36 }
0x1ad5   :  { %8367 = vmatmul.msk.f32.gmra.mxu3 %vm35_vm0, %v7238_v8 }
0x1add   :  { %8368 = vmatmul.msk.f32.gmra.mxu3 %vm35_vm0, %v7240_v32  ;;  %v7281_v32 = vpop.permute.xlu0 %7280 }
0x1ae5   :  { %8369 = vmatmul.msk.f32.gmra.mxu3 %vm35_vm0, %v7242_v51  ;;  %v7342_v59 = vpop.f32.mrf.mxu3 }
0x1ae6   :  { %v7343_v47 = vadd.f32 %v7342_v59, %v7257_v26 }
0x1aed   :  { %8370 = vmatmul.msk.f32.gmra.mxu3 %vm35_vm0, %v7244_v2  ;;  %v7345_v23 = vpop.f32.mrf.mxu3 }
0x1aee   :  { %v7346_v60 = vadd.f32 %v7345_v23, %v7261_v11 }
0x1af5   :  { %8371 = vmatmul.msk.f32.gmra.mxu3 %vm35_vm0, %v7246_v39  ;;  %v7348_v19 = vpop.f32.mrf.mxu3 }
0x1af6   :  { %v7349_v44 = vadd.f32 %v7348_v19, %v7265_v24 }
0x1afd   :  { %8372 = vmatmul.msk.f32.gmra.mxu3 %vm35_vm0, %v7248_v52  ;;  %v7351_v3 = vpop.f32.mrf.mxu3  ;;  %v7285_v52 = vpop.permute.xlu1 %7284 }
0x1afe   :  { %v7352_v38 = vadd.f32 %v7351_v3, %v7269_v7 }
0x1b05   :  { %8373 = vmatmul.msk.f32.gmra.mxu3 %vm35_vm0, %v7250_v5  ;;  %v7354_v18 = vpop.f32.mrf.mxu3 }
0x1b06   :  { %v7355_v29 = vadd.f32 %v7354_v18, %v7273_v4  ;;  %v7289_v18 = vpop.permute.xlu2 %7288 }
0x1b0d   :  { %8374 = vmatmul.msk.f32.gmra.mxu3 %vm35_vm0, %v7252_v53  ;;  %v7357_v1 = vpop.f32.mrf.mxu3 }
0x1b0e   :  { %v7358_v28 = vadd.f32 %v7357_v1, %v7277_v40  ;;  %v7560_v40 = vld [vmem:[%s14789_s2 + $0x98] sm:$0xff] }
0x1b15   :  { %8375 = vmatmul.msk.f32.gmra.mxu3 %vm35_vm0, %v7254_v17  ;;  %v7360_v6 = vpop.f32.mrf.mxu3 }
0x1b16   :  { %v7361_v2 = vadd.f32 %v7360_v6, %v7281_v32  ;;  %v7566_v32 = vld [vmem:[%s14789_s2 + $0x1a0] sm:$0xff] }
0x1b1d   :  { %v7363_v37 = vpop.f32.mrf.mxu3 }
0x1b1e   :  { %v7364_v5 = vadd.f32 %v7363_v37, %v7285_v52  ;;  %v7572_v52 = vld [vmem:[%s14789_s2 + $0x2a8] sm:$0xff] }
0x1b25   :  { %v7366_v42 = vpop.f32.mrf.mxu3 }
0x1b26   :  { %v7367_v36 = vadd.f32 %v7366_v42, %v7289_v18  ;;  %v7761_v18 = vld [vmem:[%s14788_s1 + $0x48] sm:$0xff] }
0x1b2d   :  { %v14597_v34 = vpop.f32.mrf.mxu3 }
0x1b50   :  { %v7389_v12 = vpop.f32.mrf.mxu3 }
0x1b51   :  { %v7390_v55 = vadd.f32 %v7389_v12, %v7343_v47  ;;  %v7293_v12 = vpop.permute.xlu0 %7292 }
0x1b53   :  { %v7419_v10 = vmul.f32 0.01, %v7390_v55 }
0x1b55   :  { %v7429_v27 = vmax.f32 %v7390_v55, %v7419_v10  ;;  %v7370_v10 = vadd.f32 %v14597_v34, %v7293_v12 }
0x1b57   :  { %8376 = vmatmul.msk.f32.vlgmr.msrb.gmra.mxu3 %vm609_vm4, %v7429_v27 }
0x1b58   :  { %v7392_v43 = vpop.f32.mrf.mxu3 }
0x1b59   :  { %v7393_v63 = vadd.f32 %v7392_v43, %v7346_v60 }
0x1b5b   :  { %v7420_v50 = vmul.f32 0.01, %v7393_v63 }
0x1b5d   :  { %v7430_v35 = vmax.f32 %v7393_v63, %v7420_v50 }
0x1b5f   :  { %8377 = vmatmul.msk.f32.gmra.mxu3 %vm609_vm4, %v7430_v35 }
0x1b60   :  { %v7395_v14 = vpop.f32.mrf.mxu3 }
0x1b61   :  { %v7396_v62 = vadd.f32 %v7395_v14, %v7349_v44 }
0x1b63   :  { %v7421_v58 = vmul.f32 0.01, %v7396_v62 }
0x1b65   :  { %v7431_v21 = vmax.f32 %v7396_v62, %v7421_v58 }
0x1b67   :  { %8378 = vmatmul.msk.f32.gmra.mxu3 %vm609_vm4, %v7431_v21 }
0x1b68   :  { %v7398_v30 = vpop.f32.mrf.mxu3 }
0x1b69   :  { %v7399_v15 = vadd.f32 %v7398_v30, %v7352_v38 }
0x1b6b   :  { %v7422_v16 = vmul.f32 0.01, %v7399_v15 }
0x1b6d   :  { %v7432_v13 = vmax.f32 %v7399_v15, %v7422_v16 }
0x1b6f   :  { %8379 = vmatmul.msk.f32.gmra.mxu3 %vm609_vm4, %v7432_v13 }
0x1b70   :  { %v7401_v56 = vpop.f32.mrf.mxu3 }
0x1b71   :  { %v7402_v57 = vadd.f32 %v7401_v56, %v7355_v29 }
0x1b73   :  { %v7423_v31 = vmul.f32 0.01, %v7402_v57 }
0x1b75   :  { %v7433_v22 = vmax.f32 %v7402_v57, %v7423_v31  ;;  %v7558_v57 = vld [vmem:[%s14789_s2 + $0x40] sm:$0xff]  ;;  %v7559_v31 = vld [vmem:[%s14789_s2 + $0x90] sm:$0xff] }
0x1b77   :  { %8380 = vmatmul.msk.f32.gmra.mxu3 %vm609_vm4, %v7433_v22  ;;  %v7561_v22 = vld [vmem:[%s14789_s2 + $0xe8] sm:$0xff] }
0x1b78   :  { %v7404_v25 = vpop.f32.mrf.mxu3 }
0x1b79   :  { %v7405_v46 = vadd.f32 %v7404_v25, %v7358_v28  ;;  %v7562_v28 = vld [vmem:[%s14789_s2 + $0xf0] sm:$0xff]  ;;  %v7563_v25 = vld [vmem:[%s14789_s2 + $0x140] sm:$0xff] }
0x1b7b   :  { %v7424_v8 = vmul.f32 0.01, %v7405_v46 }
0x1b7d   :  { %v7434_v51 = vmax.f32 %v7405_v46, %v7424_v8  ;;  %v7564_v46 = vld [vmem:[%s14789_s2 + $0x148] sm:$0xff]  ;;  %v7565_v8 = vld [vmem:[%s14789_s2 + $0x198] sm:$0xff] }
0x1b7f   :  { %8381 = vmatmul.msk.f32.gmra.mxu3 %vm609_vm4, %v7434_v51  ;;  %v7567_v51 = vld [vmem:[%s14789_s2 + $0x1f0] sm:$0xff] }
0x1b80   :  { %v7407_v59 = vpop.f32.mrf.mxu3 }
0x1b81   :  { %v7408_v39 = vadd.f32 %v7407_v59, %v7361_v2  ;;  %v7568_v2 = vld [vmem:[%s14789_s2 + $0x1f8] sm:$0xff]  ;;  %v7569_v59 = vld [vmem:[%s14789_s2 + $0x248] sm:$0xff] }
0x1b83   :  { %v7425_v23 = vmul.f32 0.01, %v7408_v39 }
0x1b85   :  { %v7435_v19 = vmax.f32 %v7408_v39, %v7425_v23  ;;  %v7570_v39 = vld [vmem:[%s14789_s2 + $0x250] sm:$0xff]  ;;  %v7571_v23 = vld [vmem:[%s14789_s2 + $0x2a0] sm:$0xff] }
0x1b87   :  { %8382 = vmatmul.msk.f32.gmra.mxu3 %vm609_vm4, %v7435_v19  ;;  %v7573_v19 = vld [vmem:[%s14789_s2 + $0x2f8] sm:$0xff] }
0x1b88   :  { %v7410_v53 = vpop.f32.mrf.mxu3 }
0x1b89   :  { %v7411_v3 = vadd.f32 %v7410_v53, %v7364_v5  ;;  %v7574_v5 = vld [vmem:[%s14789_s2 + $0x300] sm:$0xff]  ;;  %v7575_v53 = vld [vmem:[%s14789_s2 + $0x350] sm:$0xff] }
0x1b8b   :  { %v7426_v17 = vmul.f32 0.01, %v7411_v3 }
0x1b8d   :  { %v7436_v1 = vmax.f32 %v7411_v3, %v7426_v17  ;;  %v7576_v3 = vld [vmem:[%s14789_s2 + $0x358] sm:$0xff]  ;;  %v7762_v17 = vld [vmem:[%s14788_s1 + $0x50] sm:$0xff]  ;;  %s9090_s1 = smov 8  }
0x1b8e   :  { %7807 = vmatpush.msra.mxu1 %v7762_v17 }
0x1b8f   :  { %8383 = vmatmul.msk.f32.gmra.mxu3 %vm609_vm4, %v7436_v1 }
0x1b90   :  { %v7413_v26 = vpop.f32.mrf.mxu3  ;;  %7808 = vmatpush.msra.mxu1 %v7761_v18 }
0x1b91   :  { %v7414_v6 = vadd.f32 %v7413_v26, %v7367_v36 }
0x1b93   :  { %v7427_v47 = vmul.f32 0.01, %v7414_v6 }
0x1b95   :  { %v7437_v55 = vmax.f32 %v7414_v6, %v7427_v47 }
0x1b97   :  { %8384 = vmatmul.msk.f32.gmra.mxu3 %vm609_vm4, %v7437_v55 }
0x1b98   :  { %v7416_v37 = vpop.f32.mrf.mxu3 }
0x1b99   :  { %v7417_v11 = vadd.f32 %v7416_v37, %v7370_v10 }
0x1b9b   :  { %v7428_v27 = vmul.f32 0.01, %v7417_v11 }
0x1b9d   :  { %v7438_v60 = vmax.f32 %v7417_v11, %v7428_v27 }
0x1b9f   :  { %8385 = vmatmul.msk.f32.gmra.mxu3 %vm609_vm4, %v7438_v60 }
0x1bda   :  { %v7487_v43 = vpop.f32.mrf.mxu3 }
0x1be2   :  { %v7490_v63 = vpop.f32.mrf.mxu3 }
0x1be3   :  { %v8980_v42 = vpack.i.bf16 %v7487_v43, %v7490_v63 }
0x1be5   :  { %8981 = vrot.lane.b32.xlu0 %v8980_v42, %s9072_s17 }
0x1bea   :  { %v7493_v50 = vpop.f32.mrf.mxu3 }
0x1bed   :  { %7578 = vperm.xlu0 %8995, %v14444_v48  }
0x1bf2   :  { %v7496_v24 = vpop.f32.mrf.mxu3 }
0x1bf3   :  { %v8975_v35 = vpack.i.bf16 %v7493_v50, %v7496_v24 }
0x1bf5   :  { %8976 = vrot.lane.b32.xlu2 %v8975_v35, %s9072_s17  ;;  %7598 = vperm.xlu0 %8995, %v14466_v61  }
0x1bfa   :  { %v7499_v34 = vpop.f32.mrf.mxu3 }
0x1bfd   :  { %7610 = vperm.xlu0 %8995, %v14477_v49  }
0x1c02   :  { %v7502_v44 = vpop.f32.mrf.mxu3 }
0x1c03   :  { %v8970_v14 = vpack.i.bf16 %v7499_v34, %v7502_v44 }
0x1c05   :  { %8971 = vrot.lane.b32.xlu1 %v8970_v14, %s9072_s17 }
0x1c0a   :  { %v7505_v62 = vpop.f32.mrf.mxu3 }
0x1c12   :  { %v7508_v58 = vpop.f32.mrf.mxu3 }
0x1c13   :  { %v8990_v7 = vpack.i.bf16 %v7505_v62, %v7508_v58 }
0x1c15   :  { %8991 = vrot.lane.b32.xlu2 %v8990_v7, %s9072_s17 }
0x1c1a   :  { %v7511_v21 = vpop.f32.mrf.mxu3 }
0x1c1d   :  { %7586 = vperm.xlu2 %8997, %v14485_v33  }
0x1c22   :  { %v7514_v48 = vpop.f32.mrf.mxu3 }
0x1c23   :  { %v8985_v38 = vpack.i.bf16 %v7511_v21, %v7514_v48 }
0x1c25   :  { %8986 = vrot.lane.b32.xlu1 %v8985_v38, %s9072_s17  ;;  %7594 = vperm.xlu2 %8997, %v14491_v0  }
0x1c2d   :  { %7582 = vperm.xlu1 %8996, %v14505_v41   ;;  %7606 = vperm.xlu2 %8997, %v14497_v45  }
0x1c35   :  { %7590 = vperm.xlu1 %8996, %v14458_v20   ;;  %v7557_v20 = vld [vmem:[%s14789_s2 + $0x38] sm:$0xff] }
0x1c3d   :  { %7602 = vperm.xlu1 %8996, %v14517_v9  }
0x1c45   :  { %7614 = vperm.xlu1 %8996, %v14526_v54  }
0x1c4f   :  { %v8977_v30 = vpop.permute.xlu2 %8976 }
0x1c50   :  { %v8978_v15 = vunpack.i.l.bf16 %v8977_v30  ;;  %v8979_v4 = vunpack.i.h.bf16 %v8977_v30 }
0x1c57   :  { %v8982_v16 = vpop.permute.xlu0 %8981 }
0x1c58   :  { %v8983_v0 = vunpack.i.l.bf16 %v8982_v16  ;;  %v8984_v41 = vunpack.i.h.bf16 %v8982_v16 }
0x1c5f   :  { %v7579_v26 = vpop.permute.xlu0 %7578 }
0x1c6f   :  { %v8992_v54 = vpop.permute.xlu2 %8991 }
0x1c70   :  { %v8993_v29 = vunpack.i.l.bf16 %v8992_v54  ;;  %v8994_v56 = vunpack.i.h.bf16 %v8992_v54 }
0x1c77   :  { %v8972_v61 = vpop.permute.xlu1 %8971 }
0x1c78   :  { %v8973_v49 = vunpack.i.l.bf16 %v8972_v61  ;;  %v8974_v33 = vunpack.i.h.bf16 %v8972_v61 }
0x1c7a   :  { %7647 = vmatpush.msra.mxu0 %v8973_v49 }
0x1c7c   :  { %7648 = vmatpush.msra.mxu0 %v8974_v33 }
0x1c7e   :  { %7649 = vmatpush.msra.mxu0 %v8978_v15 }
0x1c80   :  { %7650 = vmatpush.msra.mxu0 %v8979_v4 }
0x1c82   :  { %7651 = vmatpush.msra.mxu0 %v8983_v0 }
0x1c84   :  { %7652 = vmatpush.msra.mxu0 %v8984_v41 }
0x1c86   :  { %7653 = vmatpush.msra.mxu0 %v7514_v48 }
0x1c88   :  { %7654 = vmatpush.msra.mxu0 %v7511_v21 }
0x1c8a   :  { %7655 = vmatpush.msra.mxu0 %v7508_v58 }
0x1c8c   :  { %7656 = vmatpush.msra.mxu0 %v7505_v62 }
0x1c8e   :  { %7657 = vmatpush.msra.mxu0 %v7502_v44 }
0x1c90   :  { %7658 = vmatpush.msra.mxu0 %v7499_v34 }
0x1c92   :  { %7659 = vmatpush.msra.mxu0 %v7496_v24 }
0x1c94   :  { %7660 = vmatpush.msra.mxu0 %v7493_v50  ;;  %v7587_v50 = vpop.permute.xlu2 %7586 }
0x1c96   :  { %7661 = vmatpush.msra.mxu0 %v7490_v63 }
0x1c97   :  { %v8987_v45 = vpop.permute.xlu1 %8986 }
0x1c98   :  { %v8988_v9 = vunpack.i.l.bf16 %v8987_v45  ;;  %7662 = vmatpush.msra.mxu0 %v7487_v43  ;;  %v8989_v13 = vunpack.i.h.bf16 %v8987_v45 }
0x1c99   :  { %7663 = vmatmul.f32.vlgmr.msra.gmra.mxu0 %v7557_v20  ;;  %v7599_v20 = vpop.permute.xlu0 %7598 }
0x1c9a   :  { %7706 = vmatpush.msrb.mxu2 %v8988_v9 }
0x1c9c   :  { %7707 = vmatpush.msrb.mxu2 %v8989_v13  ;;  %v7595_v33 = vpop.permute.xlu2 %7594 }
0x1c9e   :  { %7708 = vmatpush.msrb.mxu2 %v8993_v29 }
0x1c9f   :  { %v7583_v37 = vpop.permute.xlu1 %7582 }
0x1ca0   :  { %7709 = vmatpush.msrb.mxu2 %v8994_v56 }
0x1ca1   :  { %8386 = vmatmul.msk.f32.vlgmr.msrb.gmra.mxu2 %vm35_vm0, %v7558_v57  ;;  %7666 = vmatmul.f32.gmra.mxu0 %v7559_v31 }
0x1ca7   :  { %v7591_v7 = vpop.permute.xlu1 %7590 }
0x1ca9   :  { %8387 = vmatmul.msk.f32.gmra.mxu2 %vm35_vm0, %v7560_v40  ;;  %7669 = vmatmul.f32.gmra.mxu0 %v7561_v22 }
0x1caf   :  { %v7603_v57 = vpop.permute.xlu1 %7602 }
0x1cb1   :  { %8388 = vmatmul.msk.f32.gmra.mxu2 %vm35_vm0, %v7562_v28  ;;  %7672 = vmatmul.f32.gmra.mxu0 %v7563_v25 }
0x1cb9   :  { %8389 = vmatmul.msk.f32.gmra.mxu2 %vm35_vm0, %v7564_v46  ;;  %7675 = vmatmul.f32.gmra.mxu0 %v7565_v8  ;;  %v7607_v8 = vpop.permute.xlu2 %7606 }
0x1cc1   :  { %8390 = vmatmul.msk.f32.gmra.mxu2 %vm35_vm0, %v7566_v32  ;;  %7678 = vmatmul.f32.gmra.mxu0 %v7567_v51 }
0x1cc9   :  { %8391 = vmatmul.msk.f32.gmra.mxu2 %vm35_vm0, %v7568_v2  ;;  %7681 = vmatmul.f32.gmra.mxu0 %v7569_v59 }
0x1cd1   :  { %8392 = vmatmul.msk.f32.gmra.mxu2 %vm35_vm0, %v7570_v39  ;;  %7684 = vmatmul.f32.gmra.mxu0 %v7571_v23 }
0x1cd9   :  { %8393 = vmatmul.msk.f32.gmra.mxu2 %vm35_vm0, %v7572_v52  ;;  %7687 = vmatmul.f32.gmra.mxu0 %v7573_v19  ;;  %v7611_v52 = vpop.permute.xlu0 %7610 }
0x1ce1   :  { %8394 = vmatmul.msk.f32.gmra.mxu2 %vm35_vm0, %v7574_v5  ;;  %7690 = vmatmul.f32.gmra.mxu0 %v7575_v53 }
0x1ce9   :  { %8395 = vmatmul.msk.f32.gmra.mxu2 %vm35_vm0, %v7576_v3 }
0x1d16   :  { %v7664_v1 = vpop.f32.mrf.mxu0 }
0x1d17   :  { %v7665_v6 = vadd.f32 %v7664_v1, %v7579_v26  ;;  %v7615_v1 = vpop.permute.xlu1 %7614 }
0x1d1e   :  { %v7667_v36 = vpop.f32.mrf.mxu0 }
0x1d1f   :  { %v7668_v27 = vadd.f32 %v7667_v36, %v7583_v37 }
0x1d24   :  { %v7711_v47 = vpop.f32.mrf.mxu2 }
0x1d25   :  { %v7712_v12 = vadd.f32 %v7711_v47, %v7665_v6 }
0x1d26   :  { %v7670_v55 = vpop.f32.mrf.mxu0 }
0x1d27   :  { %v7741_v10 = vmul.f32 0.01, %v7712_v12  ;;  %v7671_v35 = vadd.f32 %v7670_v55, %v7587_v50  ;;  %v9087_v55 = vmov 5  }
0x1d28   :  { %9023 = vset.pattern.permute.xlu1 %v9087_v55  ;;  %9025 = vset.pattern.permute.xlu0 %v9087_v55 }
0x1d29   :  { %v7751_v11 = vmax.f32 %v7712_v12, %v7741_v10  ;;  %9024 = vset.pattern.permute.xlu2 %v9087_v55  ;;  %v7884_v55 = vld [vmem:[%s14789_s2 + $0xf8] sm:$0xff] }
0x1d2b   :  { %8396 = vmatmul.msk.f32.vlgmr.msra.gmra.mxu1 %vm265_vm2, %v7751_v11 }
0x1d2c   :  { %v7714_v60 = vpop.f32.mrf.mxu2 }
0x1d2d   :  { %v7715_v43 = vadd.f32 %v7714_v60, %v7668_v27  ;;  %v3910_v60 = vld [vmem:[%s14792_s5] sm:$0xff] }
0x1d2e   :  { %v7673_v63 = vpop.f32.mrf.mxu0 }
0x1d2f   :  { %v7742_v42 = vmul.f32 0.01, %v7715_v43  ;;  %v7674_v21 = vadd.f32 %v7673_v63, %v7591_v7  ;;  %v3913_v63 = vld [vmem:[%s14792_s5 + $0x18] sm:$0xff]  ;;  %v3912_v7 = vld [vmem:[%s14792_s5 + $0x10] sm:$0xff] }
0x1d31   :  { %v7752_v24 = vmax.f32 %v7715_v43, %v7742_v42 }
0x1d33   :  { %8397 = vmatmul.msk.f32.gmra.mxu1 %vm265_vm2, %v7752_v24 }
0x1d34   :  { %v7717_v34 = vpop.f32.mrf.mxu2 }
0x1d35   :  { %v7718_v44 = vadd.f32 %v7717_v34, %v7671_v35  ;;  %v3911_v34 = vld [vmem:[%s14792_s5 + $0x8] sm:$0xff] }
0x1d36   :  { %v7676_v14 = vpop.f32.mrf.mxu0 }
0x1d37   :  { %v7743_v62 = vmul.f32 0.01, %v7718_v44  ;;  %v7677_v15 = vadd.f32 %v7676_v14, %v7595_v33 }
0x1d39   :  { %v7753_v58 = vmax.f32 %v7718_v44, %v7743_v62 }
0x1d3b   :  { %8398 = vmatmul.msk.f32.gmra.mxu1 %vm265_vm2, %v7753_v58 }
0x1d3c   :  { %v7720_v48 = vpop.f32.mrf.mxu2 }
0x1d3d   :  { %v7721_v38 = vadd.f32 %v7720_v48, %v7674_v21 }
0x1d3e   :  { %v7679_v49 = vpop.f32.mrf.mxu0 }
0x1d3f   :  { %v7744_v61 = vmul.f32 0.01, %v7721_v38  ;;  %v7680_v9 = vadd.f32 %v7679_v49, %v7599_v20 }
0x1d41   :  { %v7754_v30 = vmax.f32 %v7721_v38, %v7744_v61 }
0x1d43   :  { %8399 = vmatmul.msk.f32.gmra.mxu1 %vm265_vm2, %v7754_v30  ;;  %v15035_v30 = vld [vmem:[#allocation19_spill] sm:$0xff] }
0x1d44   :  { %v7723_v16 = vpop.f32.mrf.mxu2 }
0x1d45   :  { %v7724_v4 = vadd.f32 %v7723_v16, %v7677_v15  ;;  %v15036_v16 = vld [vmem:[#allocation22_spill] sm:$0xff] }
0x1d46   :  { %v7682_v45 = vpop.f32.mrf.mxu0 }
0x1d47   :  { %v7745_v0 = vmul.f32 0.01, %v7724_v4  ;;  %v7683_v31 = vadd.f32 %v7682_v45, %v7603_v57 }
0x1d49   :  { %v7755_v41 = vmax.f32 %v7724_v4, %v7745_v0 }
0x1d4b   :  { %8400 = vmatmul.msk.f32.gmra.mxu1 %vm265_vm2, %v7755_v41 }
0x1d4c   :  { %v7726_v54 = vpop.f32.mrf.mxu2 }
0x1d4d   :  { %v7727_v13 = vadd.f32 %v7726_v54, %v7680_v9  ;;  %v15037_v54 = vld [vmem:[#allocation25_spill] sm:$0xff] }
0x1d4e   :  { %v7685_v22 = vpop.f32.mrf.mxu0 }
0x1d4f   :  { %v7746_v29 = vmul.f32 0.01, %v7727_v13  ;;  %v7686_v32 = vadd.f32 %v7685_v22, %v7607_v8 }
0x1d51   :  { %v7756_v56 = vmax.f32 %v7727_v13, %v7746_v29 }
0x1d53   :  { %8401 = vmatmul.msk.f32.gmra.mxu1 %vm265_vm2, %v7756_v56  ;;  %v15038_v56 = vld [vmem:[#allocation24_spill] sm:$0xff] }
0x1d54   :  { %v7729_v40 = vpop.f32.mrf.mxu2 }
0x1d55   :  { %v7730_v28 = vadd.f32 %v7729_v40, %v7683_v31 }
0x1d56   :  { %v7688_v59 = vpop.f32.mrf.mxu0 }
0x1d57   :  { %v7747_v25 = vmul.f32 0.01, %v7730_v28  ;;  %v7689_v19 = vadd.f32 %v7688_v59, %v7611_v52 }
0x1d59   :  { %v7757_v46 = vmax.f32 %v7730_v28, %v7747_v25 }
0x1d5b   :  { %8402 = vmatmul.msk.f32.gmra.mxu1 %vm265_vm2, %v7757_v46 }
0x1d5c   :  { %v7732_v51 = vpop.f32.mrf.mxu2 }
0x1d5d   :  { %v7733_v2 = vadd.f32 %v7732_v51, %v7686_v32  ;;  %v7880_v51 = vld [vmem:[%s14789_s2 + $0x48] sm:$0xff] }
0x1d5e   :  { %v7691_v17 = vpop.f32.mrf.mxu0 }
0x1d5f   :  { %v7748_v39 = vmul.f32 0.01, %v7733_v2  ;;  %v7692_v36 = vadd.f32 %v7691_v17, %v7615_v1  ;;  %v7881_v17 = vld [vmem:[%s14789_s2 + $0x50] sm:$0xff] }
0x1d61   :  { %v7758_v23 = vmax.f32 %v7733_v2, %v7748_v39 }
0x1d63   :  { %8403 = vmatmul.msk.f32.gmra.mxu1 %vm265_vm2, %v7758_v23  ;;  %v15039_v23 = vld [vmem:[#allocation9_spill] sm:$0xff] }
0x1d64   :  { %v7735_v5 = vpop.f32.mrf.mxu2 }
0x1d65   :  { %v7736_v53 = vadd.f32 %v7735_v5, %v7689_v19  ;;  %v15040_v5 = vld [vmem:[#allocation27_spill] sm:$0xff] }
0x1d67   :  { %v7749_v3 = vmul.f32 0.01, %v7736_v53 }
0x1d69   :  { %v7759_v18 = vmax.f32 %v7736_v53, %v7749_v3  ;;  %v7882_v3 = vld [vmem:[%s14789_s2 + $0xa0] sm:$0xff] }
0x1d6b   :  { %8404 = vmatmul.msk.f32.gmra.mxu1 %vm265_vm2, %v7759_v18 }
0x1d6c   :  { %v7738_v26 = vpop.f32.mrf.mxu2 }
0x1d6d   :  { %v7739_v6 = vadd.f32 %v7738_v26, %v7692_v36  ;;  %v15041_v26 = vld [vmem:[#allocation23_spill] sm:$0xff] }
0x1d6f   :  { %v7750_v47 = vmul.f32 0.01, %v7739_v6 }
0x1d71   :  { %v7760_v12 = vmax.f32 %v7739_v6, %v7750_v47  ;;  %v15042_v47 = vld [vmem:[#allocation29_spill] sm:$0xff] }
0x1d73   :  { %8405 = vmatmul.msk.f32.gmra.mxu1 %vm265_vm2, %v7760_v12 }
0x1da8   :  { %v14711_v10 = vpop.f32.mrf.mxu1 }
0x1db0   :  { %v14713_v37 = vpop.f32.mrf.mxu1 }
0x1db1   :  { %v9008_v11 = vpack.i.bf16 %v14711_v10, %v14713_v37 }
0x1db3   :  { %9009 = vrot.lane.b32.xlu1 %v9008_v11, %s9073_s18 }
0x1db8   :  { %v14718_v27 = vpop.f32.mrf.mxu1 }
0x1dbb   :  { %3916 = vperm.xlu1 %9023, %v3910_v60  }
0x1dc0   :  { %v7819_v43 = vpop.f32.mrf.mxu1 }
0x1dc1   :  { %v9003_v42 = vpack.i.bf16 %v14718_v27, %v7819_v43 }
0x1dc3   :  { %3931 = vperm.xlu1 %9023, %v3913_v63   ;;  %9004 = vrot.lane.b32.xlu0 %v9003_v42, %s9073_s18 }
0x1dc8   :  { %v7822_v50 = vpop.f32.mrf.mxu1 }
0x1dcb   :  { %7899 = vperm.xlu1 %9023, %v3911_v34  }
0x1dd0   :  { %v7825_v24 = vpop.f32.mrf.mxu1 }
0x1dd1   :  { %v8998_v35 = vpack.i.bf16 %v7822_v50, %v7825_v24 }
0x1dd3   :  { %8999 = vrot.lane.b32.xlu2 %v8998_v35, %s9073_s18 }
0x1dd8   :  { %v7828_v44 = vpop.f32.mrf.mxu1 }
0x1de0   :  { %v7831_v14 = vpop.f32.mrf.mxu1 }
0x1de1   :  { %v9018_v62 = vpack.i.bf16 %v7828_v44, %v7831_v14 }
0x1de3   :  { %9019 = vrot.lane.b32.xlu0 %v9018_v62, %s9073_s18 }
0x1de8   :  { %v7834_v58 = vpop.f32.mrf.mxu1 }
0x1deb   :  { %3926 = vperm.xlu0 %9025, %v3912_v7  }
0x1df0   :  { %v7837_v21 = vpop.f32.mrf.mxu1 }
0x1df1   :  { %v9013_v48 = vpack.i.bf16 %v7834_v58, %v7837_v21 }
0x1df3   :  { %9014 = vrot.lane.b32.xlu2 %v9013_v48, %s9073_s18  ;;  %7909 = vperm.xlu0 %9025, %v3913_v63  }
0x1dfb   :  { %3921 = vperm.xlu2 %9024, %v3911_v34  }
0x1e03   :  { %7894 = vperm.xlu2 %9024, %v3910_v60   ;;  %v7885_v60 = vld [vmem:[%s14789_s2 + $0x100] sm:$0xff] }
0x1e0b   :  { %7904 = vperm.xlu2 %9024, %v3912_v7  }
0x1e25   :  { %v9010_v38 = vpop.permute.xlu1 %9009 }
0x1e26   :  { %v9011_v40 = vunpack.i.l.bf16 %v9010_v38  ;;  %v9012_v28 = vunpack.i.h.bf16 %v9010_v38 }
0x1e2d   :  { %v3917_v61 = vpop.permute.xlu1 %3916  ;;  %v9000_v49 = vpop.permute.xlu2 %8999 }
0x1e2e   :  { %v3964_v33 = vadd.f32 %v15035_v30, %v3917_v61  ;;  %v9001_v15 = vunpack.i.l.bf16 %v9000_v49  ;;  %v9002_v0 = vunpack.i.h.bf16 %v9000_v49 }
0x1e30   :  { %v3993_v4 = vadd.f32 %v15036_v16, %v3964_v33  ;;  %7924 = vmatpush.msra.mxu3 %v9001_v15 }
0x1e32   :  { %v4004_v41 = vmul.f32 0.01, %v3993_v4  ;;  %7925 = vmatpush.msra.mxu3 %v9002_v0 }
0x1e34   :  { %v4008_v20 = vmax.f32 %v3993_v4, %v4004_v41 }
0x1e35   :  { %v3932_v45 = vpop.permute.xlu1 %3931  ;;  %v9005_v9 = vpop.permute.xlu0 %9004 }
0x1e36   :  { %4012 = vst.msk [vmem:[#allocation2] sm:$0xff] %vm35_vm0, %v4008_v20  ;;  %v3973_v13 = vadd.f32 %v15037_v54, %v3932_v45  ;;  %v9006_v29 = vunpack.i.l.bf16 %v9005_v9  ;;  %v9007_v31 = vunpack.i.h.bf16 %v9005_v9 }
0x1e38   :  { %v4002_v57 = vadd.f32 %v15038_v56, %v3973_v13  ;;  %7926 = vmatpush.msra.mxu3 %v9006_v29 }
0x1e3a   :  { %v4007_v22 = vmul.f32 0.01, %v4002_v57  ;;  %7927 = vmatpush.msra.mxu3 %v9007_v31 }
0x1e3c   :  { %v4011_v25 = vmax.f32 %v4002_v57, %v4007_v22  ;;  %7928 = vmatpush.msra.mxu3 %v9011_v40 }
0x1e3e   :  { %4015 = vst.msk [vmem:[#allocation2 + $0x18] sm:$0xff] %vm35_vm0, %v4011_v25  ;;  %7929 = vmatpush.msra.mxu3 %v9012_v28 }
0x1e40   :  { %7930 = vmatpush.msra.mxu3 %v7837_v21 }
0x1e42   :  { %7931 = vmatpush.msra.mxu3 %v7834_v58 }
0x1e44   :  { %7932 = vmatpush.msra.mxu3 %v7831_v14 }
0x1e46   :  { %7933 = vmatpush.msra.mxu3 %v7828_v44  ;;  %v7900_v44 = vpop.permute.xlu1 %7899 }
0x1e48   :  { %7934 = vmatpush.msra.mxu3 %v7825_v24 }
0x1e4a   :  { %7935 = vmatpush.msra.mxu3 %v7822_v50 }
0x1e4c   :  { %7936 = vmatpush.msra.mxu3 %v7819_v43  ;;  %v7887_v43 = vld [vmem:[%s14789_s2 + $0x158] sm:$0xff] }
0x1e4d   :  { %v9015_v46 = vpop.permute.xlu2 %9014 }
0x1e4e   :  { %v9016_v8 = vunpack.i.l.bf16 %v9015_v46  ;;  %7937 = vmatpush.msra.mxu3 %v14718_v27  ;;  %v9017_v32 = vunpack.i.h.bf16 %v9015_v46  ;;  %v7886_v27 = vld [vmem:[%s14789_s2 + $0x150] sm:$0xff] }
0x1e50   :  { %7938 = vmatpush.msra.mxu3 %v14713_v37  ;;  %7965 = vmatpush.msrb.mxu0 %v9016_v8 }
0x1e52   :  { %7939 = vmatpush.msra.mxu3 %v14711_v10  ;;  %7966 = vmatpush.msrb.mxu0 %v9017_v32  ;;  %v7883_v10 = vld [vmem:[%s14789_s2 + $0xa8] sm:$0xff]  ;;  %s9088_s2 = smov [#allocation2]  }
0x1e53   :  { %7940 = vmatmul.f32.vlgmr.msra.gmra.mxu3 %v7880_v51  ;;  %s7998_s10 = sshll.u32 %s9088_s2, 4  ;;  %s7999_s10 = int_to_ptr.vmem [resolvable:$true] %s7998_s10 }
0x1e55   :  { %v9020_v2 = vpop.permute.xlu0 %9019  ;;  %v3922_v59 = vpop.permute.xlu2 %3921 }
0x1e56   :  { %v9021_v39 = vunpack.i.l.bf16 %v9020_v2  ;;  %v3967_v52 = vadd.f32 %v15039_v23, %v3922_v59  ;;  %v9022_v19 = vunpack.i.h.bf16 %v9020_v2 }
0x1e58   :  { %v3996_v53 = vadd.f32 %v15040_v5, %v3967_v52  ;;  %7967 = vmatpush.msrb.mxu0 %v9021_v39 }
0x1e5a   :  { %v4005_v18 = vmul.f32 0.01, %v3996_v53  ;;  %7968 = vmatpush.msrb.mxu0 %v9022_v19 }
0x1e5b   :  { %7943 = vmatmul.f32.gmra.mxu3 %v7882_v3  ;;  %8406 = vmatmul.msk.f32.vlgmr.msrb.gmra.mxu0 %vm35_vm0, %v7881_v17 }
0x1e5c   :  { %v4009_v1 = vmax.f32 %v3996_v53, %v4005_v18 }
0x1e5d   :  { %v3927_v36 = vpop.permute.xlu0 %3926  ;;  %v7895_v63 = vpop.permute.xlu2 %7894 }
0x1e5e   :  { %4013 = vst.msk [vmem:[#allocation2 + $0x8] sm:$0xff] %vm35_vm0, %v4009_v1  ;;  %v3970_v6 = vadd.f32 %v15041_v26, %v3927_v36 }
0x1e60   :  { %v3999_v12 = vadd.f32 %v15042_v47, %v3970_v6 }
0x1e62   :  { %v4006_v37 = vmul.f32 0.01, %v3999_v12 }
0x1e63   :  { %7946 = vmatmul.f32.gmra.mxu3 %v7884_v55  ;;  %8407 = vmatmul.msk.f32.gmra.mxu0 %vm35_vm0, %v7883_v10 }
0x1e64   :  { %v4010_v11 = vmax.f32 %v3999_v12, %v4006_v37 }
0x1e65   :  { %v7905_v61 = vpop.permute.xlu2 %7904  ;;  %v7910_v0 = vpop.permute.xlu0 %7909 }
0x1e66   :  { %4014 = vst.msk [vmem:[#allocation2 + $0x10] sm:$0xff] %vm35_vm0, %v4010_v11 }
0x1e6b   :  { %7949 = vmatmul.f32.gmra.mxu3 %v7886_v27  ;;  %8408 = vmatmul.msk.f32.gmra.mxu0 %vm35_vm0, %v7885_v60 }
0x1e73   :  { %8409 = vmatmul.msk.f32.gmra.mxu0 %vm35_vm0, %v7887_v43 }
0x1ed6   :  { %v7941_v42 = vpop.f32.mrf.mxu3 }
0x1ed7   :  { %v7942_v50 = vadd.f32 %v7941_v42, %v7895_v63 }
0x1ed8   :  { %v7970_v24 = vpop.f32.mrf.mxu0 }
0x1ed9   :  { %v7971_v35 = vadd.f32 %v7970_v24, %v7942_v50 }
0x1edb   :  { %v7982_v34 = vmul.f32 0.01, %v7971_v35 }
0x1edd   :  { %v7986_v14 = vmax.f32 %v7971_v35, %v7982_v34 }
0x1ede   :  { %v7944_v62 = vpop.f32.mrf.mxu3 }
0x1edf   :  { %7990 = vst.msk [vmem:[#allocation2 + $0x20] sm:$0xff] %vm35_vm0, %v7986_v14  ;;  %v7945_v58 = vadd.f32 %v7944_v62, %v7900_v44 }
0x1ee0   :  { %v7973_v7 = vpop.f32.mrf.mxu0 }
0x1ee1   :  { %v7974_v21 = vadd.f32 %v7973_v7, %v7945_v58 }
0x1ee3   :  { %v7983_v48 = vmul.f32 0.01, %v7974_v21 }
0x1ee5   :  { %v7987_v38 = vmax.f32 %v7974_v21, %v7983_v48 }
0x1ee6   :  { %v7947_v49 = vpop.f32.mrf.mxu3 }
0x1ee7   :  { %7991 = vst.msk [vmem:[#allocation2 + $0x28] sm:$0xff] %vm35_vm0, %v7987_v38  ;;  %v7948_v30 = vadd.f32 %v7947_v49, %v7905_v61 }
0x1ee8   :  { %v7976_v33 = vpop.f32.mrf.mxu0 }
0x1ee9   :  { %v7977_v15 = vadd.f32 %v7976_v33, %v7948_v30 }
0x1eeb   :  { %v7984_v16 = vmul.f32 0.01, %v7977_v15 }
0x1eed   :  { %v7988_v4 = vmax.f32 %v7977_v15, %v7984_v16 }
0x1eee   :  { %v7950_v41 = vpop.f32.mrf.mxu3 }
0x1eef   :  { %7992 = vst.msk [vmem:[#allocation2 + $0x30] sm:$0xff] %vm35_vm0, %v7988_v4  ;;  %v7951_v20 = vadd.f32 %v7950_v41, %v7910_v0 }
0x1ef0   :  { %v7979_v45 = vpop.f32.mrf.mxu0 }
0x1ef1   :  { %v7980_v9 = vadd.f32 %v7979_v45, %v7951_v20 }
0x1ef3   :  { %v7985_v54 = vmul.f32 0.01, %v7980_v9 }
0x1ef5   :  { %v7989_v13 = vmax.f32 %v7980_v9, %v7985_v54 }
0x1ef7   :  { %7993 = vst.msk [vmem:[#allocation2 + $0x38] sm:$0xff] %vm35_vm0, %v7989_v13 }
0x1ef8   :  { %8006 = dma.vmem_to_hbm [thread:$0]  %s7999_s10, 1024, %s8001_s11, [#allocation3], %s9089_s8, %s9089_s8, %s9090_s1  }
0x1ef9   :  { %9070 = dma.done.wait [#allocation3], 1024  }
0x1efa   :  { %9071 = vsyncadd [#allocation3], 4294966272 }
0x1efb   :  { %8011 = vsyncpa [#allocation3], 1 }

</bundles_post_ra>
